<compile_context>
chip_gen: v7x
topology: tpu7x:2x2x1
jax: 0.10.0
libtpu: 0.0.40
codegen_flags: <defaults>
</compile_context>

<pallas_src>
import functools

import jax
import jax.numpy as jnp
from jax.experimental import pallas as pl
from jax.experimental.pallas import tpu as pltpu


def _round_up(x, m):
    return -(-x // m) * m


# ------------------------------ Pallas kernels ------------------------------ #
def _matmul_bias_relu_kernel(x_ref, w_ref, bias_ref, o_ref):
    """o = relu(W @ X + bias); BN scale pre-folded into the rows of W."""
    y = jnp.dot(w_ref[...], x_ref[...], preferred_element_type=jnp.float32)
    y = jnp.maximum(y + bias_ref[...], 0.0)
    o_ref[...] = y.astype(o_ref.dtype)


def _conv3x3_bn_kernel(x0_ref, x1_ref, x2_ref, w_ref, bias_ref, *rest,
                       relu, res_mode, dl, wq, w_valid, s_out, x_aligned):
    """Fused 3x3x3 conv + bias (+ residual | + fused 1x1 projection) (+ ReLU).

    Inputs/outputs live in the canonical padded lane-flat layout
    (C, s_in = Hp*Wq + 2*dl).  Grid axis 1 runs over the *padded* z extent; halo
    z-steps just write zeros so the output is directly consumable by the next conv.
    """
    if res_mode == "direct":
        res_ref, o_ref = rest
    elif res_mode == "proj":
        ps_ref, pw_ref, pbias_ref, o_ref = rest
    else:
        (o_ref,) = rest

    zp = pl.program_id(1)
    interior = jnp.logical_and(zp >= dl, zp < pl.num_programs(1) - dl)
    lead = dl * wq + dl            # flat offset of voxel (y=0, x=0) in the padded slab

    @pl.when(jnp.logical_not(interior))
    def _zero_halo_slab():
        o_ref[...] = jnp.zeros(o_ref.shape, o_ref.dtype)

    @pl.when(interior)
    def _compute():
        # Build the (27*Cin, s_out) tap stack in VMEM, bf16 end to end.
        parts = []
        for x_ref in (x0_ref, x1_ref, x2_ref):                 # kd = 0, 1, 2
            xs = x_ref[...]                                     # (Cin, s_in) bf16
            if x_aligned:
                # Only the 3 kx shifts are unaligned lane slices; the 9 ky windows
                # per shift are lane-aligned (wq % 128 == 0) block copies.
                sh = [xs[:, kx * dl: kx * dl + 2 * dl * wq + s_out] for kx in range(3)]
                for ky in range(3):
                    for kx in range(3):
                        parts.append(sh[kx][:, ky * dl * wq: ky * dl * wq + s_out])
            else:
                for ky in range(3):
                    for kx in range(3):
                        off = ky * dl * wq + kx * dl
                        parts.append(xs[:, off: off + s_out])
        x_stack = jnp.concatenate(parts, axis=0)                # (27*Cin, s_out) bf16

        # Single deep-contraction MXU matmul; BN scale is folded into w_ref rows.
        y = jnp.dot(w_ref[...], x_stack, preferred_element_type=jnp.float32)
        y = y + bias_ref[...]

        if res_mode == "direct":
            y = y + res_ref[:, pl.ds(lead, s_out)].astype(jnp.float32)
        elif res_mode == "proj":
            sc = jnp.dot(pw_ref[...], ps_ref[:, pl.ds(lead, s_out)],
                         preferred_element_type=jnp.float32)
            y = y + sc + pbias_ref[...]
        if relu:
            y = jnp.maximum(y, 0.0)

        # Zero the junk columns (they become the halo of the canonical layout).
        col = jax.lax.broadcasted_iota(jnp.int32, (1, s_out), 1) % wq
        y = jnp.where(col < w_valid, y, 0.0)

        # Write the full padded slab: zero halos + computed interior.
        o_ref[...] = jnp.zeros(o_ref.shape, o_ref.dtype)
        o_ref[:, pl.ds(lead, s_out)] = y.astype(o_ref.dtype)


# ------------------------------ layout helpers ------------------------------ #
def to_canonical(a, dl, wq, c_pad):
    """(N, D, C, H, W) -> canonical (N, D+2dl, c_pad, Hp*wq + 2dl) bf16, zero halos."""
    n, d, c, h, w = a.shape
    hp = h + 2 * dl
    ap = jnp.pad(a.astype(jnp.bfloat16),
                 ((0, 0), (dl, dl), (0, c_pad - c), (dl, dl), (dl, wq - w - dl)))
    ap = ap.reshape(n, d + 2 * dl, c_pad, hp * wq)
    return jnp.pad(ap, ((0, 0), (0, 0), (0, 0), (0, 2 * dl)))


def from_canonical(a, dl, wq, d, h, w, c):
    """Canonical (N, Dp, Cp, s_in) -> dense (N, d, c, h, w)."""
    n, dp, cp, _ = a.shape
    hp = h + 2 * dl
    a = a[..., :hp * wq].reshape(n, dp, cp, hp, wq)
    return a[:, dl:dl + d, :c, dl:dl + h, dl:dl + w]


# ------------------------------- wrappers ----------------------------------- #
def _pick_tile_and_pad(m0, per_col_bytes, budget=8 * 1024 * 1024):
    """Largest multiple-of-128 tile fitting a double-buffered VMEM budget."""
    cap = (budget // (2 * per_col_bytes)) // 128 * 128
    cap = max(128, min(8192, cap))
    for t in range(cap, 127, -128):
        if m0 % t == 0:
            return t, m0
    if m0 <= cap:
        return m0, m0                       # full (last-dim) block is always legal
    return cap, _round_up(m0, cap)          # pad M; junk columns sliced off after


def deconv2x_bn_relu(x, w8s, bias8):
    """Fused ConvTranspose3d(k=2, s=2) + BN + ReLU, BN scale pre-folded into w8s.

    x: (N, Cin, D0, H0, W0) -> (N, 2*D0, Cout, 2*H0, 2*W0)  (z, C, y, x layout).
    One (8*Cout, Cin) GEMM over the input grid; parity interleave is a cheap
    XLA reshape/transpose fused with the subsequent cat/canonicalization.
    """
    n, cin, d0, h0, w0 = x.shape
    co8 = w8s.shape[0]
    cout = co8 // 8
    m0 = d0 * h0 * w0
    per_col = (cin + co8) * 2               # bf16 bytes per voxel column (in + out)
    tm, mp = _pick_tile_and_pad(m0, per_col)

    xf = x.reshape(n, cin, m0).astype(jnp.bfloat16)
    if mp != m0:
        xf = jnp.pad(xf, ((0, 0), (0, 0), (0, mp - m0)))

    y = pl.pallas_call(
        _matmul_bias_relu_kernel,
        out_shape=jax.ShapeDtypeStruct((n, co8, mp), jnp.bfloat16),
        grid_spec=pltpu.PrefetchScalarGridSpec(
            num_scalar_prefetch=0,
            grid=(n, mp // tm),
            in_specs=[
                pl.BlockSpec((None, cin, tm), lambda b, j: (b, 0, j)),
                pl.BlockSpec((co8, cin), lambda b, j: (0, 0)),
                pl.BlockSpec((co8, 1), lambda b, j: (0, 0)),
            ],
            out_specs=pl.BlockSpec((None, co8, tm), lambda b, j: (b, 0, j)),
        ),
        compiler_params=pltpu.CompilerParams(
            dimension_semantics=("parallel", "parallel"),
            vmem_limit_bytes=64 * 1024 * 1024),
    )(xf, w8s, bias8)

    if mp != m0:
        y = y[..., :m0]
    # out[n, 2i+a, o, 2j+b, 2k+c] = y[n, ((a*2+b)*2+c)*Cout + o, (i*H0+j)*W0 + k]
    y = y.reshape(n, 2, 2, 2, cout, d0, h0, w0)
    y = y.transpose(0, 5, 1, 4, 6, 2, 7, 3)
    return y.reshape(n, 2 * d0, cout, 2 * h0, 2 * w0)


def conv3x3_bn(xc, w_cat, bias, *, dl, H, W, Wq, relu=True, residual=None, proj=None):
    """Fused 3x3x3 conv (SAME, stride 1) + bias (+residual / +1x1 shortcut) (+ReLU).

    xc: canonical (N, D+2dl, Cin_p, s_in) bf16 -> canonical (N, D+2dl, Cout_p, s_in).
    """
    n, dp, cin_p, s_in = xc.shape
    cout_p = w_cat.shape[0]
    hp = H + 2 * dl
    s_out = H * Wq
    assert s_in == hp * Wq + 2 * dl
    assert w_cat.shape[1] == 27 * cin_p
    x_aligned = (Wq % 128 == 0)

    def zspec(off):
        def imap(b, zp):
            z = jnp.maximum(jnp.minimum(zp + off, dp - 1), 0)   # clamp only matters on halo steps
            return (b, z, 0, 0)
        return pl.BlockSpec((None, None, cin_p, s_in), imap)

    in_specs = [zspec(-dl), zspec(0), zspec(dl),
                pl.BlockSpec((cout_p, 27 * cin_p), lambda b, zp: (0, 0)),
                pl.BlockSpec((cout_p, 1), lambda b, zp: (0, 0))]
    args = [xc, xc, xc, w_cat, bias]

    res_mode = None
    if residual is not None:
        res_mode = "direct"
        args.append(residual)
        in_specs.append(pl.BlockSpec((None, None, cout_p, s_in),
                                     lambda b, zp: (b, zp, 0, 0)))
    elif proj is not None:
        res_mode = "proj"
        psrc, pw, pbias = proj
        cp = psrc.shape[2]
        args += [psrc, pw, pbias]
        in_specs += [
            pl.BlockSpec((None, None, cp, s_in), lambda b, zp: (b, zp, 0, 0)),
            pl.BlockSpec((cout_p, cp), lambda b, zp: (0, 0)),
            pl.BlockSpec((cout_p, 1), lambda b, zp: (0, 0)),
        ]

    kernel = functools.partial(_conv3x3_bn_kernel, relu=relu, res_mode=res_mode,
                               dl=dl, wq=Wq, w_valid=W, s_out=s_out,
                               x_aligned=x_aligned)
    return pl.pallas_call(
        kernel,
        out_shape=jax.ShapeDtypeStruct((n, dp, cout_p, s_in), jnp.bfloat16),
        grid_spec=pltpu.PrefetchScalarGridSpec(
            num_scalar_prefetch=0,
            grid=(n, dp),
            in_specs=in_specs,
            out_specs=pl.BlockSpec((None, None, cout_p, s_in),
                                   lambda b, zp: (b, zp, 0, 0)),
        ),
        compiler_params=pltpu.CompilerParams(
            dimension_semantics=("parallel", "parallel"),
            vmem_limit_bytes=64 * 1024 * 1024),
    )(*args)


# --------------------------- parameter preparation -------------------------- #
def conv_w_cat(w, scale, cin_pad, cout_pad):
    """(K, Cin, Cout) weights + BN scale -> (cout_pad, K*cin_pad) bf16, scale folded."""
    k, ci, co = w.shape
    wc = w * scale[None, None, :]
    wc = jnp.pad(wc, ((0, 0), (0, cin_pad - ci), (0, cout_pad - co)))
    return wc.transpose(2, 0, 1).reshape(cout_pad, k * cin_pad).astype(jnp.bfloat16)


def _bias_col(b, cout_pad):
    return jnp.pad(b.astype(jnp.float32), (0, cout_pad - b.shape[0])).reshape(cout_pad, 1)


def _bn_fold(key, c, eps=1e-5):
    k1, k2, k3, k4 = jax.random.split(key, 4)
    gamma = 1.0 + 0.1 * jax.random.normal(k1, (c,), jnp.float32)
    beta = 0.1 * jax.random.normal(k2, (c,), jnp.float32)
    mean = 0.1 * jax.random.normal(k3, (c,), jnp.float32)
    var = 1.0 + 0.1 * jnp.abs(jax.random.normal(k4, (c,), jnp.float32))
    scale = gamma / jnp.sqrt(var + eps)
    bias = beta - mean * scale
    return scale, bias


def _conv_w(key, ktaps, cin, cout):
    fan_in = ktaps * cin
    return jax.random.normal(key, (ktaps, cin, cout), jnp.float32) / jnp.sqrt(fan_in)


def init_params(key, in_channels, out_channels, skip_channels):
    ks = jax.random.split(key, 12)
    p = {}
    # BasicDeconvolutionBlock: ConvTranspose3d(k=2, s=2) + BN + ReLU
    p["bdb_w"] = _conv_w(ks[0], 8, in_channels, out_channels)
    p["bdb_scale"], p["bdb_bias"] = _bn_fold(ks[1], out_channels)
    # ResidualBlock 1: (out + skip) -> out  (1x1 downsample branch)
    cin1 = out_channels + skip_channels
    p["r1c1_w"] = _conv_w(ks[2], 27, cin1, out_channels)
    p["r1c1_scale"], p["r1c1_bias"] = _bn_fold(ks[3], out_channels)
    p["r1c2_w"] = _conv_w(ks[4], 27, out_channels, out_channels)
    p["r1c2_scale"], p["r1c2_bias"] = _bn_fold(ks[5], out_channels)
    p["r1d_w"] = _conv_w(ks[6], 1, cin1, out_channels)
    p["r1d_scale"], p["r1d_bias"] = _bn_fold(ks[7], out_channels)
    # ResidualBlock 2: out -> out (identity shortcut)
    p["r2c1_w"] = _conv_w(ks[8], 27, out_channels, out_channels)
    p["r2c1_scale"], p["r2c1_bias"] = _bn_fold(ks[9], out_channels)
    p["r2c2_w"] = _conv_w(ks[10], 27, out_channels, out_channels)
    p["r2c2_scale"], p["r2c2_bias"] = _bn_fold(ks[11], out_channels)
    return p


# --------------------------------- forward ---------------------------------- #
def up_voxel_stage_forward(params, x, skip, dilation=1):
    """x: (N, Cin, D0, H0, W0), skip: (N, Cskip, 2D0, 2H0, 2W0) -> (N, Cout, 2D0, 2H0, 2W0)."""
    n, cin, d0, h0, w0 = x.shape
    cout = params["bdb_w"].shape[-1]
    cskip = skip.shape[1]
    D, H, W = 2 * d0, 2 * h0, 2 * w0
    dl = dilation

    # Row stride Wq: lane-align (multiple of 128) only when the padding overhead is
    # small; otherwise keep the tight stride (the stage is HBM-bound).
    wp = W + 2 * dl
    wq_al = _round_up(wp, 128)
    Wq = wq_al if wq_al <= max(128, (wp * 5) // 4) else wp

    cin1 = cout + cskip
    cin1_p = _round_up(cin1, 16)
    cout_p = _round_up(cout, 16)

    # --- bdb: ConvTranspose3d(k=2, s=2) + BN + ReLU (BN scale folded into W) ---
    w8 = params["bdb_w"].transpose(0, 2, 1).reshape(8 * cout, cin)   # parity-major rows
    scale8 = jnp.tile(params["bdb_scale"], 8).reshape(-1, 1)
    bias8 = jnp.tile(params["bdb_bias"], 8).reshape(-1, 1).astype(jnp.float32)
    out_bdb = deconv2x_bn_relu(x, (w8 * scale8).astype(jnp.bfloat16), bias8)

    # --- torchsparse.cat -> channel concat, one pass into the canonical layout ---
    skip_t = skip.astype(jnp.bfloat16).transpose(0, 2, 1, 3, 4)      # (N, D, Cskip, H, W)
    cat = jnp.concatenate([out_bdb, skip_t], axis=2)                 # (N, D, cin1, H, W)
    catc = to_canonical(cat, dl, Wq, cin1_p)                         # (N, D+2dl, cin1_p, s_in)

    # --- ResidualBlock 1 (1x1-BN downsample fused into the second conv) ---
    h = conv3x3_bn(catc,
                   conv_w_cat(params["r1c1_w"], params["r1c1_scale"], cin1_p, cout_p),
                   _bias_col(params["r1c1_bias"], cout_p), dl=dl, H=H, W=W, Wq=Wq)
    pw = (params["r1d_w"][0] * params["r1d_scale"][None, :]).T       # (Cout, cin1), scale folded
    pw = jnp.pad(pw, ((0, cout_p - cout), (0, cin1_p - cin1))).astype(jnp.bfloat16)
    out1 = conv3x3_bn(h,
                      conv_w_cat(params["r1c2_w"], params["r1c2_scale"], cout_p, cout_p),
                      _bias_col(params["r1c2_bias"], cout_p), dl=dl, H=H, W=W, Wq=Wq,
                      proj=(catc, pw, _bias_col(params["r1d_bias"], cout_p)))

    # --- ResidualBlock 2 (identity shortcut) ---
    h2 = conv3x3_bn(out1,
                    conv_w_cat(params["r2c1_w"], params["r2c1_scale"], cout_p, cout_p),
                    _bias_col(params["r2c1_bias"], cout_p), dl=dl, H=H, W=W, Wq=Wq)
    out2 = conv3x3_bn(h2,
                      conv_w_cat(params["r2c2_w"], params["r2c2_scale"], cout_p, cout_p),
                      _bias_col(params["r2c2_bias"], cout_p), dl=dl, H=H, W=W, Wq=Wq,
                      residual=out1)

    # TODO(synk): the final un-pad + transpose + f32 upcast is one extra HBM pass;
    #             drop it if the consumer can accept the canonical bf16 layout.
    dense = from_canonical(out2, dl, Wq, D, H, W, cout)              # (N, D, Cout, H, W)
    return dense.transpose(0, 2, 1, 3, 4).astype(jnp.float32)        # NCDHW


# ----------------------------------- main ------------------------------------ #
if __name__ == "__main__":
    key = jax.random.PRNGKey(0)
    kp, kx, ksk = jax.random.split(key, 3)

    in_channels, out_channels, skip_channels = 8, 8, 8
    N, D0, H0, W0 = 2, 4, 4, 4

    params = init_params(kp, in_channels, out_channels, skip_channels)
    x = jax.random.normal(kx, (N, in_channels, D0, H0, W0), jnp.float32)
    skip = jax.random.normal(ksk, (N, skip_channels, 2 * D0, 2 * H0, 2 * W0), jnp.float32)

    fwd = jax.jit(functools.partial(up_voxel_stage_forward, params))
    out = fwd(x, skip)
    jax.block_until_ready(out)
    assert out.shape == (N, out_channels, 2 * D0, 2 * H0, 2 * W0), out.shape
    assert bool(jnp.isfinite(out).all())
    print("KERNEL_OK")
</pallas_src>

<mosaic_0001>
module attributes {stable_mosaic.version = 11 : i64} {
  func.func @_matmul_bias_relu_kernel(%arg0: i32, %arg1: i32, %arg2: memref<1x8x64xbf16, #tpu.memory_space<vmem>>, %arg3: memref<64x8xbf16, #tpu.memory_space<vmem>>, %arg4: memref<64x1xf32, #tpu.memory_space<vmem>>, %arg5: memref<1x64x64xbf16, #tpu.memory_space<vmem>>) attributes {dimension_semantics = [#tpu.dimension_semantics<parallel>, #tpu.dimension_semantics<parallel>], iteration_bounds = array<i64: 2, 1>, scalar_prefetch = 0 : i64, scratch_operands = 0 : i64, tpu.core_type = #tpu.core_type<tc>, window_params = [{transform_indices = @transform_0, window_bounds = array<i64: 1, 8, 64>}, {pipeline_mode = #tpu.pipeline_mode<synchronous>, transform_indices = @transform_1, window_bounds = array<i64: 64, 8>}, {pipeline_mode = #tpu.pipeline_mode<synchronous>, transform_indices = @transform_2, window_bounds = array<i64: 64, 1>}, {transform_indices = @transform_3, window_bounds = array<i64: 1, 64, 64>}]} {
    %c0 = arith.constant 0 : index
    %c0_0 = arith.constant 0 : index
    %0 = vector.load %arg3[%c0, %c0_0] : memref<64x8xbf16, #tpu.memory_space<vmem>>, vector<64x8xbf16>
    %c0_1 = arith.constant 0 : index
    %c0_2 = arith.constant 0 : index
    %c0_3 = arith.constant 0 : index
    %1 = vector.load %arg2[%c0_1, %c0_2, %c0_3] : memref<1x8x64xbf16, #tpu.memory_space<vmem>>, vector<1x8x64xbf16>
    %2 = vector.shape_cast %1 : vector<1x8x64xbf16> to vector<8x64xbf16>
    %cst = arith.constant dense<0.000000e+00> : vector<64x64xf32>
    %3 = tpu.matmul %0, %2, %cst {dimension_numbers = #tpu.dot_dimension_numbers<[1], [0], [0], [1], [0, 0, 1, 1], [], []>} : vector<64x8xbf16>, vector<8x64xbf16>, vector<64x64xf32> -> vector<64x64xf32>
    %c0_4 = arith.constant 0 : index
    %c0_5 = arith.constant 0 : index
    %4 = vector.load %arg4[%c0_4, %c0_5] : memref<64x1xf32, #tpu.memory_space<vmem>>, vector<64x1xf32>
    %5 = vector.broadcast %4 : vector<64x1xf32> to vector<64x64xf32>
    %6 = arith.addf %3, %5 : vector<64x64xf32>
    %cst_6 = arith.constant 0.000000e+00 : f32
    %7 = vector.broadcast %cst_6 : f32 to vector<64x64xf32>
    %8 = arith.maximumf %6, %7 : vector<64x64xf32>
    %9 = arith.truncf %8 : vector<64x64xf32> to vector<64x64xbf16>
    %c0_7 = arith.constant 0 : index
    %c0_8 = arith.constant 0 : index
    %c0_9 = arith.constant 0 : index
    %10 = vector.load %arg5[%c0_7, %c0_8, %c0_9] : memref<1x64x64xbf16, #tpu.memory_space<vmem>>, vector<1x64x64xbf16>
    %11 = vector.shape_cast %10 : vector<1x64x64xbf16> to vector<64x64xbf16>
    %12 = vector.shape_cast %9 : vector<64x64xbf16> to vector<1x64x64xbf16>
    tpu.vector_store %arg5[%c0_7, %c0_8, %c0_9], %12 {strides = array<i32>} : memref<1x64x64xbf16, #tpu.memory_space<vmem>>, vector<1x64x64xbf16>,
    return
  }
  func.func @transform_0(%arg0: i32, %arg1: i32) -> (i32, i32, i32) {
    %c0_i32 = arith.constant 0 : i32
    %c0_i32_0 = arith.constant 0 : i32
    return %arg0, %c0_i32, %arg1 : i32, i32, i32
  }
  func.func @transform_1(%arg0: i32, %arg1: i32) -> (i32, i32) {
    %c0_i32 = arith.constant 0 : i32
    %c0_i32_0 = arith.constant 0 : i32
    %c0_i32_1 = arith.constant 0 : i32
    return %c0_i32, %c0_i32_0 : i32, i32
  }
  func.func @transform_2(%arg0: i32, %arg1: i32) -> (i32, i32) {
    %c0_i32 = arith.constant 0 : i32
    %c0_i32_0 = arith.constant 0 : i32
    %c0_i32_1 = arith.constant 0 : i32
    return %c0_i32, %c0_i32_0 : i32, i32
  }
  func.func @transform_3(%arg0: i32, %arg1: i32) -> (i32, i32, i32) {
    %c0_i32 = arith.constant 0 : i32
    %c0_i32_0 = arith.constant 0 : i32
    return %arg0, %c0_i32, %arg1 : i32, i32, i32
  }
}

module attributes {stable_mosaic.version = 11 : i64} {
  func.func @_conv3x3_bn_kernel(%arg0: i32, %arg1: i32, %arg2: memref<1x1x16x1282xbf16, #tpu.memory_space<vmem>>, %arg3: memref<1x1x16x1282xbf16, #tpu.memory_space<vmem>>, %arg4: memref<1x1x16x1282xbf16, #tpu.memory_space<vmem>>, %arg5: memref<16x432xbf16, #tpu.memory_space<vmem>>, %arg6: memref<16x1xf32, #tpu.memory_space<vmem>>, %arg7: memref<1x1x16x1282xbf16, #tpu.memory_space<vmem>>) attributes {dimension_semantics = [#tpu.dimension_semantics<parallel>, #tpu.dimension_semantics<parallel>], iteration_bounds = array<i64: 2, 10>, scalar_prefetch = 0 : i64, scratch_operands = 0 : i64, tpu.core_type = #tpu.core_type<tc>, window_params = [{transform_indices = @transform_0, window_bounds = array<i64: 1, 1, 16, 1282>}, {transform_indices = @transform_1, window_bounds = array<i64: 1, 1, 16, 1282>}, {transform_indices = @transform_2, window_bounds = array<i64: 1, 1, 16, 1282>}, {pipeline_mode = #tpu.pipeline_mode<synchronous>, transform_indices = @transform_3, window_bounds = array<i64: 16, 432>}, {pipeline_mode = #tpu.pipeline_mode<synchronous>, transform_indices = @transform_4, window_bounds = array<i64: 16, 1>}, {transform_indices = @transform_5, window_bounds = array<i64: 1, 1, 16, 1282>}]} {
    %c1_i32 = arith.constant 1 : i32
    %0 = arith.cmpi sge, %arg1, %c1_i32 : i32
    %c9_i32 = arith.constant 9 : i32
    %1 = arith.cmpi slt, %arg1, %c9_i32 : i32
    %2 = arith.andi %0, %1 : i1
    %true = arith.constant true
    %3 = arith.xori %2, %true : i1
    %4 = arith.extui %3 : i1 to i32
    %c0_i32 = arith.constant 0 : i32
    %5 = arith.cmpi ne, %4, %c0_i32 : i32
    scf.if %5 {
      %cst = arith.constant 0.000000e+00 : bf16
      %8 = vector.broadcast %cst : bf16 to vector<16x1282xbf16>
      %c0 = arith.constant 0 : index
      %c0_1 = arith.constant 0 : index
      %c0_2 = arith.constant 0 : index
      %c0_3 = arith.constant 0 : index
      %9 = vector.load %arg7[%c0, %c0_1, %c0_2, %c0_3] : memref<1x1x16x1282xbf16, #tpu.memory_space<vmem>>, vector<1x1x16x1282xbf16>
      %10 = vector.shape_cast %9 : vector<1x1x16x1282xbf16> to vector<16x1282xbf16>
      %11 = vector.shape_cast %8 : vector<16x1282xbf16> to vector<1x1x16x1282xbf16>
      tpu.vector_store %arg7[%c0, %c0_1, %c0_2, %c0_3], %11 {strides = array<i32>} : memref<1x1x16x1282xbf16, #tpu.memory_space<vmem>>, vector<1x1x16x1282xbf16>,
    } else {
    }
    %6 = arith.extui %2 : i1 to i32
    %c0_i32_0 = arith.constant 0 : i32
    %7 = arith.cmpi ne, %6, %c0_i32_0 : i32
    scf.if %7 {
      %c0 = arith.constant 0 : index
      %c0_1 = arith.constant 0 : index
      %c0_2 = arith.constant 0 : index
      %c0_3 = arith.constant 0 : index
      %8 = vector.load %arg2[%c0, %c0_1, %c0_2, %c0_3] : memref<1x1x16x1282xbf16, #tpu.memory_space<vmem>>, vector<1x1x16x1282xbf16>
      %9 = vector.shape_cast %8 : vector<1x1x16x1282xbf16> to vector<16x1282xbf16>
      %10 = vector.extract_strided_slice %9 {offsets = [0, 0], sizes = [16, 1280], strides = [1, 1]} : vector<16x1282xbf16> to vector<16x1280xbf16>
      %11 = vector.extract_strided_slice %9 {offsets = [0, 1], sizes = [16, 1280], strides = [1, 1]} : vector<16x1282xbf16> to vector<16x1280xbf16>
      %12 = vector.extract_strided_slice %9 {offsets = [0, 2], sizes = [16, 1280], strides = [1, 1]} : vector<16x1282xbf16> to vector<16x1280xbf16>
      %13 = vector.extract_strided_slice %10 {offsets = [0, 0], sizes = [16, 1024], strides = [1, 1]} : vector<16x1280xbf16> to vector<16x1024xbf16>
      %14 = vector.extract_strided_slice %11 {offsets = [0, 0], sizes = [16, 1024], strides = [1, 1]} : vector<16x1280xbf16> to vector<16x1024xbf16>
      %15 = vector.extract_strided_slice %12 {offsets = [0, 0], sizes = [16, 1024], strides = [1, 1]} : vector<16x1280xbf16> to vector<16x1024xbf16>
      %16 = vector.extract_strided_slice %10 {offsets = [0, 128], sizes = [16, 1024], strides = [1, 1]} : vector<16x1280xbf16> to vector<16x1024xbf16>
      %17 = vector.extract_strided_slice %11 {offsets = [0, 128], sizes = [16, 1024], strides = [1, 1]} : vector<16x1280xbf16> to vector<16x1024xbf16>
      %18 = vector.extract_strided_slice %12 {offsets = [0, 128], sizes = [16, 1024], strides = [1, 1]} : vector<16x1280xbf16> to vector<16x1024xbf16>
      %19 = vector.extract_strided_slice %10 {offsets = [0, 256], sizes = [16, 1024], strides = [1, 1]} : vector<16x1280xbf16> to vector<16x1024xbf16>
      %20 = vector.extract_strided_slice %11 {offsets = [0, 256], sizes = [16, 1024], strides = [1, 1]} : vector<16x1280xbf16> to vector<16x1024xbf16>
      %21 = vector.extract_strided_slice %12 {offsets = [0, 256], sizes = [16, 1024], strides = [1, 1]} : vector<16x1280xbf16> to vector<16x1024xbf16>
      %c0_4 = arith.constant 0 : index
      %c0_5 = arith.constant 0 : index
      %c0_6 = arith.constant 0 : index
      %c0_7 = arith.constant 0 : index
      %22 = vector.load %arg3[%c0_4, %c0_5, %c0_6, %c0_7] : memref<1x1x16x1282xbf16, #tpu.memory_space<vmem>>, vector<1x1x16x1282xbf16>
      %23 = vector.shape_cast %22 : vector<1x1x16x1282xbf16> to vector<16x1282xbf16>
      %24 = vector.extract_strided_slice %23 {offsets = [0, 0], sizes = [16, 1280], strides = [1, 1]} : vector<16x1282xbf16> to vector<16x1280xbf16>
      %25 = vector.extract_strided_slice %23 {offsets = [0, 1], sizes = [16, 1280], strides = [1, 1]} : vector<16x1282xbf16> to vector<16x1280xbf16>
      %26 = vector.extract_strided_slice %23 {offsets = [0, 2], sizes = [16, 1280], strides = [1, 1]} : vector<16x1282xbf16> to vector<16x1280xbf16>
      %27 = vector.extract_strided_slice %24 {offsets = [0, 0], sizes = [16, 1024], strides = [1, 1]} : vector<16x1280xbf16> to vector<16x1024xbf16>
      %28 = vector.extract_strided_slice %25 {offsets = [0, 0], sizes = [16, 1024], strides = [1, 1]} : vector<16x1280xbf16> to vector<16x1024xbf16>
      %29 = vector.extract_strided_slice %26 {offsets = [0, 0], sizes = [16, 1024], strides = [1, 1]} : vector<16x1280xbf16> to vector<16x1024xbf16>
      %30 = vector.extract_strided_slice %24 {offsets = [0, 128], sizes = [16, 1024], strides = [1, 1]} : vector<16x1280xbf16> to vector<16x1024xbf16>
      %31 = vector.extract_strided_slice %25 {offsets = [0, 128], sizes = [16, 1024], strides = [1, 1]} : vector<16x1280xbf16> to vector<16x1024xbf16>
      %32 = vector.extract_strided_slice %26 {offsets = [0, 128], sizes = [16, 1024], strides = [1, 1]} : vector<16x1280xbf16> to vector<16x1024xbf16>
      %33 = vector.extract_strided_slice %24 {offsets = [0, 256], sizes = [16, 1024], strides = [1, 1]} : vector<16x1280xbf16> to vector<16x1024xbf16>
      %34 = vector.extract_strided_slice %25 {offsets = [0, 256], sizes = [16, 1024], strides = [1, 1]} : vector<16x1280xbf16> to vector<16x1024xbf16>
      %35 = vector.extract_strided_slice %26 {offsets = [0, 256], sizes = [16, 1024], strides = [1, 1]} : vector<16x1280xbf16> to vector<16x1024xbf16>
      %c0_8 = arith.constant 0 : index
      %c0_9 = arith.constant 0 : index
      %c0_10 = arith.constant 0 : index
      %c0_11 = arith.constant 0 : index
      %36 = vector.load %arg4[%c0_8, %c0_9, %c0_10, %c0_11] : memref<1x1x16x1282xbf16, #tpu.memory_space<vmem>>, vector<1x1x16x1282xbf16>
      %37 = vector.shape_cast %36 : vector<1x1x16x1282xbf16> to vector<16x1282xbf16>
      %38 = vector.extract_strided_slice %37 {offsets = [0, 0], sizes = [16, 1280], strides = [1, 1]} : vector<16x1282xbf16> to vector<16x1280xbf16>
      %39 = vector.extract_strided_slice %37 {offsets = [0, 1], sizes = [16, 1280], strides = [1, 1]} : vector<16x1282xbf16> to vector<16x1280xbf16>
      %40 = vector.extract_strided_slice %37 {offsets = [0, 2], sizes = [16, 1280], strides = [1, 1]} : vector<16x1282xbf16> to vector<16x1280xbf16>
      %41 = vector.extract_strided_slice %38 {offsets = [0, 0], sizes = [16, 1024], strides = [1, 1]} : vector<16x1280xbf16> to vector<16x1024xbf16>
      %42 = vector.extract_strided_slice %39 {offsets = [0, 0], sizes = [16, 1024], strides = [1, 1]} : vector<16x1280xbf16> to vector<16x1024xbf16>
      %43 = vector.extract_strided_slice %40 {offsets = [0, 0], sizes = [16, 1024], strides = [1, 1]} : vector<16x1280xbf16> to vector<16x1024xbf16>
      %44 = vector.extract_strided_slice %38 {offsets = [0, 128], sizes = [16, 1024], strides = [1, 1]} : vector<16x1280xbf16> to vector<16x1024xbf16>
      %45 = vector.extract_strided_slice %39 {offsets = [0, 128], sizes = [16, 1024], strides = [1, 1]} : vector<16x1280xbf16> to vector<16x1024xbf16>
      %46 = vector.extract_strided_slice %40 {offsets = [0, 128], sizes = [16, 1024], strides = [1, 1]} : vector<16x1280xbf16> to vector<16x1024xbf16>
      %47 = vector.extract_strided_slice %38 {offsets = [0, 256], sizes = [16, 1024], strides = [1, 1]} : vector<16x1280xbf16> to vector<16x1024xbf16>
      %48 = vector.extract_strided_slice %39 {offsets = [0, 256], sizes = [16, 1024], strides = [1, 1]} : vector<16x1280xbf16> to vector<16x1024xbf16>
      %49 = vector.extract_strided_slice %40 {offsets = [0, 256], sizes = [16, 1024], strides = [1, 1]} : vector<16x1280xbf16> to vector<16x1024xbf16>
      %50 = tpu.concatenate %13, %14, %15, %16, %17, %18, %19, %20, %21, %27, %28, %29, %30, %31, %32, %33 in 0 : vector<16x1024xbf16>, vector<16x1024xbf16>, vector<16x1024xbf16>, vector<16x1024xbf16>, vector<16x1024xbf16>, vector<16x1024xbf16>, vector<16x1024xbf16>, vector<16x1024xbf16>, vector<16x1024xbf16>, vector<16x1024xbf16>, vector<16x1024xbf16>, vector<16x1024xbf16>, vector<16x1024xbf16>, vector<16x1024xbf16>, vector<16x1024xbf16>, vector<16x1024xbf16> -> vector<256x1024xbf16>
      %51 = tpu.concatenate %34, %35, %41, %42, %43, %44, %45, %46, %47, %48, %49 in 0 : vector<16x1024xbf16>, vector<16x1024xbf16>, vector<16x1024xbf16>, vector<16x1024xbf16>, vector<16x1024xbf16>, vector<16x1024xbf16>, vector<16x1024xbf16>, vector<16x1024xbf16>, vector<16x1024xbf16>, vector<16x1024xbf16>, vector<16x1024xbf16> -> vector<176x1024xbf16>
      %52 = tpu.concatenate %50, %51 in 0 : vector<256x1024xbf16>, vector<176x1024xbf16> -> vector<432x1024xbf16>
      %c0_12 = arith.constant 0 : index
      %c0_13 = arith.constant 0 : index
      %53 = vector.load %arg5[%c0_12, %c0_13] : memref<16x432xbf16, #tpu.memory_space<vmem>>, vector<16x432xbf16>
      %cst = arith.constant dense<0.000000e+00> : vector<16x1024xf32>
      %54 = tpu.matmul %53, %52, %cst {dimension_numbers = #tpu.dot_dimension_numbers<[1], [0], [0], [1], [0, 0, 1, 1], [], []>} : vector<16x432xbf16>, vector<432x1024xbf16>, vector<16x1024xf32> -> vector<16x1024xf32>
      %c0_14 = arith.constant 0 : index
      %c0_15 = arith.constant 0 : index
      %55 = vector.load %arg6[%c0_14, %c0_15] : memref<16x1xf32, #tpu.memory_space<vmem>>, vector<16x1xf32>
      %56 = vector.broadcast %55 : vector<16x1xf32> to vector<16x1024xf32>
      %57 = arith.addf %54, %56 : vector<16x1024xf32>
      %cst_16 = arith.constant 0.000000e+00 : f32
      %58 = vector.broadcast %cst_16 : f32 to vector<16x1024xf32>
      %59 = arith.maximumf %57, %58 : vector<16x1024xf32>
      %60 = tpu.iota {dimensions = array<i32: 1>} : vector<1x1024xi32>
      %c128_i32 = arith.constant 128 : i32
      %c0_i32_17 = arith.constant 0 : i32
      %61 = arith.cmpi eq, %c128_i32, %c0_i32_17 : i32
      %c1_i32_18 = arith.constant 1 : i32
      %62 = arith.select %61, %c1_i32_18, %c128_i32 : i32
      %63 = vector.broadcast %62 : i32 to vector<1x1024xi32>
      %64 = arith.remsi %60, %63 : vector<1x1024xi32>
      %c0_i32_19 = arith.constant 0 : i32
      %65 = vector.broadcast %c0_i32_19 : i32 to vector<1x1024xi32>
      %66 = arith.cmpi ne, %64, %65 : vector<1x1024xi32>
      %c0_i32_20 = arith.constant 0 : i32
      %67 = vector.broadcast %c0_i32_20 : i32 to vector<1x1024xi32>
      %68 = arith.cmpi slt, %64, %67 : vector<1x1024xi32>
      %c0_i32_21 = arith.constant 0 : i32
      %69 = arith.cmpi slt, %62, %c0_i32_21 : i32
      %70 = vector.broadcast %69 : i1 to vector<1x1024xi1>
      %71 = vector.broadcast %70 : vector<1x1024xi1> to vector<1x1024xi1>
      %72 = arith.xori %68, %71 : vector<1x1024xi1>
      %73 = arith.andi %72, %66 : vector<1x1024xi1>
      %74 = vector.broadcast %62 : i32 to vector<1x1024xi32>
      %75 = arith.addi %64, %74 : vector<1x1024xi32>
      %76 = arith.select %73, %75, %64 : vector<1x1024xi1>, vector<1x1024xi32>
      %c8_i32 = arith.constant 8 : i32
      %77 = vector.broadcast %c8_i32 : i32 to vector<1x1024xi32>
      %78 = arith.cmpi slt, %76, %77 : vector<1x1024xi32>
      %cst_22 = arith.constant 0.000000e+00 : f32
      %79 = vector.shape_cast %78 : vector<1x1024xi1> to vector<1x1024xi1>
      %80 = vector.broadcast %79 : vector<1x1024xi1> to vector<16x1024xi1>
      %81 = vector.broadcast %cst_22 : f32 to vector<16x1024xf32>
      %82 = arith.select %80, %59, %81 : vector<16x1024xi1>, vector<16x1024xf32>
      %cst_23 = arith.constant 0.000000e+00 : bf16
      %83 = vector.broadcast %cst_23 : bf16 to vector<16x1282xbf16>
      %c0_24 = arith.constant 0 : index
      %c0_25 = arith.constant 0 : index
      %c0_26 = arith.constant 0 : index
      %c0_27 = arith.constant 0 : index
      %84 = vector.load %arg7[%c0_24, %c0_25, %c0_26, %c0_27] : memref<1x1x16x1282xbf16, #tpu.memory_space<vmem>>, vector<1x1x16x1282xbf16>
      %85 = vector.shape_cast %84 : vector<1x1x16x1282xbf16> to vector<16x1282xbf16>
      %86 = vector.shape_cast %83 : vector<16x1282xbf16> to vector<1x1x16x1282xbf16>
      tpu.vector_store %arg7[%c0_24, %c0_25, %c0_26, %c0_27], %86 {strides = array<i32>} : memref<1x1x16x1282xbf16, #tpu.memory_space<vmem>>, vector<1x1x16x1282xbf16>,
      %87 = arith.truncf %82 : vector<16x1024xf32> to vector<16x1024xbf16>
      %c0_28 = arith.constant 0 : index
      %c0_29 = arith.constant 0 : index
      %c0_30 = arith.constant 0 : index
      %c129 = arith.constant 129 : index
      %88 = vector.load %arg7[%c0_28, %c0_29, %c0_30, %c129] : memref<1x1x16x1282xbf16, #tpu.memory_space<vmem>>, vector<1x1x16x1024xbf16>
      %89 = vector.shape_cast %88 : vector<1x1x16x1024xbf16> to vector<16x1024xbf16>
      %90 = vector.shape_cast %87 : vector<16x1024xbf16> to vector<1x1x16x1024xbf16>
      tpu.vector_store %arg7[%c0_28, %c0_29, %c0_30, %c129], %90 {strides = array<i32>} : memref<1x1x16x1282xbf16, #tpu.memory_space<vmem>>, vector<1x1x16x1024xbf16>,
    } else {
    }
    return
  }
  func.func @transform_0(%arg0: i32, %arg1: i32) -> (i32, i32, i32, i32) {
    %c-1_i32 = arith.constant -1 : i32
    %0 = arith.addi %arg1, %c-1_i32 : i32
    %c9_i32 = arith.constant 9 : i32
    %1 = arith.minsi %0, %c9_i32 : i32
    %c0_i32 = arith.constant 0 : i32
    %2 = arith.maxsi %1, %c0_i32 : i32
    %c0_i32_0 = arith.constant 0 : i32
    %c0_i32_1 = arith.constant 0 : i32
    %c0_i32_2 = arith.constant 0 : i32
    return %arg0, %2, %c0_i32_0, %c0_i32_1 : i32, i32, i32, i32
  }
  func.func @transform_1(%arg0: i32, %arg1: i32) -> (i32, i32, i32, i32) {
    %c0_i32 = arith.constant 0 : i32
    %0 = arith.addi %arg1, %c0_i32 : i32
    %c9_i32 = arith.constant 9 : i32
    %1 = arith.minsi %0, %c9_i32 : i32
    %c0_i32_0 = arith.constant 0 : i32
    %2 = arith.maxsi %1, %c0_i32_0 : i32
    %c0_i32_1 = arith.constant 0 : i32
    %c0_i32_2 = arith.constant 0 : i32
    %c0_i32_3 = arith.constant 0 : i32
    return %arg0, %2, %c0_i32_1, %c0_i32_2 : i32, i32, i32, i32
  }
  func.func @transform_2(%arg0: i32, %arg1: i32) -> (i32, i32, i32, i32) {
    %c1_i32 = arith.constant 1 : i32
    %0 = arith.addi %arg1, %c1_i32 : i32
    %c9_i32 = arith.constant 9 : i32
    %1 = arith.minsi %0, %c9_i32 : i32
    %c0_i32 = arith.constant 0 : i32
    %2 = arith.maxsi %1, %c0_i32 : i32
    %c0_i32_0 = arith.constant 0 : i32
    %c0_i32_1 = arith.constant 0 : i32
    %c0_i32_2 = arith.constant 0 : i32
    return %arg0, %2, %c0_i32_0, %c0_i32_1 : i32, i32, i32, i32
  }
  func.func @transform_3(%arg0: i32, %arg1: i32) -> (i32, i32) {
    %c0_i32 = arith.constant 0 : i32
    %c0_i32_0 = arith.constant 0 : i32
    %c0_i32_1 = arith.constant 0 : i32
    return %c0_i32, %c0_i32_0 : i32, i32
  }
  func.func @transform_4(%arg0: i32, %arg1: i32) -> (i32, i32) {
    %c0_i32 = arith.constant 0 : i32
    %c0_i32_0 = arith.constant 0 : i32
    %c0_i32_1 = arith.constant 0 : i32
    return %c0_i32, %c0_i32_0 : i32, i32
  }
  func.func @transform_5(%arg0: i32, %arg1: i32) -> (i32, i32, i32, i32) {
    %c0_i32 = arith.constant 0 : i32
    %c0_i32_0 = arith.constant 0 : i32
    %c0_i32_1 = arith.constant 0 : i32
    return %arg0, %arg1, %c0_i32, %c0_i32_0 : i32, i32, i32, i32
  }
}

module attributes {stable_mosaic.version = 11 : i64} {
  func.func @_conv3x3_bn_kernel(%arg0: i32, %arg1: i32, %arg2: memref<1x1x16x1282xbf16, #tpu.memory_space<vmem>>, %arg3: memref<1x1x16x1282xbf16, #tpu.memory_space<vmem>>, %arg4: memref<1x1x16x1282xbf16, #tpu.memory_space<vmem>>, %arg5: memref<16x432xbf16, #tpu.memory_space<vmem>>, %arg6: memref<16x1xf32, #tpu.memory_space<vmem>>, %arg7: memref<1x1x16x1282xbf16, #tpu.memory_space<vmem>>, %arg8: memref<16x16xbf16, #tpu.memory_space<vmem>>, %arg9: memref<16x1xf32, #tpu.memory_space<vmem>>, %arg10: memref<1x1x16x1282xbf16, #tpu.memory_space<vmem>>) attributes {dimension_semantics = [#tpu.dimension_semantics<parallel>, #tpu.dimension_semantics<parallel>], iteration_bounds = array<i64: 2, 10>, scalar_prefetch = 0 : i64, scratch_operands = 0 : i64, tpu.core_type = #tpu.core_type<tc>, window_params = [{transform_indices = @transform_0, window_bounds = array<i64: 1, 1, 16, 1282>}, {transform_indices = @transform_1, window_bounds = array<i64: 1, 1, 16, 1282>}, {transform_indices = @transform_2, window_bounds = array<i64: 1, 1, 16, 1282>}, {pipeline_mode = #tpu.pipeline_mode<synchronous>, transform_indices = @transform_3, window_bounds = array<i64: 16, 432>}, {pipeline_mode = #tpu.pipeline_mode<synchronous>, transform_indices = @transform_4, window_bounds = array<i64: 16, 1>}, {transform_indices = @transform_5, window_bounds = array<i64: 1, 1, 16, 1282>}, {pipeline_mode = #tpu.pipeline_mode<synchronous>, transform_indices = @transform_6, window_bounds = array<i64: 16, 16>}, {pipeline_mode = #tpu.pipeline_mode<synchronous>, transform_indices = @transform_7, window_bounds = array<i64: 16, 1>}, {transform_indices = @transform_8, window_bounds = array<i64: 1, 1, 16, 1282>}]} {
    %c1_i32 = arith.constant 1 : i32
    %0 = arith.cmpi sge, %arg1, %c1_i32 : i32
    %c9_i32 = arith.constant 9 : i32
    %1 = arith.cmpi slt, %arg1, %c9_i32 : i32
    %2 = arith.andi %0, %1 : i1
    %true = arith.constant true
    %3 = arith.xori %2, %true : i1
    %4 = arith.extui %3 : i1 to i32
    %c0_i32 = arith.constant 0 : i32
    %5 = arith.cmpi ne, %4, %c0_i32 : i32
    scf.if %5 {
      %cst = arith.constant 0.000000e+00 : bf16
      %8 = vector.broadcast %cst : bf16 to vector<16x1282xbf16>
      %c0 = arith.constant 0 : index
      %c0_1 = arith.constant 0 : index
      %c0_2 = arith.constant 0 : index
      %c0_3 = arith.constant 0 : index
      %9 = vector.load %arg10[%c0, %c0_1, %c0_2, %c0_3] : memref<1x1x16x1282xbf16, #tpu.memory_space<vmem>>, vector<1x1x16x1282xbf16>
      %10 = vector.shape_cast %9 : vector<1x1x16x1282xbf16> to vector<16x1282xbf16>
      %11 = vector.shape_cast %8 : vector<16x1282xbf16> to vector<1x1x16x1282xbf16>
      tpu.vector_store %arg10[%c0, %c0_1, %c0_2, %c0_3], %11 {strides = array<i32>} : memref<1x1x16x1282xbf16, #tpu.memory_space<vmem>>, vector<1x1x16x1282xbf16>,
    } else {
    }
    %6 = arith.extui %2 : i1 to i32
    %c0_i32_0 = arith.constant 0 : i32
    %7 = arith.cmpi ne, %6, %c0_i32_0 : i32
    scf.if %7 {
      %c0 = arith.constant 0 : index
      %c0_1 = arith.constant 0 : index
      %c0_2 = arith.constant 0 : index
      %c0_3 = arith.constant 0 : index
      %8 = vector.load %arg2[%c0, %c0_1, %c0_2, %c0_3] : memref<1x1x16x1282xbf16, #tpu.memory_space<vmem>>, vector<1x1x16x1282xbf16>
      %9 = vector.shape_cast %8 : vector<1x1x16x1282xbf16> to vector<16x1282xbf16>
      %10 = vector.extract_strided_slice %9 {offsets = [0, 0], sizes = [16, 1280], strides = [1, 1]} : vector<16x1282xbf16> to vector<16x1280xbf16>
      %11 = vector.extract_strided_slice %9 {offsets = [0, 1], sizes = [16, 1280], strides = [1, 1]} : vector<16x1282xbf16> to vector<16x1280xbf16>
      %12 = vector.extract_strided_slice %9 {offsets = [0, 2], sizes = [16, 1280], strides = [1, 1]} : vector<16x1282xbf16> to vector<16x1280xbf16>
      %13 = vector.extract_strided_slice %10 {offsets = [0, 0], sizes = [16, 1024], strides = [1, 1]} : vector<16x1280xbf16> to vector<16x1024xbf16>
      %14 = vector.extract_strided_slice %11 {offsets = [0, 0], sizes = [16, 1024], strides = [1, 1]} : vector<16x1280xbf16> to vector<16x1024xbf16>
      %15 = vector.extract_strided_slice %12 {offsets = [0, 0], sizes = [16, 1024], strides = [1, 1]} : vector<16x1280xbf16> to vector<16x1024xbf16>
      %16 = vector.extract_strided_slice %10 {offsets = [0, 128], sizes = [16, 1024], strides = [1, 1]} : vector<16x1280xbf16> to vector<16x1024xbf16>
      %17 = vector.extract_strided_slice %11 {offsets = [0, 128], sizes = [16, 1024], strides = [1, 1]} : vector<16x1280xbf16> to vector<16x1024xbf16>
      %18 = vector.extract_strided_slice %12 {offsets = [0, 128], sizes = [16, 1024], strides = [1, 1]} : vector<16x1280xbf16> to vector<16x1024xbf16>
      %19 = vector.extract_strided_slice %10 {offsets = [0, 256], sizes = [16, 1024], strides = [1, 1]} : vector<16x1280xbf16> to vector<16x1024xbf16>
      %20 = vector.extract_strided_slice %11 {offsets = [0, 256], sizes = [16, 1024], strides = [1, 1]} : vector<16x1280xbf16> to vector<16x1024xbf16>
      %21 = vector.extract_strided_slice %12 {offsets = [0, 256], sizes = [16, 1024], strides = [1, 1]} : vector<16x1280xbf16> to vector<16x1024xbf16>
      %c0_4 = arith.constant 0 : index
      %c0_5 = arith.constant 0 : index
      %c0_6 = arith.constant 0 : index
      %c0_7 = arith.constant 0 : index
      %22 = vector.load %arg3[%c0_4, %c0_5, %c0_6, %c0_7] : memref<1x1x16x1282xbf16, #tpu.memory_space<vmem>>, vector<1x1x16x1282xbf16>
      %23 = vector.shape_cast %22 : vector<1x1x16x1282xbf16> to vector<16x1282xbf16>
      %24 = vector.extract_strided_slice %23 {offsets = [0, 0], sizes = [16, 1280], strides = [1, 1]} : vector<16x1282xbf16> to vector<16x1280xbf16>
      %25 = vector.extract_strided_slice %23 {offsets = [0, 1], sizes = [16, 1280], strides = [1, 1]} : vector<16x1282xbf16> to vector<16x1280xbf16>
      %26 = vector.extract_strided_slice %23 {offsets = [0, 2], sizes = [16, 1280], strides = [1, 1]} : vector<16x1282xbf16> to vector<16x1280xbf16>
      %27 = vector.extract_strided_slice %24 {offsets = [0, 0], sizes = [16, 1024], strides = [1, 1]} : vector<16x1280xbf16> to vector<16x1024xbf16>
      %28 = vector.extract_strided_slice %25 {offsets = [0, 0], sizes = [16, 1024], strides = [1, 1]} : vector<16x1280xbf16> to vector<16x1024xbf16>
      %29 = vector.extract_strided_slice %26 {offsets = [0, 0], sizes = [16, 1024], strides = [1, 1]} : vector<16x1280xbf16> to vector<16x1024xbf16>
      %30 = vector.extract_strided_slice %24 {offsets = [0, 128], sizes = [16, 1024], strides = [1, 1]} : vector<16x1280xbf16> to vector<16x1024xbf16>
      %31 = vector.extract_strided_slice %25 {offsets = [0, 128], sizes = [16, 1024], strides = [1, 1]} : vector<16x1280xbf16> to vector<16x1024xbf16>
      %32 = vector.extract_strided_slice %26 {offsets = [0, 128], sizes = [16, 1024], strides = [1, 1]} : vector<16x1280xbf16> to vector<16x1024xbf16>
      %33 = vector.extract_strided_slice %24 {offsets = [0, 256], sizes = [16, 1024], strides = [1, 1]} : vector<16x1280xbf16> to vector<16x1024xbf16>
      %34 = vector.extract_strided_slice %25 {offsets = [0, 256], sizes = [16, 1024], strides = [1, 1]} : vector<16x1280xbf16> to vector<16x1024xbf16>
      %35 = vector.extract_strided_slice %26 {offsets = [0, 256], sizes = [16, 1024], strides = [1, 1]} : vector<16x1280xbf16> to vector<16x1024xbf16>
      %c0_8 = arith.constant 0 : index
      %c0_9 = arith.constant 0 : index
      %c0_10 = arith.constant 0 : index
      %c0_11 = arith.constant 0 : index
      %36 = vector.load %arg4[%c0_8, %c0_9, %c0_10, %c0_11] : memref<1x1x16x1282xbf16, #tpu.memory_space<vmem>>, vector<1x1x16x1282xbf16>
      %37 = vector.shape_cast %36 : vector<1x1x16x1282xbf16> to vector<16x1282xbf16>
      %38 = vector.extract_strided_slice %37 {offsets = [0, 0], sizes = [16, 1280], strides = [1, 1]} : vector<16x1282xbf16> to vector<16x1280xbf16>
      %39 = vector.extract_strided_slice %37 {offsets = [0, 1], sizes = [16, 1280], strides = [1, 1]} : vector<16x1282xbf16> to vector<16x1280xbf16>
      %40 = vector.extract_strided_slice %37 {offsets = [0, 2], sizes = [16, 1280], strides = [1, 1]} : vector<16x1282xbf16> to vector<16x1280xbf16>
      %41 = vector.extract_strided_slice %38 {offsets = [0, 0], sizes = [16, 1024], strides = [1, 1]} : vector<16x1280xbf16> to vector<16x1024xbf16>
      %42 = vector.extract_strided_slice %39 {offsets = [0, 0], sizes = [16, 1024], strides = [1, 1]} : vector<16x1280xbf16> to vector<16x1024xbf16>
      %43 = vector.extract_strided_slice %40 {offsets = [0, 0], sizes = [16, 1024], strides = [1, 1]} : vector<16x1280xbf16> to vector<16x1024xbf16>
      %44 = vector.extract_strided_slice %38 {offsets = [0, 128], sizes = [16, 1024], strides = [1, 1]} : vector<16x1280xbf16> to vector<16x1024xbf16>
      %45 = vector.extract_strided_slice %39 {offsets = [0, 128], sizes = [16, 1024], strides = [1, 1]} : vector<16x1280xbf16> to vector<16x1024xbf16>
      %46 = vector.extract_strided_slice %40 {offsets = [0, 128], sizes = [16, 1024], strides = [1, 1]} : vector<16x1280xbf16> to vector<16x1024xbf16>
      %47 = vector.extract_strided_slice %38 {offsets = [0, 256], sizes = [16, 1024], strides = [1, 1]} : vector<16x1280xbf16> to vector<16x1024xbf16>
      %48 = vector.extract_strided_slice %39 {offsets = [0, 256], sizes = [16, 1024], strides = [1, 1]} : vector<16x1280xbf16> to vector<16x1024xbf16>
      %49 = vector.extract_strided_slice %40 {offsets = [0, 256], sizes = [16, 1024], strides = [1, 1]} : vector<16x1280xbf16> to vector<16x1024xbf16>
      %50 = tpu.concatenate %13, %14, %15, %16, %17, %18, %19, %20, %21, %27, %28, %29, %30, %31, %32, %33 in 0 : vector<16x1024xbf16>, vector<16x1024xbf16>, vector<16x1024xbf16>, vector<16x1024xbf16>, vector<16x1024xbf16>, vector<16x1024xbf16>, vector<16x1024xbf16>, vector<16x1024xbf16>, vector<16x1024xbf16>, vector<16x1024xbf16>, vector<16x1024xbf16>, vector<16x1024xbf16>, vector<16x1024xbf16>, vector<16x1024xbf16>, vector<16x1024xbf16>, vector<16x1024xbf16> -> vector<256x1024xbf16>
      %51 = tpu.concatenate %34, %35, %41, %42, %43, %44, %45, %46, %47, %48, %49 in 0 : vector<16x1024xbf16>, vector<16x1024xbf16>, vector<16x1024xbf16>, vector<16x1024xbf16>, vector<16x1024xbf16>, vector<16x1024xbf16>, vector<16x1024xbf16>, vector<16x1024xbf16>, vector<16x1024xbf16>, vector<16x1024xbf16>, vector<16x1024xbf16> -> vector<176x1024xbf16>
      %52 = tpu.concatenate %50, %51 in 0 : vector<256x1024xbf16>, vector<176x1024xbf16> -> vector<432x1024xbf16>
      %c0_12 = arith.constant 0 : index
      %c0_13 = arith.constant 0 : index
      %53 = vector.load %arg5[%c0_12, %c0_13] : memref<16x432xbf16, #tpu.memory_space<vmem>>, vector<16x432xbf16>
      %cst = arith.constant dense<0.000000e+00> : vector<16x1024xf32>
      %54 = tpu.matmul %53, %52, %cst {dimension_numbers = #tpu.dot_dimension_numbers<[1], [0], [0], [1], [0, 0, 1, 1], [], []>} : vector<16x432xbf16>, vector<432x1024xbf16>, vector<16x1024xf32> -> vector<16x1024xf32>
      %c0_14 = arith.constant 0 : index
      %c0_15 = arith.constant 0 : index
      %55 = vector.load %arg6[%c0_14, %c0_15] : memref<16x1xf32, #tpu.memory_space<vmem>>, vector<16x1xf32>
      %56 = vector.broadcast %55 : vector<16x1xf32> to vector<16x1024xf32>
      %57 = arith.addf %54, %56 : vector<16x1024xf32>
      %c0_16 = arith.constant 0 : index
      %c0_17 = arith.constant 0 : index
      %58 = vector.load %arg8[%c0_16, %c0_17] : memref<16x16xbf16, #tpu.memory_space<vmem>>, vector<16x16xbf16>
      %c0_18 = arith.constant 0 : index
      %c0_19 = arith.constant 0 : index
      %c0_20 = arith.constant 0 : index
      %c129 = arith.constant 129 : index
      %59 = vector.load %arg7[%c0_18, %c0_19, %c0_20, %c129] : memref<1x1x16x1282xbf16, #tpu.memory_space<vmem>>, vector<1x1x16x1024xbf16>
      %60 = vector.shape_cast %59 : vector<1x1x16x1024xbf16> to vector<16x1024xbf16>
      %cst_21 = arith.constant dense<0.000000e+00> : vector<16x1024xf32>
      %61 = tpu.matmul %58, %60, %cst_21 {dimension_numbers = #tpu.dot_dimension_numbers<[1], [0], [0], [1], [0, 0, 1, 1], [], []>} : vector<16x16xbf16>, vector<16x1024xbf16>, vector<16x1024xf32> -> vector<16x1024xf32>
      %62 = arith.addf %57, %61 : vector<16x1024xf32>
      %c0_22 = arith.constant 0 : index
      %c0_23 = arith.constant 0 : index
      %63 = vector.load %arg9[%c0_22, %c0_23] : memref<16x1xf32, #tpu.memory_space<vmem>>, vector<16x1xf32>
      %64 = vector.broadcast %63 : vector<16x1xf32> to vector<16x1024xf32>
      %65 = arith.addf %62, %64 : vector<16x1024xf32>
      %cst_24 = arith.constant 0.000000e+00 : f32
      %66 = vector.broadcast %cst_24 : f32 to vector<16x1024xf32>
      %67 = arith.maximumf %65, %66 : vector<16x1024xf32>
      %68 = tpu.iota {dimensions = array<i32: 1>} : vector<1x1024xi32>
      %c128_i32 = arith.constant 128 : i32
      %c0_i32_25 = arith.constant 0 : i32
      %69 = arith.cmpi eq, %c128_i32, %c0_i32_25 : i32
      %c1_i32_26 = arith.constant 1 : i32
      %70 = arith.select %69, %c1_i32_26, %c128_i32 : i32
      %71 = vector.broadcast %70 : i32 to vector<1x1024xi32>
      %72 = arith.remsi %68, %71 : vector<1x1024xi32>
      %c0_i32_27 = arith.constant 0 : i32
      %73 = vector.broadcast %c0_i32_27 : i32 to vector<1x1024xi32>
      %74 = arith.cmpi ne, %72, %73 : vector<1x1024xi32>
      %c0_i32_28 = arith.constant 0 : i32
      %75 = vector.broadcast %c0_i32_28 : i32 to vector<1x1024xi32>
      %76 = arith.cmpi slt, %72, %75 : vector<1x1024xi32>
      %c0_i32_29 = arith.constant 0 : i32
      %77 = arith.cmpi slt, %70, %c0_i32_29 : i32
      %78 = vector.broadcast %77 : i1 to vector<1x1024xi1>
      %79 = vector.broadcast %78 : vector<1x1024xi1> to vector<1x1024xi1>
      %80 = arith.xori %76, %79 : vector<1x1024xi1>
      %81 = arith.andi %80, %74 : vector<1x1024xi1>
      %82 = vector.broadcast %70 : i32 to vector<1x1024xi32>
      %83 = arith.addi %72, %82 : vector<1x1024xi32>
      %84 = arith.select %81, %83, %72 : vector<1x1024xi1>, vector<1x1024xi32>
      %c8_i32 = arith.constant 8 : i32
      %85 = vector.broadcast %c8_i32 : i32 to vector<1x1024xi32>
      %86 = arith.cmpi slt, %84, %85 : vector<1x1024xi32>
      %cst_30 = arith.constant 0.000000e+00 : f32
      %87 = vector.shape_cast %86 : vector<1x1024xi1> to vector<1x1024xi1>
      %88 = vector.broadcast %87 : vector<1x1024xi1> to vector<16x1024xi1>
      %89 = vector.broadcast %cst_30 : f32 to vector<16x1024xf32>
      %90 = arith.select %88, %67, %89 : vector<16x1024xi1>, vector<16x1024xf32>
      %cst_31 = arith.constant 0.000000e+00 : bf16
      %91 = vector.broadcast %cst_31 : bf16 to vector<16x1282xbf16>
      %c0_32 = arith.constant 0 : index
      %c0_33 = arith.constant 0 : index
      %c0_34 = arith.constant 0 : index
      %c0_35 = arith.constant 0 : index
      %92 = vector.load %arg10[%c0_32, %c0_33, %c0_34, %c0_35] : memref<1x1x16x1282xbf16, #tpu.memory_space<vmem>>, vector<1x1x16x1282xbf16>
      %93 = vector.shape_cast %92 : vector<1x1x16x1282xbf16> to vector<16x1282xbf16>
      %94 = vector.shape_cast %91 : vector<16x1282xbf16> to vector<1x1x16x1282xbf16>
      tpu.vector_store %arg10[%c0_32, %c0_33, %c0_34, %c0_35], %94 {strides = array<i32>} : memref<1x1x16x1282xbf16, #tpu.memory_space<vmem>>, vector<1x1x16x1282xbf16>,
      %95 = arith.truncf %90 : vector<16x1024xf32> to vector<16x1024xbf16>
      %c0_36 = arith.constant 0 : index
      %c0_37 = arith.constant 0 : index
      %c0_38 = arith.constant 0 : index
      %c129_39 = arith.constant 129 : index
      %96 = vector.load %arg10[%c0_36, %c0_37, %c0_38, %c129_39] : memref<1x1x16x1282xbf16, #tpu.memory_space<vmem>>, vector<1x1x16x1024xbf16>
      %97 = vector.shape_cast %96 : vector<1x1x16x1024xbf16> to vector<16x1024xbf16>
      %98 = vector.shape_cast %95 : vector<16x1024xbf16> to vector<1x1x16x1024xbf16>
      tpu.vector_store %arg10[%c0_36, %c0_37, %c0_38, %c129_39], %98 {strides = array<i32>} : memref<1x1x16x1282xbf16, #tpu.memory_space<vmem>>, vector<1x1x16x1024xbf16>,
    } else {
    }
    return
  }
  func.func @transform_0(%arg0: i32, %arg1: i32) -> (i32, i32, i32, i32) {
    %c-1_i32 = arith.constant -1 : i32
    %0 = arith.addi %arg1, %c-1_i32 : i32
    %c9_i32 = arith.constant 9 : i32
    %1 = arith.minsi %0, %c9_i32 : i32
    %c0_i32 = arith.constant 0 : i32
    %2 = arith.maxsi %1, %c0_i32 : i32
    %c0_i32_0 = arith.constant 0 : i32
    %c0_i32_1 = arith.constant 0 : i32
    %c0_i32_2 = arith.constant 0 : i32
    return %arg0, %2, %c0_i32_0, %c0_i32_1 : i32, i32, i32, i32
  }
  func.func @transform_1(%arg0: i32, %arg1: i32) -> (i32, i32, i32, i32) {
    %c0_i32 = arith.constant 0 : i32
    %0 = arith.addi %arg1, %c0_i32 : i32
    %c9_i32 = arith.constant 9 : i32
    %1 = arith.minsi %0, %c9_i32 : i32
    %c0_i32_0 = arith.constant 0 : i32
    %2 = arith.maxsi %1, %c0_i32_0 : i32
    %c0_i32_1 = arith.constant 0 : i32
    %c0_i32_2 = arith.constant 0 : i32
    %c0_i32_3 = arith.constant 0 : i32
    return %arg0, %2, %c0_i32_1, %c0_i32_2 : i32, i32, i32, i32
  }
  func.func @transform_2(%arg0: i32, %arg1: i32) -> (i32, i32, i32, i32) {
    %c1_i32 = arith.constant 1 : i32
    %0 = arith.addi %arg1, %c1_i32 : i32
    %c9_i32 = arith.constant 9 : i32
    %1 = arith.minsi %0, %c9_i32 : i32
    %c0_i32 = arith.constant 0 : i32
    %2 = arith.maxsi %1, %c0_i32 : i32
    %c0_i32_0 = arith.constant 0 : i32
    %c0_i32_1 = arith.constant 0 : i32
    %c0_i32_2 = arith.constant 0 : i32
    return %arg0, %2, %c0_i32_0, %c0_i32_1 : i32, i32, i32, i32
  }
  func.func @transform_3(%arg0: i32, %arg1: i32) -> (i32, i32) {
    %c0_i32 = arith.constant 0 : i32
    %c0_i32_0 = arith.constant 0 : i32
    %c0_i32_1 = arith.constant 0 : i32
    return %c0_i32, %c0_i32_0 : i32, i32
  }
  func.func @transform_4(%arg0: i32, %arg1: i32) -> (i32, i32) {
    %c0_i32 = arith.constant 0 : i32
    %c0_i32_0 = arith.constant 0 : i32
    %c0_i32_1 = arith.constant 0 : i32
    return %c0_i32, %c0_i32_0 : i32, i32
  }
  func.func @transform_5(%arg0: i32, %arg1: i32) -> (i32, i32, i32, i32) {
    %c0_i32 = arith.constant 0 : i32
    %c0_i32_0 = arith.constant 0 : i32
    %c0_i32_1 = arith.constant 0 : i32
    return %arg0, %arg1, %c0_i32, %c0_i32_0 : i32, i32, i32, i32
  }
  func.func @transform_6(%arg0: i32, %arg1: i32) -> (i32, i32) {
    %c0_i32 = arith.constant 0 : i32
    %c0_i32_0 = arith.constant 0 : i32
    %c0_i32_1 = arith.constant 0 : i32
    return %c0_i32, %c0_i32_0 : i32, i32
  }
  func.func @transform_7(%arg0: i32, %arg1: i32) -> (i32, i32) {
    %c0_i32 = arith.constant 0 : i32
    %c0_i32_0 = arith.constant 0 : i32
    %c0_i32_1 = arith.constant 0 : i32
    return %c0_i32, %c0_i32_0 : i32, i32
  }
  func.func @transform_8(%arg0: i32, %arg1: i32) -> (i32, i32, i32, i32) {
    %c0_i32 = arith.constant 0 : i32
    %c0_i32_0 = arith.constant 0 : i32
    %c0_i32_1 = arith.constant 0 : i32
    return %arg0, %arg1, %c0_i32, %c0_i32_0 : i32, i32, i32, i32
  }
}

module attributes {stable_mosaic.version = 11 : i64} {
  func.func @_conv3x3_bn_kernel(%arg0: i32, %arg1: i32, %arg2: memref<1x1x16x1282xbf16, #tpu.memory_space<vmem>>, %arg3: memref<1x1x16x1282xbf16, #tpu.memory_space<vmem>>, %arg4: memref<1x1x16x1282xbf16, #tpu.memory_space<vmem>>, %arg5: memref<16x432xbf16, #tpu.memory_space<vmem>>, %arg6: memref<16x1xf32, #tpu.memory_space<vmem>>, %arg7: memref<1x1x16x1282xbf16, #tpu.memory_space<vmem>>, %arg8: memref<1x1x16x1282xbf16, #tpu.memory_space<vmem>>) attributes {dimension_semantics = [#tpu.dimension_semantics<parallel>, #tpu.dimension_semantics<parallel>], iteration_bounds = array<i64: 2, 10>, scalar_prefetch = 0 : i64, scratch_operands = 0 : i64, tpu.core_type = #tpu.core_type<tc>, window_params = [{transform_indices = @transform_0, window_bounds = array<i64: 1, 1, 16, 1282>}, {transform_indices = @transform_1, window_bounds = array<i64: 1, 1, 16, 1282>}, {transform_indices = @transform_2, window_bounds = array<i64: 1, 1, 16, 1282>}, {pipeline_mode = #tpu.pipeline_mode<synchronous>, transform_indices = @transform_3, window_bounds = array<i64: 16, 432>}, {pipeline_mode = #tpu.pipeline_mode<synchronous>, transform_indices = @transform_4, window_bounds = array<i64: 16, 1>}, {transform_indices = @transform_5, window_bounds = array<i64: 1, 1, 16, 1282>}, {transform_indices = @transform_6, window_bounds = array<i64: 1, 1, 16, 1282>}]} {
    %c1_i32 = arith.constant 1 : i32
    %0 = arith.cmpi sge, %arg1, %c1_i32 : i32
    %c9_i32 = arith.constant 9 : i32
    %1 = arith.cmpi slt, %arg1, %c9_i32 : i32
    %2 = arith.andi %0, %1 : i1
    %true = arith.constant true
    %3 = arith.xori %2, %true : i1
    %4 = arith.extui %3 : i1 to i32
    %c0_i32 = arith.constant 0 : i32
    %5 = arith.cmpi ne, %4, %c0_i32 : i32
    scf.if %5 {
      %cst = arith.constant 0.000000e+00 : bf16
      %8 = vector.broadcast %cst : bf16 to vector<16x1282xbf16>
      %c0 = arith.constant 0 : index
      %c0_1 = arith.constant 0 : index
      %c0_2 = arith.constant 0 : index
      %c0_3 = arith.constant 0 : index
      %9 = vector.load %arg8[%c0, %c0_1, %c0_2, %c0_3] : memref<1x1x16x1282xbf16, #tpu.memory_space<vmem>>, vector<1x1x16x1282xbf16>
      %10 = vector.shape_cast %9 : vector<1x1x16x1282xbf16> to vector<16x1282xbf16>
      %11 = vector.shape_cast %8 : vector<16x1282xbf16> to vector<1x1x16x1282xbf16>
      tpu.vector_store %arg8[%c0, %c0_1, %c0_2, %c0_3], %11 {strides = array<i32>} : memref<1x1x16x1282xbf16, #tpu.memory_space<vmem>>, vector<1x1x16x1282xbf16>,
    } else {
    }
    %6 = arith.extui %2 : i1 to i32
    %c0_i32_0 = arith.constant 0 : i32
    %7 = arith.cmpi ne, %6, %c0_i32_0 : i32
    scf.if %7 {
      %c0 = arith.constant 0 : index
      %c0_1 = arith.constant 0 : index
      %c0_2 = arith.constant 0 : index
      %c0_3 = arith.constant 0 : index
      %8 = vector.load %arg2[%c0, %c0_1, %c0_2, %c0_3] : memref<1x1x16x1282xbf16, #tpu.memory_space<vmem>>, vector<1x1x16x1282xbf16>
      %9 = vector.shape_cast %8 : vector<1x1x16x1282xbf16> to vector<16x1282xbf16>
      %10 = vector.extract_strided_slice %9 {offsets = [0, 0], sizes = [16, 1280], strides = [1, 1]} : vector<16x1282xbf16> to vector<16x1280xbf16>
      %11 = vector.extract_strided_slice %9 {offsets = [0, 1], sizes = [16, 1280], strides = [1, 1]} : vector<16x1282xbf16> to vector<16x1280xbf16>
      %12 = vector.extract_strided_slice %9 {offsets = [0, 2], sizes = [16, 1280], strides = [1, 1]} : vector<16x1282xbf16> to vector<16x1280xbf16>
      %13 = vector.extract_strided_slice %10 {offsets = [0, 0], sizes = [16, 1024], strides = [1, 1]} : vector<16x1280xbf16> to vector<16x1024xbf16>
      %14 = vector.extract_strided_slice %11 {offsets = [0, 0], sizes = [16, 1024], strides = [1, 1]} : vector<16x1280xbf16> to vector<16x1024xbf16>
      %15 = vector.extract_strided_slice %12 {offsets = [0, 0], sizes = [16, 1024], strides = [1, 1]} : vector<16x1280xbf16> to vector<16x1024xbf16>
      %16 = vector.extract_strided_slice %10 {offsets = [0, 128], sizes = [16, 1024], strides = [1, 1]} : vector<16x1280xbf16> to vector<16x1024xbf16>
      %17 = vector.extract_strided_slice %11 {offsets = [0, 128], sizes = [16, 1024], strides = [1, 1]} : vector<16x1280xbf16> to vector<16x1024xbf16>
      %18 = vector.extract_strided_slice %12 {offsets = [0, 128], sizes = [16, 1024], strides = [1, 1]} : vector<16x1280xbf16> to vector<16x1024xbf16>
      %19 = vector.extract_strided_slice %10 {offsets = [0, 256], sizes = [16, 1024], strides = [1, 1]} : vector<16x1280xbf16> to vector<16x1024xbf16>
      %20 = vector.extract_strided_slice %11 {offsets = [0, 256], sizes = [16, 1024], strides = [1, 1]} : vector<16x1280xbf16> to vector<16x1024xbf16>
      %21 = vector.extract_strided_slice %12 {offsets = [0, 256], sizes = [16, 1024], strides = [1, 1]} : vector<16x1280xbf16> to vector<16x1024xbf16>
      %c0_4 = arith.constant 0 : index
      %c0_5 = arith.constant 0 : index
      %c0_6 = arith.constant 0 : index
      %c0_7 = arith.constant 0 : index
      %22 = vector.load %arg3[%c0_4, %c0_5, %c0_6, %c0_7] : memref<1x1x16x1282xbf16, #tpu.memory_space<vmem>>, vector<1x1x16x1282xbf16>
      %23 = vector.shape_cast %22 : vector<1x1x16x1282xbf16> to vector<16x1282xbf16>
      %24 = vector.extract_strided_slice %23 {offsets = [0, 0], sizes = [16, 1280], strides = [1, 1]} : vector<16x1282xbf16> to vector<16x1280xbf16>
      %25 = vector.extract_strided_slice %23 {offsets = [0, 1], sizes = [16, 1280], strides = [1, 1]} : vector<16x1282xbf16> to vector<16x1280xbf16>
      %26 = vector.extract_strided_slice %23 {offsets = [0, 2], sizes = [16, 1280], strides = [1, 1]} : vector<16x1282xbf16> to vector<16x1280xbf16>
      %27 = vector.extract_strided_slice %24 {offsets = [0, 0], sizes = [16, 1024], strides = [1, 1]} : vector<16x1280xbf16> to vector<16x1024xbf16>
      %28 = vector.extract_strided_slice %25 {offsets = [0, 0], sizes = [16, 1024], strides = [1, 1]} : vector<16x1280xbf16> to vector<16x1024xbf16>
      %29 = vector.extract_strided_slice %26 {offsets = [0, 0], sizes = [16, 1024], strides = [1, 1]} : vector<16x1280xbf16> to vector<16x1024xbf16>
      %30 = vector.extract_strided_slice %24 {offsets = [0, 128], sizes = [16, 1024], strides = [1, 1]} : vector<16x1280xbf16> to vector<16x1024xbf16>
      %31 = vector.extract_strided_slice %25 {offsets = [0, 128], sizes = [16, 1024], strides = [1, 1]} : vector<16x1280xbf16> to vector<16x1024xbf16>
      %32 = vector.extract_strided_slice %26 {offsets = [0, 128], sizes = [16, 1024], strides = [1, 1]} : vector<16x1280xbf16> to vector<16x1024xbf16>
      %33 = vector.extract_strided_slice %24 {offsets = [0, 256], sizes = [16, 1024], strides = [1, 1]} : vector<16x1280xbf16> to vector<16x1024xbf16>
      %34 = vector.extract_strided_slice %25 {offsets = [0, 256], sizes = [16, 1024], strides = [1, 1]} : vector<16x1280xbf16> to vector<16x1024xbf16>
      %35 = vector.extract_strided_slice %26 {offsets = [0, 256], sizes = [16, 1024], strides = [1, 1]} : vector<16x1280xbf16> to vector<16x1024xbf16>
      %c0_8 = arith.constant 0 : index
      %c0_9 = arith.constant 0 : index
      %c0_10 = arith.constant 0 : index
      %c0_11 = arith.constant 0 : index
      %36 = vector.load %arg4[%c0_8, %c0_9, %c0_10, %c0_11] : memref<1x1x16x1282xbf16, #tpu.memory_space<vmem>>, vector<1x1x16x1282xbf16>
      %37 = vector.shape_cast %36 : vector<1x1x16x1282xbf16> to vector<16x1282xbf16>
      %38 = vector.extract_strided_slice %37 {offsets = [0, 0], sizes = [16, 1280], strides = [1, 1]} : vector<16x1282xbf16> to vector<16x1280xbf16>
      %39 = vector.extract_strided_slice %37 {offsets = [0, 1], sizes = [16, 1280], strides = [1, 1]} : vector<16x1282xbf16> to vector<16x1280xbf16>
      %40 = vector.extract_strided_slice %37 {offsets = [0, 2], sizes = [16, 1280], strides = [1, 1]} : vector<16x1282xbf16> to vector<16x1280xbf16>
      %41 = vector.extract_strided_slice %38 {offsets = [0, 0], sizes = [16, 1024], strides = [1, 1]} : vector<16x1280xbf16> to vector<16x1024xbf16>
      %42 = vector.extract_strided_slice %39 {offsets = [0, 0], sizes = [16, 1024], strides = [1, 1]} : vector<16x1280xbf16> to vector<16x1024xbf16>
      %43 = vector.extract_strided_slice %40 {offsets = [0, 0], sizes = [16, 1024], strides = [1, 1]} : vector<16x1280xbf16> to vector<16x1024xbf16>
      %44 = vector.extract_strided_slice %38 {offsets = [0, 128], sizes = [16, 1024], strides = [1, 1]} : vector<16x1280xbf16> to vector<16x1024xbf16>
      %45 = vector.extract_strided_slice %39 {offsets = [0, 128], sizes = [16, 1024], strides = [1, 1]} : vector<16x1280xbf16> to vector<16x1024xbf16>
      %46 = vector.extract_strided_slice %40 {offsets = [0, 128], sizes = [16, 1024], strides = [1, 1]} : vector<16x1280xbf16> to vector<16x1024xbf16>
      %47 = vector.extract_strided_slice %38 {offsets = [0, 256], sizes = [16, 1024], strides = [1, 1]} : vector<16x1280xbf16> to vector<16x1024xbf16>
      %48 = vector.extract_strided_slice %39 {offsets = [0, 256], sizes = [16, 1024], strides = [1, 1]} : vector<16x1280xbf16> to vector<16x1024xbf16>
      %49 = vector.extract_strided_slice %40 {offsets = [0, 256], sizes = [16, 1024], strides = [1, 1]} : vector<16x1280xbf16> to vector<16x1024xbf16>
      %50 = tpu.concatenate %13, %14, %15, %16, %17, %18, %19, %20, %21, %27, %28, %29, %30, %31, %32, %33 in 0 : vector<16x1024xbf16>, vector<16x1024xbf16>, vector<16x1024xbf16>, vector<16x1024xbf16>, vector<16x1024xbf16>, vector<16x1024xbf16>, vector<16x1024xbf16>, vector<16x1024xbf16>, vector<16x1024xbf16>, vector<16x1024xbf16>, vector<16x1024xbf16>, vector<16x1024xbf16>, vector<16x1024xbf16>, vector<16x1024xbf16>, vector<16x1024xbf16>, vector<16x1024xbf16> -> vector<256x1024xbf16>
      %51 = tpu.concatenate %34, %35, %41, %42, %43, %44, %45, %46, %47, %48, %49 in 0 : vector<16x1024xbf16>, vector<16x1024xbf16>, vector<16x1024xbf16>, vector<16x1024xbf16>, vector<16x1024xbf16>, vector<16x1024xbf16>, vector<16x1024xbf16>, vector<16x1024xbf16>, vector<16x1024xbf16>, vector<16x1024xbf16>, vector<16x1024xbf16> -> vector<176x1024xbf16>
      %52 = tpu.concatenate %50, %51 in 0 : vector<256x1024xbf16>, vector<176x1024xbf16> -> vector<432x1024xbf16>
      %c0_12 = arith.constant 0 : index
      %c0_13 = arith.constant 0 : index
      %53 = vector.load %arg5[%c0_12, %c0_13] : memref<16x432xbf16, #tpu.memory_space<vmem>>, vector<16x432xbf16>
      %cst = arith.constant dense<0.000000e+00> : vector<16x1024xf32>
      %54 = tpu.matmul %53, %52, %cst {dimension_numbers = #tpu.dot_dimension_numbers<[1], [0], [0], [1], [0, 0, 1, 1], [], []>} : vector<16x432xbf16>, vector<432x1024xbf16>, vector<16x1024xf32> -> vector<16x1024xf32>
      %c0_14 = arith.constant 0 : index
      %c0_15 = arith.constant 0 : index
      %55 = vector.load %arg6[%c0_14, %c0_15] : memref<16x1xf32, #tpu.memory_space<vmem>>, vector<16x1xf32>
      %56 = vector.broadcast %55 : vector<16x1xf32> to vector<16x1024xf32>
      %57 = arith.addf %54, %56 : vector<16x1024xf32>
      %c0_16 = arith.constant 0 : index
      %c0_17 = arith.constant 0 : index
      %c0_18 = arith.constant 0 : index
      %c129 = arith.constant 129 : index
      %58 = vector.load %arg7[%c0_16, %c0_17, %c0_18, %c129] : memref<1x1x16x1282xbf16, #tpu.memory_space<vmem>>, vector<1x1x16x1024xbf16>
      %59 = vector.shape_cast %58 : vector<1x1x16x1024xbf16> to vector<16x1024xbf16>
      %60 = arith.extf %59 : vector<16x1024xbf16> to vector<16x1024xf32>
      %61 = arith.addf %57, %60 : vector<16x1024xf32>
      %cst_19 = arith.constant 0.000000e+00 : f32
      %62 = vector.broadcast %cst_19 : f32 to vector<16x1024xf32>
      %63 = arith.maximumf %61, %62 : vector<16x1024xf32>
      %64 = tpu.iota {dimensions = array<i32: 1>} : vector<1x1024xi32>
      %c128_i32 = arith.constant 128 : i32
      %c0_i32_20 = arith.constant 0 : i32
      %65 = arith.cmpi eq, %c128_i32, %c0_i32_20 : i32
      %c1_i32_21 = arith.constant 1 : i32
      %66 = arith.select %65, %c1_i32_21, %c128_i32 : i32
      %67 = vector.broadcast %66 : i32 to vector<1x1024xi32>
      %68 = arith.remsi %64, %67 : vector<1x1024xi32>
      %c0_i32_22 = arith.constant 0 : i32
      %69 = vector.broadcast %c0_i32_22 : i32 to vector<1x1024xi32>
      %70 = arith.cmpi ne, %68, %69 : vector<1x1024xi32>
      %c0_i32_23 = arith.constant 0 : i32
      %71 = vector.broadcast %c0_i32_23 : i32 to vector<1x1024xi32>
      %72 = arith.cmpi slt, %68, %71 : vector<1x1024xi32>
      %c0_i32_24 = arith.constant 0 : i32
      %73 = arith.cmpi slt, %66, %c0_i32_24 : i32
      %74 = vector.broadcast %73 : i1 to vector<1x1024xi1>
      %75 = vector.broadcast %74 : vector<1x1024xi1> to vector<1x1024xi1>
      %76 = arith.xori %72, %75 : vector<1x1024xi1>
      %77 = arith.andi %76, %70 : vector<1x1024xi1>
      %78 = vector.broadcast %66 : i32 to vector<1x1024xi32>
      %79 = arith.addi %68, %78 : vector<1x1024xi32>
      %80 = arith.select %77, %79, %68 : vector<1x1024xi1>, vector<1x1024xi32>
      %c8_i32 = arith.constant 8 : i32
      %81 = vector.broadcast %c8_i32 : i32 to vector<1x1024xi32>
      %82 = arith.cmpi slt, %80, %81 : vector<1x1024xi32>
      %cst_25 = arith.constant 0.000000e+00 : f32
      %83 = vector.shape_cast %82 : vector<1x1024xi1> to vector<1x1024xi1>
      %84 = vector.broadcast %83 : vector<1x1024xi1> to vector<16x1024xi1>
      %85 = vector.broadcast %cst_25 : f32 to vector<16x1024xf32>
      %86 = arith.select %84, %63, %85 : vector<16x1024xi1>, vector<16x1024xf32>
      %cst_26 = arith.constant 0.000000e+00 : bf16
      %87 = vector.broadcast %cst_26 : bf16 to vector<16x1282xbf16>
      %c0_27 = arith.constant 0 : index
      %c0_28 = arith.constant 0 : index
      %c0_29 = arith.constant 0 : index
      %c0_30 = arith.constant 0 : index
      %88 = vector.load %arg8[%c0_27, %c0_28, %c0_29, %c0_30] : memref<1x1x16x1282xbf16, #tpu.memory_space<vmem>>, vector<1x1x16x1282xbf16>
      %89 = vector.shape_cast %88 : vector<1x1x16x1282xbf16> to vector<16x1282xbf16>
      %90 = vector.shape_cast %87 : vector<16x1282xbf16> to vector<1x1x16x1282xbf16>
      tpu.vector_store %arg8[%c0_27, %c0_28, %c0_29, %c0_30], %90 {strides = array<i32>} : memref<1x1x16x1282xbf16, #tpu.memory_space<vmem>>, vector<1x1x16x1282xbf16>,
      %91 = arith.truncf %86 : vector<16x1024xf32> to vector<16x1024xbf16>
      %c0_31 = arith.constant 0 : index
      %c0_32 = arith.constant 0 : index
      %c0_33 = arith.constant 0 : index
      %c129_34 = arith.constant 129 : index
      %92 = vector.load %arg8[%c0_31, %c0_32, %c0_33, %c129_34] : memref<1x1x16x1282xbf16, #tpu.memory_space<vmem>>, vector<1x1x16x1024xbf16>
      %93 = vector.shape_cast %92 : vector<1x1x16x1024xbf16> to vector<16x1024xbf16>
      %94 = vector.shape_cast %91 : vector<16x1024xbf16> to vector<1x1x16x1024xbf16>
      tpu.vector_store %arg8[%c0_31, %c0_32, %c0_33, %c129_34], %94 {strides = array<i32>} : memref<1x1x16x1282xbf16, #tpu.memory_space<vmem>>, vector<1x1x16x1024xbf16>,
    } else {
    }
    return
  }
  func.func @transform_0(%arg0: i32, %arg1: i32) -> (i32, i32, i32, i32) {
    %c-1_i32 = arith.constant -1 : i32
    %0 = arith.addi %arg1, %c-1_i32 : i32
    %c9_i32 = arith.constant 9 : i32
    %1 = arith.minsi %0, %c9_i32 : i32
    %c0_i32 = arith.constant 0 : i32
    %2 = arith.maxsi %1, %c0_i32 : i32
    %c0_i32_0 = arith.constant 0 : i32
    %c0_i32_1 = arith.constant 0 : i32
    %c0_i32_2 = arith.constant 0 : i32
    return %arg0, %2, %c0_i32_0, %c0_i32_1 : i32, i32, i32, i32
  }
  func.func @transform_1(%arg0: i32, %arg1: i32) -> (i32, i32, i32, i32) {
    %c0_i32 = arith.constant 0 : i32
    %0 = arith.addi %arg1, %c0_i32 : i32
    %c9_i32 = arith.constant 9 : i32
    %1 = arith.minsi %0, %c9_i32 : i32
    %c0_i32_0 = arith.constant 0 : i32
    %2 = arith.maxsi %1, %c0_i32_0 : i32
    %c0_i32_1 = arith.constant 0 : i32
    %c0_i32_2 = arith.constant 0 : i32
    %c0_i32_3 = arith.constant 0 : i32
    return %arg0, %2, %c0_i32_1, %c0_i32_2 : i32, i32, i32, i32
  }
  func.func @transform_2(%arg0: i32, %arg1: i32) -> (i32, i32, i32, i32) {
    %c1_i32 = arith.constant 1 : i32
    %0 = arith.addi %arg1, %c1_i32 : i32
    %c9_i32 = arith.constant 9 : i32
    %1 = arith.minsi %0, %c9_i32 : i32
    %c0_i32 = arith.constant 0 : i32
    %2 = arith.maxsi %1, %c0_i32 : i32
    %c0_i32_0 = arith.constant 0 : i32
    %c0_i32_1 = arith.constant 0 : i32
    %c0_i32_2 = arith.constant 0 : i32
    return %arg0, %2, %c0_i32_0, %c0_i32_1 : i32, i32, i32, i32
  }
  func.func @transform_3(%arg0: i32, %arg1: i32) -> (i32, i32) {
    %c0_i32 = arith.constant 0 : i32
    %c0_i32_0 = arith.constant 0 : i32
    %c0_i32_1 = arith.constant 0 : i32
    return %c0_i32, %c0_i32_0 : i32, i32
  }
  func.func @transform_4(%arg0: i32, %arg1: i32) -> (i32, i32) {
    %c0_i32 = arith.constant 0 : i32
    %c0_i32_0 = arith.constant 0 : i32
    %c0_i32_1 = arith.constant 0 : i32
    return %c0_i32, %c0_i32_0 : i32, i32
  }
  func.func @transform_5(%arg0: i32, %arg1: i32) -> (i32, i32, i32, i32) {
    %c0_i32 = arith.constant 0 : i32
    %c0_i32_0 = arith.constant 0 : i32
    %c0_i32_1 = arith.constant 0 : i32
    return %arg0, %arg1, %c0_i32, %c0_i32_0 : i32, i32, i32, i32
  }
  func.func @transform_6(%arg0: i32, %arg1: i32) -> (i32, i32, i32, i32) {
    %c0_i32 = arith.constant 0 : i32
    %c0_i32_0 = arith.constant 0 : i32
    %c0_i32_1 = arith.constant 0 : i32
    return %arg0, %arg1, %c0_i32, %c0_i32_0 : i32, i32, i32, i32
  }
}

</mosaic_0001>

<bundles_post_ra>
// kernel: tile.14
= control target key start
LH: loop header
LB: loop body
LE: loop exit
PB: predicated region body
PF: predicated region fallthrough
CT: control target
= control target key end

     0   :  { %2 = vsyncpa [#allocation1], 0  ;;  %s44_s6 = smov [#allocation0]   ;;  %s70_s0 = inlined_call_operand.hbm [shape: f32[8], index: 0, kind: input, shape index: {}]   ;;  %s71_s1 = inlined_call_operand.vmem [shape: f32[8,8], index: 1, kind: output, shape index: {}]  }
   0x1   :  { %s9_s7 = sshll.u32 %s44_s6, 4  ;;  %s20_s10 = scalar_lea.hbm %s70_s0, 16  ;;  %s10_s7 = int_to_ptr.vmem [resolvable:$true] %s9_s7 }
   0x2   :  { %p21_p0 = scmp.ne.s32.totalorder %s70_s0, %s20_s10  ;;  %p24_p1 = scmp.lt.u32.totalorder %s20_s10, %s70_s0 }
   0x4   :  { %p26_p2 = pnand %p24_p1, %p21_p0 }
   0x6   :  { %29 = shalt.err (!%p26_p2)
}
   0x7   :  { %s30_s15 = scalar_lea.vmem %s10_s7, 16  ;;  %s34_s16 = scalar_lea.vmem %s10_s7, 32 }
   0x8   :  { %p31_p3 = scmp.ne.s32.totalorder %s10_s7, %s30_s15  ;;  %p35_p4 = scmp.lt.s32.totalorder %s10_s7, %s10_s7 }
   0x9   :  { %p36_p5 = scmp.lt.s32.totalorder %s34_s16, %s30_s15 }
   0xb   :  { %p37_p6 = por %p36_p5, %p35_p4 }
   0xd   :  { %p38_p7 = pnand %p37_p6, %p31_p3 }
   0xf   :  { %41 = shalt.err (!%p38_p7)
}
  0x10   :  { %12 = dma.hbm_to_vmem [thread:$0]  %s70_s0, 16, %s10_s7, [#allocation1]  }
  0x11   :  { %42 = dma.done.wait [#allocation1], 16  }
  0x12   :  { %43 = vsyncadd [#allocation1], 4294967280  ;;  %v16_v0 = vld [vmem:[#allocation0] ss:$0 sm:$0xff] }
  0x13   :  { %17 = vst [vmem:[%s71_s1] sm:$0xff] %v16_v0 }
  0x14   :  { %18 = vsyncpa [#allocation1], 1 }

// kernel: tile.0
= control target key start
LH: loop header
LB: loop body
LE: loop exit
PB: predicated region body
PF: predicated region fallthrough
CT: control target
= control target key end

     0   :  { %vm4_vm0 = vcmask 7168   ;;  %s154_s0 = inlined_call_operand.vmem [shape: f32[8,8], index: 0, kind: input, shape index: {}]   ;;  %s155_s1 = inlined_call_operand.hbm [shape: f32[64,1], index: 1, kind: output, shape index: {}]  }
   0x1   :  { %v7_v0 = vld [vmem:[%s154_s0] sm:$0xff]  }
   0x2   :  { %2 = vsyncpa [#allocation1], 0  ;;  %s105_s0 = smov 127   ;;  %s106_s8 = smov 125  }
   0x3   :  { %8 = vrot.lane.b32.xlu0 %v7_v0, %s105_s0  ;;  %24 = vrot.lane.b32.xlu1 %v7_v0, %s106_s8  ;;  %5 = vst.msk [vmem:[#allocation0] ss:$8 sm:$0xf] %vm4_vm0, %v7_v0   ;;  %6 = vst.msk [vmem:[#allocation0] ss:$8 sm:$0xf0] %vm4_vm0, %v7_v0  }
   0x4   :  { %s107_s9 = smov 126   ;;  %s108_s10 = smov 124  }
   0x5   :  { %s109_s11 = smov 123   ;;  %s110_s12 = smov 122  }
   0x6   :  { %s111_s13 = smov 121   ;;  %s112_s14 = smov [#allocation0]  }
   0x7   :  { %16 = vrot.lane.b32.xlu0 %v7_v0, %s107_s9  ;;  %32 = vrot.lane.b32.xlu1 %v7_v0, %s108_s10  ;;  %s67_s15 = sshll.u32 %s112_s14, 4  ;;  %s68_s15 = int_to_ptr.vmem [resolvable:$true] %s67_s15 }
   0x8   :  { %s81_s16 = scalar_lea.vmem %s68_s15, 1024  ;;  %p86_p1 = scmp.lt.s32.totalorder %s68_s15, %s68_s15 }
   0x9   :  { %p82_p0 = scmp.ne.s32.totalorder %s68_s15, %s81_s16  ;;  %p87_p2 = scmp.lt.s32.totalorder %s81_s16, %s81_s16 }
   0xb   :  { %40 = vrot.lane.b32.xlu0 %v7_v0, %s109_s11  ;;  %48 = vrot.lane.b32.xlu1 %v7_v0, %s110_s12  ;;  %p88_p3 = por %p87_p2, %p86_p1 }
   0xd   :  { %p89_p4 = pnand %p88_p3, %p82_p0 }
   0xf   :  { %56 = vrot.lane.b32.xlu0 %v7_v0, %s111_s13 }
  0x75   :  { %v9_v1 = vpop.permute.xlu0 %8   ;;  %v25_v2 = vpop.permute.xlu1 %24  }
  0x76   :  { %12 = vst.msk [vmem:[#allocation0 + $0x1] ss:$8 sm:$0xf] %vm4_vm0, %v9_v1   ;;  %14 = vst.msk [vmem:[#allocation0 + $0x1] ss:$8 sm:$0xf0] %vm4_vm0, %v9_v1  }
  0x77   :  { %28 = vst.msk [vmem:[#allocation0 + $0x3] ss:$8 sm:$0xf] %vm4_vm0, %v25_v2   ;;  %30 = vst.msk [vmem:[#allocation0 + $0x3] ss:$8 sm:$0xf0] %vm4_vm0, %v25_v2  }
  0x79   :  { %v17_v3 = vpop.permute.xlu0 %16   ;;  %v33_v4 = vpop.permute.xlu1 %32  }
  0x7a   :  { %20 = vst.msk [vmem:[#allocation0 + $0x2] ss:$8 sm:$0xf] %vm4_vm0, %v17_v3   ;;  %22 = vst.msk [vmem:[#allocation0 + $0x2] ss:$8 sm:$0xf0] %vm4_vm0, %v17_v3  }
  0x7b   :  { %36 = vst.msk [vmem:[#allocation0 + $0x4] ss:$8 sm:$0xf] %vm4_vm0, %v33_v4   ;;  %38 = vst.msk [vmem:[#allocation0 + $0x4] ss:$8 sm:$0xf0] %vm4_vm0, %v33_v4  }
  0x7d   :  { %v41_v5 = vpop.permute.xlu0 %40   ;;  %v49_v6 = vpop.permute.xlu1 %48  }
  0x7e   :  { %44 = vst.msk [vmem:[#allocation0 + $0x5] ss:$8 sm:$0xf] %vm4_vm0, %v41_v5   ;;  %46 = vst.msk [vmem:[#allocation0 + $0x5] ss:$8 sm:$0xf0] %vm4_vm0, %v41_v5  }
  0x7f   :  { %52 = vst.msk [vmem:[#allocation0 + $0x6] ss:$8 sm:$0xf] %vm4_vm0, %v49_v6   ;;  %54 = vst.msk [vmem:[#allocation0 + $0x6] ss:$8 sm:$0xf0] %vm4_vm0, %v49_v6  }
  0x81   :  { %v57_v7 = vpop.permute.xlu0 %56  }
  0x82   :  { %60 = vst.msk [vmem:[#allocation0 + $0x7] ss:$8 sm:$0xf] %vm4_vm0, %v57_v7   ;;  %62 = vst.msk [vmem:[#allocation0 + $0x7] ss:$8 sm:$0xf0] %vm4_vm0, %v57_v7  }
  0x83   :  { %92 = shalt.err (!%p89_p4)
}
  0x84   :  { %s93_s19 = scalar_lea.hbm %s155_s1, 1024 }
  0x85   :  { %p94_p5 = scmp.ne.s32.totalorder %s155_s1, %s93_s19  ;;  %p97_p6 = scmp.lt.u32.totalorder %s93_s19, %s155_s1 }
  0x87   :  { %p99_p7 = pnand %p97_p6, %p94_p5 }
  0x89   :  { %102 = shalt.err (!%p99_p7)
}
  0x8a   :  { %70 = dma.vmem_to_hbm [thread:$0]  %s68_s15, 1024, %s155_s1, [#allocation1]  }
  0x8b   :  { %103 = dma.done.wait [#allocation1], 1024  }
  0x8c   :  { %104 = vsyncadd [#allocation1], 4294966272 }
  0x8d   :  { %72 = vsyncpa [#allocation1], 1 }

// kernel: mul.23
= control target key start
LH: loop header
LB: loop body
LE: loop exit
PB: predicated region body
PF: predicated region fallthrough
CT: control target
= control target key end

     0   :  { %s67_s10 = smov 56   ;;  %s68_s11 = smov 40   ;;  %vm3_vm0 = vcmask 64512   ;;  %vm9_vm1 = vcmask 523712   ;;  %vm15_vm2 = vcmask 458112   ;;  %vm21_vm3 = vcmask 392512   ;;  %s111_s0 = inlined_call_operand.vmem [shape: f32[8,8], index: 0, kind: input, shape index: {}]   ;;  %s112_s1 = inlined_call_operand.vmem [shape: f32[64], index: 1, kind: output, shape index: {}]  }
   0x1   :  { %v53_v0 = vld [vmem:[%s111_s0 + $0x7] sm:$0x1]   ;;  %v55_v1 = vld [vmem:[%s111_s0 + $0x5] sm:$0x1]   ;;  %v54_v2 = vld [vmem:[%s111_s0 + $0x6] sm:$0x1]  }
   0x2   :  { %7 = vrot.lane.b32.xlu0 %v53_v0, %s67_s10  ;;  %19 = vrot.lane.b32.xlu1 %v55_v1, %s68_s11  ;;  %v56_v3 = vld [vmem:[%s111_s0 + $0x4] sm:$0x1]   ;;  %v2_v4 = vld [vmem:[%s111_s0] sm:$0x1]   ;;  %s69_s18 = smov 48   ;;  %s70_s19 = smov 32  }
   0x3   :  { %4 = vst.msk [vmem:[#allocation0] sm:$0x1] %vm3_vm0, %v2_v4   ;;  %v57_v5 = vld [vmem:[%s111_s0 + $0x3] sm:$0x1]   ;;  %v58_v6 = vld [vmem:[%s111_s0 + $0x2] sm:$0x1]  }
   0x4   :  { %s71_s24 = smov 24   ;;  %s72_s25 = smov 16   ;;  %v59_v7 = vld [vmem:[%s111_s0 + $0x1] sm:$0x1]   ;;  %vm27_vm4 = vcmask 326912   ;;  %vm33_vm5 = vcmask 261312  }
   0x5   :  { %s73_s0 = smov 8   ;;  %vm39_vm6 = vcmask 195712   ;;  %vm45_vm7 = vcmask 130112  }
   0x6   :  { %13 = vrot.lane.b32.xlu0 %v54_v2, %s69_s18  ;;  %25 = vrot.lane.b32.xlu1 %v56_v3, %s70_s19 }
   0xa   :  { %31 = vrot.lane.b32.xlu0 %v57_v5, %s71_s24  ;;  %37 = vrot.lane.b32.xlu1 %v58_v6, %s72_s25 }
   0xe   :  { %43 = vrot.lane.b32.xlu0 %v59_v7, %s73_s0 }
  0x74   :  { %v8_v8 = vpop.permute.xlu0 %7   ;;  %v20_v9 = vpop.permute.xlu1 %19  }
  0x75   :  { %10 = vst.msk [vmem:[#allocation0] sm:$0x1] %vm9_vm1, %v8_v8  }
  0x78   :  { %v14_v10 = vpop.permute.xlu0 %13   ;;  %v26_v11 = vpop.permute.xlu1 %25  }
  0x79   :  { %16 = vst.msk [vmem:[#allocation0] sm:$0x1] %vm15_vm2, %v14_v10  }
  0x7a   :  { %22 = vst.msk [vmem:[#allocation0] sm:$0x1] %vm21_vm3, %v20_v9  }
  0x7b   :  { %28 = vst.msk [vmem:[#allocation0] sm:$0x1] %vm27_vm4, %v26_v11  }
  0x7c   :  { %v32_v12 = vpop.permute.xlu0 %31   ;;  %v38_v13 = vpop.permute.xlu1 %37  }
  0x7d   :  { %34 = vst.msk [vmem:[#allocation0] sm:$0x1] %vm33_vm5, %v32_v12  }
  0x7e   :  { %40 = vst.msk [vmem:[#allocation0] sm:$0x1] %vm39_vm6, %v38_v13  }
  0x80   :  { %v44_v14 = vpop.permute.xlu0 %43  }
  0x81   :  { %46 = vst.msk [vmem:[#allocation0] sm:$0x1] %vm45_vm7, %v44_v14  }
  0x88   :  { %v50_v15 = vld [vmem:[#allocation0] sm:$0x1] }
  0x89   :  { %52 = vst [vmem:[%s112_s1] sm:$0x1] %v50_v15 }

// kernel: up_voxel_stage_forward.5
= control target key start
LH: loop header
LB: loop body
LE: loop exit
PB: predicated region body
PF: predicated region fallthrough
CT: control target
= control target key end

     0   :  { %8 = vsyncpa [#allocation3], 0  ;;  %s1187_s0 = inlined_call_operand.hbm [shape: bf16[2,8,64], index: 0, kind: input, shape index: {}]   ;;  %s1188_s1 = inlined_call_operand.hbm [shape: bf16[64,8], index: 1, kind: input, shape index: {}]   ;;  %s1189_s2 = inlined_call_operand.hbm [shape: f32[64,1], index: 2, kind: input, shape index: {}]   ;;  %s1190_s3 = inlined_call_operand.hbm [shape: bf16[2,64,64], index: 3, kind: output, shape index: {}]  }
   0x1   :  { %10 = vsyncpa [#allocation3 + $0x1], 0 }
   0x2   :  { %11 = vsyncpa [#allocation6], 0 }
   0x3   :  { %12 = vsyncpa [#allocation4], 0 }
   0x4   :  { %14 = vsyncpa [#allocation4 + $0x1], 0  ;;  %s922_s12 = smov 0   ;;  %s924_s13 = smov 0  }
   0x5   :  { %s926_s14 = smov 0   ;;  %s928_s15 = smov 0  }
   0x6   :  { %s930_s16 = smov 0   ;;  %s932_s17 = smov 0  }
   0x7 LB: > { %s559_s18 = sadd.s32 4294967295, %s889_s17   ;;  %s560_s19 = sadd.s32 4294967294, %s889_s17   ;;  %s889_s17 = sphi %s932_s17, %s20_s17   ;;  %s885_s16 = sphi %s930_s16, %s1212_s16   ;;  %s881_s15 = sphi %s928_s15, %s1211_s15   ;;  %s877_s14 = sphi %s926_s14, %s1210_s14   ;;  %s873_s13 = sphi %s924_s13, %s1209_s13   ;;  %s869_s12 = sphi %s922_s12, %s1208_s12  }
   0x8   : > { %p54_p0 = scmp.ne.s32.totalorder %s873_s13, %s869_s12  ;;  %p956_p1 = scmp.eq.s32.totalorder %s559_s18, 0 }
   0x9   : > { %p960_p2 = scmp.eq.s32.totalorder %s559_s18, 1  ;;  %p128_p3 = scmp.eq.s32.totalorder %s560_s19, 1 }
   0xa   : > { %s1195_s20 = scalar_select %p956_p1, 1, 0 }
   0xb   : > { %p966_p4 = por %p956_p1, %p54_p0  ;;  %p561_p5 = scmp.ge.s32.totalorder %s889_s17, 1 }
   0xc   : > { %p971_p6 = por %p128_p3, %p54_p0  ;;  %p135_p7 = scmp.lt.s32.totalorder %s889_s17, 3 }
   0xd   : > { %s1197_s22 = scalar_select %p966_p4, 1, 0 }
   0xe   : > { %s1198_s23 = scalar_select %p971_p6, 1, 0 }
   0xf   : > { %p976_p8 = pnand %p561_p5, %p135_p7  ;;  %s891_s25 = smov [#allocation5]  }
  0x10   : > { %s147_s26 = sshll.u32 %s891_s25, 4  ;;  %s892_s28 = smov [#allocation7]   ;;  %s980_s26 = int_to_ptr.vmem [resolvable:$true] %s147_s26 }
  0x11   : > { %p633_p9 = pneg %p976_p8  ;;  %s160_s29 = sshll.u32 %s892_s28, 4  ;;  %s991_s29 = int_to_ptr.vmem [resolvable:$true] %s160_s29 }
  0x12   : > { %s717_s5 = scalar_lea.hbm %s1188_s1, 512 }
  0x13   : > { %p987_p11 = pnand %p633_p9, %p956_p1  ;;  %p718_p12 = scmp.ne.s32.totalorder %s1188_s1, %s717_s5 }
  0x14   : > { %p724_p5 = scmp.lt.u32.totalorder %s717_s5, %s1188_s1 }
  0x15   : > { %p719_p13 = pneg %p987_p11 }
  0x17   : > { %p720_p0 = pnand %p719_p13, %p718_p12 }
  0x19   : > { %p721_p3 = pneg %p720_p0 }
  0x1b   : > { %p726_p7 = pnand %p724_p5, %p721_p3 }
  0x1d   : > { %729 = shalt.err (!%p726_p7)
}
  0x1e   : > { %s730_s10 = scalar_lea.vmem %s980_s26, 512  ;;  %p738_p1 = scmp.lt.s32.totalorder %s980_s26, %s980_s26 }
  0x1f   : > { %p731_p9 = scmp.ne.s32.totalorder %s980_s26, %s730_s10  ;;  %p739_p12 = scmp.lt.s32.totalorder %s730_s10, %s730_s10 }
  0x21   : > { %p733_p10 = pnand %p731_p9, %p719_p13  ;;  %p740_p0 = por %p739_p12, %p738_p1 }
  0x23   : > { %p734_p6 = pneg %p733_p10 }
  0x25   : > { %p741_p4 = pnand %p740_p0, %p734_p6 }
  0x27   : > { %744 = shalt.err (!%p741_p4)
}
  0x28   : > { %s893_s11 = smov 64   ;;  %s894_s18 = smov 4  }
  0x29   : > { %636 = dma.hbm_to_vmem [thread:$0]  (!%p987_p11), %s1188_s1, 512, %s980_s26, [#allocation6], %s893_s11, %s893_s11, %s894_s18  }
  0x2a   : > { %s745_s4 = scalar_lea.hbm %s1189_s2, 1024 }
  0x2b   : > { %p746_p1 = scmp.ne.s32.totalorder %s1189_s2, %s745_s4  ;;  %p752_p10 = scmp.lt.u32.totalorder %s745_s4, %s1189_s2 }
  0x2d   : > { %p748_p4 = pnand %p746_p1, %p719_p13 }
  0x2f   : > { %p749_p6 = pneg %p748_p4 }
  0x31   : > { %p754_p3 = pnand %p752_p10, %p749_p6 }
  0x33   : > { %757 = shalt.err (!%p754_p3)
}
  0x34   : > { %s758_s26 = scalar_lea.vmem %s991_s29, 1024  ;;  %p766_p12 = scmp.lt.s32.totalorder %s991_s29, %s991_s29 }
  0x35   : > { %p759_p5 = scmp.ne.s32.totalorder %s991_s29, %s758_s26  ;;  %p767_p0 = scmp.lt.s32.totalorder %s758_s26, %s758_s26 }
  0x37   : > { %p761_p7 = pnand %p759_p5, %p719_p13  ;;  %p768_p1 = por %p767_p0, %p766_p12 }
  0x39   : > { %p762_p9 = pneg %p761_p7 }
  0x3b   : > { %p769_p4 = pnand %p768_p1, %p762_p9 }
  0x3d   : > { %772 = shalt.err (!%p769_p4)
}
  0x3e   : > { %s895_s9 = smov 128   ;;  %s896_s10 = smov 8  }
  0x3f   : > { %639 = dma.hbm_to_vmem [thread:$0]  (!%p987_p11), %s1189_s2, 1024, %s991_s29, [#allocation6], %s895_s9, %s895_s9, %s896_s10  }
  0x40   : > { %s32_s19 = sadd.s32 1, %s885_s16  ;;  %s41_s25 = sadd.s32 1, %s877_s14 }
  0x41   : > { %p34_p13 = scmp.ge.s32.totalorder %s32_s19, 2  ;;  %p48_p6 = scmp.ne.s32.totalorder %s877_s14, %s873_s13 }
  0x42   : > { %p49_p10 = scmp.eq.s32.totalorder %s889_s17, 0  ;;  %p650_p3 = scmp.lt.s32.totalorder %s889_s17, 2 }
  0x43   : > { %s1214_s19 = smov (%p34_p13, %s32_s19), 0  ;;  %p1055_p7 = por %p960_p2, %p48_p6 }
  0x44   : > { %p50_p5 = por %p49_p10, %p48_p6  ;;  %s36_s27 = ssub.s32 %s885_s16, %s1214_s19 }
  0x45   : > { %s1201_s28 = scalar_select %p1055_p7, 1, 0 }
  0x46   : > { %s174_s30 = sand.u32 1, %s877_s14   ;;  %p39_p9 = scmp.eq.s32.totalorder %s36_s27, 0 }
  0x47   : > { %s565_s29 = sshll.u32 %s174_s30, 2  ;;  %s566_s4 = sshll.u32 %s885_s16, 6 }
  0x48   : > { %s1064_s5 = scalar_select %p39_p9, %s877_s14, %s41_s25  }
  0x49   : > { %s1069_s8 = scalar_lea.hbm %s1187_s0, %s566_s4  ;;  %s178_s21 = scalar_lea.vmem [#allocation2], %s565_s29 }
  0x4a   : > { %s186_s26 = sshll.u32 %s178_s21, 4  ;;  %p1073_p2 = pnand %p650_p3, %p50_p5  ;;  %s1077_s26 = int_to_ptr.vmem [resolvable:$true] %s186_s26 }
  0x4b   : > { %s175_s10 = scalar_lea.sflag [#allocation3], %s174_s30  ;;  %s773_s11 = scalar_lea.hbm %s1069_s8, 64 }
  0x4c   : > { %p774_p11 = scmp.ne.s32.totalorder %s1069_s8, %s773_s11  ;;  %p775_p12 = pneg %p1073_p2 }
  0x4d   : > { %s778_s27 = scalar_lea.hbm %s1187_s0, 128  ;;  %p779_p4 = scmp.lt.u32.totalorder %s1069_s8, %s1187_s0 }
  0x4e   : > { %p776_p0 = pnand %p775_p12, %p774_p11  ;;  %p780_p13 = scmp.lt.u32.totalorder %s778_s27, %s773_s11 }
  0x4f   : > { %p782_p10 = scmp.lt.u32.totalorder %s773_s11, %s1069_s8 }
  0x50   : > { %p777_p1 = pneg %p776_p0  ;;  %p781_p6 = por %p780_p13, %p779_p4 }
  0x52   : > { %p783_p3 = por %p782_p10, %p781_p6 }
  0x54   : > { %p784_p5 = pnand %p783_p3, %p777_p1 }
  0x56   : > { %787 = shalt.err (!%p784_p5)
}
  0x57   : > { %s788_s30 = scalar_lea.vmem %s1077_s26, 64  ;;  %s897_s6 = smov [#allocation2]  }
  0x58   : > { %p789_p9 = scmp.ne.s32.totalorder %s1077_s26, %s788_s30  ;;  %s793_s7 = sshll.u32 %s897_s6, 4  ;;  %s794_s7 = int_to_ptr.vmem [resolvable:$false] %s793_s7 }
  0x59   : > { %s795_s21 = scalar_lea.vmem %s794_s7, 128  ;;  %p796_p7 = scmp.lt.s32.totalorder %s1077_s26, %s794_s7 }
  0x5a   : > { %p791_p11 = pnand %p789_p9, %p775_p12  ;;  %p797_p4 = scmp.lt.s32.totalorder %s795_s21, %s788_s30 }
  0x5c   : > { %p792_p0 = pneg %p791_p11  ;;  %p798_p13 = por %p797_p4, %p796_p7 }
  0x5e   : > { %p799_p6 = pnand %p798_p13, %p792_p0 }
  0x60   : > { %802 = shalt.err (!%p799_p6)
}
  0x61   : > { %643 = dma.hbm_to_vmem [thread:$0]  (!%p1073_p2), %s1069_s8, 64, %s1077_s26, %s175_s10  }
  0x62   : > { %195 = sbr.rel (%p976_p8) target bundleno = 351 (0x15f), region = 32  ;;  %s1107_s11 = sand.u32 (!%p976_p8), 1, %s873_s13  }
  0x63   : > { %s568_s18 = sshll.u32 (!%p976_p8), %s1107_s11, 2  ;;  %s198_s25 = scalar_lea.sflag (!%p976_p8), [#allocation3], %s1107_s11 }
  0x64   : > { %s201_s27 = scalar_lea.vmem (!%p976_p8), [#allocation2], %s568_s18  ;;  %p1203_p7 = scmp.ne.s32.totalorder (!%p976_p8), %s1197_s22, 0 }
  0x69   : > { %856 = dma.done.wait (%p1203_p7), %s198_s25, 64  }
  0x6a   : > { %858 = vsyncadd (%p1203_p7), %s198_s25, 4294967232  ;;  %p1204_p12 = scmp.ne.s32.totalorder %s1195_s20, 0 }
  0x6c   : > { %860 = dma.done.wait (%p1204_p12), [#allocation6], 1536  }
  0x6d   : > { %862 = vsyncadd (%p1204_p12), [#allocation6], 4294965760  ;;  %v898_v0 = vmov 0   ;;  %vm323_vm0 = vcmask 1043456   ;;  %vm310_vm1 = vcmask 64512   ;;  %v713_v3 = vld [vmem:[#allocation5] sm:$0xff]  }
  0x6e   : > { %712 = vset.pattern.permute.xlu1 %v898_v0  ;;  %711 = vset.pattern.permute.xlu0 %v898_v0  ;;  %v241_v1 = vld [vmem:[%s201_s27] sm:$0xf]  ;;  %v714_v4 = vld [vmem:[#allocation5 + $0x10] sm:$0xff]   ;;  %v715_v5 = vld [vmem:[#allocation5 + $0x8] sm:$0xff]   ;;  %s571_s20 = sshll.u32 %s1107_s11, 5  ;;  %vm432_vm2 = vcmask 519168  }
  0x6f   : > { %619 = vmatprep.subr.msk.bf16.mxu0 %vm323_vm0, %v241_v1  ;;  %620 = vmatprep.subr.msk.bf16.mxu1 %vm323_vm0, %v241_v1  ;;  %v325_v2 = vsel %vm323_vm0, %v241_v1, 0  ;;  %v716_v6 = vld [vmem:[#allocation5 + $0x18] sm:$0xff]   ;;  %v244_v7 = vld [vmem:[#allocation7 + $0x10] sm:$0xff]  ;;  %v242_v8 = vld [vmem:[#allocation7] sm:$0xff]  ;;  %s601_s22 = sshll.u32 %s881_s15, 9  ;;  %s231_s24 = scalar_lea.vmem [#allocation8], %s571_s20 }
  0x70   : > { %608 = vmatpush3.bf16.msra.mxu0 %v325_v2  ;;  %618 = vmatpush3.bf16.msra.mxu1 %v325_v2  ;;  %v245_v9 = vld [vmem:[#allocation7 + $0x18] sm:$0xff]  ;;  %v243_v10 = vld [vmem:[#allocation7 + $0x8] sm:$0xff]  ;;  %v246_v12 = vld [vmem:[#allocation7 + $0x20] sm:$0xff]  ;;  %s456_s8 = sshll.u32 %s231_s24, 4  ;;  %s1131_s9 = scalar_lea.hbm %s1190_s3, %s601_s22  ;;  %s1133_s8 = int_to_ptr.vmem [resolvable:$true] %s456_s8 }
  0x71   : > { %609 = vmatprep.mubr.msk.bf16.mxu0 %vm310_vm1, %v713_v3  ;;  %613 = vmatprep.mubr.msk.bf16.mxu1 %vm310_vm1, %v714_v4  ;;  %v247_v11 = vld [vmem:[#allocation7 + $0x28] sm:$0xff]  ;;  %v249_v13 = vld [vmem:[#allocation7 + $0x38] sm:$0xff]  ;;  %v248_v14 = vld [vmem:[#allocation7 + $0x30] sm:$0xff]  ;;  %s442_s10 = scalar_lea.sflag [#allocation4], %s1107_s11  ;;  %s803_s29 = scalar_lea.vmem %s1133_s8, 512 }
  0x72   : > { %262 = vperm.xlu1 %712, %v244_v7   ;;  %252 = vperm.xlu0 %711, %v242_v8   ;;  %p804_p8 = scmp.ne.s32.totalorder %s1133_s8, %s803_s29  ;;  %p1205_p2 = scmp.ne.s32.totalorder %s1201_s28, 0 }
  0x73   : > { %610 = vmatmul.mubr.msk.bf16.vlgmr.msra.gmra.mrb[0].mxu0 %vm310_vm1, %v715_v5  ;;  %614 = vmatmul.mubr.msk.bf16.vlgmr.msra.gmra.mrb[0].mxu1 %vm310_vm1, %v716_v6  ;;  %s899_s4 = smov [#allocation8]  }
  0x74   : > { %p805_p1 = pnand %p804_p8, %p1205_p2  ;;  %s807_s30 = sshll.u32 %s899_s4, 4  ;;  %s808_s30 = int_to_ptr.vmem [resolvable:$false] %s807_s30 }
  0x75   : > { %s809_s6 = scalar_lea.vmem %s808_s30, 1024  ;;  %p810_p3 = scmp.lt.s32.totalorder %s1133_s8, %s808_s30 }
  0x76   : > { %267 = vperm.xlu1 %712, %v245_v9   ;;  %257 = vperm.xlu0 %711, %v243_v10   ;;  %p806_p10 = pneg %p805_p1  ;;  %p811_p5 = scmp.lt.s32.totalorder %s809_s6, %s803_s29 }
  0x78   : > { %p812_p9 = por %p811_p5, %p810_p3 }
  0x7a   : > { %277 = vperm.xlu1 %712, %v247_v11   ;;  %272 = vperm.xlu0 %711, %v246_v12   ;;  %p813_p11 = pnand %p812_p9, %p806_p10 }
  0x7e   : > { %287 = vperm.xlu1 %712, %v249_v13   ;;  %282 = vperm.xlu0 %711, %v248_v14  }
  0xf1   : > { %v263_v15 = vpop.permute.xlu1 %262  ;;  %v253_v16 = vpop.permute.xlu0 %252 }
  0xf5   : > { %v268_v17 = vpop.permute.xlu1 %267  ;;  %v258_v18 = vpop.permute.xlu0 %257 }
  0xf9   : > { %v278_v19 = vpop.permute.xlu1 %277  ;;  %v273_v20 = vpop.permute.xlu0 %272 }
  0xfd   : > { %v288_v21 = vpop.permute.xlu1 %287  ;;  %v283_v22 = vpop.permute.xlu0 %282 }
 0x146   : > { %v611_v23 = vpop.f32.mrb[0].mxu0  ;;  %v615_v25 = vpop.f32.mrb[0].mxu1 }
 0x147   : > { %v370_v24 = vadd.f32 %v611_v23, %v263_v15  ;;  %v361_v26 = vpop.f32.mrb[1].mxu0  ;;  %v386_v27 = vadd.f32 %v615_v25, %v283_v22  ;;  %v377_v29 = vpop.f32.mrb[1].mxu1 }
 0x148   : > { %v362_v28 = vadd.f32 %v361_v26, %v253_v16  ;;  %v612_v30 = vpop.f32.mrb[2].mxu0  ;;  %v378_v32 = vadd.f32 %v377_v29, %v273_v20  ;;  %v616_v34 = vpop.f32.mrb[2].mxu1 }
 0x149   : > { %v394_v31 = vmax.f32 %v370_v24, 0.0  ;;  %v373_v33 = vadd.f32 %v612_v30, %v268_v17  ;;  %v364_v35 = vpop.f32.mrb[3].mxu0  ;;  %v398_v36 = vmax.f32 %v386_v27, 0.0  ;;  %v389_v38 = vadd.f32 %v616_v34, %v288_v21  ;;  %v380_v40 = vpop.f32.mrb[3].mxu1 }
 0x14a   : > { %v392_v37 = vmax.f32 %v362_v28, 0.0  ;;  %v365_v39 = vadd.f32 %v364_v35, %v258_v18  ;;  %v396_v42 = vmax.f32 %v378_v32, 0.0  ;;  %v381_v44 = vadd.f32 %v380_v40, %v278_v19 }
 0x14b   : > { %v595_v41 = vpack.c.bf16 %v394_v31, %v394_v31  ;;  %v395_v43 = vmax.f32 %v373_v33, 0.0  ;;  %v599_v45 = vpack.c.bf16 %v398_v36, %v398_v36  ;;  %v399_v47 = vmax.f32 %v389_v38, 0.0 }
 0x14c   : > { %v593_v46 = vpack.c.bf16 %v392_v37, %v392_v37  ;;  %v393_v48 = vmax.f32 %v365_v39, 0.0  ;;  %v597_v49 = vpack.c.bf16 %v396_v42, %v396_v42  ;;  %v397_v51 = vmax.f32 %v381_v44, 0.0 }
 0x14d   : > { %435 = vst.msk [vmem:[%s231_s24 + $0x8] sm:$0xf] %vm432_vm2, %v595_v41  ;;  %v596_v50 = vpack.c.bf16 %v395_v43, %v395_v43  ;;  %439 = vst.msk [vmem:[%s231_s24 + $0x18] sm:$0xf] %vm432_vm2, %v599_v45  ;;  %v600_v52 = vpack.c.bf16 %v399_v47, %v399_v47 }
 0x14e   : > { %433 = vst.msk [vmem:[%s231_s24] sm:$0xf] %vm432_vm2, %v593_v46  ;;  %v594_v53 = vpack.c.bf16 %v393_v48, %v393_v48  ;;  %437 = vst.msk [vmem:[%s231_s24 + $0x10] sm:$0xf] %vm432_vm2, %v597_v49  ;;  %v598_v54 = vpack.c.bf16 %v397_v51, %v397_v51 }
 0x14f   : > { %436 = vst.msk [vmem:[%s231_s24 + $0xc] sm:$0xf] %vm432_vm2, %v596_v50  ;;  %440 = vst.msk [vmem:[%s231_s24 + $0x1c] sm:$0xf] %vm432_vm2, %v600_v52 }
 0x150   : > { %434 = vst.msk [vmem:[%s231_s24 + $0x4] sm:$0xf] %vm432_vm2, %v594_v53  ;;  %438 = vst.msk [vmem:[%s231_s24 + $0x14] sm:$0xf] %vm432_vm2, %v598_v54 }
 0x151   : > { %816 = shalt.err (!%p813_p11)
}
 0x152   : > { %s817_s7 = scalar_lea.hbm %s1131_s9, 512  ;;  %s821_s25 = scalar_lea.hbm %s1190_s3, 1024 }
 0x153   : > { %p818_p0 = scmp.ne.s32.totalorder %s1131_s9, %s817_s7  ;;  %p822_p6 = scmp.lt.u32.totalorder %s1131_s9, %s1190_s3 }
 0x154   : > { %p823_p7 = scmp.lt.u32.totalorder %s821_s25, %s817_s7  ;;  %p825_p8 = scmp.lt.u32.totalorder %s817_s7, %s1131_s9 }
 0x155   : > { %p819_p4 = pnand %p818_p0, %p1205_p2 }
 0x156   : > { %p824_p12 = por %p823_p7, %p822_p6 }
 0x157   : > { %p820_p13 = pneg %p819_p4 }
 0x158   : > { %p826_p1 = por %p825_p8, %p824_p12 }
 0x15a   : > { %p827_p10 = pnand %p826_p1, %p820_p13 }
 0x15c   : > { %830 = shalt.err (!%p827_p10)
}
 0x15d   : > { %s900_s22 = smov 64   ;;  %s901_s24 = smov 4  }
 0x15e   : > { %631 = dma.vmem_to_hbm [thread:$0]  (%p1205_p2), %s1133_s8, 512, %s1131_s9, %s442_s10, %s900_s22, %s900_s22, %s901_s24  }
 0x15f PF: > { %s471_s15 = sand.u32 1, %s869_s12   ;;  %p1206_p3 = scmp.ne.s32.totalorder %s1198_s23, 0 }
 0x160   : > { %p1207_p5 = scmp.ge.s32.totalorder %s889_s17, 2  ;;  %s472_s26 = scalar_lea.sflag [#allocation4], %s471_s15 }
 0x162   : > { %p645_p9 = pnand %p1207_p5, %p1206_p3 }
 0x164   : > { %864 = dma.done.wait (!%p645_p9), %s472_s26, 512  }
 0x165   : > { %866 = vsyncadd (!%p645_p9), %s472_s26, 4294966784  ;;  %s20_s17 = sadd.s32 1, %s889_s17   ;;  %s1208_s12 = smov %s873_s13 }
 0x166   : > { %p17_p11 = scmp.ge.s32.totalorder %s20_s17, 4   ;;  %s1209_s13 = smov %s877_s14 }
 0x167   : > { %s1210_s14 = smov %s1064_s5  ;;  %s1211_s15 = smov %s885_s16 }
 0x168   : > { %s1212_s16 = smov %s1214_s19  ;;  %19 = sbr.rel (!%p17_p11) target bundleno = 7 (0x7), region = 85 }
 0x16f   :  { %477 = vsyncpa [#allocation3], 1 }
 0x170   :  { %479 = vsyncpa [#allocation3 + $0x1], 1 }
 0x171   :  { %480 = vsyncpa [#allocation6], 1 }
 0x172   :  { %481 = vsyncpa [#allocation4], 1 }
 0x173   :  { %483 = vsyncpa [#allocation4 + $0x1], 1 }

// kernel: up_voxel_stage_forward.6
= control target key start
LH: loop header
LB: loop body
LE: loop exit
PB: predicated region body
PF: predicated region fallthrough
CT: control target
= control target key end

     0   :  { %s3943_s0 = inlined_call_operand.hbm [shape: bf16[2,10,16,1282], index: 0, kind: input, shape index: {}, may-alias: {0,1,2}]   ;;  %s3944_s1 = inlined_call_operand.hbm [shape: bf16[2,10,16,1282], index: 1, kind: input, shape index: {}, may-alias: {0,1,2}]   ;;  %s3945_s2 = inlined_call_operand.hbm [shape: bf16[2,10,16,1282], index: 2, kind: input, shape index: {}, may-alias: {0,1,2}]   ;;  %s3946_s3 = inlined_call_operand.hbm [shape: bf16[16,432], index: 3, kind: input, shape index: {}]   ;;  %s3947_s4 = inlined_call_operand.hbm [shape: f32[16,1], index: 4, kind: input, shape index: {}]   ;;  %s3948_s5 = inlined_call_operand.hbm [shape: bf16[2,10,16,1282], index: 5, kind: output, shape index: {}]  }
   0x1   :  { %3982 = sst [smem:[#allocation33_spill]] %s3943_s0 }
   0x2   :  { %3983 = sst [smem:[#allocation34_spill]] %s3944_s1 }
   0x3   :  { %3984 = sst [smem:[#allocation35_spill]] %s3945_s2 }
   0x4   :  { %3985 = sst [smem:[#allocation36_spill]] %s3946_s3 }
   0x5   :  { %3986 = sst [smem:[#allocation37_spill]] %s3947_s4 }
   0x6   :  { %3987 = sst [smem:[#allocation38_spill]] %s3948_s5 }
   0x7   :  { %10 = vsyncpa [#allocation3], 0 }
   0x8   :  { %12 = vsyncpa [#allocation3 + $0x1], 0 }
   0x9   :  { %13 = vsyncpa [#allocation6], 0 }
   0xa   :  { %15 = vsyncpa [#allocation6 + $0x1], 0 }
   0xb   :  { %16 = vsyncpa [#allocation9], 0 }
   0xc   :  { %17 = vsyncpa [#allocation4], 0 }
   0xd   :  { %19 = vsyncpa [#allocation4 + $0x1], 0  ;;  %s2670_s18 = smov 0   ;;  %s2672_s19 = smov 0  }
   0xe   :  { %s2674_s20 = smov 0   ;;  %s2676_s21 = smov 0  }
   0xf   :  { %s2678_s22 = smov 0   ;;  %s2680_s23 = smov 0  }
  0x10   :  { %s2682_s24 = smov 0   ;;  %s2684_s25 = smov 0  }
  0x11   :  { %s2686_s26 = smov 0   ;;  %s2688_s27 = smov 0  }
  0x12   :  { %s2690_s28 = smov 0   ;;  %s2692_s29 = smov 0  }
  0x13   :  { %s2694_s30 = smov 0   ;;  %s2696_s6 = smov 0  }
  0x14   :  { %s2698_s7 = smov 0   ;;  %s2700_s8 = smov 0  }
  0x15   :  { %s2702_s9 = smov 0  }
  0x16 LB: > { %3988 = sst [smem:[#allocation17_spill]] %s2555_s18  ;;  %s2756_s10 = sadd.s32 4294967295, %s2619_s9   ;;  %s2619_s9 = sphi %s2702_s9, %s25_s9   ;;  %s2615_s8 = sphi %s2700_s8, %s4079_s8   ;;  %s2611_s7 = sphi %s2698_s7, %s4078_s7   ;;  %s2607_s6 = sphi %s2696_s6, %s4091_s6   ;;  %s2603_s30 = sphi %s2694_s30, %s4090_s30   ;;  %s2599_s29 = sphi %s2692_s29, %s4089_s29   ;;  %s2595_s28 = sphi %s2690_s28, %s4088_s28   ;;  %s2591_s27 = sphi %s2688_s27, %s4087_s27   ;;  %s2587_s26 = sphi %s2686_s26, %s4086_s26   ;;  %s2583_s25 = sphi %s2684_s25, %s4085_s25   ;;  %s2579_s24 = sphi %s2682_s24, %s4074_s24   ;;  %s2575_s23 = sphi %s2680_s23, %s4084_s23   ;;  %s2571_s22 = sphi %s2678_s22, %s4073_s22   ;;  %s2567_s21 = sphi %s2676_s21, %s4083_s21   ;;  %s2563_s20 = sphi %s2674_s20, %s4082_s20   ;;  %s2559_s19 = sphi %s2672_s19, %s4080_s19   ;;  %s2555_s18 = sphi %s2670_s18, %s4071_s18  }
  0x17   : > { %3989 = sst [smem:[#allocation18_spill]] %s2559_s19  ;;  %s1860_s11 = sadd.s32 4294967294, %s2619_s9  }
  0x18   : > { %3990 = sst [smem:[#allocation19_spill]] %s2567_s21  ;;  %p3954_p0 = scmp.eq.s32.totalorder %s2756_s10, 0 }
  0x19   : > { %3991 = sst [smem:[#allocation20_spill]] %s2571_s22  ;;  %p210_p1 = scmp.ne.s32.totalorder %s2563_s20, %s2559_s19 }
  0x1a   : > { %3992 = sst [smem:[#allocation21_spill]] %s2575_s23  ;;  %p211_p2 = scmp.eq.s32.totalorder %s2756_s10, 19 }
  0x1b   : > { %3993 = sst [smem:[#allocation22_spill]] %s2583_s25  ;;  %p216_p3 = scmp.ne.s32.totalorder %s2559_s19, %s2555_s18 }
  0x1c   : > { %3994 = sst [smem:[#allocation23_spill]] %s2603_s30  ;;  %p217_p4 = scmp.eq.s32.totalorder %s1860_s11, 19 }
  0x1d   : > { %3995 = sst [smem:[#allocation24_spill]] %s2607_s6  ;;  %p2766_p5 = por %p211_p2, %p210_p1 }
  0x1e   : > { %3996 = sst [smem:[#allocation25_spill]] %s2611_s7  ;;  %p1891_p6 = scmp.ge.s32.totalorder %s2619_s9, 1 }
  0x1f   : > { %3997 = sst [smem:[#allocation26_spill]] %s2615_s8  ;;  %p2771_p7 = por %p217_p4, %p216_p3 }
  0x20   : > { %s3998_s13 = scalar_select %p2766_p5, 1, 0 }
  0x21   : > { %s4000_s14 = scalar_select %p2771_p7, 1, 0 }
  0x22   : > { %3999 = sst [smem:[#allocation27_spill]] %s3998_s13  ;;  %p224_p8 = scmp.lt.s32.totalorder %s2619_s9, 21 }
  0x23   : > { %4001 = sst [smem:[#allocation28_spill]] %s4000_s14  ;;  %s2621_s16 = smov [#allocation8]  }
  0x24   : > { %p2776_p9 = pnand %p1891_p6, %p224_p8  ;;  %s236_s17 = sshll.u32 %s2621_s16, 4  ;;  %s237_s17 = int_to_ptr.vmem [resolvable:$true] %s236_s17 }
  0x25   : > { %s4005_s3 = sld [smem:[#allocation36_spill]] }
  0x26   : > { %s4002_s15 = scalar_select %p2776_p9, 1, 0 }
  0x27   : > { %p2057_p10 = pneg %p2776_p9 }
  0x28   : > { %4003 = sst [smem:[#allocation29_spill]] %s4002_s15 }
  0x29   : > { %p2784_p11 = pnand %p2057_p10, %p3954_p0 }
  0x2b   : > { %s2291_s14 = scalar_lea.hbm %s4005_s3, 512  ;;  %p3972_p13 = pneg %p2784_p11 }
  0x2c   : > { %p2292_p12 = scmp.ne.s32.totalorder %s4005_s3, %s2291_s14  ;;  %p2298_p3 = scmp.lt.u32.totalorder %s2291_s14, %s4005_s3 }
  0x2e   : > { %p2294_p1 = pnand %p3972_p13, %p2292_p12 }
  0x30   : > { %p2295_p2 = pneg %p2294_p1 }
  0x32   : > { %p2300_p4 = pnand %p2298_p3, %p2295_p2 }
  0x34   : > { %2303 = shalt.err (!%p2300_p4)
}
  0x35   : > { %s2304_s18 = scalar_lea.vmem %s237_s17, 512  ;;  %p2312_p0 = scmp.lt.s32.totalorder %s237_s17, %s237_s17 }
  0x36   : > { %p2305_p6 = scmp.ne.s32.totalorder %s237_s17, %s2304_s18  ;;  %p2313_p7 = scmp.lt.s32.totalorder %s2304_s18, %s2304_s18 }
  0x38   : > { %p2307_p8 = pnand %p2305_p6, %p3972_p13  ;;  %p2314_p5 = por %p2313_p7, %p2312_p0 }
  0x3a   : > { %p2308_p10 = pneg %p2307_p8 }
  0x3c   : > { %p2315_p9 = pnand %p2314_p5, %p2308_p10 }
  0x3e   : > { %2318 = shalt.err (!%p2315_p9)
}
  0x3f   : > { %s2622_s5 = smov 256   ;;  %s2623_s6 = smov 16  }
  0x40   : > { %2060 = dma.hbm_to_vmem [thread:$0]  (!%p2784_p11), %s4005_s3, 512, %s237_s17, [#allocation9], %s2622_s5, %s2622_s5, %s2623_s6  }
  0x41   : > { %s2811_s14 = sadd.s32 1, %s2611_s7  ;;  %s37_s16 = sadd.s32 1, %s2615_s8 }
  0x42   : > { %4006 = sst [smem:[#allocation30_spill]] %s2811_s14  ;;  %p35_p0 = scmp.ge.s32.totalorder %s2811_s14, 10 }
  0x43   : > { %p3971_p5 = scmp.eq.s32.totalorder %s2619_s9, 0  ;;  %p79_p7 = scmp.lt.s32.totalorder %s2611_s7, 9 }
  0x44   : > { %s2818_s18 = scalar_select %p35_p0, 0, %s2811_s14  }
  0x45   : > { %s4093_s16 = smov (!%p35_p0, %s37_s16), %s2615_s8  ;;  %p1871_p12 = scmp.gt.s32.totalorder %s2611_s7, 0 }
  0x46   : > { %4007 = sst [smem:[#allocation31_spill]] %s2818_s18  ;;  %p39_p9 = scmp.ge.s32.totalorder %s4093_s16, 2 }
  0x47   : > { %s80_s17 = scalar_select %p79_p7, %s2611_s7, 9 }
  0x48   : > { %p83_p1 = scmp.lt.s32.totalorder %s2818_s18, 9  ;;  %p1876_p2 = scmp.gt.s32.totalorder %s2818_s18, 0 }
  0x49   : > { %s4095_s16 = smov (%p39_p9, %s4093_s16), 0  ;;  %s4097_s17 = smov (!%p1871_p12, %s80_s17), 0 }
  0x4a   : > { %4008 = sst [smem:[#allocation32_spill]] %s4095_s16  ;;  %s2829_s5 = ssub.s32 %s2615_s8, %s4095_s16 }
  0x4b   : > { %s92_s6 = sadd.s32 1, %s2587_s26  ;;  %p99_p3 = scmp.ne.s32.totalorder %s2587_s26, %s2583_s25 }
  0x4c   : > { %s84_s12 = scalar_select %p83_p1, %s2818_s18, 9 }
  0x4d   : > { %p105_p4 = scmp.ne.s32.totalorder %s2583_s25, %s2579_s24  ;;  %p2839_p6 = por %p99_p3, %p3971_p5 }
  0x4e   : > { %s4099_s12 = smov (!%p1876_p2, %s84_s12), 0  ;;  %p4010_p8 = scmp.eq.s32.totalorder %s2756_s10, 0 }
  0x4f   : > { %s88_s16 = ssub.s32 %s4097_s17, %s4099_s12  ;;  %s196_s30 = ssub.s32 %s2611_s7, %s2818_s18 }
  0x50   : > { %p2845_p10 = por %p105_p4, %p4010_p8  ;;  %s89_s19 = sor.u32 %s88_s16, %s2829_s5 }
  0x51   : > { %s197_s15 = sor.u32 %s196_s30, %s2829_s5  ;;  %p90_p0 = scmp.eq.s32.totalorder %s89_s19, 0 }
  0x52   : > { %s4011_s3 = scalar_select %p2845_p10, 1, 0 }
  0x53   : > { %p198_p7 = scmp.eq.s32.totalorder %s197_s15, 0  ;;  %p3970_p9 = scmp.lt.s32.totalorder %s2619_s9, 20 }
  0x54   : > { %s2855_s24 = smul.u32 220, %s2615_s8  ;;  %s4012_s2 = sadd.s32 1, %s2563_s20 }
  0x55   : > { %s2858_s25 = scalar_select %p90_p0, %s2587_s26, %s92_s6  }
  0x56   : > { %s2863_s21 = scalar_select %p198_p7, %s2563_s20, %s4012_s2  }
  0x57   : > { %s291_s22 = sand.u32 1, %s2619_s9   ;;  %s293_s23 = sand.u32 1, %s2587_s26  }
  0x58   : > { %s2029_s14 = smul.u32 88, %s293_s23  ;;  %p2871_p12 = pnand %p3970_p9, %p2839_p6 }
  0x59   : > { %s2030_s0 = smul.u32 22, %s4097_s17  ;;  %s4014_s1 = sld [smem:[#allocation34_spill]] }
  0x5a   : > { %s295_s30 = scalar_lea.vmem [#allocation5], %s2029_s14  ;;  %s2883_s23 = scalar_lea.sflag [#allocation6], %s291_s22 }
  0x5b   : > { %s305_s19 = sadd.s32 %s2030_s0, %s2855_s24  ;;  %s308_s15 = sshll.u32 %s295_s30, 4  ;;  %s2876_s15 = int_to_ptr.vmem [resolvable:$true] %s308_s15 }
  0x5c   : > { %s1906_s6 = sshll.u32 %s305_s19, 6  ;;  %p2321_p2 = pneg %p2871_p12 }
  0x5f   : > { %s2881_s8 = scalar_lea.hbm %s4014_s1, %s1906_s6  ;;  %s2324_s13 = scalar_lea.hbm %s4014_s1, 28160 }
  0x60   : > { %s2319_s17 = scalar_lea.hbm %s2881_s8, 1408  ;;  %p2325_p6 = scmp.lt.u32.totalorder %s2881_s8, %s4014_s1 }
  0x61   : > { %p2320_p1 = scmp.ne.s32.totalorder %s2881_s8, %s2319_s17  ;;  %p2326_p8 = scmp.lt.u32.totalorder %s2324_s13, %s2319_s17 }
  0x62   : > { %p2328_p7 = scmp.lt.u32.totalorder %s2319_s17, %s2881_s8 }
  0x63   : > { %p2322_p3 = pnand %p2321_p2, %p2320_p1  ;;  %p2327_p0 = por %p2326_p8, %p2325_p6 }
  0x65   : > { %p2323_p4 = pneg %p2322_p3  ;;  %p2329_p9 = por %p2328_p7, %p2327_p0 }
  0x67   : > { %p2330_p5 = pnand %p2329_p9, %p2323_p4 }
  0x69   : > { %2333 = shalt.err (!%p2330_p5)
}
  0x6a   : > { %s2334_s22 = scalar_lea.vmem %s2876_s15, 1408  ;;  %s2624_s6 = smov [#allocation5]  }
  0x6b   : > { %p2335_p1 = scmp.ne.s32.totalorder %s2876_s15, %s2334_s22  ;;  %s2339_s2 = sshll.u32 %s2624_s6, 4  ;;  %s2340_s2 = int_to_ptr.vmem [resolvable:$false] %s2339_s2 }
  0x6c   : > { %s2341_s12 = scalar_lea.vmem %s2340_s2, 2816  ;;  %p2342_p10 = scmp.lt.s32.totalorder %s2876_s15, %s2340_s2 }
  0x6d   : > { %p2337_p3 = pnand %p2335_p1, %p2321_p2  ;;  %p2343_p6 = scmp.lt.s32.totalorder %s2341_s12, %s2334_s22 }
  0x6f   : > { %p2338_p13 = pneg %p2337_p3  ;;  %p2344_p8 = por %p2343_p6, %p2342_p10 }
  0x71   : > { %p2345_p0 = pnand %p2344_p8, %p2338_p13 }
  0x73   : > { %2348 = shalt.err (!%p2345_p0)
}
  0x74   : > { %s3974_s17 = smov 704   ;;  %s3976_s0 = smov 44  }
  0x75   : > { %2070 = dma.hbm_to_vmem [thread:$0]  (!%p2871_p12), %s2881_s8, 1408, %s2876_s15, %s2883_s23, %s3974_s17, %s3974_s17, %s3976_s0  }
  0x76   : > { %s2627_s14 = smov [#allocation10]   ;;  %s4015_s4 = sld [smem:[#allocation37_spill]] }
  0x77   : > { %s249_s13 = sshll.u32 %s2627_s14, 4  ;;  %p4016_p5 = pneg %p2784_p11  ;;  %s250_s13 = int_to_ptr.vmem [resolvable:$true] %s249_s13 }
  0x7c   : > { %s2349_s22 = scalar_lea.hbm %s4015_s4, 256 }
  0x7d   : > { %p2350_p13 = scmp.ne.s32.totalorder %s4015_s4, %s2349_s22  ;;  %p2356_p2 = scmp.lt.u32.totalorder %s2349_s22, %s4015_s4 }
  0x7f   : > { %p2352_p10 = pnand %p2350_p13, %p4016_p5 }
  0x81   : > { %p2353_p9 = pneg %p2352_p10 }
  0x83   : > { %p2358_p12 = pnand %p2356_p2, %p2353_p9 }
  0x85   : > { %2361 = shalt.err (!%p2358_p12)
}
  0x86   : > { %s2362_s8 = scalar_lea.vmem %s250_s13, 256  ;;  %p4017_p7 = pmov %p4016_p5 }
  0x87   : > { %p2363_p4 = scmp.ne.s32.totalorder %s250_s13, %s2362_s8  ;;  %p2370_p6 = scmp.lt.s32.totalorder %s250_s13, %s250_s13 }
  0x88   : > { %p2371_p8 = scmp.lt.s32.totalorder %s2362_s8, %s2362_s8 }
  0x89   : > { %p2365_p1 = pnand %p2363_p4, %p4017_p7 }
  0x8a   : > { %p2372_p0 = por %p2371_p8, %p2370_p6 }
  0x8b   : > { %p2366_p3 = pneg %p2365_p1 }
  0x8d   : > { %p2373_p5 = pnand %p2372_p0, %p2366_p3 }
  0x8f   : > { %2376 = shalt.err (!%p2373_p5)
}
  0x90   : > { %s2628_s15 = smov 128   ;;  %s2629_s14 = smov 8  }
  0x91   : > { %2063 = dma.hbm_to_vmem [thread:$0]  (!%p2784_p11), %s4015_s4, 256, %s250_s13, [#allocation9], %s2628_s15, %s2628_s15, %s2629_s14  }
  0x92   : > { %s41_s22 = sadd.s32 4294967295, %s2611_s7  ;;  %s46_s6 = sadd.s32 4294967295, %s2818_s18 }
  0x93   : > { %p1861_p13 = scmp.gt.s32.totalorder %s41_s22, 0  ;;  %p1866_p10 = scmp.gt.s32.totalorder %s46_s6, 0 }
  0x94   : > { %s56_s2 = sadd.s32 1, %s2599_s29  ;;  %p63_p9 = scmp.ne.s32.totalorder %s2599_s29, %s2595_s28 }
  0x95   : > { %s4101_s22 = smov (!%p1861_p13, %s41_s22), 0  ;;  %s4103_s6 = smov (!%p1866_p10, %s46_s6), 0 }
  0x96   : > { %s52_s16 = ssub.s32 %s4101_s22, %s4103_s6  ;;  %p69_p2 = scmp.ne.s32.totalorder %s2595_s28, %s2591_s27 }
  0x97   : > { %s53_s12 = sor.u32 %s52_s16, %s2829_s5  ;;  %p4018_p12 = scmp.eq.s32.totalorder %s2619_s9, 0 }
  0x98   : > { %p54_p7 = scmp.eq.s32.totalorder %s53_s12, 0  ;;  %p4019_p1 = scmp.eq.s32.totalorder %s2756_s10, 0 }
  0x99   : > { %p65_p4 = por %p4018_p12, %p63_p9  ;;  %s263_s13 = sand.u32 1, %s2599_s29  }
  0x9a   : > { %p2946_p3 = por %p4019_p1, %p69_p2  ;;  %s2027_s8 = smul.u32 22, %s4101_s22 }
  0x9b   : > { %s2952_s15 = scalar_select %p54_p7, %s2599_s29, %s56_s2  }
  0x9c   : > { %s2026_s14 = smul.u32 88, %s263_s13  ;;  %s278_s19 = sadd.s32 %s2855_s24, %s2027_s8 }
  0x9d   : > { %p4021_p11 = scmp.lt.s32.totalorder %s2619_s9, 20  ;;  %s1900_s27 = sshll.u32 %s278_s19, 6 }
  0x9e   : > { %s4023_s12 = sld [smem:[#allocation33_spill]]  ;;  %s267_s22 = scalar_lea.vmem [#allocation2], %s2026_s14 }
  0x9f   : > { %p2957_p6 = pnand %p4021_p11, %p65_p4  ;;  %s281_s2 = sshll.u32 %s267_s22, 4  ;;  %s2966_s2 = int_to_ptr.vmem [resolvable:$true] %s281_s2 }
  0xa0   : > { %s2968_s8 = scalar_lea.sflag [#allocation3], %s263_s13 }
  0xa1   : > { %p2379_p0 = pneg %p2957_p6 }
  0xa4   : > { %s2964_s17 = scalar_lea.hbm %s4023_s12, %s1900_s27  ;;  %s2382_s6 = scalar_lea.hbm %s4023_s12, 28160 }
  0xa5   : > { %s2377_s0 = scalar_lea.hbm %s2964_s17, 1408  ;;  %p2383_p10 = scmp.lt.u32.totalorder %s2964_s17, %s4023_s12 }
  0xa6   : > { %p2378_p8 = scmp.ne.s32.totalorder %s2964_s17, %s2377_s0  ;;  %p2384_p9 = scmp.lt.u32.totalorder %s2382_s6, %s2377_s0 }
  0xa7   : > { %p2386_p12 = scmp.lt.u32.totalorder %s2377_s0, %s2964_s17 }
  0xa8   : > { %p2380_p5 = pnand %p2379_p0, %p2378_p8  ;;  %p2385_p2 = por %p2384_p9, %p2383_p10 }
  0xaa   : > { %p2381_p13 = pneg %p2380_p5  ;;  %p2387_p4 = por %p2386_p12, %p2385_p2 }
  0xac   : > { %p2388_p7 = pnand %p2387_p4, %p2381_p13 }
  0xae   : > { %2391 = shalt.err (!%p2388_p7)
}
  0xaf   : > { %s2392_s13 = scalar_lea.vmem %s2966_s2, 1408  ;;  %s2630_s14 = smov [#allocation2]  }
  0xb0   : > { %p2393_p1 = scmp.ne.s32.totalorder %s2966_s2, %s2392_s13  ;;  %s2397_s22 = sshll.u32 %s2630_s14, 4  ;;  %s2398_s22 = int_to_ptr.vmem [resolvable:$false] %s2397_s22 }
  0xb1   : > { %s2399_s1 = scalar_lea.vmem %s2398_s22, 2816  ;;  %p2400_p5 = scmp.lt.s32.totalorder %s2966_s2, %s2398_s22 }
  0xb2   : > { %p2395_p11 = pnand %p2393_p1, %p2379_p0  ;;  %p2401_p10 = scmp.lt.s32.totalorder %s2399_s1, %s2392_s13 }
  0xb4   : > { %p2396_p8 = pneg %p2395_p11  ;;  %p2402_p9 = por %p2401_p10, %p2400_p5 }
  0xb6   : > { %p2403_p2 = pnand %p2402_p9, %p2396_p8 }
  0xb8   : > { %2406 = shalt.err (!%p2403_p2)
}
  0xb9   : > { %s4024_s0 = smov 44   ;;  %s4025_s19 = smov 704  }
  0xba   : > { %s4026_s27 = sld [smem:[#allocation30_spill]]  ;;  %s4027_s6 = sld [smem:[#allocation21_spill]] }
  0xbb   : > { %s4028_s16 = sld [smem:[#allocation20_spill]]  ;;  %s120_s30 = sadd.s32 1, %s2818_s18 }
  0xbc   : > { %s4029_s14 = sld [smem:[#allocation19_spill]]  ;;  %p121_p13 = scmp.lt.s32.totalorder %s120_s30, 9 }
  0xbd   : > { %2067 = dma.hbm_to_vmem [thread:$0]  (!%p2957_p6), %s2964_s17, 1408, %s2966_s2, %s2968_s8, %s4025_s19, %s4025_s19, %s4024_s0  }
  0xbe   : > { %s4107_s30 = smov (!%p121_p13, %s120_s30), 9  ;;  %p4030_p7 = scmp.eq.s32.totalorder %s2619_s9, 0 }
  0xbf   : > { %p4031_p11 = scmp.eq.s32.totalorder %s2756_s10, 0  ;;  %p4033_p5 = scmp.lt.s32.totalorder %s2619_s9, 20 }
  0xc0   : > { %p116_p0 = scmp.lt.s32.totalorder %s4026_s27, 9  ;;  %s130_s13 = sadd.s32 1, %s4027_s6 }
  0xc1   : > { %p137_p12 = scmp.ne.s32.totalorder %s4027_s6, %s4028_s16  ;;  %s320_s17 = sand.u32 1, %s4027_s6  }
  0xc2   : > { %s4105_s27 = smov (!%p116_p0, %s4026_s27), 9  ;;  %p143_p4 = scmp.ne.s32.totalorder %s4028_s16, %s4029_s14 }
  0xc3   : > { %p139_p1 = por %p137_p12, %p4030_p7  ;;  %s126_s1 = ssub.s32 %s4105_s27, %s4107_s30 }
  0xc4   : > { %p3011_p8 = por %p143_p4, %p4031_p11  ;;  %s127_s2 = sor.u32 %s126_s1, %s2829_s5 }
  0xc5   : > { %s2032_s8 = smul.u32 88, %s320_s17  ;;  %p128_p6 = scmp.eq.s32.totalorder %s127_s2, 0 }
  0xc6   : > { %s4032_s22 = scalar_select %p3011_p8, 1, 0 }
  0xc7   : > { %s2033_s4 = smul.u32 22, %s4105_s27  ;;  %p3019_p10 = pnand %p4033_p5, %p139_p1 }
  0xc8   : > { %s4109_s6 = smov (!%p128_p6, %s4027_s6), %s130_s13  ;;  %s322_s14 = scalar_lea.vmem [#allocation7], %s2032_s8 }
  0xc9   : > { %s333_s16 = sadd.s32 %s2033_s4, %s2855_s24  ;;  %s336_s18 = sshll.u32 %s322_s14, 4  ;;  %s3027_s18 = int_to_ptr.vmem [resolvable:$true] %s336_s18 }
  0xca   : > { %s1912_s7 = sshll.u32 %s333_s16, 6  ;;  %s4035_s1 = sld [smem:[#allocation35_spill]] }
  0xcb   : > { %p2409_p2 = pneg %p3019_p10 }
  0xd0   : > { %s3032_s17 = scalar_lea.hbm %s4035_s1, %s1912_s7  ;;  %s2412_s13 = scalar_lea.hbm %s4035_s1, 28160 }
  0xd1   : > { %s2407_s27 = scalar_lea.hbm %s3032_s17, 1408  ;;  %p2413_p12 = scmp.lt.u32.totalorder %s3032_s17, %s4035_s1 }
  0xd2   : > { %p2408_p9 = scmp.ne.s32.totalorder %s3032_s17, %s2407_s27  ;;  %p2414_p4 = scmp.lt.u32.totalorder %s2412_s13, %s2407_s27 }
  0xd3   : > { %p2416_p1 = scmp.lt.u32.totalorder %s2407_s27, %s3032_s17 }
  0xd4   : > { %p2410_p0 = pnand %p2409_p2, %p2408_p9  ;;  %p2415_p7 = por %p2414_p4, %p2413_p12 }
  0xd6   : > { %p2411_p13 = pneg %p2410_p0  ;;  %p2417_p11 = por %p2416_p1, %p2415_p7 }
  0xd8   : > { %p2418_p6 = pnand %p2417_p11, %p2411_p13 }
  0xda   : > { %2421 = shalt.err (!%p2418_p6)
}
  0xdb   : > { %s2422_s7 = scalar_lea.vmem %s3027_s18, 1408  ;;  %s2631_s16 = smov [#allocation7]  }
  0xdc   : > { %p2423_p5 = scmp.ne.s32.totalorder %s3027_s18, %s2422_s7  ;;  %s2427_s14 = sshll.u32 %s2631_s16, 4  ;;  %s2428_s14 = int_to_ptr.vmem [resolvable:$false] %s2427_s14 }
  0xdd   : > { %s2429_s30 = scalar_lea.vmem %s2428_s14, 2816  ;;  %p2430_p8 = scmp.lt.s32.totalorder %s3027_s18, %s2428_s14 }
  0xde   : > { %p2425_p9 = pnand %p2423_p5, %p2409_p2  ;;  %p2431_p12 = scmp.lt.s32.totalorder %s2429_s30, %s2422_s7 }
  0xe0   : > { %p2426_p0 = pneg %p2425_p9  ;;  %p2432_p4 = por %p2431_p12, %p2430_p8 }
  0xe2   : > { %p2433_p7 = pnand %p2432_p4, %p2426_p0 }
  0xe4   : > { %2436 = shalt.err (!%p2433_p7)
}
  0xe5   : > { %2073 = dma.hbm_to_vmem [thread:$0]  (!%p3019_p10), %s3032_s17, 1408, %s3027_s18, %s2883_s23, %s4025_s19, %s4025_s19, %s4024_s0  }
  0xe6   : > { %s4036_s5 = sld [smem:[#allocation29_spill]] }
  0xec   : > { %p4037_p2 = scmp.ne.s32.totalorder %s4036_s5, 0 }
  0xed   : > { %s350_s27 = sand.u32 (!%p4037_p2), 1, %s2595_s28  }
  0xee   : > { %348 = sbr.rel (%p4037_p2) target bundleno = 1146 (0x47a), region = 40  ;;  %s351_s24 = scalar_lea.sflag (!%p4037_p2), [#allocation3], %s350_s27 }
  0xef   : > { %s2035_s4 = smul.u32 (!%p4037_p2), 88, %s350_s27 }
  0xf1   : > { %s3066_s13 = scalar_lea.vmem (!%p4037_p2), [#allocation2], %s2035_s4 }
  0xf5   : > { %2534 = dma.done.wait (%p2946_p3), %s351_s24, 1408  }
  0xf6   : > { %2536 = vsyncadd (%p2946_p3), %s351_s24, 4294965888  ;;  %s4038_s12 = sld [smem:[#allocation22_spill]]  ;;  %s359_s2 = sand.u32 1, %s2756_s10  }
  0xf7   : > { %s360_s0 = scalar_lea.sflag [#allocation6], %s359_s2  ;;  %p4039_p8 = scmp.ne.s32.totalorder %s4011_s3, 0 }
  0xfc   : > { %s361_s18 = sand.u32 1, %s4038_s12  }
  0xfd   : > { %s2036_s23 = smul.u32 88, %s361_s18 }
  0xff   : > { %s3074_s19 = scalar_lea.vmem [#allocation5], %s2036_s23 }
 0x100   : > { %2538 = dma.done.wait (%p4039_p8), %s360_s0, 1408  }
 0x101   : > { %2540 = vsyncadd (%p4039_p8), %s360_s0, 4294965888  ;;  %s4040_s17 = sld [smem:[#allocation20_spill]]  ;;  %p4041_p3 = scmp.ne.s32.totalorder %s4032_s22, 0 }
 0x107   : > { %s370_s8 = sand.u32 1, %s4040_s17  }
 0x108   : > { %s2037_s7 = smul.u32 88, %s370_s8 }
 0x10a   : > { %s3081_s11 = scalar_lea.vmem [#allocation7], %s2037_s7 }
 0x10b   : > { %2542 = dma.done.wait (%p4041_p3), %s360_s0, 1408  }
 0x10c   : > { %2544 = vsyncadd (%p4041_p3), %s360_s0, 4294965888  ;;  %p4042_p10 = scmp.eq.s32.totalorder %s2756_s10, 0 }
 0x10e   : > { %2546 = dma.done.wait (%p4042_p10), [#allocation9], 768   ;;  %p4043_p13 = pmov %p4042_p10 }
 0x10f   : > { %s4044_s16 = sld [smem:[#allocation18_spill]]  ;;  %s4045_s3 = sld [smem:[#allocation23_spill]] }
 0x110   : > { %2548 = vsyncadd (%p4043_p13), [#allocation9], 4294966528 }
 0x115   : > { %s414_s14 = sand.u32 1, %s4044_s16   ;;  %p432_p1 = scmp.ge.s32.totalorder %s4045_s3, 1 }
 0x116   : > { %s2038_s30 = smul.u32 88, %s414_s14  ;;  %p433_p11 = scmp.lt.s32.totalorder %s4045_s3, 9 }
 0x118   : > { %p3096_p6 = pnand %p433_p11, %p432_p1  ;;  %s3100_s22 = scalar_lea.vmem [#allocation11], %s2038_s30 }
 0x119   : > { %v3105_v0 = vld [vmem:[%s3066_s13 + $0xc] ss:$44 sps:$4 sm:$0xff] (!%p3096_p6)   ;;  %v3108_v1 = vld [vmem:[%s3066_s13 + $0x4] ss:$44 sps:$4 sm:$0xff] (!%p3096_p6)   ;;  %s2632_s10 = smov (!%p3096_p6), 127   ;;  %s2633_s27 = smov (!%p3096_p6), 126  }
 0x11a   : > { %437 = sbr.rel (%p3096_p6) target bundleno = 1110 (0x456), region = 64  ;;  %525 = vrot.lane.b32.xlu1 (!%p3096_p6), %v3105_v0, %s2632_s10  ;;  %v3113_v2 = vld [vmem:[%s3066_s13 + $0x10] ss:$44 sps:$4 sm:$0xff] (!%p3096_p6)   ;;  %1134 = vmatprep.subr.bf16.mxu1 (!%p3096_p6), %v3105_v0  ;;  %v3119_v3 = vld [vmem:[%s3066_s13 + $0x8] ss:$44 sps:$4 sm:$0xff] (!%p3096_p6)   ;;  %s2634_s4 = smov (!%p3096_p6), 1  }
 0x11b   : > { %521 = vrot.lane.b32.xlu0 (!%p3096_p6), %v3108_v1, %s2632_s10  ;;  %v2244_v4 = vld [vmem:[%s3066_s13] ss:$44 sps:$4 sm:$0xff] (!%p3096_p6)   ;;  %1048 = vmatprep.subr.bf16.mxu0 (!%p3096_p6), %v3108_v1  ;;  %v3139_v6 = vld [vmem:[%s3074_s19 + $0xc] ss:$44 sps:$4 sm:$0xff] (!%p3096_p6)   ;;  %v3152_v8 = vld [vmem:[%s3074_s19 + $0x14] ss:$44 sps:$4 sm:$0xff] (!%p3096_p6)  }
 0x11c   : > { %1135 = vmatpush1.bf16.msra.mxu1 (!%p3096_p6), %v3119_v3  ;;  %1049 = vmatpush1.bf16.msra.mxu0 (!%p3096_p6), %v2244_v4  ;;  %v3136_v5 = vld [vmem:[%s3074_s19 + $0x10] ss:$44 sps:$4 sm:$0xff] (!%p3096_p6)   ;;  %v3147_v7 = vld [vmem:[%s3074_s19 + $0x18] ss:$44 sps:$4 sm:$0xff] (!%p3096_p6)   ;;  %v3157_v9 = vld [vmem:[%s3074_s19 + $0x8] ss:$44 sps:$4 sm:$0xff] (!%p3096_p6)  }
 0x11d   : > { %v3162_v10 = vld [vmem:[%s3074_s19 + $0x1c] ss:$44 sps:$4 sm:$0xff] (!%p3096_p6)   ;;  %v2254_v11 = vld [vmem:[%s3081_s11 + $0x4] ss:$44 sps:$4 sm:$0xff] (!%p3096_p6)   ;;  %v2259_v14 = vld [vmem:[%s3081_s11 + $0x8] ss:$44 sps:$4 sm:$0xff] (!%p3096_p6)  }
 0x11e   : > { %527 = vrot.lane.b32.xlu1 (!%p3096_p6), %v3113_v2, %s2632_s10  ;;  %v2256_v12 = vld [vmem:[%s3081_s11] ss:$44 sps:$4 sm:$0xff] (!%p3096_p6)   ;;  %v2261_v16 = vld [vmem:[%s3081_s11 + $0x10] ss:$44 sps:$4 sm:$0xff] (!%p3096_p6)   ;;  %v3193_v18 = vld [vmem:[%s3066_s13 + $0x18] ss:$44 sps:$4 sm:$0xff] (!%p3096_p6)  }
 0x11f   : > { %523 = vrot.lane.b32.xlu0 (!%p3096_p6), %v3119_v3, %s2632_s10  ;;  %v2257_v13 = vld [vmem:[%s3081_s11 + $0xc] ss:$44 sps:$4 sm:$0xff] (!%p3096_p6)   ;;  %v3176_v15 = vld [vmem:[%s3066_s13 + $0x14] ss:$44 sps:$4 sm:$0xff] (!%p3096_p6)   ;;  %v3203_v20 = vld [vmem:[%s3074_s19] ss:$44 sps:$4 sm:$0xff] (!%p3096_p6)  }
 0x120   : > { %v2263_v17 = vld [vmem:[%s3081_s11 + $0x14] ss:$44 sps:$4 sm:$0xff] (!%p3096_p6)   ;;  %v2266_v19 = vld [vmem:[%s3081_s11 + $0x18] ss:$44 sps:$4 sm:$0xff] (!%p3096_p6)   ;;  %v3220_v22 = vld [vmem:[%s3081_s11 + $0x1c] ss:$44 sps:$4 sm:$0xff] (!%p3096_p6)  }
 0x121   : > { %v3207_v21 = vld [vmem:[%s3074_s19 + $0x4] ss:$44 sps:$4 sm:$0xff]   ;;  %vm537_vm0 = vcmask 1039360   ;;  %vm572_vm1 = vcmask 1031168   ;;  %vm797_vm2 = vcmask 7168   ;;  %vm1044_vm3 = vcmask 392192  }
 0x122   : > { %556 = vrot.lane.b32.xlu1 %v3108_v1, %s2633_s27  ;;  %v3228_v23 = vld [vmem:[#allocation8 + $0x4] ss:$16 sps:$4 sm:$0xff]   ;;  %vm1558_vm4 = vcmask 11264   ;;  %vm1655_vm9 = vcmask 1043464   ;;  %vm1656_vm10 = vcmask 1047556   ;;  %vm1631_vm12 = vcmask 1043456  }
 0x123   : > { %519 = vrot.lane.b32.xlu0 %v2244_v4, %s2632_s10  ;;  %1166 = vmatprep.mubr.bf16.mxu1 %v3228_v23  ;;  %vm1657_vm11 = vmor %vm1656_vm10, %vm1655_vm9 }
 0x124   : > { %1080 = vmatprep.mubr.bf16.mxu0 %v3228_v23 }
 0x126   : > { %560 = vrot.lane.b32.xlu1 %v3105_v0, %s2633_s27 }
 0x127   : > { %558 = vrot.lane.b32.xlu0 %v3119_v3, %s2633_s27 }
 0x12a   : > { %554 = vrot.lane.b32.xlu1 %v2244_v4, %s2633_s27 }
 0x12b   : > { %562 = vrot.lane.b32.xlu0 %v3113_v2, %s2633_s27 }
 0x12e   : > { %668 = vrot.lane.b32.xlu1 %v3136_v5, %s2632_s10 }
 0x12f   : > { %666 = vrot.lane.b32.xlu0 %v3139_v6, %s2632_s10 }
 0x132   : > { %672 = vrot.lane.b32.xlu1 %v3147_v7, %s2632_s10 }
 0x133   : > { %670 = vrot.lane.b32.xlu0 %v3152_v8, %s2632_s10 }
 0x136   : > { %664 = vrot.lane.b32.xlu1 %v3157_v9, %s2632_s10 }
 0x137   : > { %674 = vrot.lane.b32.xlu0 %v3162_v10, %s2632_s10 }
 0x13a   : > { %783 = vrot.lane.b32.xlu1 %v2254_v11, %s2634_s4 }
 0x13b   : > { %781 = vrot.lane.b32.xlu0 %v2256_v12, %s2634_s4 }
 0x13e   : > { %787 = vrot.lane.b32.xlu1 %v2257_v13, %s2634_s4 }
 0x13f   : > { %785 = vrot.lane.b32.xlu0 %v2259_v14, %s2634_s4 }
 0x142   : > { %529 = vrot.lane.b32.xlu1 %v3176_v15, %s2632_s10 }
 0x143   : > { %789 = vrot.lane.b32.xlu0 %v2261_v16, %s2634_s4 }
 0x146   : > { %812 = vrot.lane.b32.xlu1 %v2254_v11, %s2632_s10 }
 0x147   : > { %564 = vrot.lane.b32.xlu0 %v3176_v15, %s2633_s27 }
 0x14a   : > { %816 = vrot.lane.b32.xlu1 %v2257_v13, %s2632_s10 }
 0x14b   : > { %814 = vrot.lane.b32.xlu0 %v2259_v14, %s2632_s10 }
 0x14e   : > { %820 = vrot.lane.b32.xlu1 %v2263_v17, %s2632_s10 }
 0x14f   : > { %818 = vrot.lane.b32.xlu0 %v2261_v16, %s2632_s10 }
 0x152   : > { %791 = vrot.lane.b32.xlu1 %v2263_v17, %s2634_s4 }
 0x153   : > { %810 = vrot.lane.b32.xlu0 %v2256_v12, %s2632_s10 }
 0x156   : > { %566 = vrot.lane.b32.xlu1 %v3193_v18, %s2633_s27 }
 0x157   : > { %531 = vrot.lane.b32.xlu0 %v3193_v18, %s2632_s10 }
 0x15a   : > { %793 = vrot.lane.b32.xlu1 %v2266_v19, %s2634_s4 }
 0x15b   : > { %822 = vrot.lane.b32.xlu0 %v2266_v19, %s2632_s10 }
 0x15e   : > { %660 = vrot.lane.b32.xlu1 %v3203_v20, %s2632_s10 }
 0x15f   : > { %662 = vrot.lane.b32.xlu0 %v3207_v21, %s2632_s10 }
 0x162   : > { %698 = vrot.lane.b32.xlu1 %v3157_v9, %s2633_s27 }
 0x163   : > { %696 = vrot.lane.b32.xlu0 %v3207_v21, %s2633_s27 }
 0x166   : > { %702 = vrot.lane.b32.xlu1 %v3136_v5, %s2633_s27 }
 0x167   : > { %700 = vrot.lane.b32.xlu0 %v3139_v6, %s2633_s27 }
 0x16a   : > { %824 = vrot.lane.b32.xlu1 %v3220_v22, %s2632_s10 }
 0x16b   : > { %694 = vrot.lane.b32.xlu0 %v3203_v20, %s2633_s27 }
 0x16f   : > { %704 = vrot.lane.b32.xlu0 %v3152_v8, %s2633_s27 }
 0x18c   : > { %v526_v24 = vpop.permute.xlu1 %525 }
 0x18d   : > { %v522_v25 = vpop.permute.xlu0 %521 }
 0x190   : > { %v3234_v26 = vpop.permute.xlu1 %527 }
 0x191   : > { %v524_v27 = vpop.permute.xlu0 %523  ;;  %v3238_v28 = vsel %vm537_vm0, %v526_v24, %v3234_v26 }
 0x192   : > { %1136 = vmatprep.subr.bf16.mxu1 %v3238_v28  ;;  %v540_v29 = vsel %vm537_vm0, %v524_v27, %v526_v24  ;;  %v539_v30 = vsel %vm537_vm0, %v522_v25, %v524_v27 }
 0x193   : > { %1137 = vmatpush1.bf16.msra.mxu1 %v540_v29  ;;  %1050 = vmatprep.subr.bf16.mxu0 %v539_v30 }
 0x194   : > { %v557_v31 = vpop.permute.xlu1 %556 }
 0x195   : > { %v520_v32 = vpop.permute.xlu0 %519 }
 0x196   : > { %v538_v33 = vsel %vm537_vm0, %v520_v32, %v522_v25 }
 0x197   : > { %1051 = vmatpush1.bf16.msra.mxu0 %v538_v33 }
 0x198   : > { %v561_v34 = vpop.permute.xlu1 %560 }
 0x199   : > { %v559_v35 = vpop.permute.xlu0 %558 }
 0x19a   : > { %v574_v36 = vsel %vm572_vm1, %v557_v31, %v559_v35  ;;  %v575_v41 = vsel %vm572_vm1, %v559_v35, %v561_v34 }
 0x19b   : > { %1052 = vmatprep.subr.bf16.mxu0 %v574_v36 }
 0x19c   : > { %v555_v37 = vpop.permute.xlu1 %554 }
 0x19d   : > { %v563_v38 = vpop.permute.xlu0 %562  ;;  %v573_v39 = vsel %vm572_vm1, %v555_v37, %v557_v31 }
 0x19e   : > { %1053 = vmatpush1.bf16.msra.mxu0 %v573_v39  ;;  %v576_v40 = vsel %vm572_vm1, %v561_v34, %v563_v38  ;;  %v3374_v39 = vld [vmem:[%s3066_s13 + $0x1c] ss:$44 sps:$4 sm:$0xff]  }
 0x19f   : > { %1138 = vmatprep.subr.bf16.mxu1 %v576_v40  ;;  %1054 = vmatprep.subr.bf16.mxu0 %v3119_v3 }
 0x1a0   : > { %1139 = vmatpush1.bf16.msra.mxu1 %v575_v41  ;;  %v669_v42 = vpop.permute.xlu1 %668 }
 0x1a1   : > { %v667_v43 = vpop.permute.xlu0 %666  ;;  %1140 = vmatprep.subr.bf16.mxu1 %v3113_v2 }
 0x1a2   : > { %v3251_v44 = vsel %vm537_vm0, %v667_v43, %v669_v42  ;;  %1055 = vmatpush1.bf16.msra.mxu0 %v3108_v1 }
 0x1a3   : > { %858 = vrot.lane.b32.xlu1 %v3251_v44, %s2632_s10  ;;  %1056 = vmatprep.subr.bf16.mxu0 %v540_v29 }
 0x1a4   : > { %v673_v45 = vpop.permute.xlu1 %672  ;;  %1141 = vmatpush1.bf16.msra.mxu1 %v3105_v0 }
 0x1a5   : > { %v671_v46 = vpop.permute.xlu0 %670 }
 0x1a6   : > { %v3258_v47 = vsel %vm537_vm0, %v671_v46, %v673_v45  ;;  %1057 = vmatpush1.bf16.msra.mxu0 %v539_v30  ;;  %v3277_v54 = vsel %vm537_vm0, %v669_v42, %v671_v46 }
 0x1a7   : > { %862 = vrot.lane.b32.xlu1 %v3258_v47, %s2632_s10  ;;  %1058 = vmatprep.subr.bf16.mxu0 %v575_v41 }
 0x1a8   : > { %v3262_v48 = vpop.permute.xlu1 %664 }
 0x1a9   : > { %v3266_v49 = vsel %vm537_vm0, %v3262_v48, %v667_v43  ;;  %v3268_v50 = vpop.permute.xlu0 %674 }
 0x1aa   : > { %1059 = vmatpush1.bf16.msra.mxu0 %v574_v36  ;;  %v3288_v58 = vsel %vm537_vm0, %v673_v45, %v3268_v50 }
 0x1ab   : > { %856 = vrot.lane.b32.xlu1 %v3266_v49, %s2632_s10  ;;  %1060 = vmatprep.subr.bf16.mxu0 %v3105_v0 }
 0x1ac   : > { %v784_v51 = vpop.permute.xlu1 %783 }
 0x1ad   : > { %v782_v52 = vpop.permute.xlu0 %781 }
 0x1ae   : > { %874 = vrot.lane.b32.xlu0 %v782_v52, %s2632_s10  ;;  %1061 = vmatpush1.bf16.msra.mxu0 %v3119_v3  ;;  %v798_v0 = vsel %vm797_vm2, %v782_v52, %v784_v51 }
 0x1af   : > { %1062 = vmatprep.subr.bf16.mxu0 %v3238_v28 }
 0x1b0   : > { %v788_v53 = vpop.permute.xlu1 %787 }
 0x1b1   : > { %v3279_v55 = vpop.permute.xlu0 %785 }
 0x1b2   : > { %860 = vrot.lane.b32.xlu0 %v3277_v54, %s2632_s10  ;;  %v799_v56 = vsel %vm797_vm2, %v784_v51, %v3279_v55  ;;  %1063 = vmatpush1.bf16.msra.mxu0 %v540_v29  ;;  %v800_v11 = vsel %vm797_vm2, %v3279_v55, %v788_v53 }
 0x1b3   : > { %878 = vrot.lane.b32.xlu1 %v799_v56, %s2632_s10  ;;  %1064 = vmatprep.subr.bf16.mxu0 %v576_v40 }
 0x1b4   : > { %v530_v57 = vpop.permute.xlu1 %529 }
 0x1b5   : > { %v790_v59 = vpop.permute.xlu0 %789  ;;  %v3292_v60 = vsel %vm537_vm0, %v3234_v26, %v530_v57 }
 0x1b6   : > { %864 = vrot.lane.b32.xlu0 %v3288_v58, %s2632_s10  ;;  %1142 = vmatprep.subr.bf16.mxu1 %v3292_v60  ;;  %v801_v61 = vsel %vm797_vm2, %v788_v53, %v790_v59 }
 0x1b7   : > { %882 = vrot.lane.b32.xlu1 %v801_v61, %s2632_s10  ;;  %1065 = vmatpush1.bf16.msra.mxu0 %v575_v41 }
 0x1b8   : > { %1143 = vmatpush1.bf16.msra.mxu1 %v3238_v28  ;;  %v813_v62 = vpop.permute.xlu1 %812  ;;  %1066 = vmatprep.subr.bf16.mxu0 %v3207_v21 }
 0x1b9   : > { %v565_v63 = vpop.permute.xlu0 %564 }
 0x1ba   : > { %876 = vrot.lane.b32.xlu0 %v798_v0, %s2632_s10  ;;  %v3304_v1 = vsel %vm572_vm1, %v563_v38, %v565_v63  ;;  %v3427_v0 = vld [vmem:[%s3074_s19 + $0x24] ss:$44 sps:$4 sm:$0xff]  }
 0x1bb   : > { %1144 = vmatprep.subr.bf16.mxu1 %v3304_v1  ;;  %1067 = vmatpush1.bf16.msra.mxu0 %v3203_v20 }
 0x1bc   : > { %1145 = vmatpush1.bf16.msra.mxu1 %v576_v40  ;;  %v817_v3 = vpop.permute.xlu1 %816 }
 0x1bd   : > { %v815_v4 = vpop.permute.xlu0 %814  ;;  %1146 = vmatprep.subr.bf16.mxu1 %v3176_v15 }
 0x1be   : > { %880 = vrot.lane.b32.xlu0 %v800_v11, %s2632_s10  ;;  %v3313_v12 = vsel %vm537_vm0, %v813_v62, %v815_v4  ;;  %v3319_v14 = vsel %vm537_vm0, %v815_v4, %v817_v3  ;;  %v3439_v4 = vld [vmem:[#allocation8] ss:$16 sps:$4 sm:$0xff]   ;;  %v3442_v11 = vld [vmem:[#allocation8 + $0xc] ss:$16 sps:$4 sm:$0xff]  }
 0x1bf   : > { %894 = vrot.lane.b32.xlu1 %v3313_v12, %s2632_s10 }
 0x1c0   : > { %v821_v13 = vpop.permute.xlu1 %820  ;;  %1147 = vmatpush1.bf16.msra.mxu1 %v3113_v2 }
 0x1c1   : > { %v819_v16 = vpop.permute.xlu0 %818 }
 0x1c2   : > { %v3322_v17 = vsel %vm537_vm0, %v817_v3, %v819_v16  ;;  %896 = vrot.lane.b32.xlu0 %v3319_v14, %s2632_s10  ;;  %v3329_v20 = vsel %vm537_vm0, %v819_v16, %v821_v13  ;;  %v2284_v3 = vld [vmem:[%s3066_s13 + $0x28] ss:$44 sps:$4 sm:$0xff]  }
 0x1c3   : > { %898 = vrot.lane.b32.xlu1 %v3322_v17, %s2632_s10 }
 0x1c4   : > { %v792_v19 = vpop.permute.xlu1 %791 }
 0x1c5   : > { %v811_v24 = vpop.permute.xlu0 %810  ;;  %v802_v28 = vsel %vm797_vm2, %v790_v59, %v792_v19  ;;  %v2277_v59 = vld [vmem:[%s3074_s19 + $0x28] ss:$44 sps:$4 sm:$0xff]  }
 0x1c6   : > { %900 = vrot.lane.b32.xlu0 %v3329_v20, %s2632_s10  ;;  %v3334_v25 = vsel %vm537_vm0, %v811_v24, %v813_v62  ;;  %v3415_v62 = vld [vmem:[%s3066_s13 + $0x24] ss:$44 sps:$4 sm:$0xff]  }
 0x1c7   : > { %892 = vrot.lane.b32.xlu1 %v3334_v25, %s2632_s10 }
 0x1c8   : > { %v3338_v26 = vpop.permute.xlu1 %566 }
 0x1c9   : > { %v3340_v27 = vpop.permute.xlu0 %531  ;;  %v3355_v31 = vsel %vm572_vm1, %v565_v63, %v3338_v26 }
 0x1ca   : > { %884 = vrot.lane.b32.xlu0 %v802_v28, %s2632_s10  ;;  %v3346_v29 = vsel %vm537_vm0, %v530_v57, %v3340_v27  ;;  %v3400_v57 = vld [vmem:[%s3066_s13 + $0x20] ss:$44 sps:$4 sm:$0xff]  }
 0x1cb   : > { %910 = vrot.lane.b32.xlu1 %v784_v51, %s2632_s10  ;;  %1148 = vmatprep.subr.bf16.mxu1 %v3346_v29  ;;  %v3387_v51 = vld [vmem:[%s3074_s19 + $0x20] ss:$44 sps:$4 sm:$0xff]  }
 0x1cc   : > { %1149 = vmatpush1.bf16.msra.mxu1 %v3292_v60  ;;  %v3351_v30 = vpop.permute.xlu1 %793 }
 0x1cd   : > { %1150 = vmatprep.subr.bf16.mxu1 %v3355_v31  ;;  %v823_v32 = vpop.permute.xlu0 %822  ;;  %v803_v33 = vsel %vm797_vm2, %v792_v19, %v3351_v30 }
 0x1ce   : > { %v3361_v34 = vsel %vm537_vm0, %v821_v13, %v823_v32  ;;  %v2286_v13 = vld [vmem:[%s3081_s11 + $0x24] ss:$44 sps:$4 sm:$0xff]  }
 0x1cf   : > { %886 = vrot.lane.b32.xlu1 %v803_v33, %s2632_s10  ;;  %902 = vrot.lane.b32.xlu0 %v3361_v34, %s2632_s10 }
 0x1d0   : > { %1151 = vmatpush1.bf16.msra.mxu1 %v3304_v1  ;;  %v661_v35 = vpop.permute.xlu1 %660 }
 0x1d1   : > { %v663_v36 = vpop.permute.xlu0 %662  ;;  %1152 = vmatprep.subr.bf16.mxu1 %v3139_v6 }
 0x1d2   : > { %v679_v37 = vsel %vm537_vm0, %v663_v36, %v3262_v48  ;;  %v678_v38 = vsel %vm537_vm0, %v661_v35, %v663_v36 }
 0x1d3   : > { %920 = vrot.lane.b32.xlu0 %v3279_v55, %s2632_s10  ;;  %1068 = vmatprep.subr.bf16.mxu0 %v679_v37 }
 0x1d4   : > { %1069 = vmatpush1.bf16.msra.mxu0 %v678_v38  ;;  %1153 = vmatpush1.bf16.msra.mxu1 %v3157_v9  ;;  %v699_v40 = vpop.permute.xlu1 %698 }
 0x1d5   : > { %1154 = vmatprep.subr.bf16.mxu1 %v3251_v44  ;;  %v697_v41 = vpop.permute.xlu0 %696 }
 0x1d6   : > { %v713_v42 = vsel %vm572_vm1, %v697_v41, %v699_v40 }
 0x1d7   : > { %533 = vrot.lane.b32.xlu0 %v3374_v39, %s2632_s10  ;;  %1070 = vmatprep.subr.bf16.mxu0 %v713_v42 }
 0x1d8   : > { %1155 = vmatpush1.bf16.msra.mxu1 %v3266_v49  ;;  %v703_v43 = vpop.permute.xlu1 %702 }
 0x1d9   : > { %v701_v45 = vpop.permute.xlu0 %700 }
 0x1da   : > { %v715_v46 = vsel %vm572_vm1, %v701_v45, %v703_v43  ;;  %v714_v48 = vsel %vm572_vm1, %v699_v40, %v701_v45 }
 0x1db   : > { %568 = vrot.lane.b32.xlu0 %v3374_v39, %s2633_s27  ;;  %1156 = vmatprep.subr.bf16.mxu1 %v715_v46 }
 0x1dc   : > { %1157 = vmatpush1.bf16.msra.mxu1 %v714_v48  ;;  %v3389_v52 = vpop.permute.xlu1 %824 }
 0x1dd   : > { %v3393_v53 = vsel %vm537_vm0, %v823_v32, %v3389_v52  ;;  %v695_v55 = vpop.permute.xlu0 %694  ;;  %1158 = vmatprep.subr.bf16.mxu1 %v3136_v5 }
 0x1de   : > { %904 = vrot.lane.b32.xlu1 %v3393_v53, %s2632_s10  ;;  %v712_v56 = vsel %vm572_vm1, %v695_v55, %v697_v41 }
 0x1df   : > { %676 = vrot.lane.b32.xlu0 %v3387_v51, %s2632_s10  ;;  %1071 = vmatpush1.bf16.msra.mxu0 %v712_v56 }
 0x1e0   : > { %1159 = vmatpush1.bf16.msra.mxu1 %v3139_v6  ;;  %1072 = vmatprep.subr.bf16.mxu0 %v3157_v9 }
 0x1e1   : > { %1160 = vmatprep.subr.bf16.mxu1 %v3277_v54  ;;  %v3408_v61 = vpop.permute.xlu0 %704 }
 0x1e2   : > { %535 = vrot.lane.b32.xlu1 %v3400_v57, %s2632_s10  ;;  %v3421_v63 = vsel %vm572_vm1, %v703_v43, %v3408_v61 }
 0x1e3   : > { %746 = vrot.lane.b32.xlu0 %v2277_v59, %s2632_s10  ;;  %1073 = vmatpush1.bf16.msra.mxu0 %v3207_v21  ;;  %v2280_v21 = vld [vmem:[%s3081_s11 + $0x20] ss:$44 sps:$4 sm:$0xff]  }
 0x1e4   : > { %1074 = vmatprep.subr.bf16.mxu0 %v3266_v49  ;;  %1161 = vmatpush1.bf16.msra.mxu1 %v3251_v44 }
 0x1e5   : > { %1162 = vmatprep.subr.bf16.mxu1 %v3421_v63 }
 0x1e6   : > { %570 = vrot.lane.b32.xlu1 %v3400_v57, %s2633_s27 }
 0x1e7   : > { %593 = vrot.lane.b32.xlu0 %v3415_v62, %s2632_s10  ;;  %1075 = vmatpush1.bf16.msra.mxu0 %v679_v37 }
 0x1e8   : > { %1076 = vmatprep.subr.bf16.mxu0 %v714_v48  ;;  %1163 = vmatpush1.bf16.msra.mxu1 %v715_v46 }
 0x1e9   : > { %1164 = vmatprep.subr.bf16.mxu1 %v3152_v8 }
 0x1ea   : > { %732 = vrot.lane.b32.xlu1 %v3427_v0, %s2632_s10 }
 0x1eb   : > { %826 = vrot.lane.b32.xlu0 %v2280_v21, %s2632_s10  ;;  %1077 = vmatpush1.bf16.msra.mxu0 %v713_v42 }
 0x1ec   : > { %1165 = vmatpush1.bf16.msra.mxu1 %v3136_v5  ;;  %1078 = vmatprep.subr.bf16.mxu0 %v3139_v6  ;;  %v2287_v6 = vld [vmem:[%s3081_s11 + $0x28] ss:$44 sps:$4 sm:$0xff]  }
 0x1ed   : > { %1177 = vmatprep.subr.bf16.mxu1 %v3258_v47 }
 0x1ee   : > { %795 = vrot.lane.b32.xlu1 %v3220_v22, %s2634_s4  ;;  %v2635_v22 = vmov 0  }
 0x1ef   : > { %607 = vrot.lane.b32.xlu0 %v2284_v3, %s2632_s10  ;;  %1079 = vmatpush1.bf16.msra.mxu0 %v3157_v9  ;;  %1559 = vst.msk [vmem:[%s3100_s22 + $0x28] sm:$0xf] %vm1558_vm4, %v2635_v22  ;;  %1565 = vst.msk [vmem:[%s3100_s22 + $0x54] sm:$0xf] %vm1558_vm4, %v2635_v22 }
 0x1f0   : > { %1091 = vmatprep.subr.bf16.mxu0 %v3251_v44  ;;  %1167 = vmatmul.mubr.bf16.vlgmr.msra.gmra.mrb[0].mxu1 %v3439_v4  ;;  %1553 = vst [vmem:[%s3100_s22] sm:$0xff] %v2635_v22  ;;  %1554 = vst [vmem:[%s3100_s22 + $0x8] sm:$0xff] %v2635_v22 }
 0x1f1   : > { %1178 = vmatpush1.bf16.msra.mxu1 %v3277_v54  ;;  %1954 = vmatprep.mubr.msk.bf16.mxu1 %vm1044_vm3, %v3442_v11  ;;  %1555 = vst [vmem:[%s3100_s22 + $0x10] sm:$0xff] %v2635_v22  ;;  %1556 = vst [vmem:[%s3100_s22 + $0x18] sm:$0xff] %v2635_v22 }
 0x1f2   : > { %597 = vrot.lane.b32.xlu1 %v3415_v62, %s2633_s27  ;;  %1081 = vmatmul.mubr.bf16.vlgmr.msra.gmra.mrb[0].mxu0 %v3439_v4  ;;  %1557 = vst [vmem:[%s3100_s22 + $0x20] sm:$0xff] %v2635_v22  ;;  %1560 = vst [vmem:[%s3100_s22 + $0x2c] sm:$0xff] %v2635_v22 }
 0x1f3   : > { %842 = vrot.lane.b32.xlu0 %v2286_v13, %s2632_s10  ;;  %1092 = vmatpush1.bf16.msra.mxu0 %v3266_v49  ;;  %1561 = vst [vmem:[%s3100_s22 + $0x34] sm:$0xff] %v2635_v22  ;;  %1562 = vst [vmem:[%s3100_s22 + $0x3c] sm:$0xff] %v2635_v22 }
 0x1f4   : > { %1953 = vmatprep.mubr.msk.bf16.mxu0 %vm1044_vm3, %v3442_v11  ;;  %2235 = vset.pattern.permute.xlu1 %v2635_v22  ;;  %1563 = vst [vmem:[%s3100_s22 + $0x44] sm:$0xff] %v2635_v22  ;;  %1564 = vst [vmem:[%s3100_s22 + $0x4c] sm:$0xff] %v2635_v22 }
 0x1f5   : > { %2236 = vset.pattern.permute.xlu0 %v2635_v22 }
 0x1f6   : > { %836 = vrot.lane.b32.xlu1 %v2280_v21, %s2634_s4 }
 0x1f7   : > { %706 = vrot.lane.b32.xlu0 %v3147_v7, %s2633_s27 }
 0x1fa   : > { %611 = vrot.lane.b32.xlu1 %v2284_v3, %s2633_s27 }
 0x1fb   : > { %710 = vrot.lane.b32.xlu0 %v3387_v51, %s2633_s27 }
 0x1fe   : > { %845 = vrot.lane.b32.xlu1 %v2286_v13, %s2634_s4 }
 0x1ff   : > { %736 = vrot.lane.b32.xlu0 %v3427_v0, %s2633_s27 }
 0x202   : > { %708 = vrot.lane.b32.xlu1 %v3162_v10, %s2633_s27 }
 0x206   : > { %853 = vrot.lane.b32.xlu1 %v2287_v6, %s2632_s10 }
 0x215   : > { %v859_v9 = vpop.permute.xlu1 %858 }
 0x219   : > { %v863_v44 = vpop.permute.xlu1 %862 }
 0x21d   : > { %v857_v16 = vpop.permute.xlu1 %856 }
 0x21e   : > { %v930_v28 = vsel %vm537_vm0, %v857_v16, %v859_v9 }
 0x220   : > { %v875_v49 = vpop.permute.xlu0 %874 }
 0x224   : > { %v861_v19 = vpop.permute.xlu0 %860 }
 0x225   : > { %v931_v24 = vsel %vm537_vm0, %v859_v9, %v861_v19  ;;  %v879_v32 = vpop.permute.xlu1 %878  ;;  %v932_v36 = vsel %vm537_vm0, %v861_v19, %v863_v44 }
 0x226   : > { %1093 = vmatprep.subr.bf16.mxu0 %v931_v24 }
 0x227   : > { %1094 = vmatpush1.bf16.msra.mxu0 %v930_v28 }
 0x228   : > { %v3488_v33 = vpop.permute.xlu0 %864 }
 0x229   : > { %v933_v35 = vsel %vm537_vm0, %v863_v44, %v3488_v33  ;;  %v883_v38 = vpop.permute.xlu1 %882 }
 0x22a   : > { %1179 = vmatprep.subr.bf16.mxu1 %v933_v35 }
 0x22b   : > { %1180 = vmatpush1.bf16.msra.mxu1 %v932_v36 }
 0x22c   : > { %v877_v37 = vpop.permute.xlu0 %876 }
 0x22d   : > { %v938_v40 = vsel %vm537_vm0, %v875_v49, %v877_v37  ;;  %v939_v41 = vsel %vm537_vm0, %v877_v37, %v879_v32 }
 0x22e   : > { %1095 = vmatprep.subr.bf16.mxu0 %v939_v41 }
 0x22f   : > { %1096 = vmatpush1.bf16.msra.mxu0 %v938_v40 }
 0x230   : > { %v881_v42 = vpop.permute.xlu0 %880  ;;  %1097 = vmatprep.subr.bf16.mxu0 %v3313_v12 }
 0x231   : > { %v895_v43 = vpop.permute.xlu1 %894  ;;  %v941_v45 = vsel %vm537_vm0, %v881_v42, %v883_v38  ;;  %v940_v46 = vsel %vm537_vm0, %v879_v32, %v881_v42 }
 0x232   : > { %1181 = vmatprep.subr.bf16.mxu1 %v941_v45 }
 0x233   : > { %1098 = vmatpush1.bf16.msra.mxu0 %v3334_v25  ;;  %1182 = vmatpush1.bf16.msra.mxu1 %v940_v46 }
 0x234   : > { %1183 = vmatprep.subr.bf16.mxu1 %v3322_v17  ;;  %v897_v48 = vpop.permute.xlu0 %896 }
 0x235   : > { %v899_v55 = vpop.permute.xlu1 %898  ;;  %v947_v56 = vsel %vm537_vm0, %v895_v43, %v897_v48 }
 0x236   : > { %1099 = vmatprep.subr.bf16.mxu0 %v947_v56  ;;  %v948_v13 = vsel %vm537_vm0, %v897_v48, %v899_v55 }
 0x237   : > { %1184 = vmatpush1.bf16.msra.mxu1 %v3319_v14 }
 0x238   : > { %v901_v59 = vpop.permute.xlu0 %900 }
 0x239   : > { %v893_v21 = vpop.permute.xlu1 %892  ;;  %v949_v3 = vsel %vm537_vm0, %v899_v55, %v901_v59 }
 0x23a   : > { %v946_v6 = vsel %vm537_vm0, %v893_v21, %v895_v43  ;;  %1185 = vmatprep.subr.bf16.mxu1 %v949_v3 }
 0x23b   : > { %1100 = vmatpush1.bf16.msra.mxu0 %v946_v6  ;;  %1186 = vmatpush1.bf16.msra.mxu1 %v948_v13 }
 0x23c   : > { %v885_v25 = vpop.permute.xlu0 %884  ;;  %1101 = vmatprep.subr.bf16.mxu0 %v940_v46 }
 0x23d   : > { %v911_v9 = vpop.permute.xlu1 %910  ;;  %v3506_v22 = vsel %vm537_vm0, %v883_v38, %v885_v25 }
 0x23e   : > { %v954_v44 = vsel %vm537_vm0, %v911_v9, %v879_v32  ;;  %1187 = vmatprep.subr.bf16.mxu1 %v3506_v22 }
 0x23f   : > { %1102 = vmatpush1.bf16.msra.mxu0 %v954_v44  ;;  %1188 = vmatpush1.bf16.msra.mxu1 %v941_v45 }
 0x240   : > { %1103 = vmatprep.subr.bf16.mxu0 %v3319_v14  ;;  %1189 = vmatprep.subr.bf16.mxu1 %v3329_v20 }
 0x241   : > { %v903_v49 = vpop.permute.xlu0 %902  ;;  %v3517_v19 = vpop.permute.xlu1 %886 }
 0x242   : > { %v3513_v16 = vsel %vm537_vm0, %v901_v59, %v903_v49  ;;  %v3522_v28 = vsel %vm537_vm0, %v885_v25, %v3517_v19 }
 0x243   : > { %1104 = vmatpush1.bf16.msra.mxu0 %v3313_v12  ;;  %1190 = vmatpush1.bf16.msra.mxu1 %v3322_v17 }
 0x244   : > { %1105 = vmatprep.subr.bf16.mxu0 %v948_v13  ;;  %1191 = vmatprep.subr.bf16.mxu1 %v3513_v16 }
 0x245   : > { %v921_v24 = vpop.permute.xlu0 %920 }
 0x246   : > { %v959_v12 = vsel %vm537_vm0, %v921_v24, %v881_v42  ;;  %v1014_v24 = vld [vmem:[#allocation10 + $0x8] sm:$0xff] }
 0x247   : > { %1106 = vmatpush1.bf16.msra.mxu0 %v947_v56  ;;  %1192 = vmatpush1.bf16.msra.mxu1 %v949_v3 }
 0x248   : > { %1107 = vmatprep.subr.bf16.mxu0 %v941_v45  ;;  %1193 = vmatprep.subr.bf16.mxu1 %v3522_v28 }
 0x249   : > { %v534_v32 = vpop.permute.xlu0 %533 }
 0x24a   : > { %v544_v45 = vsel %vm537_vm0, %v3340_v27, %v534_v32 }
 0x24b   : > { %1108 = vmatpush1.bf16.msra.mxu0 %v959_v12  ;;  %1194 = vmatpush1.bf16.msra.mxu1 %v3506_v22 }
 0x24c   : > { %1109 = vmatprep.subr.bf16.mxu0 %v3322_v17  ;;  %1195 = vmatprep.subr.bf16.mxu1 %v3361_v34  ;;  %v3542_v17 = vld [vmem:[#allocation8 + $0x8] ss:$16 sps:$4 sm:$0xff]  }
 0x24d   : > { %v569_v35 = vpop.permute.xlu0 %568 }
 0x24f   : > { %1110 = vmatpush1.bf16.msra.mxu0 %v3319_v14  ;;  %1196 = vmatpush1.bf16.msra.mxu1 %v3329_v20 }
 0x250   : > { %1111 = vmatprep.subr.bf16.mxu0 %v949_v3  ;;  %v3531_v36 = vpop.permute.xlu1 %904 }
 0x251   : > { %v677_v37 = vpop.permute.xlu0 %676  ;;  %v3535_v38 = vsel %vm537_vm0, %v903_v49, %v3531_v36  ;;  %v1013_v49 = vld [vmem:[#allocation10] sm:$0xff] }
 0x252   : > { %v3539_v40 = vsel %vm537_vm0, %v3268_v50, %v677_v37  ;;  %1197 = vmatprep.subr.bf16.mxu1 %v3535_v38 }
 0x253   : > { %866 = vrot.lane.b32.xlu1 %v3539_v40, %s2632_s10  ;;  %1112 = vmatpush1.bf16.msra.mxu0 %v948_v13 }
 0x254   : > { %1198 = vmatpush1.bf16.msra.mxu1 %v3513_v16  ;;  %v536_v14 = vpop.permute.xlu1 %535  ;;  %1220 = vmatprep.subr.bf16.mxu0 %v3176_v15 }
 0x255   : > { %v747_v41 = vpop.permute.xlu0 %746  ;;  %1306 = vmatprep.subr.bf16.mxu1 %v3374_v39  ;;  %v545_v42 = vsel %vm537_vm0, %v534_v32, %v536_v14 }
 0x256   : > { %1124 = vmatmul.mubr.bf16.vlgmr.msra.gmra.mrb[0].mxu0 %v3542_v17 }
 0x257   : > { %1221 = vmatpush1.bf16.msra.mxu0 %v3113_v2  ;;  %1210 = vmatmul.mubr.bf16.vlgmr.msra.gmra.mrb[0].mxu1 %v3542_v17 }
 0x258   : > { %1222 = vmatprep.subr.bf16.mxu0 %v3346_v29  ;;  %1307 = vmatpush1.bf16.msra.mxu1 %v3193_v18  ;;  %v571_v50 = vpop.permute.xlu1 %570 }
 0x259   : > { %1308 = vmatprep.subr.bf16.mxu1 %v545_v42  ;;  %v594_v43 = vpop.permute.xlu0 %593  ;;  %1252 = vmatprep.mubr.bf16.mxu0 %v3228_v23  ;;  %v580_v46 = vsel %vm572_vm1, %v569_v35, %v571_v50 }
 0x25a   : > { %1338 = vmatprep.mubr.bf16.mxu1 %v3228_v23  ;;  %v579_v23 = vsel %vm572_vm1, %v3338_v26, %v569_v35  ;;  %v595_v26 = vsel %vm537_vm0, %v536_v14, %v594_v43 }
 0x25b   : > { %1223 = vmatpush1.bf16.msra.mxu0 %v3292_v60 }
 0x25c   : > { %1224 = vmatprep.subr.bf16.mxu0 %v3355_v31  ;;  %1309 = vmatpush1.bf16.msra.mxu1 %v544_v45  ;;  %v733_v2 = vpop.permute.xlu1 %732 }
 0x25d   : > { %1310 = vmatprep.subr.bf16.mxu1 %v580_v46  ;;  %v3563_v48 = vsel %vm537_vm0, %v677_v37, %v733_v2  ;;  %v3566_v55 = vsel %vm537_vm0, %v733_v2, %v747_v41  ;;  %v827_v56 = vpop.permute.xlu0 %826 }
 0x25e   : > { %868 = vrot.lane.b32.xlu0 %v3563_v48, %s2632_s10  ;;  %870 = vrot.lane.b32.xlu1 %v3566_v55, %s2632_s10  ;;  %v3586_v21 = vsel %vm537_vm0, %v3389_v52, %v827_v56 }
 0x25f   : > { %1225 = vmatpush1.bf16.msra.mxu0 %v3304_v1 }
 0x260   : > { %1311 = vmatpush1.bf16.msra.mxu1 %v579_v23  ;;  %v796_v60 = vpop.permute.xlu1 %795  ;;  %1226 = vmatprep.subr.bf16.mxu0 %v3193_v18 }
 0x261   : > { %1312 = vmatprep.subr.bf16.mxu1 %v3400_v57  ;;  %v804_v27 = vsel %vm797_vm2, %v3351_v30, %v796_v60  ;;  %v608_v59 = vpop.permute.xlu0 %607 }
 0x262   : > { %888 = vrot.lane.b32.xlu1 %v804_v27, %s2632_s10  ;;  %872 = vrot.lane.b32.xlu0 %v747_v41, %s2632_s10  ;;  %v609_v6 = vsel %vm537_vm0, %v594_v43, %v608_v59 }
 0x263   : > { %1227 = vmatpush1.bf16.msra.mxu0 %v3176_v15 }
 0x264   : > { %1228 = vmatprep.subr.bf16.mxu0 %v544_v45  ;;  %1313 = vmatpush1.bf16.msra.mxu1 %v3374_v39  ;;  %v598_v1 = vpop.permute.xlu1 %597 }
 0x265   : > { %1314 = vmatprep.subr.bf16.mxu1 %v595_v26  ;;  %v599_v30 = vsel %vm572_vm1, %v571_v50, %v598_v1  ;;  %v843_v13 = vpop.permute.xlu0 %842 }
 0x266   : > { %890 = vrot.lane.b32.xlu0 %v796_v60, %s2632_s10  ;;  %906 = vrot.lane.b32.xlu1 %v3586_v21, %s2632_s10  ;;  %v3598_v52 = vsel %vm537_vm0, %v827_v56, %v843_v13 }
 0x267   : > { %1229 = vmatpush1.bf16.msra.mxu0 %v3346_v29 }
 0x268   : > { %1230 = vmatprep.subr.bf16.mxu0 %v579_v23  ;;  %1315 = vmatpush1.bf16.msra.mxu1 %v545_v42  ;;  %v837_v15 = vpop.permute.xlu1 %836 }
 0x269   : > { %1316 = vmatprep.subr.bf16.mxu1 %v599_v30  ;;  %v838_v3 = vsel %vm797_vm2, %v796_v60, %v837_v15 }
 0x26a   : > { %912 = vrot.lane.b32.xlu1 %v838_v3, %s2632_s10  ;;  %908 = vrot.lane.b32.xlu0 %v827_v56, %s2632_s10 }
 0x26b   : > { %1231 = vmatpush1.bf16.msra.mxu0 %v3355_v31 }
 0x26c   : > { %1317 = vmatpush1.bf16.msra.mxu1 %v580_v46  ;;  %v612_v29 = vpop.permute.xlu1 %611  ;;  %1232 = vmatprep.subr.bf16.mxu0 %v3374_v39 }
 0x26d   : > { %1318 = vmatprep.subr.bf16.mxu1 %v3415_v62  ;;  %v613_v62 = vsel %vm572_vm1, %v598_v1, %v612_v29 }
 0x26e   : > { %914 = vrot.lane.b32.xlu0 %v837_v15, %s2632_s10  ;;  %916 = vrot.lane.b32.xlu1 %v3598_v52, %s2632_s10 }
 0x26f   : > { %1233 = vmatpush1.bf16.msra.mxu0 %v3193_v18  ;;  %v707_v18 = vpop.permute.xlu0 %706 }
 0x270   : > { %1234 = vmatprep.subr.bf16.mxu0 %v545_v42  ;;  %1319 = vmatpush1.bf16.msra.mxu1 %v3400_v57  ;;  %v846_v31 = vpop.permute.xlu1 %845  ;;  %v717_v12 = vsel %vm572_vm1, %v3408_v61, %v707_v18 }
 0x271   : > { %1320 = vmatprep.subr.bf16.mxu1 %v609_v6  ;;  %v847_v25 = vsel %vm797_vm2, %v837_v15, %v846_v31 }
 0x272   : > { %922 = vrot.lane.b32.xlu1 %v847_v25, %s2632_s10  ;;  %918 = vrot.lane.b32.xlu0 %v843_v13, %s2632_s10 }
 0x273   : > { %1235 = vmatpush1.bf16.msra.mxu0 %v544_v45  ;;  %v711_v44 = vpop.permute.xlu0 %710 }
 0x274   : > { %1236 = vmatprep.subr.bf16.mxu0 %v580_v46  ;;  %1321 = vmatpush1.bf16.msra.mxu1 %v595_v26  ;;  %v709_v39 = vpop.permute.xlu1 %708 }
 0x275   : > { %1322 = vmatprep.subr.bf16.mxu1 %v613_v62  ;;  %v719_v32 = vsel %vm572_vm1, %v709_v39, %v711_v44 }
 0x276   : > { %924 = vrot.lane.b32.xlu0 %v846_v31, %s2632_s10 }
 0x277   : > { %1237 = vmatpush1.bf16.msra.mxu0 %v579_v23  ;;  %v737_v35 = vpop.permute.xlu0 %736 }
 0x278   : > { %1323 = vmatpush1.bf16.msra.mxu1 %v599_v30  ;;  %v854_v57 = vpop.permute.xlu1 %853  ;;  %1238 = vmatprep.subr.bf16.mxu0 %v3152_v8 }
 0x279   : > { %v3615_v9 = vsel %vm537_vm0, %v843_v13, %v854_v57  ;;  %1324 = vmatprep.subr.bf16.mxu1 %v3162_v10 }
 0x27a   : > { %926 = vrot.lane.b32.xlu1 %v3615_v9, %s2632_s10  ;;  %928 = vrot.lane.b32.xlu0 %v854_v57, %s2632_s10 }
 0x27b   : > { %1239 = vmatpush1.bf16.msra.mxu0 %v3136_v5  ;;  %v718_v5 = vsel %vm572_vm1, %v707_v18, %v709_v39 }
 0x27c   : > { %1240 = vmatprep.subr.bf16.mxu0 %v3258_v47  ;;  %1325 = vmatpush1.bf16.msra.mxu1 %v3147_v7 }
 0x27d   : > { %1326 = vmatprep.subr.bf16.mxu1 %v3539_v40 }
 0x27e   : > { %1017 = vperm.xlu1 %2235, %v1013_v49   ;;  %1022 = vperm.xlu0 %2236, %v1014_v24  }
 0x27f   : > { %1241 = vmatpush1.bf16.msra.mxu0 %v3277_v54  ;;  %v738_v54 = vsel %vm572_vm1, %v711_v44, %v737_v35  ;;  %vm1662_vm1 = vcmask 3072  }
 0x280   : > { %1242 = vmatprep.subr.bf16.mxu0 %v717_v12  ;;  %1327 = vmatpush1.bf16.msra.mxu1 %v3288_v58 }
 0x281   : > { %1328 = vmatprep.subr.bf16.mxu1 %v719_v32 }
 0x283   : > { %1243 = vmatpush1.bf16.msra.mxu0 %v3421_v63 }
 0x284   : > { %1329 = vmatpush1.bf16.msra.mxu1 %v718_v5  ;;  %1244 = vmatprep.subr.bf16.mxu0 %v3147_v7 }
 0x285   : > { %1330 = vmatprep.subr.bf16.mxu1 %v3387_v51 }
 0x287   : > { %1245 = vmatpush1.bf16.msra.mxu0 %v3152_v8 }
 0x288   : > { %1246 = vmatprep.subr.bf16.mxu0 %v3288_v58  ;;  %1331 = vmatpush1.bf16.msra.mxu1 %v3162_v10 }
 0x289   : > { %1332 = vmatprep.subr.bf16.mxu1 %v3563_v48 }
 0x28b   : > { %1247 = vmatpush1.bf16.msra.mxu0 %v3258_v47 }
 0x28c   : > { %1248 = vmatprep.subr.bf16.mxu0 %v718_v5  ;;  %1333 = vmatpush1.bf16.msra.mxu1 %v3539_v40 }
 0x28d   : > { %1334 = vmatprep.subr.bf16.mxu1 %v738_v54 }
 0x28f   : > { %1249 = vmatpush1.bf16.msra.mxu0 %v717_v12 }
 0x290   : > { %1335 = vmatpush1.bf16.msra.mxu1 %v719_v32  ;;  %1250 = vmatprep.subr.bf16.mxu0 %v3162_v10 }
 0x291   : > { %1336 = vmatprep.subr.bf16.mxu1 %v3427_v0 }
 0x293   : > { %1251 = vmatpush1.bf16.msra.mxu0 %v3147_v7 }
 0x294   : > { %1263 = vmatprep.subr.bf16.mxu0 %v3539_v40  ;;  %1337 = vmatpush1.bf16.msra.mxu1 %v3387_v51 }
 0x295   : > { %1349 = vmatprep.subr.bf16.mxu1 %v3566_v55 }
 0x296   : > { %1253 = vmatmul.mubr.bf16.vlgmr.msra.gmra.mrb[4].mxu0 %v3439_v4 }
 0x297   : > { %1264 = vmatpush1.bf16.msra.mxu0 %v3288_v58  ;;  %1339 = vmatmul.mubr.bf16.vlgmr.msra.gmra.mrb[4].mxu1 %v3439_v4 }
 0x298   : > { %1350 = vmatpush1.bf16.msra.mxu1 %v3563_v48  ;;  %1955 = vmatprep.mubr.msk.bf16.mxu0 %vm1044_vm3, %v3442_v11 }
 0x299   : > { %1956 = vmatprep.mubr.msk.bf16.mxu1 %vm1044_vm3, %v3442_v11 }
 0x2c5   : > { %v867_v7 = vpop.permute.xlu1 %866 }
 0x2c6   : > { %v934_v51 = vsel %vm537_vm0, %v3488_v33, %v867_v7 }
 0x2d0   : > { %v871_v8 = vpop.permute.xlu1 %870  ;;  %v869_v10 = vpop.permute.xlu0 %868 }
 0x2d1   : > { %v935_v47 = vsel %vm537_vm0, %v867_v7, %v869_v10  ;;  %v936_v63 = vsel %vm537_vm0, %v869_v10, %v871_v8 }
 0x2d2   : > { %1265 = vmatprep.subr.bf16.mxu0 %v935_v47 }
 0x2d3   : > { %1266 = vmatpush1.bf16.msra.mxu0 %v934_v51 }
 0x2d4   : > { %v873_v58 = vpop.permute.xlu0 %872  ;;  %1267 = vmatprep.subr.bf16.mxu0 %v3522_v28  ;;  %v889_v0 = vpop.permute.xlu1 %888 }
 0x2d5   : > { %v937_v61 = vsel %vm537_vm0, %v871_v8, %v873_v58  ;;  %v944_v33 = vsel %vm537_vm0, %v3517_v19, %v889_v0 }
 0x2d6   : > { %1351 = vmatprep.subr.bf16.mxu1 %v937_v61 }
 0x2d7   : > { %1268 = vmatpush1.bf16.msra.mxu0 %v3506_v22  ;;  %1352 = vmatpush1.bf16.msra.mxu1 %v936_v63 }
 0x2d8   : > { %v891_v4 = vpop.permute.xlu0 %890  ;;  %1269 = vmatprep.subr.bf16.mxu0 %v3361_v34  ;;  %v907_v37 = vpop.permute.xlu1 %906 }
 0x2d9   : > { %v945_v11 = vsel %vm537_vm0, %v889_v0, %v891_v4 }
 0x2da   : > { %1353 = vmatprep.subr.bf16.mxu1 %v945_v11 }
 0x2db   : > { %1270 = vmatpush1.bf16.msra.mxu0 %v3329_v20  ;;  %1354 = vmatpush1.bf16.msra.mxu1 %v944_v33  ;;  %v952_v20 = vsel %vm537_vm0, %v3531_v36, %v907_v37 }
 0x2dc   : > { %1355 = vmatprep.subr.bf16.mxu1 %v3586_v21  ;;  %v909_v40 = vpop.permute.xlu0 %908  ;;  %1271 = vmatprep.subr.bf16.mxu0 %v3535_v38  ;;  %v913_v41 = vpop.permute.xlu1 %912 }
 0x2dd   : > { %v953_v22 = vsel %vm537_vm0, %v907_v37, %v909_v40  ;;  %v955_v50 = vsel %vm537_vm0, %v889_v0, %v913_v41 }
 0x2df   : > { %1272 = vmatpush1.bf16.msra.mxu0 %v3513_v16  ;;  %1356 = vmatpush1.bf16.msra.mxu1 %v3393_v53 }
 0x2e0   : > { %1357 = vmatprep.subr.bf16.mxu1 %v953_v22  ;;  %v915_v14 = vpop.permute.xlu0 %914  ;;  %1273 = vmatprep.subr.bf16.mxu0 %v944_v33  ;;  %v917_v42 = vpop.permute.xlu1 %916 }
 0x2e1   : > { %v956_v19 = vsel %vm537_vm0, %v913_v41, %v915_v14  ;;  %v957_v45 = vsel %vm537_vm0, %v907_v37, %v917_v42 }
 0x2e3   : > { %1274 = vmatpush1.bf16.msra.mxu0 %v3522_v28  ;;  %1358 = vmatpush1.bf16.msra.mxu1 %v952_v20 }
 0x2e4   : > { %1359 = vmatprep.subr.bf16.mxu1 %v956_v19  ;;  %1275 = vmatprep.subr.bf16.mxu0 %v3393_v53  ;;  %v919_v16 = vpop.permute.xlu0 %918  ;;  %v923_v43 = vpop.permute.xlu1 %922 }
 0x2e5   : > { %v958_v28 = vsel %vm537_vm0, %v917_v42, %v919_v16  ;;  %v960_v2 = vsel %vm537_vm0, %v913_v41, %v923_v43 }
 0x2e7   : > { %1276 = vmatpush1.bf16.msra.mxu0 %v3361_v34  ;;  %1360 = vmatpush1.bf16.msra.mxu1 %v955_v50 }
 0x2e8   : > { %1361 = vmatprep.subr.bf16.mxu1 %v3598_v52  ;;  %1277 = vmatprep.subr.bf16.mxu0 %v952_v20  ;;  %v925_v36 = vpop.permute.xlu0 %924 }
 0x2e9   : > { %v961_v34 = vsel %vm537_vm0, %v923_v43, %v925_v36 }
 0x2eb   : > { %1278 = vmatpush1.bf16.msra.mxu0 %v3535_v38  ;;  %1362 = vmatpush1.bf16.msra.mxu1 %v3586_v21 }
 0x2ec   : > { %1363 = vmatprep.subr.bf16.mxu1 %v958_v28  ;;  %1279 = vmatprep.subr.bf16.mxu0 %v955_v50  ;;  %v927_v38 = vpop.permute.xlu1 %926  ;;  %v929_v46 = vpop.permute.xlu0 %928 }
 0x2ed   : > { %v963_v48 = vsel %vm537_vm0, %v927_v38, %v929_v46  ;;  %v962_v55 = vsel %vm537_vm0, %v917_v42, %v927_v38 }
 0x2ef   : > { %1280 = vmatpush1.bf16.msra.mxu0 %v944_v33  ;;  %1364 = vmatpush1.bf16.msra.mxu1 %v957_v45 }
 0x2f0   : > { %1281 = vmatprep.subr.bf16.mxu0 %v3586_v21  ;;  %1365 = vmatprep.subr.bf16.mxu1 %v961_v34 }
 0x2f3   : > { %1282 = vmatpush1.bf16.msra.mxu0 %v3393_v53  ;;  %1366 = vmatpush1.bf16.msra.mxu1 %v960_v2  ;;  %v1408_v53 = vlaneseq }
 0x2f4   : > { %1283 = vmatprep.subr.bf16.mxu0 %v957_v45  ;;  %1367 = vmatprep.subr.bf16.mxu1 %v3615_v9 }
 0x2f5   : > { %v3694_v56 = vand.u32 127, %v1408_v53 }
 0x2f7   : > { %1284 = vmatpush1.bf16.msra.mxu0 %v952_v20  ;;  %1368 = vmatpush1.bf16.msra.mxu1 %v3598_v52  ;;  %v1410_v23 = vadd.s32 128, %v3694_v56  ;;  %v1411_v60 = vadd.s32 256, %v3694_v56  ;;  %v1412_v27 = vadd.s32 384, %v3694_v56  ;;  %vm1513_vm5 = vcmp.lt.s32.totalorder %v3694_v56, 8 }
 0x2f8   : > { %1369 = vmatprep.subr.bf16.mxu1 %v963_v48  ;;  %v1414_v53 = vadd.s32 640, %v3694_v56 }
 0x2f9   : > { %v1428_v1 = vand.u32 127, %v1410_v23  ;;  %v1435_v26 = vand.u32 127, %v1411_v60  ;;  %v1442_v21 = vand.u32 127, %v1412_v27  ;;  %v1415_v23 = vadd.s32 768, %v3694_v56 }
 0x2fa   : > { %1296 = vmatmul.mubr.bf16.vlgmr.msra.gmra.mrb[4].mxu0 %v3542_v17  ;;  %v1416_v27 = vadd.s32 896, %v3694_v56 }
 0x2fb   : > { %1370 = vmatpush1.bf16.msra.mxu1 %v962_v55  ;;  %vm3706_vm6 = vcmp.lt.s32.totalorder %v1428_v1, 8  ;;  %vm3711_vm7 = vcmp.lt.s32.totalorder %v1435_v26, 8  ;;  %vm3716_vm8 = vcmp.lt.s32.totalorder %v1442_v21, 8  ;;  %v1413_v55 = vadd.s32 512, %v3694_v56 }
 0x2fc   : > { %v1456_v1 = vand.u32 127, %v1414_v53  ;;  %v1470_v29 = vand.u32 127, %v1416_v27 }
 0x2fd   : > { %v3699_v59 = vpop.permute.xlu1 %1017  ;;  %v3701_v30 = vpop.permute.xlu0 %1022  ;;  %v1449_v60 = vand.u32 127, %v1413_v55 }
 0x2fe   : > { %1382 = vmatmul.mubr.bf16.vlgmr.msra.gmra.mrb[4].mxu1 %v3542_v17  ;;  %vm3776_vm14 = vcmp.lt.s32.totalorder %v1456_v1, 8  ;;  %vm3792_vm0 = vcmp.lt.s32.totalorder %v1470_v29, 8 }
 0x2ff   : > { %vm3771_vm13 = vcmp.lt.s32.totalorder %v1449_v60, 8 }
 0x329   : > { %v1125_v15 = vpop.f32.mrb[0].mxu0 }
 0x32a   : > { %v1994_v3 = vadd.f32 %v1125_v15, %v3699_v59  ;;  %v1127_v17 = vpop.f32.mrb[1].mxu0  ;;  %v1211_v13 = vpop.f32.mrb[0].mxu1 }
 0x32b   : > { %v1995_v52 = vadd.f32 %v1127_v17, %v3699_v59  ;;  %v1998_v31 = vadd.f32 %v1211_v13, %v3699_v59  ;;  %v1213_v25 = vpop.f32.mrb[1].mxu1  ;;  %v1129_v39 = vpop.f32.mrb[2].mxu0 }
 0x32c   : > { %v1392_v62 = vmax.f32 %v1994_v3, 0.0  ;;  %v1999_v18 = vadd.f32 %v1213_v25, %v3699_v59  ;;  %v1215_v9 = vpop.f32.mrb[2].mxu1  ;;  %v1996_v44 = vadd.f32 %v1129_v39, %v3701_v30  ;;  %v1131_v49 = vpop.f32.mrb[3].mxu0  ;;  %v1463_v3 = vand.u32 127, %v1415_v23 }
 0x32d   : > { %v1393_v24 = vmax.f32 %v1995_v52, 0.0  ;;  %v1394_v32 = vmax.f32 %v1998_v31, 0.0  ;;  %v1217_v12 = vpop.f32.mrb[3].mxu1  ;;  %v1997_v5 = vadd.f32 %v1131_v49, %v3701_v30  ;;  %v2000_v35 = vadd.f32 %v1215_v9, %v3701_v30 }
 0x32e   : > { %v1537_v54 = vsel %vm1513_vm5, %v1392_v62, 0.0  ;;  %v1395_v7 = vmax.f32 %v1999_v18, 0.0  ;;  %v1400_v8 = vmax.f32 %v1996_v44, 0.0  ;;  %v2001_v10 = vadd.f32 %v1217_v12, %v3701_v30 }
 0x32f   : > { %v1538_v47 = vsel %vm3706_vm6, %v1393_v24, 0.0  ;;  %v1539_v51 = vsel %vm3711_vm7, %v1394_v32, 0.0  ;;  %v1401_v58 = vmax.f32 %v1997_v5, 0.0  ;;  %v1402_v61 = vmax.f32 %v2000_v35, 0.0 }
 0x330   : > { %v1986_v63 = vpack.c.bf16 %v1538_v47, %v1537_v54  ;;  %v1540_v0 = vsel %vm3716_vm8, %v1395_v7, 0.0  ;;  %v1545_v4 = vsel %vm1513_vm5, %v1400_v8, 0.0  ;;  %v1403_v11 = vmax.f32 %v2001_v10, 0.0 }
 0x331   : > { %v1987_v33 = vpack.c.bf16 %v1540_v0, %v1539_v51  ;;  %v1546_v37 = vsel %vm3706_vm6, %v1401_v58, 0.0  ;;  %v1547_v40 = vsel %vm3711_vm7, %v1402_v61, 0.0  ;;  %vm3785_vm15 = vcmp.lt.s32.totalorder %v1463_v3, 8 }
 0x332   : > { %v1990_v22 = vpack.c.bf16 %v1546_v37, %v1545_v4  ;;  %1606 = vrot.lane.b32.xlu1 %v1986_v63, %s2634_s4  ;;  %v1548_v14 = vsel %vm3716_vm8, %v1403_v11, 0.0 }
 0x333   : > { %v1991_v41 = vpack.c.bf16 %v1548_v14, %v1547_v40 }
 0x334   : > { %1614 = vrot.lane.b32.xlu0 %v1990_v22, %s2634_s4 }
 0x336   : > { %1608 = vrot.lane.b32.xlu1 %v1987_v33, %s2634_s4 }
 0x33a   : > { %1616 = vrot.lane.b32.xlu1 %v1991_v41, %s2634_s4 }
 0x3a4   : > { %v1607_v20 = vpop.permute.xlu1 %1606 }
 0x3a5   : > { %v1622_v19 = vrot.slane %v1607_v20, 4 }
 0x3a6   : > { %v1615_v16 = vpop.permute.xlu0 %1614 }
 0x3a7   : > { %v1630_v50 = vsel %vm797_vm2, %v1622_v19, %v1607_v20  ;;  %v1626_v42 = vrot.slane %v1615_v16, 4 }
 0x3a8   : > { %1658 = vst.msk [vmem:[%s3100_s22 + $0x4] sm:$0xff] %vm1657_vm11, %v1630_v50  ;;  %v3746_v28 = vpop.permute.xlu1 %1608 }
 0x3a9   : > { %v1623_v36 = vrot.slane %v3746_v28, 4  ;;  %v1638_v43 = vsel %vm797_vm2, %v1626_v42, %v1615_v16 }
 0x3aa   : > { %1664 = vst.msk [vmem:[%s3100_s22 + $0x30] sm:$0xff] %vm1657_vm11, %v1638_v43 }
 0x3ab   : > { %v1632_v45 = vsel %vm1631_vm12, %v1622_v19, %v1623_v36 }
 0x3ac   : > { %v1633_v34 = vsel %vm797_vm2, %v1632_v45, %v3746_v28  ;;  %v3756_v2 = vpop.permute.xlu1 %1616 }
 0x3ad   : > { %1659 = vst [vmem:[%s3100_s22 + $0xc] sm:$0xff] %v1633_v34  ;;  %v1627_v38 = vrot.slane %v3756_v2, 4 }
 0x3af   : > { %v1639_v46 = vsel %vm1631_vm12, %v1626_v42, %v1627_v38 }
 0x3b0   : > { %v1640_v48 = vsel %vm797_vm2, %v1639_v46, %v3756_v2 }
 0x3b1   : > { %1665 = vst [vmem:[%s3100_s22 + $0x38] sm:$0xff] %v1640_v48 }
 0x3cd   : > { %v1297_v26 = vpop.f32.mrb[4].mxu0 }
 0x3ce   : > { %v2002_v21 = vadd.f32 %v1297_v26, %v3699_v59  ;;  %v1299_v15 = vpop.f32.mrb[5].mxu0 }
 0x3cf   : > { %v2003_v13 = vadd.f32 %v1299_v15, %v3699_v59  ;;  %v1301_v52 = vpop.f32.mrb[6].mxu0 }
 0x3d0   : > { %v1396_v31 = vmax.f32 %v2002_v21, 0.0  ;;  %v2004_v56 = vadd.f32 %v1301_v52, %v3701_v30  ;;  %v1303_v25 = vpop.f32.mrb[7].mxu0 }
 0x3d1   : > { %v1397_v39 = vmax.f32 %v2003_v13, 0.0  ;;  %v2005_v62 = vadd.f32 %v1303_v25, %v3701_v30  ;;  %v1383_v18 = vpop.f32.mrb[4].mxu1 }
 0x3d2   : > { %v1541_v57 = vsel %vm3771_vm13, %v1396_v31, 0.0  ;;  %v1404_v9 = vmax.f32 %v2004_v56, 0.0  ;;  %v2006_v44 = vadd.f32 %v1383_v18, %v3699_v59  ;;  %v1385_v24 = vpop.f32.mrb[5].mxu1 }
 0x3d3   : > { %v1542_v32 = vsel %vm3776_vm14, %v1397_v39, 0.0  ;;  %v1405_v12 = vmax.f32 %v2005_v62, 0.0  ;;  %v2007_v5 = vadd.f32 %v1385_v24, %v3699_v59  ;;  %v1387_v54 = vpop.f32.mrb[6].mxu1 }
 0x3d4   : > { %v1988_v7 = vpack.c.bf16 %v1542_v32, %v1541_v57  ;;  %v1549_v8 = vsel %vm3771_vm13, %v1404_v9, 0.0  ;;  %v1398_v10 = vmax.f32 %v2006_v44, 0.0  ;;  %v2008_v47 = vadd.f32 %v1387_v54, %v3701_v30  ;;  %v1389_v51 = vpop.f32.mrb[7].mxu1 }
 0x3d5   : > { %v1550_v58 = vsel %vm3776_vm14, %v1405_v12, 0.0  ;;  %v1399_v61 = vmax.f32 %v2007_v5, 0.0  ;;  %v2009_v63 = vadd.f32 %v1389_v51, %v3701_v30 }
 0x3d6   : > { %v1992_v59 = vpack.c.bf16 %v1550_v58, %v1549_v8  ;;  %v1543_v0 = vsel %vm3785_vm15, %v1398_v10, 0.0  ;;  %v1406_v4 = vmax.f32 %v2008_v47, 0.0  ;;  %1610 = vrot.lane.b32.xlu0 %v1988_v7, %s2634_s4 }
 0x3d7   : > { %v1544_v11 = vsel %vm3792_vm0, %v1399_v61, 0.0  ;;  %v1407_v33 = vmax.f32 %v2009_v63, 0.0 }
 0x3d8   : > { %v1989_v37 = vpack.c.bf16 %v1544_v11, %v1543_v0  ;;  %v1551_v40 = vsel %vm3785_vm15, %v1406_v4, 0.0 }
 0x3d9   : > { %v1552_v22 = vsel %vm3792_vm0, %v1407_v33, 0.0 }
 0x3da   : > { %v1993_v30 = vpack.c.bf16 %v1552_v22, %v1551_v40  ;;  %1618 = vrot.lane.b32.xlu0 %v1992_v59, %s2634_s4  ;;  %1612 = vrot.lane.b32.xlu1 %v1989_v37, %s2634_s4 }
 0x3de   : > { %1620 = vrot.lane.b32.xlu1 %v1993_v30, %s2634_s4 }
 0x448   : > { %v1611_v14 = vpop.permute.xlu0 %1610 }
 0x449   : > { %v1624_v41 = vrot.slane %v1611_v14, 4 }
 0x44b   : > { %v1634_v20 = vsel %vm1631_vm12, %v1623_v36, %v1624_v41 }
 0x44c   : > { %v1635_v19 = vsel %vm797_vm2, %v1634_v20, %v1611_v14  ;;  %v1619_v16 = vpop.permute.xlu0 %1618  ;;  %v1613_v50 = vpop.permute.xlu1 %1612 }
 0x44d   : > { %1660 = vst [vmem:[%s3100_s22 + $0x14] sm:$0xff] %v1635_v19  ;;  %v1628_v42 = vrot.slane %v1619_v16, 4  ;;  %v1625_v43 = vrot.slane %v1613_v50, 4 }
 0x44f   : > { %v1641_v45 = vsel %vm1631_vm12, %v1627_v38, %v1628_v42  ;;  %v1636_v34 = vsel %vm1631_vm12, %v1624_v41, %v1625_v43  ;;  %1663 = vst.msk [vmem:[%s3100_s22 + $0x24] sm:$0xf] %vm1662_vm1, %v1625_v43 }
 0x450   : > { %v1642_v28 = vsel %vm797_vm2, %v1641_v45, %v1619_v16  ;;  %v1637_v36 = vsel %vm797_vm2, %v1636_v34, %v1613_v50  ;;  %v1621_v46 = vpop.permute.xlu1 %1620 }
 0x451   : > { %1666 = vst [vmem:[%s3100_s22 + $0x40] sm:$0xff] %v1642_v28  ;;  %1661 = vst [vmem:[%s3100_s22 + $0x1c] sm:$0xff] %v1637_v36  ;;  %v1629_v48 = vrot.slane %v1621_v46, 4 }
 0x453   : > { %v1643_v55 = vsel %vm1631_vm12, %v1628_v42, %v1629_v48  ;;  %1668 = vst.msk [vmem:[%s3100_s22 + $0x50] sm:$0xf] %vm1662_vm1, %v1629_v48 }
 0x454   : > { %v1644_v53 = vsel %vm797_vm2, %v1643_v55, %v1621_v46 }
 0x455   : > { %1667 = vst [vmem:[%s3100_s22 + $0x48] sm:$0xff] %v1644_v53 }
 0x456 PF: > { %1671 = sbr.rel (!%p3096_p6) target bundleno = 1117 (0x45d), region = 68  ;;  %vm1677_vm3 = vcmask (%p3096_p6), 11264   ;;  %v2636_v2 = vmov (%p3096_p6), 0  }
 0x457   : > { %1672 = vst [vmem:[%s3100_s22] sm:$0xff] (%p3096_p6), %v2636_v2  ;;  %1673 = vst [vmem:[%s3100_s22 + $0x8] sm:$0xff] (%p3096_p6), %v2636_v2 }
 0x458   : > { %1674 = vst [vmem:[%s3100_s22 + $0x10] sm:$0xff] (%p3096_p6), %v2636_v2  ;;  %1675 = vst [vmem:[%s3100_s22 + $0x18] sm:$0xff] (%p3096_p6), %v2636_v2 }
 0x459   : > { %1676 = vst [vmem:[%s3100_s22 + $0x20] sm:$0xff] (%p3096_p6), %v2636_v2  ;;  %1679 = vst [vmem:[%s3100_s22 + $0x2c] sm:$0xff] (%p3096_p6), %v2636_v2 }
 0x45a   : > { %1680 = vst [vmem:[%s3100_s22 + $0x34] sm:$0xff] (%p3096_p6), %v2636_v2  ;;  %1681 = vst [vmem:[%s3100_s22 + $0x3c] sm:$0xff] (%p3096_p6), %v2636_v2 }
 0x45b   : > { %1682 = vst [vmem:[%s3100_s22 + $0x44] sm:$0xff] (%p3096_p6), %v2636_v2  ;;  %1683 = vst [vmem:[%s3100_s22 + $0x4c] sm:$0xff] (%p3096_p6), %v2636_v2 }
 0x45c   : > { %1678 = vst.msk [vmem:[%s3100_s22 + $0x28] sm:$0xf] (%p3096_p6), %vm1677_vm3, %v2636_v2  ;;  %1684 = vst.msk [vmem:[%s3100_s22 + $0x54] sm:$0xf] (%p3096_p6), %vm1677_vm3, %v2636_v2 }
 0x45d PF: > { %s4061_s24 = sld [smem:[#allocation23_spill]]  ;;  %s4062_s13 = sld [smem:[#allocation24_spill]] }
 0x45e   : > { %s4064_s2 = sld [smem:[#allocation27_spill]]  ;;  %s1701_s0 = sshll.u32 %s3100_s22, 4  ;;  %s3849_s0 = int_to_ptr.vmem [resolvable:$true] %s1701_s0 }
 0x45f   : > { %s4065_s11 = sld [smem:[#allocation38_spill]]  ;;  %s3858_s3 = scalar_lea.sflag [#allocation4], %s414_s14 }
 0x460   : > { %s2437_s30 = scalar_lea.vmem %s3849_s0, 1408  ;;  %s2637_s5 = smov [#allocation11]  }
 0x461   : > { %p2438_p5 = scmp.ne.s32.totalorder %s3849_s0, %s2437_s30  ;;  %s2441_s22 = sshll.u32 %s2637_s5, 4  ;;  %s2442_s22 = int_to_ptr.vmem [resolvable:$false] %s2441_s22 }
 0x462   : > { %s2443_s10 = scalar_lea.vmem %s2442_s22, 2816  ;;  %p2444_p4 = scmp.lt.s32.totalorder %s3849_s0, %s2442_s22 }
 0x463   : > { %s2039_s18 = smul.u32 22, %s4061_s24  ;;  %p2445_p7 = scmp.lt.s32.totalorder %s2443_s10, %s2437_s30 }
 0x464   : > { %s2040_s23 = smul.u32 220, %s4062_s13  ;;  %p4066_p9 = scmp.ne.s32.totalorder %s4064_s2, 0 }
 0x465   : > { %p2446_p2 = por %p2445_p7, %p2444_p4 }
 0x466   : > { %s1698_s19 = sadd.s32 %s2040_s23, %s2039_s18  ;;  %p2439_p0 = pnand %p2438_p5, %p4066_p9 }
 0x467   : > { %s1965_s17 = sshll.u32 %s1698_s19, 6 }
 0x468   : > { %s3854_s16 = scalar_lea.hbm %s4065_s11, %s1965_s17  ;;  %p2440_p12 = pneg %p2439_p0 }
 0x46a   : > { %p2447_p8 = pnand %p2446_p2, %p2440_p12 }
 0x46c   : > { %2450 = shalt.err (!%p2447_p8)
}
 0x46d   : > { %s2451_s14 = scalar_lea.hbm %s3854_s16, 1408  ;;  %s2455_s24 = scalar_lea.hbm %s4065_s11, 28160 }
 0x46e   : > { %p2452_p3 = scmp.ne.s32.totalorder %s3854_s16, %s2451_s14  ;;  %p2456_p1 = scmp.lt.u32.totalorder %s3854_s16, %s4065_s11 }
 0x46f   : > { %p2457_p11 = scmp.lt.u32.totalorder %s2455_s24, %s2451_s14  ;;  %p2459_p5 = scmp.lt.u32.totalorder %s2451_s14, %s3854_s16 }
 0x470   : > { %p2453_p10 = pnand %p2452_p3, %p4066_p9 }
 0x471   : > { %p2458_p6 = por %p2457_p11, %p2456_p1 }
 0x472   : > { %p2454_p13 = pneg %p2453_p10 }
 0x473   : > { %p2460_p0 = por %p2459_p5, %p2458_p6 }
 0x475   : > { %p2461_p12 = pnand %p2460_p0, %p2454_p13 }
 0x477   : > { %2464 = shalt.err (!%p2461_p12)
}
 0x478   : > { %s2638_s18 = smov 704   ;;  %s2639_s23 = smov 44  }
 0x479   : > { %2055 = dma.vmem_to_hbm [thread:$0]  (%p4066_p9), %s3849_s0, 1408, %s3854_s16, %s3858_s3, %s2638_s18, %s2638_s18, %s2639_s23  }
 0x47a PF: > { %s4067_s19 = sld [smem:[#allocation17_spill]]  ;;  %s4068_s17 = sld [smem:[#allocation28_spill]] }
 0x47b   : > { %p2083_p4 = scmp.ge.s32.totalorder %s2619_s9, 2 }
 0x480   : > { %s1716_s8 = sand.u32 1, %s4067_s19   ;;  %p4069_p7 = scmp.ne.s32.totalorder %s4068_s17, 0 }
 0x481   : > { %s1717_s7 = scalar_lea.sflag [#allocation4], %s1716_s8 }
 0x482   : > { %p2075_p2 = pnand %p2083_p4, %p4069_p7 }
 0x484   : > { %2550 = dma.done.wait (!%p2075_p2), %s1717_s7, 1408  }
 0x485   : > { %2552 = vsyncadd (!%p2075_p2), %s1717_s7, 4294965888  ;;  %s25_s9 = sadd.s32 1, %s2619_s9   ;;  %s4071_s18 = sld [smem:[#allocation18_spill]] }
 0x486   : > { %p3887_p8 = scmp.ge.s32.totalorder %s25_s9, 22   ;;  %s4072_s2 = sld [smem:[#allocation20_spill]] }
 0x487   : > { %s4073_s22 = sld [smem:[#allocation21_spill]]  ;;  %s4074_s24 = sld [smem:[#allocation22_spill]] }
 0x488   : > { %s4075_s0 = smov %s2858_s25  ;;  %s4076_s16 = sld [smem:[#allocation25_spill]] }
 0x489   : > { %s4077_s3 = sld [smem:[#allocation26_spill]]  ;;  %s4078_s7 = sld [smem:[#allocation31_spill]] }
 0x48a   : > { %s4079_s8 = sld [smem:[#allocation32_spill]]  ;;  %s4080_s19 = smov %s2563_s20 }
 0x48b   : > { %s4082_s20 = smov %s2863_s21  ;;  %s4084_s23 = smov %s4109_s6 }
 0x48c   : > { %s4083_s21 = smov %s4072_s2  ;;  %s4085_s25 = smov %s2587_s26 }
 0x48d   : > { %s4086_s26 = smov %s4075_s0  ;;  %s4087_s27 = smov %s2595_s28 }
 0x48e   : > { %s4088_s28 = smov %s2599_s29  ;;  %s4089_s29 = smov %s2952_s15 }
 0x48f   : > { %s4090_s30 = smov %s4076_s16  ;;  %s4091_s6 = smov %s4077_s3 }
 0x490   :  { %24 = sbr.rel (!%p3887_p8) target bundleno = 22 (0x16), region = 125 }
 0x497   :  { %1722 = vsyncpa [#allocation3], 1 }
 0x498   :  { %1724 = vsyncpa [#allocation3 + $0x1], 1 }
 0x499   :  { %1725 = vsyncpa [#allocation6], 1 }
 0x49a   :  { %1727 = vsyncpa [#allocation6 + $0x1], 1 }
 0x49b   :  { %1728 = vsyncpa [#allocation9], 1 }
 0x49c   :  { %1729 = vsyncpa [#allocation4], 1 }
 0x49d   :  { %1731 = vsyncpa [#allocation4 + $0x1], 1 }

// kernel: up_voxel_stage_forward.7
= control target key start
LH: loop header
LB: loop body
LE: loop exit
PB: predicated region body
PF: predicated region fallthrough
CT: control target
= control target key end

     0   :  { %s4819_s0 = inlined_call_operand.hbm [shape: bf16[2,10,16,1282], index: 0, kind: input, shape index: {}, may-alias: {0,1,2}]   ;;  %s4820_s1 = inlined_call_operand.hbm [shape: bf16[2,10,16,1282], index: 1, kind: input, shape index: {}, may-alias: {0,1,2}]   ;;  %s4821_s2 = inlined_call_operand.hbm [shape: bf16[2,10,16,1282], index: 2, kind: input, shape index: {}, may-alias: {0,1,2}]   ;;  %s4822_s3 = inlined_call_operand.hbm [shape: bf16[16,432], index: 3, kind: input, shape index: {}]   ;;  %s4823_s4 = inlined_call_operand.hbm [shape: f32[16,1], index: 4, kind: input, shape index: {}]   ;;  %s4824_s5 = inlined_call_operand.hbm [shape: bf16[2,10,16,1282], index: 5, kind: input, shape index: {}]   ;;  %s4825_s6 = inlined_call_operand.hbm [shape: bf16[16,16], index: 6, kind: input, shape index: {}]   ;;  %s4826_s7 = inlined_call_operand.hbm [shape: f32[16,1], index: 7, kind: input, shape index: {}]   ;;  %s4827_s8 = inlined_call_operand.hbm [shape: bf16[2,10,16,1282], index: 8, kind: output, shape index: {}]  }
   0x1   :  { %4859 = sst [smem:[#allocation40_spill]] %s4819_s0 }
   0x2   :  { %4860 = sst [smem:[#allocation41_spill]] %s4820_s1 }
   0x3   :  { %4861 = sst [smem:[#allocation42_spill]] %s4821_s2 }
   0x4   :  { %4862 = sst [smem:[#allocation43_spill]] %s4822_s3 }
   0x5   :  { %4863 = sst [smem:[#allocation44_spill]] %s4823_s4 }
   0x6   :  { %4864 = sst [smem:[#allocation45_spill]] %s4824_s5 }
   0x7   :  { %4865 = sst [smem:[#allocation46_spill]] %s4825_s6 }
   0x8   :  { %4866 = sst [smem:[#allocation47_spill]] %s4826_s7 }
   0x9   :  { %4867 = sst [smem:[#allocation48_spill]] %s4827_s8 }
   0xa   :  { %13 = vsyncpa [#allocation3], 0 }
   0xb   :  { %15 = vsyncpa [#allocation3 + $0x1], 0 }
   0xc   :  { %16 = vsyncpa [#allocation6], 0 }
   0xd   :  { %18 = vsyncpa [#allocation6 + $0x1], 0 }
   0xe   :  { %19 = vsyncpa [#allocation9], 0 }
   0xf   :  { %20 = vsyncpa [#allocation12], 0 }
  0x10   :  { %22 = vsyncpa [#allocation12 + $0x1], 0 }
  0x11   :  { %23 = vsyncpa [#allocation15], 0 }
  0x12   :  { %24 = vsyncpa [#allocation4], 0 }
  0x13   :  { %26 = vsyncpa [#allocation4 + $0x1], 0  ;;  %s3375_s27 = smov 0   ;;  %s3377_s28 = smov 0  }
  0x14   :  { %s3379_s29 = smov 0   ;;  %s3381_s30 = smov 0  }
  0x15   :  { %s3383_s9 = smov 0   ;;  %s3385_s10 = smov 0  }
  0x16   :  { %s3387_s11 = smov 0   ;;  %s3389_s12 = smov 0  }
  0x17   :  { %s3391_s13 = smov 0   ;;  %s3393_s14 = smov 0  }
  0x18   :  { %s3395_s15 = smov 0   ;;  %s3397_s16 = smov 0  }
  0x19   :  { %s3399_s17 = smov 0   ;;  %s3401_s18 = smov 0  }
  0x1a   :  { %s3403_s19 = smov 0   ;;  %s3405_s20 = smov 0  }
  0x1b   :  { %s3407_s21 = smov 0  }
  0x1c LB: > { %4868 = sst [smem:[#allocation25_spill]] %s3240_s27  ;;  %s3461_s22 = sadd.s32 4294967295, %s3304_s21   ;;  %s3304_s21 = sphi %s3407_s21, %s32_s21   ;;  %s3300_s20 = sphi %s3405_s20, %s4988_s20   ;;  %s3296_s19 = sphi %s3403_s19, %s4987_s19   ;;  %s3292_s18 = sphi %s3401_s18, %s4976_s18   ;;  %s3288_s17 = sphi %s3399_s17, %s4986_s17   ;;  %s3284_s16 = sphi %s3397_s16, %s4985_s16   ;;  %s3280_s15 = sphi %s3395_s15, %s4984_s15   ;;  %s3276_s14 = sphi %s3393_s14, %s4983_s14   ;;  %s3272_s13 = sphi %s3391_s13, %s4974_s13   ;;  %s3268_s12 = sphi %s3389_s12, %s4973_s12   ;;  %s3264_s11 = sphi %s3387_s11, %s4982_s11   ;;  %s3260_s10 = sphi %s3385_s10, %s4981_s10   ;;  %s3256_s9 = sphi %s3383_s9, %s4971_s9   ;;  %s3252_s30 = sphi %s3381_s30, %s4970_s30   ;;  %s3248_s29 = sphi %s3379_s29, %s4980_s29   ;;  %s3244_s28 = sphi %s3377_s28, %s4969_s28   ;;  %s3240_s27 = sphi %s3375_s27, %s4968_s27  }
  0x1d   : > { %4869 = sst [smem:[#allocation26_spill]] %s3244_s28  ;;  %p2398_p0 = scmp.ge.s32.totalorder %s3304_s21, 1 }
  0x1e   : > { %4870 = sst [smem:[#allocation27_spill]] %s3248_s29  ;;  %p4835_p1 = scmp.eq.s32.totalorder %s3461_s22, 0 }
  0x1f   : > { %4871 = sst [smem:[#allocation28_spill]] %s3252_s30  ;;  %p301_p2 = scmp.lt.s32.totalorder %s3304_s21, 21 }
  0x20   : > { %4872 = sst [smem:[#allocation29_spill]] %s3256_s9  ;;  %s3306_s24 = smov [#allocation8]  }
  0x21   : > { %4873 = sst [smem:[#allocation30_spill]] %s3260_s10  ;;  %p3466_p3 = pnand %p2398_p0, %p301_p2 }
  0x22   : > { %4874 = sst [smem:[#allocation31_spill]] %s3268_s12  ;;  %s313_s25 = sshll.u32 %s3306_s24, 4  ;;  %s314_s25 = int_to_ptr.vmem [resolvable:$true] %s313_s25 }
  0x23   : > { %4875 = sst [smem:[#allocation32_spill]] %s3272_s13  ;;  %p2612_p4 = pneg %p3466_p3 }
  0x24   : > { %4876 = sst [smem:[#allocation33_spill]] %s3288_s17  ;;  %s3307_s8 = smov [#allocation13]  }
  0x25   : > { %4877 = sst [smem:[#allocation34_spill]] %s3292_s18  ;;  %p3474_p5 = pnand %p2612_p4, %p4835_p1 }
  0x26   : > { %4878 = sst [smem:[#allocation35_spill]] %s3300_s20  ;;  %s339_s18 = sshll.u32 %s3307_s8, 4  ;;  %s3478_s18 = int_to_ptr.vmem [resolvable:$true] %s339_s18 }
  0x27   : > { %s4879_s23 = scalar_select %p3466_p3, 1, 0 }
  0x28   : > { %s4881_s26 = scalar_select %p3474_p5, 1, 0 }
  0x29   : > { %4880 = sst [smem:[#allocation36_spill]] %s4879_s23  ;;  %s4882_s3 = sld [smem:[#allocation43_spill]] }
  0x2a   : > { %p3488_p7 = pneg %p3474_p5 }
  0x2f   : > { %s2878_s27 = scalar_lea.hbm %s4882_s3, 512 }
  0x30   : > { %p2879_p6 = scmp.ne.s32.totalorder %s4882_s3, %s2878_s27  ;;  %p2885_p10 = scmp.lt.u32.totalorder %s2878_s27, %s4882_s3 }
  0x32   : > { %p2881_p8 = pnand %p3488_p7, %p2879_p6 }
  0x34   : > { %p2882_p9 = pneg %p2881_p8 }
  0x36   : > { %p2887_p11 = pnand %p2885_p10, %p2882_p9 }
  0x38   : > { %2890 = shalt.err (!%p2887_p11)
}
  0x39   : > { %s2891_s5 = scalar_lea.vmem %s314_s25, 512  ;;  %p2899_p2 = scmp.lt.s32.totalorder %s314_s25, %s314_s25 }
  0x3a   : > { %p2892_p12 = scmp.ne.s32.totalorder %s314_s25, %s2891_s5  ;;  %p2900_p4 = scmp.lt.s32.totalorder %s2891_s5, %s2891_s5 }
  0x3c   : > { %p2894_p13 = pnand %p2892_p12, %p3488_p7  ;;  %p2901_p1 = por %p2900_p4, %p2899_p2 }
  0x3e   : > { %p2895_p0 = pneg %p2894_p13 }
  0x40   : > { %p2902_p3 = pnand %p2901_p1, %p2895_p0 }
  0x42   : > { %2905 = shalt.err (!%p2902_p3)
}
  0x43   : > { %s3308_s28 = smov 256   ;;  %s3309_s29 = smov 16  }
  0x44   : > { %2615 = dma.hbm_to_vmem [thread:$0]  (!%p3474_p5), %s4882_s3, 512, %s314_s25, [#allocation9], %s3308_s28, %s3308_s28, %s3309_s29  }
  0x45   : > { %s4884_s6 = sld [smem:[#allocation46_spill]] }
  0x4b   : > { %s2906_s2 = scalar_lea.hbm %s4884_s6, 128 }
  0x4c   : > { %p2907_p6 = scmp.ne.s32.totalorder %s4884_s6, %s2906_s2  ;;  %p2913_p8 = scmp.lt.u32.totalorder %s2906_s2, %s4884_s6 }
  0x4e   : > { %p2909_p1 = pnand %p2907_p6, %p3488_p7 }
  0x50   : > { %p2910_p3 = pneg %p2909_p1 }
  0x52   : > { %p2915_p9 = pnand %p2913_p8, %p2910_p3 }
  0x54   : > { %2918 = shalt.err (!%p2915_p9)
}
  0x55   : > { %s2919_s25 = scalar_lea.vmem %s3478_s18, 128  ;;  %p2927_p13 = scmp.lt.s32.totalorder %s3478_s18, %s3478_s18 }
  0x56   : > { %p2920_p10 = scmp.ne.s32.totalorder %s3478_s18, %s2919_s25  ;;  %p2928_p0 = scmp.lt.s32.totalorder %s2919_s25, %s2919_s25 }
  0x58   : > { %p2922_p11 = pnand %p2920_p10, %p3488_p7  ;;  %p2929_p2 = por %p2928_p0, %p2927_p13 }
  0x5a   : > { %p2923_p12 = pneg %p2922_p11 }
  0x5c   : > { %p2930_p4 = pnand %p2929_p2, %p2923_p12 }
  0x5e   : > { %2933 = shalt.err (!%p2930_p4)
}
  0x5f   : > { %s3310_s30 = smov 64   ;;  %s3311_s2 = smov 4  }
  0x60   : > { %2621 = dma.hbm_to_vmem [thread:$0]  (!%p3474_p5), %s4884_s6, 128, %s3478_s18, [#allocation12], %s3310_s30, %s3310_s30, %s3311_s2  }
  0x61   : > { %s3528_s28 = sadd.s32 1, %s3296_s19  ;;  %s44_s29 = sadd.s32 1, %s3300_s20 }
  0x62   : > { %p42_p6 = scmp.ge.s32.totalorder %s3528_s28, 10  ;;  %p86_p1 = scmp.lt.s32.totalorder %s3296_s19, 9 }
  0x63   : > { %p2378_p3 = scmp.gt.s32.totalorder %s3296_s19, 0  ;;  %p4847_p10 = scmp.eq.s32.totalorder %s3304_s21, 0 }
  0x64   : > { %s3535_s17 = scalar_select %p42_p6, 0, %s3528_s28  }
  0x65   : > { %s4990_s29 = smov (!%p42_p6, %s44_s29), %s3300_s20  ;;  %s99_s8 = sadd.s32 1, %s3272_s13 }
  0x66   : > { %s87_s18 = scalar_select %p86_p1, %s3296_s19, 9 }
  0x67   : > { %p46_p8 = scmp.ge.s32.totalorder %s4990_s29, 2  ;;  %p90_p9 = scmp.lt.s32.totalorder %s3535_s17, 9 }
  0x68   : > { %s4992_s18 = smov (!%p2378_p3, %s87_s18), 0  ;;  %p2383_p11 = scmp.gt.s32.totalorder %s3535_s17, 0 }
  0x69   : > { %s4994_s29 = smov (%p46_p8, %s4990_s29), 0  ;;  %p106_p12 = scmp.ne.s32.totalorder %s3272_s13, %s3268_s12 }
  0x6a   : > { %4885 = sst [smem:[#allocation37_spill]] %s4994_s29  ;;  %s3547_s23 = ssub.s32 %s3300_s20, %s4994_s29 }
  0x6b   : > { %s91_s27 = scalar_select %p90_p9, %s3535_s17, 9 }
  0x6c   : > { %p112_p13 = scmp.ne.s32.totalorder %s3268_s12, %s3264_s11  ;;  %s203_s25 = ssub.s32 %s3296_s19, %s3535_s17 }
  0x6d   : > { %s4996_s27 = smov (!%p2383_p11, %s91_s27), 0  ;;  %p4886_p0 = scmp.eq.s32.totalorder %s3461_s22, 0 }
  0x6e   : > { %s95_s5 = ssub.s32 %s4992_s18, %s4996_s27  ;;  %s3564_s9 = sor.u32 %s203_s25, %s3547_s23 }
  0x6f   : > { %s96_s30 = sor.u32 %s95_s5, %s3547_s23  ;;  %p3559_p2 = por %p112_p13, %p4886_p0 }
  0x70   : > { %p97_p4 = scmp.eq.s32.totalorder %s96_s30, 0  ;;  %p108_p6 = por %p106_p12, %p4847_p10 }
  0x71   : > { %s4887_s2 = scalar_select %p3559_p2, 1, 0 }
  0x72   : > { %p4846_p1 = scmp.lt.s32.totalorder %s3304_s21, 20  ;;  %s3574_s11 = smul.u32 220, %s3300_s20 }
  0x73   : > { %4888 = sst [smem:[#allocation38_spill]] %s4887_s2  ;;  %s396_s5 = sand.u32 1, %s3272_s13  }
  0x74   : > { %s3570_s10 = scalar_select %p97_p4, %s3272_s13, %s99_s8  }
  0x75   : > { %s2571_s3 = smul.u32 88, %s396_s5  ;;  %p3580_p8 = pnand %p4846_p1, %p108_p6 }
  0x76   : > { %4889 = sst [smem:[#allocation39_spill]] %s3570_s10  ;;  %s2572_s25 = smul.u32 22, %s4992_s18 }
  0x77   : > { %s398_s29 = scalar_lea.vmem [#allocation5], %s2571_s3  ;;  %s4891_s1 = sld [smem:[#allocation41_spill]] }
  0x78   : > { %s408_s30 = sadd.s32 %s2572_s25, %s3574_s11  ;;  %s411_s2 = sshll.u32 %s398_s29, 4  ;;  %s3585_s2 = int_to_ptr.vmem [resolvable:$true] %s411_s2 }
  0x79   : > { %s2415_s8 = sshll.u32 %s408_s30, 6  ;;  %s4892_s5 = sand.u32 1, %s3304_s21  }
  0x7a   : > { %s3594_s13 = scalar_lea.sflag [#allocation6], %s4892_s5  ;;  %p2936_p11 = pneg %p3580_p8 }
  0x7d   : > { %s3590_s27 = scalar_lea.hbm %s4891_s1, %s2415_s8  ;;  %s2939_s20 = scalar_lea.hbm %s4891_s1, 28160 }
  0x7e   : > { %s2934_s12 = scalar_lea.hbm %s3590_s27, 1408  ;;  %p2940_p0 = scmp.lt.u32.totalorder %s3590_s27, %s4891_s1 }
  0x7f   : > { %p2935_p9 = scmp.ne.s32.totalorder %s3590_s27, %s2934_s12  ;;  %p2941_p4 = scmp.lt.u32.totalorder %s2939_s20, %s2934_s12 }
  0x80   : > { %p2943_p3 = scmp.lt.u32.totalorder %s2934_s12, %s3590_s27 }
  0x81   : > { %p2937_p12 = pnand %p2936_p11, %p2935_p9  ;;  %p2942_p6 = por %p2941_p4, %p2940_p0 }
  0x83   : > { %p2938_p13 = pneg %p2937_p12  ;;  %p2944_p1 = por %p2943_p3, %p2942_p6 }
  0x85   : > { %p2945_p10 = pnand %p2944_p1, %p2938_p13 }
  0x87   : > { %2948 = shalt.err (!%p2945_p10)
}
  0x88   : > { %s2949_s25 = scalar_lea.vmem %s3585_s2, 1408  ;;  %s3312_s30 = smov [#allocation5]  }
  0x89   : > { %p2950_p9 = scmp.ne.s32.totalorder %s3585_s2, %s2949_s25  ;;  %s2954_s8 = sshll.u32 %s3312_s30, 4  ;;  %s2955_s8 = int_to_ptr.vmem [resolvable:$false] %s2954_s8 }
  0x8a   : > { %s2956_s5 = scalar_lea.vmem %s2955_s8, 2816  ;;  %p2957_p5 = scmp.lt.s32.totalorder %s3585_s2, %s2955_s8 }
  0x8b   : > { %p2952_p12 = pnand %p2950_p9, %p2936_p11  ;;  %p2958_p0 = scmp.lt.s32.totalorder %s2956_s5, %s2949_s25 }
  0x8d   : > { %p2953_p2 = pneg %p2952_p12  ;;  %p2959_p4 = por %p2958_p0, %p2957_p5 }
  0x8f   : > { %p2960_p3 = pnand %p2959_p4, %p2953_p2 }
  0x91   : > { %2963 = shalt.err (!%p2960_p3)
}
  0x92   : > { %s4851_s12 = smov 704   ;;  %s4853_s3 = smov 44  }
  0x93   : > { %2631 = dma.hbm_to_vmem [thread:$0]  (!%p3580_p8), %s3590_s27, 1408, %s3585_s2, %s3594_s13, %s4851_s12, %s4851_s12, %s4853_s3  }
  0x94   : > { %s3315_s29 = smov [#allocation10]   ;;  %s4893_s4 = sld [smem:[#allocation44_spill]] }
  0x95   : > { %s326_s20 = sshll.u32 %s3315_s29, 4  ;;  %s327_s20 = int_to_ptr.vmem [resolvable:$true] %s326_s20 }
  0x9a   : > { %s2964_s25 = scalar_lea.hbm %s4893_s4, 256 }
  0x9b   : > { %p2965_p5 = scmp.ne.s32.totalorder %s4893_s4, %s2964_s25  ;;  %p2971_p1 = scmp.lt.u32.totalorder %s2964_s25, %s4893_s4 }
  0x9d   : > { %p2967_p10 = pnand %p2965_p5, %p3488_p7 }
  0x9f   : > { %p2968_p2 = pneg %p2967_p10 }
  0xa1   : > { %p2973_p11 = pnand %p2971_p1, %p2968_p2 }
  0xa3   : > { %2976 = shalt.err (!%p2973_p11)
}
  0xa4   : > { %s2977_s2 = scalar_lea.vmem %s327_s20, 256  ;;  %p2985_p9 = scmp.lt.s32.totalorder %s327_s20, %s327_s20 }
  0xa5   : > { %p2978_p8 = scmp.ne.s32.totalorder %s327_s20, %s2977_s2  ;;  %p2986_p12 = scmp.lt.s32.totalorder %s2977_s2, %s2977_s2 }
  0xa7   : > { %p2980_p13 = pnand %p2978_p8, %p3488_p7  ;;  %p2987_p0 = por %p2986_p12, %p2985_p9 }
  0xa9   : > { %p2981_p6 = pneg %p2980_p13 }
  0xab   : > { %p2988_p4 = pnand %p2987_p0, %p2981_p6 }
  0xad   : > { %2991 = shalt.err (!%p2988_p4)
}
  0xae   : > { %s3316_s27 = smov 128   ;;  %s3317_s29 = smov 8  }
  0xaf   : > { %p4894_p3 = scmp.ne.s32.totalorder %s4881_s26, 0  ;;  %s3318_s25 = smov [#allocation14]  }
  0xb0   : > { %s352_s30 = sshll.u32 %s3318_s25, 4  ;;  %s4895_s7 = sld [smem:[#allocation47_spill]]  ;;  %s353_s30 = int_to_ptr.vmem [resolvable:$true] %s352_s30 }
  0xb1   : > { %2618 = dma.hbm_to_vmem [thread:$0]  (!%p4894_p3), %s4893_s4, 256, %s327_s20, [#allocation9], %s3316_s27, %s3316_s27, %s3317_s29  }
  0xb6   : > { %s2992_s6 = scalar_lea.hbm %s4895_s7, 256 }
  0xb7   : > { %p2993_p5 = scmp.ne.s32.totalorder %s4895_s7, %s2992_s6  ;;  %p2999_p1 = scmp.lt.u32.totalorder %s2992_s6, %s4895_s7 }
  0xb9   : > { %p2995_p10 = pnand %p2993_p5, %p3488_p7 }
  0xbb   : > { %p2996_p2 = pneg %p2995_p10 }
  0xbd   : > { %p3001_p11 = pnand %p2999_p1, %p2996_p2 }
  0xbf   : > { %3004 = shalt.err (!%p3001_p11)
}
  0xc0   : > { %s3005_s20 = scalar_lea.vmem %s353_s30, 256  ;;  %p3013_p9 = scmp.lt.s32.totalorder %s353_s30, %s353_s30 }
  0xc1   : > { %p3006_p8 = scmp.ne.s32.totalorder %s353_s30, %s3005_s20  ;;  %p3014_p12 = scmp.lt.s32.totalorder %s3005_s20, %s3005_s20 }
  0xc3   : > { %p3008_p13 = pnand %p3006_p8, %p3488_p7  ;;  %p3015_p0 = por %p3014_p12, %p3013_p9 }
  0xc5   : > { %p3009_p6 = pneg %p3008_p13 }
  0xc7   : > { %p3016_p4 = pnand %p3015_p0, %p3009_p6 }
  0xc9   : > { %3019 = shalt.err (!%p3016_p4)
}
  0xca   : > { %2624 = dma.hbm_to_vmem [thread:$0]  (!%p4894_p3), %s4895_s7, 256, %s353_s30, [#allocation15], %s3316_s27, %s3316_s27, %s3317_s29  }
  0xcb   : > { %s48_s1 = sadd.s32 4294967295, %s3296_s19  ;;  %s53_s24 = sadd.s32 4294967295, %s3535_s17 }
  0xcc   : > { %p2368_p7 = scmp.gt.s32.totalorder %s48_s1, 0  ;;  %s63_s26 = sadd.s32 1, %s3284_s16 }
  0xcd   : > { %p2373_p5 = scmp.gt.s32.totalorder %s53_s24, 0  ;;  %p70_p10 = scmp.ne.s32.totalorder %s3284_s16, %s3280_s15 }
  0xce   : > { %s4998_s1 = smov (!%p2368_p7, %s48_s1), 0  ;;  %p76_p2 = scmp.ne.s32.totalorder %s3280_s15, %s3276_s14 }
  0xcf   : > { %s5000_s24 = smov (!%p2373_p5, %s53_s24), 0  ;;  %p4896_p1 = scmp.eq.s32.totalorder %s3304_s21, 0 }
  0xd0   : > { %p4897_p8 = scmp.eq.s32.totalorder %s3461_s22, 0  ;;  %s59_s27 = ssub.s32 %s4998_s1, %s5000_s24 }
  0xd1   : > { %p72_p11 = por %p4896_p1, %p70_p10  ;;  %s366_s29 = sand.u32 1, %s3284_s16  }
  0xd2   : > { %p3672_p13 = por %p4897_p8, %p76_p2  ;;  %s60_s10 = sor.u32 %s59_s27, %s3547_s23 }
  0xd3   : > { %p61_p3 = scmp.eq.s32.totalorder %s60_s10, 0  ;;  %s2568_s25 = smul.u32 88, %s366_s29 }
  0xd4   : > { %s2569_s30 = smul.u32 22, %s4998_s1  ;;  %p4899_p6 = scmp.lt.s32.totalorder %s3304_s21, 20 }
  0xd5   : > { %s3685_s14 = scalar_select %p61_p3, %s3284_s16, %s63_s26  }
  0xd6   : > { %p3680_p9 = pnand %p4899_p6, %p72_p11  ;;  %s381_s5 = sadd.s32 %s3574_s11, %s2569_s30 }
  0xd7   : > { %s2409_s6 = sshll.u32 %s381_s5, 6  ;;  %s370_s2 = scalar_lea.vmem [#allocation2], %s2568_s25 }
  0xd8   : > { %s384_s20 = sshll.u32 %s370_s2, 4  ;;  %s4901_s0 = sld [smem:[#allocation40_spill]]  ;;  %s3693_s20 = int_to_ptr.vmem [resolvable:$true] %s384_s20 }
  0xd9   : > { %s3695_s1 = scalar_lea.sflag [#allocation3], %s366_s29  ;;  %p3022_p0 = pneg %p3680_p9 }
  0xde   : > { %s3691_s24 = scalar_lea.hbm %s4901_s0, %s2409_s6  ;;  %s3025_s25 = scalar_lea.hbm %s4901_s0, 28160 }
  0xdf   : > { %s3020_s27 = scalar_lea.hbm %s3691_s24, 1408  ;;  %p3026_p5 = scmp.lt.u32.totalorder %s3691_s24, %s4901_s0 }
  0xe0   : > { %p3021_p12 = scmp.ne.s32.totalorder %s3691_s24, %s3020_s27  ;;  %p3027_p10 = scmp.lt.u32.totalorder %s3025_s25, %s3020_s27 }
  0xe1   : > { %p3029_p1 = scmp.lt.u32.totalorder %s3020_s27, %s3691_s24 }
  0xe2   : > { %p3023_p4 = pnand %p3022_p0, %p3021_p12  ;;  %p3028_p2 = por %p3027_p10, %p3026_p5 }
  0xe4   : > { %p3024_p7 = pneg %p3023_p4  ;;  %p3030_p11 = por %p3029_p1, %p3028_p2 }
  0xe6   : > { %p3031_p8 = pnand %p3030_p11, %p3024_p7 }
  0xe8   : > { %3034 = shalt.err (!%p3031_p8)
}
  0xe9   : > { %s3035_s29 = scalar_lea.vmem %s3693_s20, 1408  ;;  %s3319_s6 = smov [#allocation2]  }
  0xea   : > { %p3036_p3 = scmp.ne.s32.totalorder %s3693_s20, %s3035_s29  ;;  %s3040_s2 = sshll.u32 %s3319_s6, 4  ;;  %s3041_s2 = int_to_ptr.vmem [resolvable:$false] %s3040_s2 }
  0xeb   : > { %s3042_s12 = scalar_lea.vmem %s3041_s2, 2816  ;;  %p3043_p4 = scmp.lt.s32.totalorder %s3693_s20, %s3041_s2 }
  0xec   : > { %p3038_p6 = pnand %p3036_p3, %p3022_p0  ;;  %p3044_p5 = scmp.lt.s32.totalorder %s3042_s12, %s3035_s29 }
  0xee   : > { %p3039_p12 = pneg %p3038_p6  ;;  %p3045_p10 = por %p3044_p5, %p3043_p4 }
  0xf0   : > { %p3046_p2 = pnand %p3045_p10, %p3039_p12 }
  0xf2   : > { %3049 = shalt.err (!%p3046_p2)
}
  0xf3   : > { %s4902_s18 = smov 44   ;;  %s4903_s27 = smov 704  }
  0xf4   : > { %s4904_s26 = sld [smem:[#allocation30_spill]]  ;;  %s4905_s10 = sld [smem:[#allocation29_spill]] }
  0xf5   : > { %s4906_s25 = sld [smem:[#allocation28_spill]]  ;;  %p123_p0 = scmp.lt.s32.totalorder %s3528_s28, 9 }
  0xf6   : > { %2628 = dma.hbm_to_vmem [thread:$0]  (!%p3680_p9), %s3691_s24, 1408, %s3693_s20, %s3695_s1, %s4903_s27, %s4903_s27, %s4902_s18  }
  0xf7   : > { %s127_s8 = sadd.s32 1, %s3535_s17  ;;  %s5002_s28 = smov (!%p123_p0, %s3528_s28), 9 }
  0xf8   : > { %p128_p7 = scmp.lt.s32.totalorder %s127_s8, 9  ;;  %p4907_p11 = scmp.eq.s32.totalorder %s3304_s21, 0 }
  0xf9   : > { %p4908_p6 = scmp.eq.s32.totalorder %s3461_s22, 0  ;;  %s2575_s24 = smul.u32 22, %s5002_s28 }
  0xfa   : > { %s5004_s8 = smov (!%p128_p7, %s127_s8), 9  ;;  %s137_s30 = sadd.s32 1, %s4904_s26 }
  0xfb   : > { %p144_p1 = scmp.ne.s32.totalorder %s4904_s26, %s4905_s10  ;;  %p150_p3 = scmp.ne.s32.totalorder %s4905_s10, %s4906_s25 }
  0xfc   : > { %s133_s5 = ssub.s32 %s5002_s28, %s5004_s8  ;;  %s423_s29 = sand.u32 1, %s4904_s26  }
  0xfd   : > { %p146_p8 = por %p144_p1, %p4907_p11  ;;  %s134_s6 = sor.u32 %s133_s5, %s3547_s23 }
  0xfe   : > { %p3740_p12 = por %p150_p3, %p4908_p6  ;;  %p135_p9 = scmp.eq.s32.totalorder %s134_s6, 0 }
  0xff   : > { %s2574_s20 = smul.u32 88, %s423_s29  ;;  %p4910_p4 = scmp.lt.s32.totalorder %s3304_s21, 20 }
 0x100   : > { %s4909_s2 = scalar_select %p3740_p12, 1, 0 }
 0x101   : > { %p3746_p5 = pnand %p4910_p4, %p146_p8  ;;  %s5006_s26 = smov (!%p135_p9, %s4904_s26), %s137_s30 }
 0x102   : > { %s436_s12 = sadd.s32 %s2575_s24, %s3574_s11  ;;  %s425_s23 = scalar_lea.vmem [#allocation7], %s2574_s20 }
 0x103   : > { %s2421_s10 = sshll.u32 %s436_s12, 6  ;;  %s439_s25 = sshll.u32 %s425_s23, 4  ;;  %s3759_s25 = int_to_ptr.vmem [resolvable:$true] %s439_s25 }
 0x104   : > { %s4912_s0 = sld [smem:[#allocation42_spill]]  ;;  %p3052_p2 = pneg %p3746_p5 }
 0x10a   : > { %s3757_s4 = scalar_lea.hbm %s4912_s0, %s2421_s10  ;;  %s3055_s6 = scalar_lea.hbm %s4912_s0, 28160 }
 0x10b   : > { %s3050_s28 = scalar_lea.hbm %s3757_s4, 1408  ;;  %p3056_p1 = scmp.lt.u32.totalorder %s3757_s4, %s4912_s0 }
 0x10c   : > { %p3051_p10 = scmp.ne.s32.totalorder %s3757_s4, %s3050_s28  ;;  %p3057_p11 = scmp.lt.u32.totalorder %s3055_s6, %s3050_s28 }
 0x10d   : > { %p3059_p3 = scmp.lt.u32.totalorder %s3050_s28, %s3757_s4 }
 0x10e   : > { %p3053_p0 = pnand %p3052_p2, %p3051_p10  ;;  %p3058_p8 = por %p3057_p11, %p3056_p1 }
 0x110   : > { %p3054_p7 = pneg %p3053_p0  ;;  %p3060_p6 = por %p3059_p3, %p3058_p8 }
 0x112   : > { %p3061_p9 = pnand %p3060_p6, %p3054_p7 }
 0x114   : > { %3064 = shalt.err (!%p3061_p9)
}
 0x115   : > { %s3065_s12 = scalar_lea.vmem %s3759_s25, 1408  ;;  %s3320_s10 = smov [#allocation7]  }
 0x116   : > { %p3066_p4 = scmp.ne.s32.totalorder %s3759_s25, %s3065_s12  ;;  %s3070_s23 = sshll.u32 %s3320_s10, 4  ;;  %s3071_s23 = int_to_ptr.vmem [resolvable:$false] %s3070_s23 }
 0x117   : > { %s3072_s8 = scalar_lea.vmem %s3071_s23, 2816  ;;  %p3073_p12 = scmp.lt.s32.totalorder %s3759_s25, %s3071_s23 }
 0x118   : > { %p3068_p10 = pnand %p3066_p4, %p3052_p2  ;;  %p3074_p1 = scmp.lt.s32.totalorder %s3072_s8, %s3065_s12 }
 0x11a   : > { %p3069_p0 = pneg %p3068_p10  ;;  %p3075_p11 = por %p3074_p1, %p3073_p12 }
 0x11c   : > { %p3076_p8 = pnand %p3075_p11, %p3069_p0 }
 0x11e   : > { %3079 = shalt.err (!%p3076_p8)
}
 0x11f   : > { %s4913_s5 = sld [smem:[#allocation27_spill]]  ;;  %s4914_s28 = sld [smem:[#allocation26_spill]] }
 0x120   : > { %s4915_s30 = sld [smem:[#allocation25_spill]]  ;;  %s2367_s1 = sadd.s32 4294967294, %s3304_s21  }
 0x121   : > { %2634 = dma.hbm_to_vmem [thread:$0]  (!%p3746_p5), %s3757_s4, 1408, %s3759_s25, %s3594_s13, %s4903_s27, %s4903_s27, %s4902_s18  }
 0x122   : > { %p4916_p2 = scmp.eq.s32.totalorder %s3564_s9, 0  ;;  %p4917_p7 = scmp.eq.s32.totalorder %s3304_s21, 0 }
 0x123   : > { %p288_p9 = scmp.eq.s32.totalorder %s3461_s22, 19  ;;  %p294_p4 = scmp.eq.s32.totalorder %s2367_s1, 19 }
 0x124   : > { %p4918_p10 = scmp.eq.s32.totalorder %s3461_s22, 0  ;;  %p4922_p11 = scmp.lt.s32.totalorder %s3304_s21, 20 }
 0x125   : > { %s207_s29 = sadd.s32 1, %s4913_s5  ;;  %p214_p12 = scmp.ne.s32.totalorder %s4913_s5, %s4914_s28 }
 0x126   : > { %s3797_s6 = scalar_select %p4916_p2, %s4913_s5, %s207_s29  }
 0x127   : > { %p216_p3 = por %p214_p12, %p4917_p7  ;;  %p220_p6 = scmp.ne.s32.totalorder %s4914_s28, %s4915_s30 }
 0x128   : > { %s451_s24 = sand.u32 1, %s4913_s5   ;;  %p3811_p5 = por %p288_p9, %p214_p12 }
 0x129   : > { %p3806_p0 = por %p220_p6, %p4918_p10  ;;  %p3815_p1 = por %p294_p4, %p220_p6 }
 0x12a   : > { %s4920_s4 = scalar_select %p3811_p5, 1, 0 }
 0x12b   : > { %s4919_s20 = scalar_select %p3806_p0, 1, 0 }
 0x12c   : > { %s4921_s13 = scalar_select %p3815_p1, 1, 0 }
 0x12d   : > { %s2577_s9 = smul.u32 88, %s451_s24  ;;  %p3821_p8 = pnand %p4922_p11, %p216_p3 }
 0x12e   : > { %s2578_s12 = smul.u32 22, %s3296_s19  ;;  %s4924_s1 = sld [smem:[#allocation45_spill]] }
 0x12f   : > { %s453_s23 = scalar_lea.vmem [#allocation11], %s2577_s9  ;;  %s4925_s24 = sand.u32 1, %s3304_s21  }
 0x130   : > { %s459_s10 = sadd.s32 %s2578_s12, %s3574_s11  ;;  %s462_s8 = sshll.u32 %s453_s23, 4  ;;  %s3827_s8 = int_to_ptr.vmem [resolvable:$true] %s462_s8 }
 0x131   : > { %s2422_s5 = sshll.u32 %s459_s10, 6  ;;  %s3836_s0 = scalar_lea.sflag [#allocation12], %s4925_s24 }
 0x132   : > { %p3082_p2 = pneg %p3821_p8 }
 0x134   : > { %s3832_s29 = scalar_lea.hbm %s4924_s1, %s2422_s5  ;;  %s3085_s12 = scalar_lea.hbm %s4924_s1, 28160 }
 0x135   : > { %s3080_s7 = scalar_lea.hbm %s3832_s29, 1408  ;;  %p3086_p6 = scmp.lt.u32.totalorder %s3832_s29, %s4924_s1 }
 0x136   : > { %p3081_p12 = scmp.ne.s32.totalorder %s3832_s29, %s3080_s7  ;;  %p3087_p9 = scmp.lt.u32.totalorder %s3085_s12, %s3080_s7 }
 0x137   : > { %p3089_p10 = scmp.lt.u32.totalorder %s3080_s7, %s3832_s29 }
 0x138   : > { %p3083_p7 = pnand %p3082_p2, %p3081_p12  ;;  %p3088_p4 = por %p3087_p9, %p3086_p6 }
 0x13a   : > { %p3084_p3 = pneg %p3083_p7  ;;  %p3090_p11 = por %p3089_p10, %p3088_p4 }
 0x13c   : > { %p3091_p1 = pnand %p3090_p11, %p3084_p3 }
 0x13e   : > { %3094 = shalt.err (!%p3091_p1)
}
 0x13f   : > { %s3095_s5 = scalar_lea.vmem %s3827_s8, 1408  ;;  %s3321_s28 = smov [#allocation11]  }
 0x140   : > { %p3096_p12 = scmp.ne.s32.totalorder %s3827_s8, %s3095_s5  ;;  %s3100_s30 = sshll.u32 %s3321_s28, 4  ;;  %s3101_s30 = int_to_ptr.vmem [resolvable:$false] %s3100_s30 }
 0x141   : > { %s3102_s24 = scalar_lea.vmem %s3101_s30, 2816  ;;  %p3103_p0 = scmp.lt.s32.totalorder %s3827_s8, %s3101_s30 }
 0x142   : > { %p3098_p7 = pnand %p3096_p12, %p3082_p2  ;;  %p3104_p6 = scmp.lt.s32.totalorder %s3102_s24, %s3095_s5 }
 0x144   : > { %p3099_p5 = pneg %p3098_p7  ;;  %p3105_p9 = por %p3104_p6, %p3103_p0 }
 0x146   : > { %p3106_p4 = pnand %p3105_p9, %p3099_p5 }
 0x148   : > { %3109 = shalt.err (!%p3106_p4)
}
 0x149   : > { %2637 = dma.hbm_to_vmem [thread:$0]  (!%p3821_p8), %s3832_s29, 1408, %s3827_s8, %s3836_s0, %s4903_s27, %s4903_s27, %s4902_s18  }
 0x14a   : > { %s4926_s7 = sld [smem:[#allocation36_spill]] }
 0x150   : > { %p4927_p1 = scmp.ne.s32.totalorder %s4926_s7, 0 }
 0x151   : > { %s476_s11 = sand.u32 (!%p4927_p1), 1, %s3280_s15  }
 0x152   : > { %474 = sbr.rel (%p4927_p1) target bundleno = 1282 (0x502), region = 52  ;;  %s477_s12 = scalar_lea.sflag (!%p4927_p1), [#allocation3], %s476_s11 }
 0x153   : > { %s2580_s9 = smul.u32 (!%p4927_p1), 88, %s476_s11 }
 0x155   : > { %s3870_s10 = scalar_lea.vmem (!%p4927_p1), [#allocation2], %s2580_s9 }
 0x159   : > { %3207 = dma.done.wait (%p3672_p13), %s477_s12, 1408  }
 0x15a   : > { %3209 = vsyncadd (%p3672_p13), %s477_s12, 4294965888  ;;  %s4928_s25 = sld [smem:[#allocation31_spill]]  ;;  %s4929_s23 = sld [smem:[#allocation38_spill]] }
 0x15b   : > { %s485_s5 = sand.u32 1, %s3461_s22  }
 0x15c   : > { %s486_s27 = scalar_lea.sflag [#allocation6], %s485_s5 }
 0x160   : > { %s487_s0 = sand.u32 1, %s4928_s25   ;;  %p4930_p0 = scmp.ne.s32.totalorder %s4929_s23, 0 }
 0x161   : > { %s2581_s18 = smul.u32 88, %s487_s0 }
 0x163   : > { %s3878_s8 = scalar_lea.vmem [#allocation5], %s2581_s18 }
 0x164   : > { %3211 = dma.done.wait (%p4930_p0), %s486_s27, 1408  }
 0x165   : > { %3213 = vsyncadd (%p4930_p0), %s486_s27, 4294965888  ;;  %s4931_s29 = sld [smem:[#allocation29_spill]]  ;;  %p4932_p13 = scmp.ne.s32.totalorder %s4909_s2, 0 }
 0x16b   : > { %s496_s28 = sand.u32 1, %s4931_s29  }
 0x16c   : > { %s2582_s30 = smul.u32 88, %s496_s28 }
 0x16e   : > { %s3885_s3 = scalar_lea.vmem [#allocation7], %s2582_s30 }
 0x16f   : > { %3215 = dma.done.wait (%p4932_p13), %s486_s27, 1408  }
 0x170   : > { %3217 = vsyncadd (%p4932_p13), %s486_s27, 4294965888  ;;  %p4933_p5 = scmp.eq.s32.totalorder %s3461_s22, 0 }
 0x172   : > { %3219 = dma.done.wait (%p4933_p5), [#allocation9], 768   ;;  %p4934_p8 = pmov %p4933_p5 }
 0x173   : > { %s4935_s24 = sld [smem:[#allocation26_spill]]  ;;  %s512_s9 = scalar_lea.sflag [#allocation12], %s485_s5 }
 0x174   : > { %3221 = vsyncadd (%p4934_p8), [#allocation9], 4294966528  ;;  %p4936_p2 = scmp.ne.s32.totalorder %s4919_s20, 0 }
 0x179   : > { %s513_s7 = sand.u32 1, %s4935_s24  }
 0x17a   : > { %s2583_s11 = smul.u32 88, %s513_s7 }
 0x17c   : > { %s3898_s12 = scalar_lea.vmem [#allocation11], %s2583_s11 }
 0x17d   : > { %3223 = dma.done.wait (%p4936_p2), %s512_s9, 1408  }
 0x17e   : > { %3225 = vsyncadd (%p4936_p2), %s512_s9, 4294965888  ;;  %p4937_p3 = pmov %p4933_p5 }
 0x180   : > { %3227 = dma.done.wait (%p4937_p3), [#allocation12], 128   ;;  %p4938_p10 = pmov %p4937_p3 }
 0x181   : > { %p4939_p11 = pmov %p4937_p3 }
 0x182   : > { %3229 = vsyncadd (%p4938_p10), [#allocation12], 4294967168 }
 0x183   : > { %3231 = dma.done.wait (%p4939_p11), [#allocation15], 256   ;;  %p4940_p12 = pmov %p4937_p3 }
 0x184   : > { %s4941_s2 = sld [smem:[#allocation33_spill]]  ;;  %s3918_s20 = scalar_lea.vmem [#allocation16], %s2583_s11 }
 0x185   : > { %3233 = vsyncadd (%p4940_p12), [#allocation15], 4294967040 }
 0x18a   : > { %p586_p7 = scmp.ge.s32.totalorder %s4941_s2, 1  ;;  %p587_p6 = scmp.lt.s32.totalorder %s4941_s2, 9 }
 0x18c   : > { %p3914_p9 = pnand %p587_p6, %p586_p7 }
 0x18d   : > { %v3923_v0 = vld [vmem:[%s3870_s10 + $0xc] ss:$44 sps:$4 sm:$0xff] (!%p3914_p9)   ;;  %v3926_v1 = vld [vmem:[%s3870_s10 + $0x4] ss:$44 sps:$4 sm:$0xff] (!%p3914_p9)   ;;  %s3322_s22 = smov (!%p3914_p9), 127   ;;  %s3323_s23 = smov (!%p3914_p9), 126  }
 0x18e   : > { %591 = sbr.rel (%p3914_p9) target bundleno = 1246 (0x4de), region = 88  ;;  %679 = vrot.lane.b32.xlu1 (!%p3914_p9), %v3923_v0, %s3322_s22  ;;  %v3931_v2 = vld [vmem:[%s3870_s10 + $0x10] ss:$44 sps:$4 sm:$0xff] (!%p3914_p9)   ;;  %1288 = vmatprep.subr.bf16.mxu1 (!%p3914_p9), %v3923_v0  ;;  %v3937_v3 = vld [vmem:[%s3870_s10 + $0x8] ss:$44 sps:$4 sm:$0xff] (!%p3914_p9)   ;;  %s3324_s5 = smov (!%p3914_p9), 1  }
 0x18f   : > { %675 = vrot.lane.b32.xlu0 (!%p3914_p9), %v3926_v1, %s3322_s22  ;;  %v2816_v4 = vld [vmem:[%s3870_s10] ss:$44 sps:$4 sm:$0xff] (!%p3914_p9)   ;;  %1202 = vmatprep.subr.bf16.mxu0 (!%p3914_p9), %v3926_v1  ;;  %v3957_v6 = vld [vmem:[%s3878_s8 + $0xc] ss:$44 sps:$4 sm:$0xff] (!%p3914_p9)   ;;  %v3966_v8 = vld [vmem:[%s3878_s8 + $0x14] ss:$44 sps:$4 sm:$0xff] (!%p3914_p9)  }
 0x190   : > { %1289 = vmatpush1.bf16.msra.mxu1 (!%p3914_p9), %v3937_v3  ;;  %1203 = vmatpush1.bf16.msra.mxu0 (!%p3914_p9), %v2816_v4  ;;  %v3954_v5 = vld [vmem:[%s3878_s8 + $0x10] ss:$44 sps:$4 sm:$0xff] (!%p3914_p9)   ;;  %v3963_v7 = vld [vmem:[%s3878_s8 + $0x18] ss:$44 sps:$4 sm:$0xff] (!%p3914_p9)   ;;  %v3975_v9 = vld [vmem:[%s3878_s8 + $0x8] ss:$44 sps:$4 sm:$0xff] (!%p3914_p9)  }
 0x191   : > { %v3980_v10 = vld [vmem:[%s3878_s8 + $0x1c] ss:$44 sps:$4 sm:$0xff] (!%p3914_p9)   ;;  %v2826_v11 = vld [vmem:[%s3885_s3 + $0x4] ss:$44 sps:$4 sm:$0xff] (!%p3914_p9)   ;;  %v2831_v14 = vld [vmem:[%s3885_s3 + $0x8] ss:$44 sps:$4 sm:$0xff] (!%p3914_p9)  }
 0x192   : > { %681 = vrot.lane.b32.xlu1 (!%p3914_p9), %v3931_v2, %s3322_s22  ;;  %v2828_v12 = vld [vmem:[%s3885_s3] ss:$44 sps:$4 sm:$0xff] (!%p3914_p9)   ;;  %v2833_v16 = vld [vmem:[%s3885_s3 + $0x10] ss:$44 sps:$4 sm:$0xff] (!%p3914_p9)   ;;  %v4011_v18 = vld [vmem:[%s3870_s10 + $0x18] ss:$44 sps:$4 sm:$0xff] (!%p3914_p9)  }
 0x193   : > { %677 = vrot.lane.b32.xlu0 (!%p3914_p9), %v3937_v3, %s3322_s22  ;;  %v2829_v13 = vld [vmem:[%s3885_s3 + $0xc] ss:$44 sps:$4 sm:$0xff] (!%p3914_p9)   ;;  %v3994_v15 = vld [vmem:[%s3870_s10 + $0x14] ss:$44 sps:$4 sm:$0xff] (!%p3914_p9)   ;;  %v4021_v20 = vld [vmem:[%s3878_s8] ss:$44 sps:$4 sm:$0xff] (!%p3914_p9)  }
 0x194   : > { %v2835_v17 = vld [vmem:[%s3885_s3 + $0x14] ss:$44 sps:$4 sm:$0xff] (!%p3914_p9)   ;;  %v2838_v19 = vld [vmem:[%s3885_s3 + $0x18] ss:$44 sps:$4 sm:$0xff] (!%p3914_p9)   ;;  %v4038_v22 = vld [vmem:[%s3885_s3 + $0x1c] ss:$44 sps:$4 sm:$0xff] (!%p3914_p9)  }
 0x195   : > { %v4025_v21 = vld [vmem:[%s3878_s8 + $0x4] ss:$44 sps:$4 sm:$0xff]   ;;  %vm691_vm0 = vcmask 1039360   ;;  %vm726_vm1 = vcmask 1031168   ;;  %vm951_vm2 = vcmask 7168   ;;  %vm1198_vm3 = vcmask 392192  }
 0x196   : > { %710 = vrot.lane.b32.xlu1 %v3926_v1, %s3323_s23  ;;  %v4046_v23 = vld [vmem:[#allocation8 + $0x4] ss:$16 sps:$4 sm:$0xff]   ;;  %vm2020_vm4 = vcmask 11264   ;;  %vm1634_vm5 = vcmask 130048   ;;  %vm2117_vm14 = vcmask 1043464   ;;  %vm2118_vm15 = vcmask 1047556  }
 0x197   : > { %673 = vrot.lane.b32.xlu0 %v2816_v4, %s3322_s22  ;;  %1320 = vmatprep.mubr.bf16.mxu1 %v4046_v23 }
 0x198   : > { %1234 = vmatprep.mubr.bf16.mxu0 %v4046_v23 }
 0x19a   : > { %714 = vrot.lane.b32.xlu1 %v3923_v0, %s3323_s23 }
 0x19b   : > { %712 = vrot.lane.b32.xlu0 %v3937_v3, %s3323_s23 }
 0x19e   : > { %708 = vrot.lane.b32.xlu1 %v2816_v4, %s3323_s23 }
 0x19f   : > { %716 = vrot.lane.b32.xlu0 %v3931_v2, %s3323_s23 }
 0x1a2   : > { %822 = vrot.lane.b32.xlu1 %v3954_v5, %s3322_s22 }
 0x1a3   : > { %820 = vrot.lane.b32.xlu0 %v3957_v6, %s3322_s22 }
 0x1a6   : > { %826 = vrot.lane.b32.xlu1 %v3963_v7, %s3322_s22 }
 0x1a7   : > { %824 = vrot.lane.b32.xlu0 %v3966_v8, %s3322_s22 }
 0x1aa   : > { %818 = vrot.lane.b32.xlu1 %v3975_v9, %s3322_s22 }
 0x1ab   : > { %828 = vrot.lane.b32.xlu0 %v3980_v10, %s3322_s22 }
 0x1ae   : > { %937 = vrot.lane.b32.xlu1 %v2826_v11, %s3324_s5 }
 0x1af   : > { %935 = vrot.lane.b32.xlu0 %v2828_v12, %s3324_s5 }
 0x1b2   : > { %941 = vrot.lane.b32.xlu1 %v2829_v13, %s3324_s5 }
 0x1b3   : > { %939 = vrot.lane.b32.xlu0 %v2831_v14, %s3324_s5 }
 0x1b6   : > { %683 = vrot.lane.b32.xlu1 %v3994_v15, %s3322_s22 }
 0x1b7   : > { %943 = vrot.lane.b32.xlu0 %v2833_v16, %s3324_s5 }
 0x1ba   : > { %966 = vrot.lane.b32.xlu1 %v2826_v11, %s3322_s22 }
 0x1bb   : > { %718 = vrot.lane.b32.xlu0 %v3994_v15, %s3323_s23 }
 0x1be   : > { %970 = vrot.lane.b32.xlu1 %v2829_v13, %s3322_s22 }
 0x1bf   : > { %968 = vrot.lane.b32.xlu0 %v2831_v14, %s3322_s22 }
 0x1c2   : > { %974 = vrot.lane.b32.xlu1 %v2835_v17, %s3322_s22 }
 0x1c3   : > { %972 = vrot.lane.b32.xlu0 %v2833_v16, %s3322_s22 }
 0x1c6   : > { %945 = vrot.lane.b32.xlu1 %v2835_v17, %s3324_s5 }
 0x1c7   : > { %964 = vrot.lane.b32.xlu0 %v2828_v12, %s3322_s22 }
 0x1ca   : > { %720 = vrot.lane.b32.xlu1 %v4011_v18, %s3323_s23 }
 0x1cb   : > { %685 = vrot.lane.b32.xlu0 %v4011_v18, %s3322_s22 }
 0x1ce   : > { %947 = vrot.lane.b32.xlu1 %v2838_v19, %s3324_s5 }
 0x1cf   : > { %976 = vrot.lane.b32.xlu0 %v2838_v19, %s3322_s22 }
 0x1d2   : > { %814 = vrot.lane.b32.xlu1 %v4021_v20, %s3322_s22 }
 0x1d3   : > { %816 = vrot.lane.b32.xlu0 %v4025_v21, %s3322_s22 }
 0x1d6   : > { %852 = vrot.lane.b32.xlu1 %v3975_v9, %s3323_s23 }
 0x1d7   : > { %850 = vrot.lane.b32.xlu0 %v4025_v21, %s3323_s23 }
 0x1da   : > { %856 = vrot.lane.b32.xlu1 %v3954_v5, %s3323_s23 }
 0x1db   : > { %854 = vrot.lane.b32.xlu0 %v3957_v6, %s3323_s23 }
 0x1de   : > { %978 = vrot.lane.b32.xlu1 %v4038_v22, %s3322_s22 }
 0x1df   : > { %848 = vrot.lane.b32.xlu0 %v4021_v20, %s3323_s23 }
 0x1e3   : > { %858 = vrot.lane.b32.xlu0 %v3966_v8, %s3323_s23 }
 0x200   : > { %v680_v24 = vpop.permute.xlu1 %679 }
 0x201   : > { %v676_v25 = vpop.permute.xlu0 %675 }
 0x204   : > { %v4052_v26 = vpop.permute.xlu1 %681 }
 0x205   : > { %v678_v27 = vpop.permute.xlu0 %677  ;;  %v4056_v28 = vsel %vm691_vm0, %v680_v24, %v4052_v26 }
 0x206   : > { %1290 = vmatprep.subr.bf16.mxu1 %v4056_v28  ;;  %v694_v29 = vsel %vm691_vm0, %v678_v27, %v680_v24  ;;  %v693_v30 = vsel %vm691_vm0, %v676_v25, %v678_v27 }
 0x207   : > { %1291 = vmatpush1.bf16.msra.mxu1 %v694_v29  ;;  %1204 = vmatprep.subr.bf16.mxu0 %v693_v30 }
 0x208   : > { %v711_v31 = vpop.permute.xlu1 %710 }
 0x209   : > { %v674_v32 = vpop.permute.xlu0 %673 }
 0x20a   : > { %v692_v33 = vsel %vm691_vm0, %v674_v32, %v676_v25 }
 0x20b   : > { %1205 = vmatpush1.bf16.msra.mxu0 %v692_v33 }
 0x20c   : > { %v715_v34 = vpop.permute.xlu1 %714 }
 0x20d   : > { %v713_v35 = vpop.permute.xlu0 %712 }
 0x20e   : > { %v728_v36 = vsel %vm726_vm1, %v711_v31, %v713_v35  ;;  %v729_v41 = vsel %vm726_vm1, %v713_v35, %v715_v34 }
 0x20f   : > { %1206 = vmatprep.subr.bf16.mxu0 %v728_v36 }
 0x210   : > { %v709_v37 = vpop.permute.xlu1 %708 }
 0x211   : > { %v717_v38 = vpop.permute.xlu0 %716  ;;  %v727_v39 = vsel %vm726_vm1, %v709_v37, %v711_v31 }
 0x212   : > { %1207 = vmatpush1.bf16.msra.mxu0 %v727_v39  ;;  %v730_v40 = vsel %vm726_vm1, %v715_v34, %v717_v38  ;;  %v4192_v39 = vld [vmem:[%s3870_s10 + $0x1c] ss:$44 sps:$4 sm:$0xff]  }
 0x213   : > { %1292 = vmatprep.subr.bf16.mxu1 %v730_v40  ;;  %1208 = vmatprep.subr.bf16.mxu0 %v3937_v3 }
 0x214   : > { %1293 = vmatpush1.bf16.msra.mxu1 %v729_v41  ;;  %v823_v42 = vpop.permute.xlu1 %822 }
 0x215   : > { %v821_v43 = vpop.permute.xlu0 %820  ;;  %1294 = vmatprep.subr.bf16.mxu1 %v3931_v2 }
 0x216   : > { %v4069_v44 = vsel %vm691_vm0, %v821_v43, %v823_v42  ;;  %1209 = vmatpush1.bf16.msra.mxu0 %v3926_v1 }
 0x217   : > { %1012 = vrot.lane.b32.xlu1 %v4069_v44, %s3322_s22  ;;  %1210 = vmatprep.subr.bf16.mxu0 %v694_v29 }
 0x218   : > { %v827_v45 = vpop.permute.xlu1 %826  ;;  %1295 = vmatpush1.bf16.msra.mxu1 %v3923_v0 }
 0x219   : > { %v825_v46 = vpop.permute.xlu0 %824 }
 0x21a   : > { %v4076_v47 = vsel %vm691_vm0, %v825_v46, %v827_v45  ;;  %1211 = vmatpush1.bf16.msra.mxu0 %v693_v30  ;;  %v4097_v55 = vsel %vm691_vm0, %v823_v42, %v825_v46 }
 0x21b   : > { %1016 = vrot.lane.b32.xlu1 %v4076_v47, %s3322_s22  ;;  %1212 = vmatprep.subr.bf16.mxu0 %v729_v41 }
 0x21c   : > { %v4080_v48 = vpop.permute.xlu1 %818 }
 0x21d   : > { %v4082_v49 = vpop.permute.xlu0 %828  ;;  %v4086_v50 = vsel %vm691_vm0, %v4080_v48, %v821_v43 }
 0x21e   : > { %1213 = vmatpush1.bf16.msra.mxu0 %v728_v36  ;;  %v4106_v59 = vsel %vm691_vm0, %v827_v45, %v4082_v49 }
 0x21f   : > { %1010 = vrot.lane.b32.xlu1 %v4086_v50, %s3322_s22  ;;  %1214 = vmatprep.subr.bf16.mxu0 %v3923_v0 }
 0x220   : > { %v938_v51 = vpop.permute.xlu1 %937 }
 0x221   : > { %v936_v52 = vpop.permute.xlu0 %935 }
 0x222   : > { %1028 = vrot.lane.b32.xlu0 %v936_v52, %s3322_s22  ;;  %1215 = vmatpush1.bf16.msra.mxu0 %v3937_v3  ;;  %v952_v0 = vsel %vm951_vm2, %v936_v52, %v938_v51 }
 0x223   : > { %1216 = vmatprep.subr.bf16.mxu0 %v4056_v28 }
 0x224   : > { %v942_v53 = vpop.permute.xlu1 %941 }
 0x225   : > { %v4094_v54 = vpop.permute.xlu0 %939 }
 0x226   : > { %1014 = vrot.lane.b32.xlu0 %v4097_v55, %s3322_s22  ;;  %v953_v56 = vsel %vm951_vm2, %v938_v51, %v4094_v54  ;;  %1217 = vmatpush1.bf16.msra.mxu0 %v694_v29  ;;  %v954_v11 = vsel %vm951_vm2, %v4094_v54, %v942_v53 }
 0x227   : > { %1032 = vrot.lane.b32.xlu1 %v953_v56, %s3322_s22  ;;  %1218 = vmatprep.subr.bf16.mxu0 %v730_v40 }
 0x228   : > { %v684_v57 = vpop.permute.xlu1 %683 }
 0x229   : > { %v944_v58 = vpop.permute.xlu0 %943  ;;  %v4110_v60 = vsel %vm691_vm0, %v4052_v26, %v684_v57 }
 0x22a   : > { %1018 = vrot.lane.b32.xlu0 %v4106_v59, %s3322_s22  ;;  %1296 = vmatprep.subr.bf16.mxu1 %v4110_v60  ;;  %v955_v61 = vsel %vm951_vm2, %v942_v53, %v944_v58 }
 0x22b   : > { %1036 = vrot.lane.b32.xlu1 %v955_v61, %s3322_s22  ;;  %1219 = vmatpush1.bf16.msra.mxu0 %v729_v41 }
 0x22c   : > { %1297 = vmatpush1.bf16.msra.mxu1 %v4056_v28  ;;  %v967_v62 = vpop.permute.xlu1 %966  ;;  %1220 = vmatprep.subr.bf16.mxu0 %v4025_v21 }
 0x22d   : > { %v719_v63 = vpop.permute.xlu0 %718 }
 0x22e   : > { %1030 = vrot.lane.b32.xlu0 %v952_v0, %s3322_s22  ;;  %v4122_v1 = vsel %vm726_vm1, %v717_v38, %v719_v63  ;;  %v4245_v0 = vld [vmem:[%s3878_s8 + $0x24] ss:$44 sps:$4 sm:$0xff]  }
 0x22f   : > { %1298 = vmatprep.subr.bf16.mxu1 %v4122_v1  ;;  %1221 = vmatpush1.bf16.msra.mxu0 %v4021_v20 }
 0x230   : > { %1299 = vmatpush1.bf16.msra.mxu1 %v730_v40  ;;  %v971_v3 = vpop.permute.xlu1 %970 }
 0x231   : > { %v969_v4 = vpop.permute.xlu0 %968  ;;  %1300 = vmatprep.subr.bf16.mxu1 %v3994_v15 }
 0x232   : > { %1034 = vrot.lane.b32.xlu0 %v954_v11, %s3322_s22  ;;  %v4131_v12 = vsel %vm691_vm0, %v967_v62, %v969_v4  ;;  %v4137_v14 = vsel %vm691_vm0, %v969_v4, %v971_v3  ;;  %v4257_v4 = vld [vmem:[#allocation8] ss:$16 sps:$4 sm:$0xff]   ;;  %v4260_v11 = vld [vmem:[#allocation8 + $0xc] ss:$16 sps:$4 sm:$0xff]  }
 0x233   : > { %1048 = vrot.lane.b32.xlu1 %v4131_v12, %s3322_s22 }
 0x234   : > { %v975_v13 = vpop.permute.xlu1 %974  ;;  %1301 = vmatpush1.bf16.msra.mxu1 %v3931_v2 }
 0x235   : > { %v973_v16 = vpop.permute.xlu0 %972 }
 0x236   : > { %v4140_v17 = vsel %vm691_vm0, %v971_v3, %v973_v16  ;;  %1050 = vrot.lane.b32.xlu0 %v4137_v14, %s3322_s22  ;;  %v4147_v20 = vsel %vm691_vm0, %v973_v16, %v975_v13  ;;  %v2856_v3 = vld [vmem:[%s3870_s10 + $0x28] ss:$44 sps:$4 sm:$0xff]  }
 0x237   : > { %1052 = vrot.lane.b32.xlu1 %v4140_v17, %s3322_s22 }
 0x238   : > { %v946_v19 = vpop.permute.xlu1 %945 }
 0x239   : > { %v965_v24 = vpop.permute.xlu0 %964  ;;  %v956_v28 = vsel %vm951_vm2, %v944_v58, %v946_v19  ;;  %v2849_v58 = vld [vmem:[%s3878_s8 + $0x28] ss:$44 sps:$4 sm:$0xff]  }
 0x23a   : > { %1054 = vrot.lane.b32.xlu0 %v4147_v20, %s3322_s22  ;;  %v4152_v25 = vsel %vm691_vm0, %v965_v24, %v967_v62  ;;  %v4233_v62 = vld [vmem:[%s3870_s10 + $0x24] ss:$44 sps:$4 sm:$0xff]  }
 0x23b   : > { %1046 = vrot.lane.b32.xlu1 %v4152_v25, %s3322_s22 }
 0x23c   : > { %v4156_v26 = vpop.permute.xlu1 %720 }
 0x23d   : > { %v4158_v27 = vpop.permute.xlu0 %685  ;;  %v4173_v31 = vsel %vm726_vm1, %v719_v63, %v4156_v26 }
 0x23e   : > { %1038 = vrot.lane.b32.xlu0 %v956_v28, %s3322_s22  ;;  %v4164_v29 = vsel %vm691_vm0, %v684_v57, %v4158_v27  ;;  %v4218_v57 = vld [vmem:[%s3870_s10 + $0x20] ss:$44 sps:$4 sm:$0xff]  }
 0x23f   : > { %1064 = vrot.lane.b32.xlu1 %v938_v51, %s3322_s22  ;;  %1302 = vmatprep.subr.bf16.mxu1 %v4164_v29  ;;  %v4205_v51 = vld [vmem:[%s3878_s8 + $0x20] ss:$44 sps:$4 sm:$0xff]  }
 0x240   : > { %1303 = vmatpush1.bf16.msra.mxu1 %v4110_v60  ;;  %v4169_v30 = vpop.permute.xlu1 %947 }
 0x241   : > { %1304 = vmatprep.subr.bf16.mxu1 %v4173_v31  ;;  %v977_v32 = vpop.permute.xlu0 %976  ;;  %v957_v33 = vsel %vm951_vm2, %v946_v19, %v4169_v30 }
 0x242   : > { %v4179_v34 = vsel %vm691_vm0, %v975_v13, %v977_v32  ;;  %v2858_v13 = vld [vmem:[%s3885_s3 + $0x24] ss:$44 sps:$4 sm:$0xff]  }
 0x243   : > { %1040 = vrot.lane.b32.xlu1 %v957_v33, %s3322_s22  ;;  %1056 = vrot.lane.b32.xlu0 %v4179_v34, %s3322_s22 }
 0x244   : > { %1305 = vmatpush1.bf16.msra.mxu1 %v4122_v1  ;;  %v815_v35 = vpop.permute.xlu1 %814 }
 0x245   : > { %v817_v36 = vpop.permute.xlu0 %816  ;;  %1306 = vmatprep.subr.bf16.mxu1 %v3957_v6 }
 0x246   : > { %v833_v37 = vsel %vm691_vm0, %v817_v36, %v4080_v48  ;;  %v832_v38 = vsel %vm691_vm0, %v815_v35, %v817_v36 }
 0x247   : > { %1074 = vrot.lane.b32.xlu0 %v4094_v54, %s3322_s22  ;;  %1222 = vmatprep.subr.bf16.mxu0 %v833_v37 }
 0x248   : > { %1223 = vmatpush1.bf16.msra.mxu0 %v832_v38  ;;  %1307 = vmatpush1.bf16.msra.mxu1 %v3975_v9  ;;  %v853_v40 = vpop.permute.xlu1 %852 }
 0x249   : > { %1308 = vmatprep.subr.bf16.mxu1 %v4069_v44  ;;  %v851_v41 = vpop.permute.xlu0 %850 }
 0x24a   : > { %v867_v42 = vsel %vm726_vm1, %v851_v41, %v853_v40 }
 0x24b   : > { %687 = vrot.lane.b32.xlu0 %v4192_v39, %s3322_s22  ;;  %1224 = vmatprep.subr.bf16.mxu0 %v867_v42 }
 0x24c   : > { %1309 = vmatpush1.bf16.msra.mxu1 %v4086_v50  ;;  %v857_v43 = vpop.permute.xlu1 %856 }
 0x24d   : > { %v855_v45 = vpop.permute.xlu0 %854 }
 0x24e   : > { %v869_v46 = vsel %vm726_vm1, %v855_v45, %v857_v43  ;;  %v868_v48 = vsel %vm726_vm1, %v853_v40, %v855_v45 }
 0x24f   : > { %722 = vrot.lane.b32.xlu0 %v4192_v39, %s3323_s23  ;;  %1310 = vmatprep.subr.bf16.mxu1 %v869_v46 }
 0x250   : > { %1311 = vmatpush1.bf16.msra.mxu1 %v868_v48  ;;  %v4207_v52 = vpop.permute.xlu1 %978 }
 0x251   : > { %v4211_v53 = vsel %vm691_vm0, %v977_v32, %v4207_v52  ;;  %v849_v54 = vpop.permute.xlu0 %848  ;;  %1312 = vmatprep.subr.bf16.mxu1 %v3954_v5 }
 0x252   : > { %1058 = vrot.lane.b32.xlu1 %v4211_v53, %s3322_s22  ;;  %v866_v56 = vsel %vm726_vm1, %v849_v54, %v851_v41 }
 0x253   : > { %830 = vrot.lane.b32.xlu0 %v4205_v51, %s3322_s22  ;;  %1225 = vmatpush1.bf16.msra.mxu0 %v866_v56 }
 0x254   : > { %1313 = vmatpush1.bf16.msra.mxu1 %v3957_v6  ;;  %1226 = vmatprep.subr.bf16.mxu0 %v3975_v9 }
 0x255   : > { %1314 = vmatprep.subr.bf16.mxu1 %v4097_v55  ;;  %v4226_v61 = vpop.permute.xlu0 %858 }
 0x256   : > { %689 = vrot.lane.b32.xlu1 %v4218_v57, %s3322_s22  ;;  %v4239_v63 = vsel %vm726_vm1, %v857_v43, %v4226_v61 }
 0x257   : > { %900 = vrot.lane.b32.xlu0 %v2849_v58, %s3322_s22  ;;  %1227 = vmatpush1.bf16.msra.mxu0 %v4025_v21  ;;  %v2852_v21 = vld [vmem:[%s3885_s3 + $0x20] ss:$44 sps:$4 sm:$0xff]  }
 0x258   : > { %1228 = vmatprep.subr.bf16.mxu0 %v4086_v50  ;;  %1315 = vmatpush1.bf16.msra.mxu1 %v4069_v44 }
 0x259   : > { %1316 = vmatprep.subr.bf16.mxu1 %v4239_v63 }
 0x25a   : > { %724 = vrot.lane.b32.xlu1 %v4218_v57, %s3323_s23 }
 0x25b   : > { %747 = vrot.lane.b32.xlu0 %v4233_v62, %s3322_s22  ;;  %1229 = vmatpush1.bf16.msra.mxu0 %v833_v37 }
 0x25c   : > { %1230 = vmatprep.subr.bf16.mxu0 %v868_v48  ;;  %1317 = vmatpush1.bf16.msra.mxu1 %v869_v46 }
 0x25d   : > { %1318 = vmatprep.subr.bf16.mxu1 %v3966_v8 }
 0x25e   : > { %886 = vrot.lane.b32.xlu1 %v4245_v0, %s3322_s22 }
 0x25f   : > { %980 = vrot.lane.b32.xlu0 %v2852_v21, %s3322_s22  ;;  %1231 = vmatpush1.bf16.msra.mxu0 %v867_v42 }
 0x260   : > { %1319 = vmatpush1.bf16.msra.mxu1 %v3954_v5  ;;  %1232 = vmatprep.subr.bf16.mxu0 %v3957_v6  ;;  %v2859_v6 = vld [vmem:[%s3885_s3 + $0x28] ss:$44 sps:$4 sm:$0xff]  }
 0x261   : > { %1331 = vmatprep.subr.bf16.mxu1 %v4076_v47 }
 0x262   : > { %949 = vrot.lane.b32.xlu1 %v4038_v22, %s3324_s5 }
 0x263   : > { %761 = vrot.lane.b32.xlu0 %v2856_v3, %s3322_s22  ;;  %1233 = vmatpush1.bf16.msra.mxu0 %v3975_v9 }
 0x264   : > { %1245 = vmatprep.subr.bf16.mxu0 %v4069_v44  ;;  %1321 = vmatmul.mubr.bf16.vlgmr.msra.gmra.mrb[0].mxu1 %v4257_v4 }
 0x265   : > { %1332 = vmatpush1.bf16.msra.mxu1 %v4097_v55  ;;  %2466 = vmatprep.mubr.msk.bf16.mxu1 %vm1198_vm3, %v4260_v11 }
 0x266   : > { %751 = vrot.lane.b32.xlu1 %v4233_v62, %s3323_s23  ;;  %1235 = vmatmul.mubr.bf16.vlgmr.msra.gmra.mrb[0].mxu0 %v4257_v4 }
 0x267   : > { %996 = vrot.lane.b32.xlu0 %v2858_v13, %s3322_s22  ;;  %1246 = vmatpush1.bf16.msra.mxu0 %v4086_v50 }
 0x268   : > { %2465 = vmatprep.mubr.msk.bf16.mxu0 %vm1198_vm3, %v4260_v11 }
 0x26a   : > { %990 = vrot.lane.b32.xlu1 %v2852_v21, %s3324_s5 }
 0x26b   : > { %860 = vrot.lane.b32.xlu0 %v3963_v7, %s3323_s23 }
 0x26e   : > { %765 = vrot.lane.b32.xlu1 %v2856_v3, %s3323_s23 }
 0x26f   : > { %864 = vrot.lane.b32.xlu0 %v4205_v51, %s3323_s23 }
 0x272   : > { %999 = vrot.lane.b32.xlu1 %v2858_v13, %s3324_s5 }
 0x273   : > { %890 = vrot.lane.b32.xlu0 %v4245_v0, %s3323_s23 }
 0x276   : > { %862 = vrot.lane.b32.xlu1 %v3980_v10, %s3323_s23 }
 0x27a   : > { %1007 = vrot.lane.b32.xlu1 %v2859_v6, %s3322_s22 }
 0x289   : > { %v1013_v9 = vpop.permute.xlu1 %1012 }
 0x28d   : > { %v1017_v22 = vpop.permute.xlu1 %1016 }
 0x291   : > { %v1011_v50 = vpop.permute.xlu1 %1010 }
 0x292   : > { %v1084_v24 = vsel %vm691_vm0, %v1011_v50, %v1013_v9 }
 0x294   : > { %v1029_v44 = vpop.permute.xlu0 %1028 }
 0x298   : > { %v1015_v16 = vpop.permute.xlu0 %1014 }
 0x299   : > { %v1085_v19 = vsel %vm691_vm0, %v1013_v9, %v1015_v16  ;;  %v1033_v28 = vpop.permute.xlu1 %1032  ;;  %v1086_v35 = vsel %vm691_vm0, %v1015_v16, %v1017_v22 }
 0x29a   : > { %1247 = vmatprep.subr.bf16.mxu0 %v1085_v19 }
 0x29b   : > { %1248 = vmatpush1.bf16.msra.mxu0 %v1084_v24 }
 0x29c   : > { %v4294_v32 = vpop.permute.xlu0 %1018 }
 0x29d   : > { %v1087_v33 = vsel %vm691_vm0, %v1017_v22, %v4294_v32  ;;  %v1037_v37 = vpop.permute.xlu1 %1036 }
 0x29e   : > { %1333 = vmatprep.subr.bf16.mxu1 %v1087_v33 }
 0x29f   : > { %1334 = vmatpush1.bf16.msra.mxu1 %v1086_v35 }
 0x2a0   : > { %v1031_v36 = vpop.permute.xlu0 %1030 }
 0x2a1   : > { %v1092_v38 = vsel %vm691_vm0, %v1029_v44, %v1031_v36  ;;  %v1093_v40 = vsel %vm691_vm0, %v1031_v36, %v1033_v28 }
 0x2a2   : > { %1249 = vmatprep.subr.bf16.mxu0 %v1093_v40 }
 0x2a3   : > { %1250 = vmatpush1.bf16.msra.mxu0 %v1092_v38 }
 0x2a4   : > { %v1035_v41 = vpop.permute.xlu0 %1034  ;;  %1251 = vmatprep.subr.bf16.mxu0 %v4131_v12 }
 0x2a5   : > { %v1049_v42 = vpop.permute.xlu1 %1048  ;;  %v1095_v43 = vsel %vm691_vm0, %v1035_v41, %v1037_v37  ;;  %v1094_v45 = vsel %vm691_vm0, %v1033_v28, %v1035_v41 }
 0x2a6   : > { %1335 = vmatprep.subr.bf16.mxu1 %v1095_v43 }
 0x2a7   : > { %1252 = vmatpush1.bf16.msra.mxu0 %v4152_v25  ;;  %1336 = vmatpush1.bf16.msra.mxu1 %v1094_v45 }
 0x2a8   : > { %1337 = vmatprep.subr.bf16.mxu1 %v4140_v17  ;;  %v1051_v46 = vpop.permute.xlu0 %1050 }
 0x2a9   : > { %v1053_v48 = vpop.permute.xlu1 %1052  ;;  %v1101_v54 = vsel %vm691_vm0, %v1049_v42, %v1051_v46 }
 0x2aa   : > { %1253 = vmatprep.subr.bf16.mxu0 %v1101_v54  ;;  %v1102_v3 = vsel %vm691_vm0, %v1051_v46, %v1053_v48 }
 0x2ab   : > { %1338 = vmatpush1.bf16.msra.mxu1 %v4137_v14 }
 0x2ac   : > { %v1055_v56 = vpop.permute.xlu0 %1054 }
 0x2ad   : > { %v1047_v58 = vpop.permute.xlu1 %1046  ;;  %v1103_v21 = vsel %vm691_vm0, %v1053_v48, %v1055_v56 }
 0x2ae   : > { %v1100_v13 = vsel %vm691_vm0, %v1047_v58, %v1049_v42  ;;  %1339 = vmatprep.subr.bf16.mxu1 %v1103_v21 }
 0x2af   : > { %1254 = vmatpush1.bf16.msra.mxu0 %v1100_v13  ;;  %1340 = vmatpush1.bf16.msra.mxu1 %v1102_v3 }
 0x2b0   : > { %v1039_v25 = vpop.permute.xlu0 %1038  ;;  %1255 = vmatprep.subr.bf16.mxu0 %v1094_v45 }
 0x2b1   : > { %v1065_v6 = vpop.permute.xlu1 %1064  ;;  %v4312_v9 = vsel %vm691_vm0, %v1037_v37, %v1039_v25 }
 0x2b2   : > { %v1108_v22 = vsel %vm691_vm0, %v1065_v6, %v1033_v28  ;;  %1341 = vmatprep.subr.bf16.mxu1 %v4312_v9 }
 0x2b3   : > { %1256 = vmatpush1.bf16.msra.mxu0 %v1108_v22  ;;  %1342 = vmatpush1.bf16.msra.mxu1 %v1095_v43  ;;  %v2863_v22 = vld [vmem:[%s3898_s12 + $0x8] ss:$44 sps:$4 sm:$0xff]  }
 0x2b4   : > { %1257 = vmatprep.subr.bf16.mxu0 %v4137_v14  ;;  %1343 = vmatprep.subr.bf16.mxu1 %v4147_v20 }
 0x2b5   : > { %v1057_v44 = vpop.permute.xlu0 %1056  ;;  %v4323_v16 = vpop.permute.xlu1 %1040 }
 0x2b6   : > { %v4319_v50 = vsel %vm691_vm0, %v1055_v56, %v1057_v44  ;;  %v4328_v24 = vsel %vm691_vm0, %v1039_v25, %v4323_v16 }
 0x2b7   : > { %1258 = vmatpush1.bf16.msra.mxu0 %v4131_v12  ;;  %1344 = vmatpush1.bf16.msra.mxu1 %v4140_v17 }
 0x2b8   : > { %1259 = vmatprep.subr.bf16.mxu0 %v1102_v3  ;;  %1345 = vmatprep.subr.bf16.mxu1 %v4319_v50 }
 0x2b9   : > { %v1075_v19 = vpop.permute.xlu0 %1074 }
 0x2ba   : > { %v1113_v12 = vsel %vm691_vm0, %v1075_v19, %v1035_v41 }
 0x2bb   : > { %1260 = vmatpush1.bf16.msra.mxu0 %v1101_v54  ;;  %1346 = vmatpush1.bf16.msra.mxu1 %v1103_v21 }
 0x2bc   : > { %1261 = vmatprep.subr.bf16.mxu0 %v1095_v43  ;;  %1347 = vmatprep.subr.bf16.mxu1 %v4328_v24 }
 0x2bd   : > { %v688_v28 = vpop.permute.xlu0 %687 }
 0x2be   : > { %v698_v43 = vsel %vm691_vm0, %v4158_v27, %v688_v28 }
 0x2bf   : > { %1262 = vmatpush1.bf16.msra.mxu0 %v1113_v12  ;;  %1348 = vmatpush1.bf16.msra.mxu1 %v4312_v9 }
 0x2c0   : > { %1263 = vmatprep.subr.bf16.mxu0 %v4140_v17  ;;  %1349 = vmatprep.subr.bf16.mxu1 %v4179_v34  ;;  %v4348_v17 = vld [vmem:[#allocation8 + $0x8] ss:$16 sps:$4 sm:$0xff]  }
 0x2c1   : > { %v723_v33 = vpop.permute.xlu0 %722 }
 0x2c3   : > { %1264 = vmatpush1.bf16.msra.mxu0 %v4137_v14  ;;  %1350 = vmatpush1.bf16.msra.mxu1 %v4147_v20 }
 0x2c4   : > { %1265 = vmatprep.subr.bf16.mxu0 %v1103_v21  ;;  %v4337_v35 = vpop.permute.xlu1 %1058 }
 0x2c5   : > { %v831_v36 = vpop.permute.xlu0 %830  ;;  %v4341_v37 = vsel %vm691_vm0, %v1057_v44, %v4337_v35  ;;  %v2867_v44 = vld [vmem:[%s3898_s12 + $0xc] ss:$44 sps:$4 sm:$0xff]  }
 0x2c6   : > { %v4345_v38 = vsel %vm691_vm0, %v4082_v49, %v831_v36  ;;  %1351 = vmatprep.subr.bf16.mxu1 %v4341_v37 }
 0x2c7   : > { %1020 = vrot.lane.b32.xlu1 %v4345_v38, %s3322_s22  ;;  %1266 = vmatpush1.bf16.msra.mxu0 %v1102_v3 }
 0x2c8   : > { %1352 = vmatpush1.bf16.msra.mxu1 %v4319_v50  ;;  %v690_v14 = vpop.permute.xlu1 %689  ;;  %1374 = vmatprep.subr.bf16.mxu0 %v3994_v15 }
 0x2c9   : > { %v901_v40 = vpop.permute.xlu0 %900  ;;  %1460 = vmatprep.subr.bf16.mxu1 %v4192_v39  ;;  %v699_v41 = vsel %vm691_vm0, %v688_v28, %v690_v14  ;;  %v2865_v28 = vld [vmem:[%s3898_s12 + $0x10] ss:$44 sps:$4 sm:$0xff]  }
 0x2ca   : > { %1278 = vmatmul.mubr.bf16.vlgmr.msra.gmra.mrb[0].mxu0 %v4348_v17 }
 0x2cb   : > { %1375 = vmatpush1.bf16.msra.mxu0 %v3931_v2  ;;  %1364 = vmatmul.mubr.bf16.vlgmr.msra.gmra.mrb[0].mxu1 %v4348_v17 }
 0x2cc   : > { %1376 = vmatprep.subr.bf16.mxu0 %v4164_v29  ;;  %1461 = vmatpush1.bf16.msra.mxu1 %v4011_v18  ;;  %v725_v49 = vpop.permute.xlu1 %724 }
 0x2cd   : > { %1462 = vmatprep.subr.bf16.mxu1 %v699_v41  ;;  %v748_v42 = vpop.permute.xlu0 %747  ;;  %1406 = vmatprep.mubr.bf16.mxu0 %v4046_v23  ;;  %v734_v45 = vsel %vm726_vm1, %v723_v33, %v725_v49 }
 0x2ce   : > { %1492 = vmatprep.mubr.bf16.mxu1 %v4046_v23  ;;  %v733_v23 = vsel %vm726_vm1, %v4156_v26, %v723_v33  ;;  %v749_v26 = vsel %vm691_vm0, %v690_v14, %v748_v42 }
 0x2cf   : > { %1377 = vmatpush1.bf16.msra.mxu0 %v4110_v60 }
 0x2d0   : > { %1378 = vmatprep.subr.bf16.mxu0 %v4173_v31  ;;  %1463 = vmatpush1.bf16.msra.mxu1 %v698_v43  ;;  %v887_v2 = vpop.permute.xlu1 %886 }
 0x2d1   : > { %1464 = vmatprep.subr.bf16.mxu1 %v734_v45  ;;  %v4369_v46 = vsel %vm691_vm0, %v831_v36, %v887_v2  ;;  %v4372_v48 = vsel %vm691_vm0, %v887_v2, %v901_v40  ;;  %v981_v54 = vpop.permute.xlu0 %980  ;;  %v3325_v36 = vmov 0   ;;  %v2877_v2 = vld [vmem:[%s3878_s8 + $0x18] ss:$44 sps:$4 sm:$0xff]  }
 0x2d2   : > { %1022 = vrot.lane.b32.xlu0 %v4369_v46, %s3322_s22  ;;  %1024 = vrot.lane.b32.xlu1 %v4372_v48, %s3322_s22  ;;  %v4392_v58 = vsel %vm691_vm0, %v4207_v52, %v981_v54  ;;  %2021 = vst.msk [vmem:[%s3918_s20 + $0x28] sm:$0xf] %vm2020_vm4, %v3325_v36  ;;  %2027 = vst.msk [vmem:[%s3918_s20 + $0x54] sm:$0xf] %vm2020_vm4, %v3325_v36 }
 0x2d3   : > { %1379 = vmatpush1.bf16.msra.mxu0 %v4122_v1  ;;  %2015 = vst [vmem:[%s3918_s20] sm:$0xff] %v3325_v36  ;;  %2016 = vst [vmem:[%s3918_s20 + $0x8] sm:$0xff] %v3325_v36  ;;  %2808 = vset.pattern.permute.xlu1 %v3325_v36 }
 0x2d4   : > { %1465 = vmatpush1.bf16.msra.mxu1 %v733_v23  ;;  %v950_v60 = vpop.permute.xlu1 %949  ;;  %1380 = vmatprep.subr.bf16.mxu0 %v4011_v18  ;;  %2017 = vst [vmem:[%s3918_s20 + $0x10] sm:$0xff] %v3325_v36  ;;  %2018 = vst [vmem:[%s3918_s20 + $0x18] sm:$0xff] %v3325_v36 }
 0x2d5   : > { %1466 = vmatprep.subr.bf16.mxu1 %v4218_v57  ;;  %v958_v27 = vsel %vm951_vm2, %v4169_v30, %v950_v60  ;;  %v762_v56 = vpop.permute.xlu0 %761  ;;  %2019 = vst [vmem:[%s3918_s20 + $0x20] sm:$0xff] %v3325_v36  ;;  %2022 = vst [vmem:[%s3918_s20 + $0x2c] sm:$0xff] %v3325_v36  ;;  %2807 = vset.pattern.permute.xlu0 %v3325_v36 }
 0x2d6   : > { %1042 = vrot.lane.b32.xlu1 %v958_v27, %s3322_s22  ;;  %1026 = vrot.lane.b32.xlu0 %v901_v40, %s3322_s22  ;;  %v763_v13 = vsel %vm691_vm0, %v748_v42, %v762_v56  ;;  %2023 = vst [vmem:[%s3918_s20 + $0x34] sm:$0xff] %v3325_v36  ;;  %2024 = vst [vmem:[%s3918_s20 + $0x3c] sm:$0xff] %v3325_v36  ;;  %v1168_v42 = vld [vmem:[#allocation10 + $0x8] sm:$0xff] }
 0x2d7   : > { %1381 = vmatpush1.bf16.msra.mxu0 %v3994_v15  ;;  %2025 = vst [vmem:[%s3918_s20 + $0x44] sm:$0xff] %v3325_v36  ;;  %2026 = vst [vmem:[%s3918_s20 + $0x4c] sm:$0xff] %v3325_v36  ;;  %v2872_v40 = vld [vmem:[%s3898_s12 + $0x1c] ss:$44 sps:$4 sm:$0xff]  }
 0x2d8   : > { %1382 = vmatprep.subr.bf16.mxu0 %v698_v43  ;;  %1467 = vmatpush1.bf16.msra.mxu1 %v4192_v39  ;;  %v752_v1 = vpop.permute.xlu1 %751 }
 0x2d9   : > { %1468 = vmatprep.subr.bf16.mxu1 %v749_v26  ;;  %v753_v30 = vsel %vm726_vm1, %v725_v49, %v752_v1  ;;  %v997_v3 = vpop.permute.xlu0 %996  ;;  %v2874_v49 = vld [vmem:[%s3898_s12 + $0x20] ss:$44 sps:$4 sm:$0xff]  }
 0x2da   : > { %1044 = vrot.lane.b32.xlu0 %v950_v60, %s3322_s22  ;;  %1060 = vrot.lane.b32.xlu1 %v4392_v58, %s3322_s22  ;;  %v4404_v52 = vsel %vm691_vm0, %v981_v54, %v997_v3 }
 0x2db   : > { %1383 = vmatpush1.bf16.msra.mxu0 %v4164_v29 }
 0x2dc   : > { %1384 = vmatprep.subr.bf16.mxu0 %v733_v23  ;;  %1469 = vmatpush1.bf16.msra.mxu1 %v699_v41  ;;  %v991_v15 = vpop.permute.xlu1 %990 }
 0x2dd   : > { %1470 = vmatprep.subr.bf16.mxu1 %v753_v30  ;;  %v992_v21 = vsel %vm951_vm2, %v950_v60, %v991_v15 }
 0x2de   : > { %1066 = vrot.lane.b32.xlu1 %v992_v21, %s3322_s22  ;;  %1062 = vrot.lane.b32.xlu0 %v981_v54, %s3322_s22 }
 0x2df   : > { %1385 = vmatpush1.bf16.msra.mxu0 %v4173_v31 }
 0x2e0   : > { %1471 = vmatpush1.bf16.msra.mxu1 %v734_v45  ;;  %v766_v29 = vpop.permute.xlu1 %765  ;;  %1386 = vmatprep.subr.bf16.mxu0 %v4192_v39 }
 0x2e1   : > { %1472 = vmatprep.subr.bf16.mxu1 %v4233_v62  ;;  %v861_v62 = vpop.permute.xlu0 %860 }
 0x2e2   : > { %1068 = vrot.lane.b32.xlu0 %v991_v15, %s3322_s22  ;;  %1070 = vrot.lane.b32.xlu1 %v4404_v52, %s3322_s22  ;;  %v871_v12 = vsel %vm726_vm1, %v4226_v61, %v861_v62  ;;  %v2871_v61 = vld [vmem:[%s3898_s12 + $0x18] ss:$44 sps:$4 sm:$0xff]  }
 0x2e3   : > { %1387 = vmatpush1.bf16.msra.mxu0 %v4011_v18  ;;  %v767_v18 = vsel %vm726_vm1, %v752_v1, %v766_v29 }
 0x2e4   : > { %1388 = vmatprep.subr.bf16.mxu0 %v699_v41  ;;  %1473 = vmatpush1.bf16.msra.mxu1 %v4218_v57  ;;  %v1000_v31 = vpop.permute.xlu1 %999 }
 0x2e5   : > { %1474 = vmatprep.subr.bf16.mxu1 %v763_v13  ;;  %v1001_v25 = vsel %vm951_vm2, %v991_v15, %v1000_v31  ;;  %v865_v19 = vpop.permute.xlu0 %864 }
 0x2e6   : > { %1076 = vrot.lane.b32.xlu1 %v1001_v25, %s3322_s22  ;;  %1072 = vrot.lane.b32.xlu0 %v997_v3, %s3322_s22 }
 0x2e7   : > { %1389 = vmatpush1.bf16.msra.mxu0 %v698_v43  ;;  %v1827_v43 = vld [vmem:[#allocation14 + $0x8] sm:$0xff] }
 0x2e8   : > { %1390 = vmatprep.subr.bf16.mxu0 %v734_v45  ;;  %1475 = vmatpush1.bf16.msra.mxu1 %v749_v26  ;;  %v863_v39 = vpop.permute.xlu1 %862 }
 0x2e9   : > { %1476 = vmatprep.subr.bf16.mxu1 %v767_v18  ;;  %v873_v33 = vsel %vm726_vm1, %v863_v39, %v865_v19  ;;  %v872_v14 = vsel %vm726_vm1, %v861_v62, %v863_v39  ;;  %v891_v41 = vpop.permute.xlu0 %890 }
 0x2ea   : > { %1078 = vrot.lane.b32.xlu0 %v1000_v31, %s3322_s22 }
 0x2eb   : > { %1391 = vmatpush1.bf16.msra.mxu0 %v733_v23 }
 0x2ec   : > { %1477 = vmatpush1.bf16.msra.mxu1 %v753_v30  ;;  %v1008_v57 = vpop.permute.xlu1 %1007  ;;  %1392 = vmatprep.subr.bf16.mxu0 %v3966_v8 }
 0x2ed   : > { %v4421_v6 = vsel %vm691_vm0, %v997_v3, %v1008_v57  ;;  %1478 = vmatprep.subr.bf16.mxu1 %v3980_v10 }
 0x2ee   : > { %1080 = vrot.lane.b32.xlu1 %v4421_v6, %s3322_s22  ;;  %1082 = vrot.lane.b32.xlu0 %v1008_v57, %s3322_s22 }
 0x2ef   : > { %1393 = vmatpush1.bf16.msra.mxu0 %v3954_v5  ;;  %v2869_v5 = vld [vmem:[%s3898_s12 + $0x14] ss:$44 sps:$4 sm:$0xff]  }
 0x2f0   : > { %1394 = vmatprep.subr.bf16.mxu0 %v4076_v47  ;;  %1479 = vmatpush1.bf16.msra.mxu1 %v3963_v7 }
 0x2f1   : > { %1480 = vmatprep.subr.bf16.mxu1 %v4345_v38 }
 0x2f2   : > { %1602 = vrot.lane.b32.xlu1 %v2863_v22, %s3322_s22  ;;  %1604 = vrot.lane.b32.xlu0 %v2867_v44, %s3322_s22 }
 0x2f3   : > { %1395 = vmatpush1.bf16.msra.mxu0 %v4097_v55  ;;  %v2868_v55 = vld [vmem:[%s3898_s12 + $0x4] ss:$44 sps:$4 sm:$0xff]  }
 0x2f4   : > { %1396 = vmatprep.subr.bf16.mxu0 %v871_v12  ;;  %1481 = vmatpush1.bf16.msra.mxu1 %v4106_v59 }
 0x2f5   : > { %1482 = vmatprep.subr.bf16.mxu1 %v873_v33 }
 0x2f6   : > { %1606 = vrot.lane.b32.xlu1 %v2865_v28, %s3322_s22  ;;  %1608 = vrot.lane.b32.xlu0 %v2869_v5, %s3322_s22  ;;  %v2876_v28 = vld [vmem:[#allocation13] sm:$0xff]  }
 0x2f7   : > { %1397 = vmatpush1.bf16.msra.mxu0 %v4239_v63  ;;  %v2875_v63 = vld [vmem:[%s3898_s12 + $0x24] ss:$44 sps:$4 sm:$0xff]  }
 0x2f8   : > { %1483 = vmatpush1.bf16.msra.mxu1 %v872_v14  ;;  %1398 = vmatprep.subr.bf16.mxu0 %v3963_v7  ;;  %v892_v7 = vsel %vm726_vm1, %v865_v19, %v891_v41  ;;  %vm2093_vm1 = vcmask 1043456  }
 0x2f9   : > { %1484 = vmatprep.subr.bf16.mxu1 %v4205_v51 }
 0x2fa   : > { %1600 = vrot.lane.b32.xlu1 %v2868_v55, %s3322_s22  ;;  %1610 = vrot.lane.b32.xlu0 %v2871_v61, %s3322_s22 }
 0x2fb   : > { %1399 = vmatpush1.bf16.msra.mxu0 %v3966_v8  ;;  %v1167_v8 = vld [vmem:[#allocation10] sm:$0xff] }
 0x2fc   : > { %1400 = vmatprep.subr.bf16.mxu0 %v4106_v59  ;;  %1485 = vmatpush1.bf16.msra.mxu1 %v3980_v10 }
 0x2fd   : > { %1486 = vmatprep.subr.bf16.mxu1 %v4369_v46 }
 0x2fe   : > { %1612 = vrot.lane.b32.xlu1 %v2872_v40, %s3322_s22  ;;  %1614 = vrot.lane.b32.xlu0 %v2874_v49, %s3322_s22 }
 0x2ff   : > { %1401 = vmatpush1.bf16.msra.mxu0 %v4076_v47  ;;  %v1826_v47 = vld [vmem:[#allocation14] sm:$0xff] }
 0x300   : > { %1402 = vmatprep.subr.bf16.mxu0 %v872_v14  ;;  %1487 = vmatpush1.bf16.msra.mxu1 %v4345_v38 }
 0x301   : > { %1488 = vmatprep.subr.bf16.mxu1 %v892_v7 }
 0x302   : > { %1616 = vrot.lane.b32.xlu1 %v2875_v63, %s3322_s22  ;;  %1171 = vperm.xlu0 %2807, %v1167_v8  }
 0x303   : > { %1403 = vmatpush1.bf16.msra.mxu0 %v871_v12 }
 0x304   : > { %1489 = vmatpush1.bf16.msra.mxu1 %v873_v33  ;;  %1404 = vmatprep.subr.bf16.mxu0 %v3980_v10 }
 0x305   : > { %1490 = vmatprep.subr.bf16.mxu1 %v4245_v0 }
 0x306   : > { %1176 = vperm.xlu1 %2808, %v1168_v42   ;;  %1835 = vperm.xlu0 %2807, %v1827_v43  }
 0x307   : > { %1405 = vmatpush1.bf16.msra.mxu0 %v2877_v2 }
 0x308   : > { %1417 = vmatprep.subr.bf16.mxu0 %v4345_v38  ;;  %1491 = vmatpush1.bf16.msra.mxu1 %v4205_v51 }
 0x309   : > { %1503 = vmatprep.subr.bf16.mxu1 %v4372_v48 }
 0x30a   : > { %1407 = vmatmul.mubr.bf16.vlgmr.msra.gmra.mrb[4].mxu0 %v4257_v4  ;;  %1830 = vperm.xlu1 %2808, %v1826_v47  }
 0x30b   : > { %1418 = vmatpush1.bf16.msra.mxu0 %v4106_v59  ;;  %1493 = vmatmul.mubr.bf16.vlgmr.msra.gmra.mrb[4].mxu1 %v4257_v4 }
 0x30c   : > { %1504 = vmatpush1.bf16.msra.mxu1 %v4369_v46  ;;  %2467 = vmatprep.mubr.msk.bf16.mxu0 %vm1198_vm3, %v4260_v11 }
 0x30d   : > { %2468 = vmatprep.mubr.msk.bf16.mxu1 %vm1198_vm3, %v4260_v11  ;;  %vm2124_vm3 = vcmask 3072  }
 0x339   : > { %v1021_v10 = vpop.permute.xlu1 %1020 }
 0x33a   : > { %v1088_v45 = vsel %vm691_vm0, %v4294_v32, %v1021_v10 }
 0x344   : > { %v1025_v0 = vpop.permute.xlu1 %1024  ;;  %v1023_v51 = vpop.permute.xlu0 %1022 }
 0x345   : > { %v1089_v38 = vsel %vm691_vm0, %v1021_v10, %v1023_v51  ;;  %v1090_v48 = vsel %vm691_vm0, %v1023_v51, %v1025_v0 }
 0x346   : > { %1419 = vmatprep.subr.bf16.mxu0 %v1089_v38 }
 0x347   : > { %1420 = vmatpush1.bf16.msra.mxu0 %v1088_v45 }
 0x348   : > { %v1043_v59 = vpop.permute.xlu1 %1042  ;;  %v1027_v4 = vpop.permute.xlu0 %1026  ;;  %1421 = vmatprep.subr.bf16.mxu0 %v4328_v24 }
 0x349   : > { %v1091_v46 = vsel %vm691_vm0, %v1025_v0, %v1027_v4  ;;  %v1098_v23 = vsel %vm691_vm0, %v4323_v16, %v1043_v59 }
 0x34a   : > { %1505 = vmatprep.subr.bf16.mxu1 %v1091_v46 }
 0x34b   : > { %1422 = vmatpush1.bf16.msra.mxu0 %v4312_v9  ;;  %1506 = vmatpush1.bf16.msra.mxu1 %v1090_v48 }
 0x34c   : > { %v1061_v11 = vpop.permute.xlu1 %1060  ;;  %v1045_v54 = vpop.permute.xlu0 %1044  ;;  %1423 = vmatprep.subr.bf16.mxu0 %v4179_v34 }
 0x34d   : > { %v1099_v32 = vsel %vm691_vm0, %v1043_v59, %v1045_v54 }
 0x34e   : > { %1507 = vmatprep.subr.bf16.mxu1 %v1099_v32 }
 0x34f   : > { %1424 = vmatpush1.bf16.msra.mxu0 %v4147_v20  ;;  %1508 = vmatpush1.bf16.msra.mxu1 %v1098_v23  ;;  %v1106_v20 = vsel %vm691_vm0, %v4337_v35, %v1061_v11 }
 0x350   : > { %v1067_v60 = vpop.permute.xlu1 %1066  ;;  %1509 = vmatprep.subr.bf16.mxu1 %v4392_v58  ;;  %v1063_v27 = vpop.permute.xlu0 %1062  ;;  %1425 = vmatprep.subr.bf16.mxu0 %v4341_v37 }
 0x351   : > { %v1107_v9 = vsel %vm691_vm0, %v1061_v11, %v1063_v27 }
 0x353   : > { %1426 = vmatpush1.bf16.msra.mxu0 %v4319_v50  ;;  %1510 = vmatpush1.bf16.msra.mxu1 %v4211_v53  ;;  %v1109_v50 = vsel %vm691_vm0, %v1043_v59, %v1067_v60 }
 0x354   : > { %1511 = vmatprep.subr.bf16.mxu1 %v1107_v9  ;;  %v1069_v56 = vpop.permute.xlu0 %1068  ;;  %1427 = vmatprep.subr.bf16.mxu0 %v1098_v23  ;;  %v1071_v1 = vpop.permute.xlu1 %1070 }
 0x355   : > { %v1110_v16 = vsel %vm691_vm0, %v1067_v60, %v1069_v56  ;;  %v1111_v3 = vsel %vm691_vm0, %v1061_v11, %v1071_v1 }
 0x357   : > { %1428 = vmatpush1.bf16.msra.mxu0 %v4328_v24  ;;  %1512 = vmatpush1.bf16.msra.mxu1 %v1106_v20 }
 0x358   : > { %1513 = vmatprep.subr.bf16.mxu1 %v1110_v16  ;;  %v1073_v26 = vpop.permute.xlu0 %1072  ;;  %1429 = vmatprep.subr.bf16.mxu0 %v4211_v53  ;;  %v1077_v15 = vpop.permute.xlu1 %1076 }
 0x359   : > { %v1112_v24 = vsel %vm691_vm0, %v1071_v1, %v1073_v26 }
 0x35b   : > { %1430 = vmatpush1.bf16.msra.mxu0 %v4179_v34  ;;  %1514 = vmatpush1.bf16.msra.mxu1 %v1109_v50 }
 0x35c   : > { %1515 = vmatprep.subr.bf16.mxu1 %v4404_v52  ;;  %v1079_v30 = vpop.permute.xlu0 %1078  ;;  %1431 = vmatprep.subr.bf16.mxu0 %v1106_v20 }
 0x35d   : > { %v1115_v34 = vsel %vm691_vm0, %v1077_v15, %v1079_v30 }
 0x35f   : > { %1432 = vmatpush1.bf16.msra.mxu0 %v4341_v37  ;;  %1516 = vmatpush1.bf16.msra.mxu1 %v4392_v58  ;;  %v1114_v37 = vsel %vm691_vm0, %v1067_v60, %v1077_v15 }
 0x360   : > { %v1081_v35 = vpop.permute.xlu1 %1080  ;;  %1517 = vmatprep.subr.bf16.mxu1 %v1112_v24  ;;  %v1083_v21 = vpop.permute.xlu0 %1082  ;;  %1433 = vmatprep.subr.bf16.mxu0 %v1109_v50 }
 0x361   : > { %v1117_v18 = vsel %vm691_vm0, %v1081_v35, %v1083_v21  ;;  %v1116_v22 = vsel %vm691_vm0, %v1071_v1, %v1081_v35 }
 0x363   : > { %1434 = vmatpush1.bf16.msra.mxu0 %v1098_v23  ;;  %1518 = vmatpush1.bf16.msra.mxu1 %v1111_v3 }
 0x364   : > { %v1603_v29 = vpop.permute.xlu1 %1602  ;;  %1435 = vmatprep.subr.bf16.mxu0 %v4392_v58  ;;  %1519 = vmatprep.subr.bf16.mxu1 %v1115_v34  ;;  %v1605_v31 = vpop.permute.xlu0 %1604 }
 0x365   : > { %v1619_v39 = vsel %vm691_vm0, %v1603_v29, %v1605_v31 }
 0x367   : > { %1436 = vmatpush1.bf16.msra.mxu0 %v4211_v53  ;;  %1520 = vmatpush1.bf16.msra.mxu1 %v1114_v37 }
 0x368   : > { %v1607_v13 = vpop.permute.xlu1 %1606  ;;  %1521 = vmatprep.subr.bf16.mxu1 %v4421_v6  ;;  %1437 = vmatprep.subr.bf16.mxu0 %v1111_v3  ;;  %v1609_v25 = vpop.permute.xlu0 %1608 }
 0x369   : > { %v1621_v53 = vsel %vm691_vm0, %v1607_v13, %v1609_v25  ;;  %v1620_v6 = vsel %vm691_vm0, %v1605_v31, %v1607_v13 }
 0x36b   : > { %1438 = vmatpush1.bf16.msra.mxu0 %v1106_v20  ;;  %1522 = vmatpush1.bf16.msra.mxu1 %v4404_v52 }
 0x36c   : > { %v1601_v58 = vpop.permute.xlu1 %1600  ;;  %1523 = vmatprep.subr.bf16.mxu1 %v1117_v18  ;;  %1638 = vmatprep.subr.bf16.mxu0 %v1619_v39  ;;  %v1611_v57 = vpop.permute.xlu0 %1610 }
 0x36d   : > { %v1618_v62 = vsel %vm691_vm0, %v1601_v58, %v1603_v29  ;;  %v1622_v5 = vsel %vm691_vm0, %v1609_v25, %v1611_v57 }
 0x36e   : > { %1450 = vmatmul.mubr.bf16.vlgmr.msra.gmra.mrb[4].mxu0 %v4348_v17 }
 0x36f   : > { %1524 = vmatpush1.bf16.msra.mxu1 %v1116_v22  ;;  %1639 = vmatpush1.bf16.msra.mxu0 %v1618_v62 }
 0x370   : > { %1681 = vmatprep.subr.bf16.mxu1 %v1621_v53  ;;  %v1613_v52 = vpop.permute.xlu1 %1612  ;;  %1670 = vmatprep.mubr.bf16.mxu0 %v3325_v36  ;;  %v1615_v19 = vpop.permute.xlu0 %1614 }
 0x371   : > { %v1623_v44 = vsel %vm691_vm0, %v1611_v57, %v1613_v52  ;;  %v1624_v55 = vsel %vm691_vm0, %v1613_v52, %v1615_v19 }
 0x372   : > { %1536 = vmatmul.mubr.bf16.vlgmr.msra.gmra.mrb[4].mxu1 %v4348_v17  ;;  %1724 = vmatprep.subr.bf16.mxu0 %v1623_v44  ;;  %v1870_v17 = vlaneseq }
 0x373   : > { %1682 = vmatpush1.bf16.msra.mxu1 %v1620_v6  ;;  %1713 = vmatprep.mubr.bf16.mxu1 %v3325_v36 }
 0x374   : > { %v1617_v12 = vpop.permute.xlu1 %1616  ;;  %v4556_v61 = vand.u32 127, %v1870_v17 }
 0x375   : > { %v1625_v33 = vsel %vm691_vm0, %v1615_v19, %v1617_v12  ;;  %vm4674_vm0 = vmor %vm2118_vm15, %vm2117_vm14 }
 0x376   : > { %2479 = vmatmul.mubr.msk.bf16.vlgmr.msra.gmra.mrb[0].mxu0 %vm1634_vm5, %v2876_v28  ;;  %1767 = vmatprep.subr.bf16.mxu1 %v1625_v33  ;;  %v1873_v40 = vadd.s32 256, %v4556_v61  ;;  %v1872_v49 = vadd.s32 128, %v4556_v61  ;;  %v1874_v7 = vadd.s32 384, %v4556_v61  ;;  %v1875_v63 = vadd.s32 512, %v4556_v61 }
 0x377   : > { %1725 = vmatpush1.bf16.msra.mxu0 %v1622_v5  ;;  %1756 = vmatprep.mubr.bf16.mxu0 %v3325_v36  ;;  %v1876_v8 = vadd.s32 640, %v4556_v61  ;;  %v1877_v45 = vadd.s32 768, %v4556_v61  ;;  %vm1975_vm6 = vcmp.lt.s32.totalorder %v4556_v61, 8  ;;  %v1878_v48 = vadd.s32 896, %v4556_v61 }
 0x378   : > { %v1890_v42 = vand.u32 127, %v1872_v49  ;;  %v1904_v47 = vand.u32 127, %v1874_v7  ;;  %v1911_v10 = vand.u32 127, %v1875_v63 }
 0x379   : > { %v1918_v38 = vand.u32 127, %v1876_v8  ;;  %v1925_v30 = vand.u32 127, %v1877_v45  ;;  %v1932_v34 = vand.u32 127, %v1878_v48 }
 0x37a   : > { %2480 = vmatmul.mubr.msk.bf16.vlgmr.msra.gmra.mrb[0].mxu1 %vm1634_vm5, %v2876_v28  ;;  %vm4582_vm8 = vcmp.lt.s32.totalorder %v1890_v42, 8  ;;  %vm4587_vm9 = vcmp.lt.s32.totalorder %v1904_v47, 8  ;;  %vm4591_vm10 = vcmp.lt.s32.totalorder %v1911_v10, 8 }
 0x37b   : > { %1768 = vmatpush1.bf16.msra.mxu1 %v1624_v55  ;;  %1799 = vmatprep.mubr.bf16.mxu1 %v3325_v36  ;;  %v1897_v36 = vand.u32 127, %v1873_v40  ;;  %vm4597_vm11 = vcmp.lt.s32.totalorder %v1918_v38, 8  ;;  %vm4614_vm12 = vcmp.lt.s32.totalorder %v1925_v30, 8  ;;  %vm4620_vm13 = vcmp.lt.s32.totalorder %v1932_v34, 8 }
 0x37d   : > { %vm4577_vm7 = vcmp.lt.s32.totalorder %v1897_v36, 8 }
 0x37e   : > { %2481 = vmatmul.mubr.msk.bf16.vlgmr.msra.gmra.mrb[4].mxu0 %vm1634_vm5, %v2876_v28 }
 0x381   : > { %v4562_v41 = vpop.permute.xlu0 %1171 }
 0x382   : > { %2482 = vmatmul.mubr.msk.bf16.vlgmr.msra.gmra.mrb[4].mxu1 %vm1634_vm5, %v2876_v28 }
 0x385   : > { %v4558_v14 = vpop.permute.xlu1 %1176  ;;  %v4572_v46 = vpop.permute.xlu0 %1835 }
 0x389   : > { %v4567_v2 = vpop.permute.xlu1 %1830 }
 0x449   : > { %v1672_v43 = vpop.f32.mrb[0].mxu0 }
 0x44a   : > { %v2520_v0 = vadd.f32 %v1672_v43, %v4562_v41  ;;  %v1674_v51 = vpop.f32.mrb[1].mxu0 }
 0x44b   : > { %v2521_v59 = vadd.f32 %v1674_v51, %v4562_v41  ;;  %v1676_v4 = vpop.f32.mrb[2].mxu0 }
 0x44c   : > { %v2522_v11 = vadd.f32 %v1676_v4, %v4558_v14  ;;  %v1678_v54 = vpop.f32.mrb[3].mxu0  ;;  %v1838_v23 = vadd.f32 %v2520_v0, %v4567_v2 }
 0x44d   : > { %v2523_v27 = vadd.f32 %v1678_v54, %v4558_v14  ;;  %v1715_v9 = vpop.f32.mrb[0].mxu1  ;;  %v1839_v20 = vadd.f32 %v2521_v59, %v4567_v2 }
 0x44e   : > { %v2524_v16 = vadd.f32 %v1715_v9, %v4562_v41  ;;  %v1717_v26 = vpop.f32.mrb[1].mxu1  ;;  %v1854_v15 = vmax.f32 %v1838_v23, 0.0  ;;  %v1846_v24 = vadd.f32 %v2522_v11, %v4572_v46 }
 0x44f   : > { %v2525_v35 = vadd.f32 %v1717_v26, %v4562_v41  ;;  %v1719_v21 = vpop.f32.mrb[2].mxu1  ;;  %v1855_v3 = vmax.f32 %v1839_v20, 0.0  ;;  %v1847_v29 = vadd.f32 %v2523_v27, %v4572_v46 }
 0x450   : > { %v1840_v31 = vadd.f32 %v2524_v16, %v4567_v2  ;;  %v2526_v37 = vadd.f32 %v1719_v21, %v4558_v14  ;;  %v1721_v13 = vpop.f32.mrb[3].mxu1  ;;  %v1999_v25 = vsel %vm1975_vm6, %v1854_v15, 0.0  ;;  %v1862_v39 = vmax.f32 %v1846_v24, 0.0 }
 0x451   : > { %v1841_v18 = vadd.f32 %v2525_v35, %v4567_v2  ;;  %v2527_v58 = vadd.f32 %v1721_v13, %v4558_v14  ;;  %v1758_v57 = vpop.f32.mrb[4].mxu0  ;;  %v2000_v62 = vsel %vm4582_vm8, %v1855_v3, 0.0  ;;  %v1863_v53 = vmax.f32 %v1847_v29, 0.0 }
 0x452   : > { %v1856_v22 = vmax.f32 %v1840_v31, 0.0  ;;  %v1848_v6 = vadd.f32 %v2526_v37, %v4572_v46  ;;  %v2528_v52 = vadd.f32 %v1758_v57, %v4562_v41  ;;  %v1760_v44 = vpop.f32.mrb[5].mxu0  ;;  %v2512_v19 = vpack.c.bf16 %v2000_v62, %v1999_v25 }
 0x453   : > { %v1857_v5 = vmax.f32 %v1841_v18, 0.0  ;;  %v1849_v12 = vadd.f32 %v2527_v58, %v4572_v46  ;;  %v2529_v33 = vadd.f32 %v1760_v44, %v4562_v41  ;;  %v1762_v55 = vpop.f32.mrb[6].mxu0  ;;  %v2007_v40 = vsel %vm1975_vm6, %v1862_v39, 0.0 }
 0x454   : > { %v2001_v49 = vsel %vm4577_vm7, %v1856_v22, 0.0  ;;  %v1864_v7 = vmax.f32 %v1848_v6, 0.0  ;;  %v1842_v63 = vadd.f32 %v2528_v52, %v4567_v2  ;;  %v2530_v8 = vadd.f32 %v1762_v55, %v4558_v14  ;;  %2068 = vrot.lane.b32.xlu1 %v2512_v19, %s3324_s5  ;;  %v1764_v36 = vpop.f32.mrb[7].mxu0 }
 0x455   : > { %v2002_v42 = vsel %vm4587_vm9, %v1857_v5, 0.0  ;;  %v1865_v43 = vmax.f32 %v1849_v12, 0.0  ;;  %v1843_v47 = vadd.f32 %v2529_v33, %v4567_v2  ;;  %v2531_v61 = vadd.f32 %v1764_v36, %v4558_v14  ;;  %v1801_v10 = vpop.f32.mrb[4].mxu1 }
 0x456   : > { %v2513_v0 = vpack.c.bf16 %v2002_v42, %v2001_v49  ;;  %v2009_v51 = vsel %vm4577_vm7, %v1864_v7, 0.0  ;;  %v1858_v38 = vmax.f32 %v1842_v63, 0.0  ;;  %v1850_v45 = vadd.f32 %v2530_v8, %v4572_v46  ;;  %v1803_v59 = vpop.f32.mrb[5].mxu1 }
 0x457   : > { %v2010_v4 = vsel %vm4587_vm9, %v1865_v43, 0.0  ;;  %v1859_v48 = vmax.f32 %v1843_v47, 0.0  ;;  %v1851_v11 = vadd.f32 %v2531_v61, %v4572_v46  ;;  %v2532_v54 = vadd.f32 %v1801_v10, %v4562_v41  ;;  %v1805_v23 = vpop.f32.mrb[6].mxu1 }
 0x458   : > { %v2517_v27 = vpack.c.bf16 %v2010_v4, %v2009_v51  ;;  %v2003_v9 = vsel %vm4591_vm10, %v1858_v38, 0.0  ;;  %v1866_v20 = vmax.f32 %v1850_v45, 0.0  ;;  %v2533_v32 = vadd.f32 %v1803_v59, %v4562_v41  ;;  %v1807_v16 = vpop.f32.mrb[7].mxu1  ;;  %2070 = vrot.lane.b32.xlu0 %v2513_v0, %s3324_s5 }
 0x459   : > { %v2004_v56 = vsel %vm4597_vm11, %v1859_v48, 0.0  ;;  %v1867_v26 = vmax.f32 %v1851_v11, 0.0  ;;  %v1844_v15 = vadd.f32 %v2532_v54, %v4567_v2  ;;  %v2534_v30 = vadd.f32 %v1805_v23, %v4558_v14 }
 0x45a   : > { %v2514_v24 = vpack.c.bf16 %v2004_v56, %v2003_v9  ;;  %v2011_v35 = vsel %vm4591_vm10, %v1866_v20, 0.0  ;;  %v1845_v21 = vadd.f32 %v2533_v32, %v4567_v2  ;;  %v2535_v3 = vadd.f32 %v1807_v16, %v4558_v14 }
 0x45b   : > { %v2012_v41 = vsel %vm4597_vm11, %v1867_v26, 0.0  ;;  %v1860_v34 = vmax.f32 %v1844_v15, 0.0  ;;  %v1852_v29 = vadd.f32 %v2534_v30, %v4572_v46  ;;  %v2008_v31 = vsel %vm4582_vm8, %v1863_v53, 0.0 }
 0x45c   : > { %v2518_v37 = vpack.c.bf16 %v2012_v41, %v2011_v35  ;;  %v1861_v13 = vmax.f32 %v1845_v21, 0.0  ;;  %v1853_v25 = vadd.f32 %v2535_v3, %v4572_v46  ;;  %v2516_v39 = vpack.c.bf16 %v2008_v31, %v2007_v40  ;;  %2078 = vrot.lane.b32.xlu0 %v2517_v27, %s3324_s5 }
 0x45d   : > { %v2005_v2 = vsel %vm4614_vm12, %v1860_v34, 0.0  ;;  %v1868_v14 = vmax.f32 %v1852_v29, 0.0 }
 0x45e   : > { %v2006_v1 = vsel %vm4620_vm13, %v1861_v13, 0.0  ;;  %v1869_v50 = vmax.f32 %v1853_v25, 0.0  ;;  %2076 = vrot.lane.b32.xlu1 %v2516_v39, %s3324_s5 }
 0x45f   : > { %v2515_v60 = vpack.c.bf16 %v2006_v1, %v2005_v2  ;;  %v2013_v18 = vsel %vm4614_vm12, %v1868_v14, 0.0 }
 0x460   : > { %v2014_v46 = vsel %vm4620_vm13, %v1869_v50, 0.0 }
 0x461   : > { %v2519_v58 = vpack.c.bf16 %v2014_v46, %v2013_v18  ;;  %2074 = vrot.lane.b32.xlu0 %v2515_v60, %s3324_s5 }
 0x462   : > { %2072 = vrot.lane.b32.xlu1 %v2514_v24, %s3324_s5 }
 0x465   : > { %2082 = vrot.lane.b32.xlu0 %v2519_v58, %s3324_s5 }
 0x466   : > { %2080 = vrot.lane.b32.xlu1 %v2518_v37, %s3324_s5 }
 0x4c6   : > { %v2069_v57 = vpop.permute.xlu1 %2068 }
 0x4c7   : > { %v2084_v53 = vrot.slane %v2069_v57, 4 }
 0x4c9   : > { %v2092_v22 = vsel %vm951_vm2, %v2084_v53, %v2069_v57 }
 0x4ca   : > { %2120 = vst.msk [vmem:[%s3918_s20 + $0x4] sm:$0xff] %vm4674_vm0, %v2092_v22  ;;  %v2071_v6 = vpop.permute.xlu0 %2070 }
 0x4cb   : > { %v2085_v52 = vrot.slane %v2071_v6, 4 }
 0x4cd   : > { %v2094_v44 = vsel %vm2093_vm1, %v2084_v53, %v2085_v52 }
 0x4ce   : > { %v2095_v19 = vsel %vm951_vm2, %v2094_v44, %v2071_v6  ;;  %v2079_v28 = vpop.permute.xlu0 %2078 }
 0x4cf   : > { %2121 = vst [vmem:[%s3918_s20 + $0xc] sm:$0xff] %v2095_v19  ;;  %v2089_v5 = vrot.slane %v2079_v28, 4 }
 0x4d0   : > { %v2077_v12 = vpop.permute.xlu1 %2076 }
 0x4d1   : > { %v2088_v33 = vrot.slane %v2077_v12, 4 }
 0x4d3   : > { %v2100_v55 = vsel %vm951_vm2, %v2088_v33, %v2077_v12  ;;  %v2101_v17 = vsel %vm2093_vm1, %v2088_v33, %v2089_v5  ;;  %v2075_v40 = vpop.permute.xlu0 %2074 }
 0x4d4   : > { %2126 = vst.msk [vmem:[%s3918_s20 + $0x30] sm:$0xff] %vm4674_vm0, %v2100_v55  ;;  %v2102_v49 = vsel %vm951_vm2, %v2101_v17, %v2079_v28  ;;  %v2073_v7 = vpop.permute.xlu1 %2072  ;;  %v2087_v63 = vrot.slane %v2075_v40, 4 }
 0x4d5   : > { %2127 = vst [vmem:[%s3918_s20 + $0x38] sm:$0xff] %v2102_v49  ;;  %v2086_v8 = vrot.slane %v2073_v7, 4 }
 0x4d6   : > { %2125 = vst.msk [vmem:[%s3918_s20 + $0x24] sm:$0xf] %vm2124_vm3, %v2087_v63 }
 0x4d7   : > { %v2096_v36 = vsel %vm2093_vm1, %v2085_v52, %v2086_v8  ;;  %v2098_v42 = vsel %vm2093_vm1, %v2086_v8, %v2087_v63  ;;  %v2083_v43 = vpop.permute.xlu0 %2082 }
 0x4d8   : > { %v2097_v47 = vsel %vm951_vm2, %v2096_v36, %v2073_v7  ;;  %v2099_v61 = vsel %vm951_vm2, %v2098_v42, %v2075_v40  ;;  %v2081_v10 = vpop.permute.xlu1 %2080  ;;  %v2091_v0 = vrot.slane %v2083_v43, 4 }
 0x4d9   : > { %2122 = vst [vmem:[%s3918_s20 + $0x14] sm:$0xff] %v2097_v47  ;;  %2123 = vst [vmem:[%s3918_s20 + $0x1c] sm:$0xff] %v2099_v61  ;;  %v2090_v51 = vrot.slane %v2081_v10, 4 }
 0x4da   : > { %2130 = vst.msk [vmem:[%s3918_s20 + $0x50] sm:$0xf] %vm2124_vm3, %v2091_v0 }
 0x4db   : > { %v2103_v38 = vsel %vm2093_vm1, %v2089_v5, %v2090_v51  ;;  %v2105_v45 = vsel %vm2093_vm1, %v2090_v51, %v2091_v0 }
 0x4dc   : > { %v2104_v59 = vsel %vm951_vm2, %v2103_v38, %v2081_v10  ;;  %v2106_v4 = vsel %vm951_vm2, %v2105_v45, %v2083_v43 }
 0x4dd   : > { %2128 = vst [vmem:[%s3918_s20 + $0x40] sm:$0xff] %v2104_v59  ;;  %2129 = vst [vmem:[%s3918_s20 + $0x48] sm:$0xff] %v2106_v4 }
 0x4de PF: > { %2133 = sbr.rel (!%p3914_p9) target bundleno = 1253 (0x4e5), region = 92  ;;  %vm2139_vm4 = vcmask (%p3914_p9), 11264   ;;  %v3326_v48 = vmov (%p3914_p9), 0  }
 0x4df   : > { %2134 = vst [vmem:[%s3918_s20] sm:$0xff] (%p3914_p9), %v3326_v48  ;;  %2135 = vst [vmem:[%s3918_s20 + $0x8] sm:$0xff] (%p3914_p9), %v3326_v48 }
 0x4e0   : > { %2136 = vst [vmem:[%s3918_s20 + $0x10] sm:$0xff] (%p3914_p9), %v3326_v48  ;;  %2137 = vst [vmem:[%s3918_s20 + $0x18] sm:$0xff] (%p3914_p9), %v3326_v48 }
 0x4e1   : > { %2138 = vst [vmem:[%s3918_s20 + $0x20] sm:$0xff] (%p3914_p9), %v3326_v48  ;;  %2141 = vst [vmem:[%s3918_s20 + $0x2c] sm:$0xff] (%p3914_p9), %v3326_v48 }
 0x4e2   : > { %2142 = vst [vmem:[%s3918_s20 + $0x34] sm:$0xff] (%p3914_p9), %v3326_v48  ;;  %2143 = vst [vmem:[%s3918_s20 + $0x3c] sm:$0xff] (%p3914_p9), %v3326_v48 }
 0x4e3   : > { %2144 = vst [vmem:[%s3918_s20 + $0x44] sm:$0xff] (%p3914_p9), %v3326_v48  ;;  %2145 = vst [vmem:[%s3918_s20 + $0x4c] sm:$0xff] (%p3914_p9), %v3326_v48 }
 0x4e4   : > { %2140 = vst.msk [vmem:[%s3918_s20 + $0x28] sm:$0xf] (%p3914_p9), %vm2139_vm4, %v3326_v48  ;;  %2146 = vst.msk [vmem:[%s3918_s20 + $0x54] sm:$0xf] (%p3914_p9), %vm2139_vm4, %v3326_v48 }
 0x4e5 PF: > { %s4959_s10 = sld [smem:[#allocation33_spill]]  ;;  %s4960_s0 = sld [smem:[#allocation34_spill]] }
 0x4e6   : > { %s2163_s29 = sshll.u32 %s3918_s20, 4  ;;  %s4962_s11 = sld [smem:[#allocation48_spill]]  ;;  %s4725_s29 = int_to_ptr.vmem [resolvable:$true] %s2163_s29 }
 0x4e7   : > { %s4734_s12 = scalar_lea.sflag [#allocation4], %s513_s7  ;;  %s3110_s25 = scalar_lea.vmem %s4725_s29, 1408 }
 0x4e8   : > { %p3111_p4 = scmp.ne.s32.totalorder %s4725_s29, %s3110_s25  ;;  %p4964_p1 = scmp.ne.s32.totalorder %s4920_s4, 0 }
 0x4e9   : > { %s3327_s20 = smov [#allocation16]  }
 0x4ea   : > { %p3112_p0 = pnand %p3111_p4, %p4964_p1  ;;  %s3114_s22 = sshll.u32 %s3327_s20, 4  ;;  %s3115_s22 = int_to_ptr.vmem [resolvable:$false] %s3114_s22 }
 0x4eb   : > { %s2584_s27 = smul.u32 22, %s4959_s10  ;;  %s3116_s23 = scalar_lea.vmem %s3115_s22, 2816 }
 0x4ec   : > { %s2585_s8 = smul.u32 220, %s4960_s0  ;;  %s4963_s2 = smov %s4962_s11 }
 0x4ed   : > { %p3113_p13 = pneg %p3112_p0  ;;  %p3117_p5 = scmp.lt.s32.totalorder %s4725_s29, %s3115_s22 }
 0x4ee   : > { %s2160_s28 = sadd.s32 %s2585_s8, %s2584_s27  ;;  %p3118_p8 = scmp.lt.s32.totalorder %s3116_s23, %s3110_s25 }
 0x4ef   : > { %s2491_s30 = sshll.u32 %s2160_s28, 6 }
 0x4f0   : > { %s4730_s9 = scalar_lea.hbm %s4962_s11, %s2491_s30  ;;  %p3119_p2 = por %p3118_p8, %p3117_p5 }
 0x4f2   : > { %p3120_p3 = pnand %p3119_p2, %p3113_p13 }
 0x4f4   : > { %3123 = shalt.err (!%p3120_p3)
}
 0x4f5   : > { %s3124_s7 = scalar_lea.hbm %s4730_s9, 1408  ;;  %s3128_s0 = scalar_lea.hbm %s4963_s2, 28160 }
 0x4f6   : > { %p3125_p10 = scmp.ne.s32.totalorder %s4730_s9, %s3124_s7  ;;  %p3129_p7 = scmp.lt.u32.totalorder %s4730_s9, %s4963_s2 }
 0x4f7   : > { %p3130_p6 = scmp.lt.u32.totalorder %s3128_s0, %s3124_s7  ;;  %p3132_p4 = scmp.lt.u32.totalorder %s3124_s7, %s4730_s9 }
 0x4f8   : > { %p3126_p11 = pnand %p3125_p10, %p4964_p1 }
 0x4f9   : > { %p3131_p9 = por %p3130_p6, %p3129_p7 }
 0x4fa   : > { %p3127_p12 = pneg %p3126_p11 }
 0x4fb   : > { %p3133_p0 = por %p3132_p4, %p3131_p9 }
 0x4fd   : > { %p3134_p13 = pnand %p3133_p0, %p3127_p12 }
 0x4ff   : > { %3137 = shalt.err (!%p3134_p13)
}
 0x500   : > { %s3328_s8 = smov 704   ;;  %s3329_s28 = smov 44  }
 0x501   : > { %2610 = dma.vmem_to_hbm [thread:$0]  (%p4964_p1), %s4725_s29, 1408, %s4730_s9, %s4734_s12, %s3328_s8, %s3328_s8, %s3329_s28  }
 0x502 PF: > { %s4965_s30 = sld [smem:[#allocation25_spill]]  ;;  %p2651_p5 = scmp.ge.s32.totalorder %s3304_s21, 2 }
 0x503   : > { %p4966_p8 = scmp.ne.s32.totalorder %s4921_s13, 0 }
 0x505   : > { %p2639_p2 = pnand %p2651_p5, %p4966_p8 }
 0x508   : > { %s2178_s3 = sand.u32 1, %s4965_s30  }
 0x509   : > { %s2179_s24 = scalar_lea.sflag [#allocation4], %s2178_s3 }
 0x50a   : > { %3235 = dma.done.wait (!%p2639_p2), %s2179_s24, 1408  }
 0x50b   : > { %3237 = vsyncadd (!%p2639_p2), %s2179_s24, 4294965888  ;;  %s32_s21 = sadd.s32 1, %s3304_s21   ;;  %s4968_s27 = sld [smem:[#allocation26_spill]] }
 0x50c   : > { %p4763_p3 = scmp.ge.s32.totalorder %s32_s21, 22   ;;  %s4969_s28 = sld [smem:[#allocation27_spill]] }
 0x50d   : > { %s4970_s30 = sld [smem:[#allocation29_spill]]  ;;  %s4971_s9 = sld [smem:[#allocation30_spill]] }
 0x50e   : > { %s4972_s4 = sld [smem:[#allocation31_spill]]  ;;  %s4973_s12 = sld [smem:[#allocation32_spill]] }
 0x50f   : > { %s4974_s13 = sld [smem:[#allocation39_spill]]  ;;  %s4975_s25 = smov %s3685_s14 }
 0x510   : > { %s4976_s18 = sld [smem:[#allocation35_spill]]  ;;  %s4977_s20 = smov %s3535_s17 }
 0x511   : > { %s4978_s22 = sld [smem:[#allocation37_spill]]  ;;  %s4980_s29 = smov %s3797_s6 }
 0x512   : > { %s4981_s10 = smov %s5006_s26  ;;  %s4983_s14 = smov %s3280_s15 }
 0x513   : > { %s4984_s15 = smov %s3284_s16  ;;  %s4985_s16 = smov %s4975_s25 }
 0x514   : > { %s4982_s11 = smov %s4972_s4  ;;  %s4986_s17 = smov %s3296_s19 }
 0x515   : > { %s4987_s19 = smov %s4977_s20  ;;  %31 = sbr.rel (!%p4763_p3) target bundleno = 28 (0x1c), region = 158 }
 0x517   : > { %s4988_s20 = smov %s4978_s22 }
 0x51c   :  { %2184 = vsyncpa [#allocation3], 1 }
 0x51d   :  { %2186 = vsyncpa [#allocation3 + $0x1], 1 }
 0x51e   :  { %2187 = vsyncpa [#allocation6], 1 }
 0x51f   :  { %2189 = vsyncpa [#allocation6 + $0x1], 1 }
 0x520   :  { %2190 = vsyncpa [#allocation9], 1 }
 0x521   :  { %2191 = vsyncpa [#allocation12], 1 }
 0x522   :  { %2193 = vsyncpa [#allocation12 + $0x1], 1 }
 0x523   :  { %2194 = vsyncpa [#allocation15], 1 }
 0x524   :  { %2195 = vsyncpa [#allocation4], 1 }
 0x525   :  { %2197 = vsyncpa [#allocation4 + $0x1], 1 }

// kernel: up_voxel_stage_forward.9
= control target key start
LH: loop header
LB: loop body
LE: loop exit
PB: predicated region body
PF: predicated region fallthrough
CT: control target
= control target key end

     0   :  { %s4389_s0 = inlined_call_operand.hbm [shape: bf16[2,10,16,1282], index: 0, kind: input, shape index: {}, may-alias: {0,1,2}]   ;;  %s4390_s1 = inlined_call_operand.hbm [shape: bf16[2,10,16,1282], index: 1, kind: input, shape index: {}, may-alias: {0,1,2}]   ;;  %s4391_s2 = inlined_call_operand.hbm [shape: bf16[2,10,16,1282], index: 2, kind: input, shape index: {}, may-alias: {0,1,2}]   ;;  %s4392_s3 = inlined_call_operand.hbm [shape: bf16[16,432], index: 3, kind: input, shape index: {}]   ;;  %s4393_s4 = inlined_call_operand.hbm [shape: f32[16,1], index: 4, kind: input, shape index: {}]   ;;  %s4394_s5 = inlined_call_operand.hbm [shape: bf16[2,10,16,1282], index: 5, kind: input, shape index: {}]   ;;  %s4395_s6 = inlined_call_operand.hbm [shape: bf16[2,10,16,1282], index: 6, kind: output, shape index: {}]  }
   0x1   :  { %4424 = sst [smem:[#allocation35_spill]] %s4389_s0 }
   0x2   :  { %4425 = sst [smem:[#allocation36_spill]] %s4390_s1 }
   0x3   :  { %4426 = sst [smem:[#allocation37_spill]] %s4391_s2 }
   0x4   :  { %4427 = sst [smem:[#allocation38_spill]] %s4392_s3 }
   0x5   :  { %4428 = sst [smem:[#allocation39_spill]] %s4393_s4 }
   0x6   :  { %4429 = sst [smem:[#allocation40_spill]] %s4394_s5 }
   0x7   :  { %4430 = sst [smem:[#allocation41_spill]] %s4395_s6 }
   0x8   :  { %11 = vsyncpa [#allocation3], 0 }
   0x9   :  { %13 = vsyncpa [#allocation3 + $0x1], 0 }
   0xa   :  { %14 = vsyncpa [#allocation6], 0 }
   0xb   :  { %16 = vsyncpa [#allocation6 + $0x1], 0 }
   0xc   :  { %17 = vsyncpa [#allocation9], 0 }
   0xd   :  { %18 = vsyncpa [#allocation12], 0 }
   0xe   :  { %20 = vsyncpa [#allocation12 + $0x1], 0 }
   0xf   :  { %21 = vsyncpa [#allocation4], 0 }
  0x10   :  { %23 = vsyncpa [#allocation4 + $0x1], 0  ;;  %s2993_s21 = smov 0   ;;  %s2995_s22 = smov 0  }
  0x11   :  { %s2997_s23 = smov 0   ;;  %s2999_s24 = smov 0  }
  0x12   :  { %s3001_s25 = smov 0   ;;  %s3003_s26 = smov 0  }
  0x13   :  { %s3005_s27 = smov 0   ;;  %s3007_s28 = smov 0  }
  0x14   :  { %s3009_s29 = smov 0   ;;  %s3011_s30 = smov 0  }
  0x15   :  { %s3013_s7 = smov 0   ;;  %s3015_s8 = smov 0  }
  0x16   :  { %s3017_s9 = smov 0   ;;  %s3019_s10 = smov 0  }
  0x17   :  { %s3021_s11 = smov 0   ;;  %s3023_s12 = smov 0  }
  0x18   :  { %s3025_s13 = smov 0  }
  0x19 LB: > { %4431 = sst [smem:[#allocation20_spill]] %s2872_s21  ;;  %s3079_s14 = sadd.s32 4294967295, %s2936_s13   ;;  %s2936_s13 = sphi %s3025_s13, %s29_s13   ;;  %s2932_s12 = sphi %s3023_s12, %s4536_s12   ;;  %s2928_s11 = sphi %s3021_s11, %s4535_s11   ;;  %s2924_s10 = sphi %s3019_s10, %s4522_s10   ;;  %s2920_s9 = sphi %s3017_s9, %s4534_s9   ;;  %s2916_s8 = sphi %s3015_s8, %s4533_s8   ;;  %s2912_s7 = sphi %s3013_s7, %s4532_s7   ;;  %s2908_s30 = sphi %s3011_s30, %s4531_s30   ;;  %s2904_s29 = sphi %s3009_s29, %s4530_s29   ;;  %s2900_s28 = sphi %s3007_s28, %s4519_s28   ;;  %s2896_s27 = sphi %s3005_s27, %s4518_s27   ;;  %s2892_s26 = sphi %s3003_s26, %s4529_s26   ;;  %s2888_s25 = sphi %s3001_s25, %s4528_s25   ;;  %s2884_s24 = sphi %s2999_s24, %s4527_s24   ;;  %s2880_s23 = sphi %s2997_s23, %s4526_s23   ;;  %s2876_s22 = sphi %s2995_s22, %s4516_s22   ;;  %s2872_s21 = sphi %s2993_s21, %s4515_s21  }
  0x1a   : > { %4432 = sst [smem:[#allocation21_spill]] %s2876_s22  ;;  %p2119_p0 = scmp.ge.s32.totalorder %s2936_s13, 1 }
  0x1b   : > { %4433 = sst [smem:[#allocation22_spill]] %s2880_s23  ;;  %p4399_p1 = scmp.eq.s32.totalorder %s3079_s14, 0 }
  0x1c   : > { %4434 = sst [smem:[#allocation23_spill]] %s2884_s24  ;;  %p256_p2 = scmp.lt.s32.totalorder %s2936_s13, 21 }
  0x1d   : > { %4435 = sst [smem:[#allocation24_spill]] %s2900_s28  ;;  %s2938_s16 = smov [#allocation8]  }
  0x1e   : > { %4436 = sst [smem:[#allocation25_spill]] %s2904_s29  ;;  %p3084_p3 = pnand %p2119_p0, %p256_p2 }
  0x1f   : > { %4437 = sst [smem:[#allocation26_spill]] %s2920_s9  ;;  %s268_s17 = sshll.u32 %s2938_s16, 4  ;;  %s269_s17 = int_to_ptr.vmem [resolvable:$true] %s268_s17 }
  0x20   : > { %4438 = sst [smem:[#allocation27_spill]] %s2924_s10  ;;  %p2291_p4 = pneg %p3084_p3 }
  0x21   : > { %4439 = sst [smem:[#allocation28_spill]] %s2932_s12 }
  0x22   : > { %s4440_s15 = scalar_select %p3084_p3, 1, 0 }
  0x23   : > { %p3092_p5 = pnand %p2291_p4, %p4399_p1  ;;  %s4443_s3 = sld [smem:[#allocation38_spill]] }
  0x24   : > { %4441 = sst [smem:[#allocation29_spill]] %s4440_s15 }
  0x25   : > { %p4413_p7 = pneg %p3092_p5 }
  0x29   : > { %s2574_s6 = scalar_lea.hbm %s4443_s3, 512 }
  0x2a   : > { %p2575_p6 = scmp.ne.s32.totalorder %s4443_s3, %s2574_s6  ;;  %p2581_p10 = scmp.lt.u32.totalorder %s2574_s6, %s4443_s3 }
  0x2c   : > { %p2577_p8 = pnand %p4413_p7, %p2575_p6 }
  0x2e   : > { %p2578_p9 = pneg %p2577_p8 }
  0x30   : > { %p2583_p11 = pnand %p2581_p10, %p2578_p9 }
  0x32   : > { %2586 = shalt.err (!%p2583_p11)
}
  0x33   : > { %s2587_s19 = scalar_lea.vmem %s269_s17, 512  ;;  %p2595_p2 = scmp.lt.s32.totalorder %s269_s17, %s269_s17 }
  0x34   : > { %p2588_p12 = scmp.ne.s32.totalorder %s269_s17, %s2587_s19  ;;  %p2596_p4 = scmp.lt.s32.totalorder %s2587_s19, %s2587_s19 }
  0x36   : > { %p2590_p13 = pnand %p2588_p12, %p4413_p7  ;;  %p2597_p1 = por %p2596_p4, %p2595_p2 }
  0x38   : > { %p2591_p0 = pneg %p2590_p13 }
  0x3a   : > { %p2598_p3 = pnand %p2597_p1, %p2591_p0 }
  0x3c   : > { %2601 = shalt.err (!%p2598_p3)
}
  0x3d   : > { %s2939_s9 = smov 256   ;;  %s2940_s6 = smov 16  }
  0x3e   : > { %2294 = dma.hbm_to_vmem [thread:$0]  (!%p3092_p5), %s4443_s3, 512, %s269_s17, [#allocation9], %s2939_s9, %s2939_s9, %s2940_s6  }
  0x3f   : > { %s3119_s20 = sadd.s32 1, %s2928_s11  ;;  %s41_s16 = sadd.s32 1, %s2932_s12 }
  0x40   : > { %p39_p1 = scmp.ge.s32.totalorder %s3119_s20, 10  ;;  %p4412_p3 = scmp.eq.s32.totalorder %s2936_s13, 0 }
  0x41   : > { %p83_p6 = scmp.lt.s32.totalorder %s2928_s11, 9  ;;  %p2099_p9 = scmp.gt.s32.totalorder %s2928_s11, 0 }
  0x42   : > { %s3126_s19 = scalar_select %p39_p1, 0, %s3119_s20  }
  0x43   : > { %s4538_s16 = smov (!%p39_p1, %s41_s16), %s2932_s12  ;;  %s96_s6 = sadd.s32 1, %s2904_s29 }
  0x44   : > { %4444 = sst [smem:[#allocation30_spill]] %s3126_s19  ;;  %p43_p8 = scmp.ge.s32.totalorder %s4538_s16, 2 }
  0x45   : > { %s84_s17 = scalar_select %p83_p6, %s2928_s11, 9 }
  0x46   : > { %p87_p10 = scmp.lt.s32.totalorder %s3126_s19, 9  ;;  %p2104_p11 = scmp.gt.s32.totalorder %s3126_s19, 0 }
  0x47   : > { %s4540_s16 = smov (%p43_p8, %s4538_s16), 0  ;;  %s4542_s17 = smov (!%p2099_p9, %s84_s17), 0 }
  0x48   : > { %4445 = sst [smem:[#allocation31_spill]] %s4540_s16  ;;  %s3137_s9 = ssub.s32 %s2932_s12, %s4540_s16 }
  0x49   : > { %s88_s10 = scalar_select %p87_p10, %s3126_s19, 9 }
  0x4a   : > { %p103_p12 = scmp.ne.s32.totalorder %s2904_s29, %s2900_s28  ;;  %p109_p13 = scmp.ne.s32.totalorder %s2900_s28, %s2896_s27 }
  0x4b   : > { %s4544_s10 = smov (!%p2104_p11, %s88_s10), 0  ;;  %p4446_p2 = scmp.eq.s32.totalorder %s3079_s14, 0 }
  0x4c   : > { %p105_p0 = por %p103_p12, %p4412_p3  ;;  %s92_s3 = ssub.s32 %s4542_s17, %s4544_s10 }
  0x4d   : > { %p3149_p4 = por %p109_p13, %p4446_p2  ;;  %p4411_p1 = scmp.lt.s32.totalorder %s2936_s13, 20 }
  0x4e   : > { %s93_s5 = sor.u32 %s92_s3, %s3137_s9  ;;  %s3156_s21 = smul.u32 220, %s2932_s12 }
  0x4f   : > { %s4447_s15 = scalar_select %p3149_p4, 1, 0 }
  0x50   : > { %p94_p6 = scmp.eq.s32.totalorder %s93_s5, 0  ;;  %s323_s16 = sand.u32 1, %s2936_s13  }
  0x51   : > { %4448 = sst [smem:[#allocation32_spill]] %s4447_s15  ;;  %s325_s23 = sand.u32 1, %s2904_s29  }
  0x52   : > { %s3160_s22 = scalar_select %p94_p6, %s2904_s29, %s96_s6  }
  0x53   : > { %s2258_s27 = smul.u32 88, %s325_s23  ;;  %p3165_p8 = pnand %p4411_p1, %p105_p0 }
  0x54   : > { %4449 = sst [smem:[#allocation33_spill]] %s3160_s22  ;;  %s2259_s15 = smul.u32 22, %s4542_s17 }
  0x55   : > { %s327_s2 = scalar_lea.vmem [#allocation5], %s2258_s27  ;;  %s4451_s1 = sld [smem:[#allocation36_spill]] }
  0x56   : > { %s337_s10 = sadd.s32 %s2259_s15, %s3156_s21  ;;  %s340_s3 = sshll.u32 %s327_s2, 4  ;;  %s3170_s3 = int_to_ptr.vmem [resolvable:$true] %s340_s3 }
  0x57   : > { %s2134_s12 = sshll.u32 %s337_s10, 6  ;;  %s2941_s23 = smov [#allocation10]  }
  0x58   : > { %s3177_s22 = sshll.u32 %s2941_s23, 4  ;;  %s3179_s29 = scalar_lea.sflag [#allocation6], %s323_s16  ;;  %s282_s22 = int_to_ptr.vmem [resolvable:$true] %s3177_s22 }
  0x59   : > { %p2604_p10 = pneg %p3165_p8 }
  0x5b   : > { %s3175_s6 = scalar_lea.hbm %s4451_s1, %s2134_s12  ;;  %s2607_s12 = scalar_lea.hbm %s4451_s1, 28160 }
  0x5c   : > { %s2602_s17 = scalar_lea.hbm %s3175_s6, 1408  ;;  %p2608_p13 = scmp.lt.u32.totalorder %s3175_s6, %s4451_s1 }
  0x5d   : > { %p2603_p9 = scmp.ne.s32.totalorder %s3175_s6, %s2602_s17  ;;  %p2609_p0 = scmp.lt.u32.totalorder %s2607_s12, %s2602_s17 }
  0x5e   : > { %p2611_p6 = scmp.lt.u32.totalorder %s2602_s17, %s3175_s6 }
  0x5f   : > { %p2605_p11 = pnand %p2604_p10, %p2603_p9  ;;  %p2610_p2 = por %p2609_p0, %p2608_p13 }
  0x61   : > { %p2606_p12 = pneg %p2605_p11  ;;  %p2612_p1 = por %p2611_p6, %p2610_p2 }
  0x63   : > { %p2613_p3 = pnand %p2612_p1, %p2606_p12 }
  0x65   : > { %2616 = shalt.err (!%p2613_p3)
}
  0x66   : > { %s2617_s16 = scalar_lea.vmem %s3170_s3, 1408  ;;  %s2942_s10 = smov [#allocation5]  }
  0x67   : > { %p2618_p9 = scmp.ne.s32.totalorder %s3170_s3, %s2617_s16  ;;  %s2622_s5 = sshll.u32 %s2942_s10, 4  ;;  %s2623_s5 = int_to_ptr.vmem [resolvable:$false] %s2622_s5 }
  0x68   : > { %s2624_s23 = scalar_lea.vmem %s2623_s5, 2816  ;;  %p2625_p4 = scmp.lt.s32.totalorder %s3170_s3, %s2623_s5 }
  0x69   : > { %p2620_p11 = pnand %p2618_p9, %p2604_p10  ;;  %p2626_p13 = scmp.lt.s32.totalorder %s2624_s23, %s2617_s16 }
  0x6b   : > { %p2621_p7 = pneg %p2620_p11  ;;  %p2627_p0 = por %p2626_p13, %p2625_p4 }
  0x6d   : > { %p2628_p2 = pnand %p2627_p0, %p2621_p7 }
  0x6f   : > { %2631 = shalt.err (!%p2628_p2)
}
  0x70   : > { %s4415_s17 = smov 704   ;;  %s4417_s2 = smov 44  }
  0x71   : > { %2304 = dma.hbm_to_vmem [thread:$0]  (!%p3165_p8), %s3175_s6, 1408, %s3170_s3, %s3179_s29, %s4415_s17, %s4415_s17, %s4417_s2  }
  0x72   : > { %s4452_s4 = sld [smem:[#allocation39_spill]]  ;;  %p4453_p3 = pneg %p3092_p5 }
  0x78   : > { %s2632_s15 = scalar_lea.hbm %s4452_s4, 256 }
  0x79   : > { %p2633_p7 = scmp.ne.s32.totalorder %s4452_s4, %s2632_s15  ;;  %p2639_p10 = scmp.lt.u32.totalorder %s2632_s15, %s4452_s4 }
  0x7b   : > { %p2635_p4 = pnand %p2633_p7, %p4453_p3 }
  0x7d   : > { %p2636_p1 = pneg %p2635_p4 }
  0x7f   : > { %p2641_p12 = pnand %p2639_p10, %p2636_p1 }
  0x81   : > { %2644 = shalt.err (!%p2641_p12)
}
  0x82   : > { %s2645_s28 = scalar_lea.vmem %s282_s22, 256  ;;  %p4454_p6 = pmov %p4453_p3 }
  0x83   : > { %p2646_p8 = scmp.ne.s32.totalorder %s282_s22, %s2645_s28  ;;  %p2653_p13 = scmp.lt.s32.totalorder %s282_s22, %s282_s22 }
  0x84   : > { %p2654_p0 = scmp.lt.s32.totalorder %s2645_s28, %s2645_s28 }
  0x85   : > { %p2648_p9 = pnand %p2646_p8, %p4454_p6 }
  0x86   : > { %p2655_p2 = por %p2654_p0, %p2653_p13 }
  0x87   : > { %p2649_p11 = pneg %p2648_p9 }
  0x89   : > { %p2656_p3 = pnand %p2655_p2, %p2649_p11 }
  0x8b   : > { %2659 = shalt.err (!%p2656_p3)
}
  0x8c   : > { %s2945_s3 = smov 128   ;;  %s2946_s6 = smov 8  }
  0x8d   : > { %2297 = dma.hbm_to_vmem [thread:$0]  (!%p3092_p5), %s4452_s4, 256, %s282_s22, [#allocation9], %s2945_s3, %s2945_s3, %s2946_s6  }
  0x8e   : > { %s45_s12 = sadd.s32 4294967295, %s2928_s11  ;;  %s50_s15 = sadd.s32 4294967295, %s3126_s19 }
  0x8f   : > { %p2089_p7 = scmp.gt.s32.totalorder %s45_s12, 0  ;;  %s60_s27 = sadd.s32 1, %s2916_s8 }
  0x90   : > { %p2094_p4 = scmp.gt.s32.totalorder %s50_s15, 0  ;;  %p67_p1 = scmp.ne.s32.totalorder %s2916_s8, %s2912_s7 }
  0x91   : > { %s4546_s12 = smov (!%p2089_p7, %s45_s12), 0  ;;  %p73_p10 = scmp.ne.s32.totalorder %s2912_s7, %s2908_s30 }
  0x92   : > { %s4548_s15 = smov (!%p2094_p4, %s50_s15), 0  ;;  %p4455_p12 = scmp.eq.s32.totalorder %s2936_s13, 0 }
  0x93   : > { %p4456_p6 = scmp.eq.s32.totalorder %s3079_s14, 0  ;;  %s56_s22 = ssub.s32 %s4546_s12, %s4548_s15 }
  0x94   : > { %p69_p8 = por %p4455_p12, %p67_p1  ;;  %s295_s16 = sand.u32 1, %s2916_s8  }
  0x95   : > { %p3242_p9 = por %p4456_p6, %p73_p10  ;;  %s57_s10 = sor.u32 %s56_s22, %s3137_s9 }
  0x96   : > { %p58_p5 = scmp.eq.s32.totalorder %s57_s10, 0  ;;  %s2255_s5 = smul.u32 88, %s295_s16 }
  0x97   : > { %s2256_s28 = smul.u32 22, %s4546_s12  ;;  %p4458_p11 = scmp.lt.s32.totalorder %s2936_s13, 20 }
  0x98   : > { %s3255_s30 = scalar_select %p58_p5, %s2916_s8, %s60_s27  }
  0x99   : > { %p3250_p13 = pnand %p4458_p11, %p69_p8  ;;  %s310_s6 = sadd.s32 %s3156_s21, %s2256_s28 }
  0x9a   : > { %4460 = sst [smem:[#allocation34_spill]] %s3255_s30  ;;  %s2128_s23 = sshll.u32 %s310_s6, 6 }
  0x9b   : > { %s299_s24 = scalar_lea.vmem [#allocation2], %s2255_s5  ;;  %s4461_s0 = sld [smem:[#allocation35_spill]] }
  0x9c   : > { %s313_s17 = sshll.u32 %s299_s24, 4  ;;  %s3265_s12 = scalar_lea.sflag [#allocation3], %s295_s16  ;;  %s3263_s17 = int_to_ptr.vmem [resolvable:$true] %s313_s17 }
  0x9d   : > { %p2662_p2 = pneg %p3250_p13 }
  0xa1   : > { %s3261_s22 = scalar_lea.hbm %s4461_s0, %s2128_s23  ;;  %s2665_s5 = scalar_lea.hbm %s4461_s0, 28160 }
  0xa2   : > { %s2660_s10 = scalar_lea.hbm %s3261_s22, 1408  ;;  %p2666_p4 = scmp.lt.u32.totalorder %s3261_s22, %s4461_s0 }
  0xa3   : > { %p2661_p0 = scmp.ne.s32.totalorder %s3261_s22, %s2660_s10  ;;  %p2667_p1 = scmp.lt.u32.totalorder %s2665_s5, %s2660_s10 }
  0xa4   : > { %p2669_p12 = scmp.lt.u32.totalorder %s2660_s10, %s3261_s22 }
  0xa5   : > { %p2663_p3 = pnand %p2662_p2, %p2661_p0  ;;  %p2668_p10 = por %p2667_p1, %p2666_p4 }
  0xa7   : > { %p2664_p7 = pneg %p2663_p3  ;;  %p2670_p8 = por %p2669_p12, %p2668_p10 }
  0xa9   : > { %p2671_p6 = pnand %p2670_p8, %p2664_p7 }
  0xab   : > { %2674 = shalt.err (!%p2671_p6)
}
  0xac   : > { %s2675_s16 = scalar_lea.vmem %s3263_s17, 1408  ;;  %s2947_s23 = smov [#allocation2]  }
  0xad   : > { %p2676_p5 = scmp.ne.s32.totalorder %s3263_s17, %s2675_s16  ;;  %s2680_s24 = sshll.u32 %s2947_s23, 4  ;;  %s2681_s24 = int_to_ptr.vmem [resolvable:$false] %s2680_s24 }
  0xae   : > { %s2682_s15 = scalar_lea.vmem %s2681_s24, 2816  ;;  %p2683_p3 = scmp.lt.s32.totalorder %s3263_s17, %s2681_s24 }
  0xaf   : > { %p2678_p11 = pnand %p2676_p5, %p2662_p2  ;;  %p2684_p4 = scmp.lt.s32.totalorder %s2682_s15, %s2675_s16 }
  0xb1   : > { %p2679_p0 = pneg %p2678_p11  ;;  %p2685_p1 = por %p2684_p4, %p2683_p3 }
  0xb3   : > { %p2686_p10 = pnand %p2685_p1, %p2679_p0 }
  0xb5   : > { %2689 = shalt.err (!%p2686_p10)
}
  0xb6   : > { %s4462_s10 = smov 44   ;;  %s4463_s27 = smov 704  }
  0xb7   : > { %s4464_s2 = sld [smem:[#allocation23_spill]]  ;;  %p120_p2 = scmp.lt.s32.totalorder %s3119_s20, 9 }
  0xb8   : > { %2301 = dma.hbm_to_vmem [thread:$0]  (!%p3250_p13), %s3261_s22, 1408, %s3263_s17, %s3265_s12, %s4463_s27, %s4463_s27, %s4462_s10  }
  0xb9   : > { %s124_s3 = sadd.s32 1, %s3126_s19  ;;  %s4550_s20 = smov (!%p120_p2, %s3119_s20), 9 }
  0xba   : > { %p125_p7 = scmp.lt.s32.totalorder %s124_s3, 9  ;;  %s134_s5 = sadd.s32 1, %s2892_s26 }
  0xbb   : > { %p141_p12 = scmp.ne.s32.totalorder %s2892_s26, %s2888_s25  ;;  %p4465_p8 = scmp.eq.s32.totalorder %s2936_s13, 0 }
  0xbc   : > { %s4552_s3 = smov (!%p125_p7, %s124_s3), 9  ;;  %s352_s6 = sand.u32 1, %s2892_s26  }
  0xbd   : > { %p143_p6 = por %p141_p12, %p4465_p8  ;;  %p147_p5 = scmp.ne.s32.totalorder %s2888_s25, %s4464_s2 }
  0xbe   : > { %s130_s28 = ssub.s32 %s4550_s20, %s4552_s3  ;;  %p4466_p11 = scmp.eq.s32.totalorder %s3079_s14, 0 }
  0xbf   : > { %s131_s16 = sor.u32 %s130_s28, %s3137_s9  ;;  %s2261_s17 = smul.u32 88, %s352_s6 }
  0xc0   : > { %p3310_p0 = por %p147_p5, %p4466_p11  ;;  %p132_p13 = scmp.eq.s32.totalorder %s131_s16, 0 }
  0xc1   : > { %s2262_s22 = smul.u32 22, %s4550_s20  ;;  %p4468_p3 = scmp.lt.s32.totalorder %s2936_s13, 20 }
  0xc2   : > { %s4467_s23 = scalar_select %p3310_p0, 1, 0 }
  0xc3   : > { %p3316_p4 = pnand %p4468_p3, %p143_p6  ;;  %s365_s15 = sadd.s32 %s2262_s22, %s3156_s21 }
  0xc4   : > { %s3321_s24 = scalar_select %p132_p13, %s2892_s26, %s134_s5  }
  0xc5   : > { %s2140_s2 = sshll.u32 %s365_s15, 6  ;;  %s354_s3 = scalar_lea.vmem [#allocation7], %s2261_s17 }
  0xc6   : > { %s368_s28 = sshll.u32 %s354_s3, 4  ;;  %s4470_s4 = sld [smem:[#allocation37_spill]]  ;;  %s3329_s28 = int_to_ptr.vmem [resolvable:$true] %s368_s28 }
  0xc7   : > { %p2692_p10 = pneg %p3316_p4 }
  0xcc   : > { %s3327_s30 = scalar_lea.hbm %s4470_s4, %s2140_s2  ;;  %s2695_s0 = scalar_lea.hbm %s4470_s4, 28160 }
  0xcd   : > { %s2690_s20 = scalar_lea.hbm %s3327_s30, 1408  ;;  %p2696_p12 = scmp.lt.u32.totalorder %s3327_s30, %s4470_s4 }
  0xce   : > { %p2691_p1 = scmp.ne.s32.totalorder %s3327_s30, %s2690_s20  ;;  %p2697_p8 = scmp.lt.u32.totalorder %s2695_s0, %s2690_s20 }
  0xcf   : > { %p2699_p5 = scmp.lt.u32.totalorder %s2690_s20, %s3327_s30 }
  0xd0   : > { %p2693_p2 = pnand %p2692_p10, %p2691_p1  ;;  %p2698_p6 = por %p2697_p8, %p2696_p12 }
  0xd2   : > { %p2694_p7 = pneg %p2693_p2  ;;  %p2700_p11 = por %p2699_p5, %p2698_p6 }
  0xd4   : > { %p2701_p13 = pnand %p2700_p11, %p2694_p7 }
  0xd6   : > { %2704 = shalt.err (!%p2701_p13)
}
  0xd7   : > { %s2705_s17 = scalar_lea.vmem %s3329_s28, 1408  ;;  %s2948_s22 = smov [#allocation7]  }
  0xd8   : > { %p2706_p3 = scmp.ne.s32.totalorder %s3329_s28, %s2705_s17  ;;  %s2710_s15 = sshll.u32 %s2948_s22, 4  ;;  %s2711_s15 = int_to_ptr.vmem [resolvable:$false] %s2710_s15 }
  0xd9   : > { %s2712_s2 = scalar_lea.vmem %s2711_s15, 2816  ;;  %p2713_p0 = scmp.lt.s32.totalorder %s3329_s28, %s2711_s15 }
  0xda   : > { %p2708_p1 = pnand %p2706_p3, %p2692_p10  ;;  %p2714_p12 = scmp.lt.s32.totalorder %s2712_s2, %s2705_s17 }
  0xdc   : > { %p2709_p2 = pneg %p2708_p1  ;;  %p2715_p8 = por %p2714_p12, %p2713_p0 }
  0xde   : > { %p2716_p6 = pnand %p2715_p8, %p2709_p2 }
  0xe0   : > { %2719 = shalt.err (!%p2716_p6)
}
  0xe1   : > { %s4471_s3 = sld [smem:[#allocation22_spill]]  ;;  %s4472_s20 = sld [smem:[#allocation21_spill]] }
  0xe2   : > { %s4473_s5 = sld [smem:[#allocation20_spill]]  ;;  %s2088_s12 = sadd.s32 4294967294, %s2936_s13  }
  0xe3   : > { %2307 = dma.hbm_to_vmem [thread:$0]  (!%p3316_p4), %s3327_s30, 1408, %s3329_s28, %s3179_s29, %s4463_s27, %s4463_s27, %s4462_s10  }
  0xe4   : > { %s200_s6 = ssub.s32 %s2928_s11, %s3126_s19  ;;  %p4474_p5 = scmp.eq.s32.totalorder %s2936_s13, 0 }
  0xe5   : > { %s201_s1 = sor.u32 %s200_s6, %s3137_s9  ;;  %p243_p13 = scmp.eq.s32.totalorder %s3079_s14, 19 }
  0xe6   : > { %p202_p10 = scmp.eq.s32.totalorder %s201_s1, 0  ;;  %p4475_p3 = scmp.eq.s32.totalorder %s3079_s14, 0 }
  0xe7   : > { %s204_s0 = sadd.s32 1, %s4471_s3  ;;  %p211_p0 = scmp.ne.s32.totalorder %s4471_s3, %s4472_s20 }
  0xe8   : > { %p217_p7 = scmp.ne.s32.totalorder %s4472_s20, %s4473_s5  ;;  %p249_p2 = scmp.eq.s32.totalorder %s2088_s12, 19 }
  0xe9   : > { %p213_p11 = por %p211_p0, %p4474_p5  ;;  %p3381_p4 = por %p243_p13, %p211_p0 }
  0xea   : > { %s3373_s16 = scalar_select %p202_p10, %s4471_s3, %s204_s0  }
  0xeb   : > { %p3377_p1 = por %p217_p7, %p4475_p3  ;;  %s378_s30 = sand.u32 1, %s4471_s3  }
  0xec   : > { %s4477_s29 = scalar_select %p3381_p4, 1, 0 }
  0xed   : > { %s4476_s17 = scalar_select %p3377_p1, 1, 0 }
  0xee   : > { %s2264_s9 = smul.u32 88, %s378_s30  ;;  %p3386_p12 = por %p249_p2, %p217_p7 }
  0xef   : > { %s2265_s22 = smul.u32 22, %s2928_s11  ;;  %p4479_p8 = scmp.lt.s32.totalorder %s2936_s13, 20 }
  0xf0   : > { %s4478_s28 = scalar_select %p3386_p12, 1, 0 }
  0xf1   : > { %p3393_p6 = pnand %p4479_p8, %p213_p11  ;;  %s388_s2 = sadd.s32 %s2265_s22, %s3156_s21 }
  0xf2   : > { %s382_s20 = scalar_lea.vmem [#allocation11], %s2264_s9  ;;  %s2141_s6 = sshll.u32 %s388_s2, 6 }
  0xf3   : > { %s391_s5 = sshll.u32 %s382_s20, 4  ;;  %s4481_s0 = sld [smem:[#allocation40_spill]]  ;;  %s3398_s5 = int_to_ptr.vmem [resolvable:$true] %s391_s5 }
  0xf4   : > { %s3405_s4 = scalar_lea.sflag [#allocation12], %s378_s30  ;;  %p2722_p10 = pneg %p3393_p6 }
  0xf9   : > { %s3403_s1 = scalar_lea.hbm %s4481_s0, %s2141_s6  ;;  %s2725_s22 = scalar_lea.hbm %s4481_s0, 28160 }
  0xfa   : > { %s2720_s19 = scalar_lea.hbm %s3403_s1, 1408  ;;  %p2726_p11 = scmp.lt.u32.totalorder %s3403_s1, %s4481_s0 }
  0xfb   : > { %p2721_p0 = scmp.ne.s32.totalorder %s3403_s1, %s2720_s19  ;;  %p2727_p13 = scmp.lt.u32.totalorder %s2725_s22, %s2720_s19 }
  0xfc   : > { %p2729_p2 = scmp.lt.u32.totalorder %s2720_s19, %s3403_s1 }
  0xfd   : > { %p2723_p7 = pnand %p2722_p10, %p2721_p0  ;;  %p2728_p3 = por %p2727_p13, %p2726_p11 }
  0xff   : > { %p2724_p5 = pneg %p2723_p7  ;;  %p2730_p8 = por %p2729_p2, %p2728_p3 }
 0x101   : > { %p2731_p12 = pnand %p2730_p8, %p2724_p5 }
 0x103   : > { %2734 = shalt.err (!%p2731_p12)
}
 0x104   : > { %s2735_s30 = scalar_lea.vmem %s3398_s5, 1408  ;;  %s2949_s6 = smov [#allocation11]  }
 0x105   : > { %p2736_p0 = scmp.ne.s32.totalorder %s3398_s5, %s2735_s30  ;;  %s2740_s3 = sshll.u32 %s2949_s6, 4  ;;  %s2741_s3 = int_to_ptr.vmem [resolvable:$false] %s2740_s3 }
 0x106   : > { %s2742_s12 = scalar_lea.vmem %s2741_s3, 2816  ;;  %p2743_p1 = scmp.lt.s32.totalorder %s3398_s5, %s2741_s3 }
 0x107   : > { %p2738_p7 = pnand %p2736_p0, %p2722_p10  ;;  %p2744_p11 = scmp.lt.s32.totalorder %s2742_s12, %s2735_s30 }
 0x109   : > { %p2739_p4 = pneg %p2738_p7  ;;  %p2745_p13 = por %p2744_p11, %p2743_p1 }
 0x10b   : > { %p2746_p3 = pnand %p2745_p13, %p2739_p4 }
 0x10d   : > { %2749 = shalt.err (!%p2746_p3)
}
 0x10e   : > { %2310 = dma.hbm_to_vmem [thread:$0]  (!%p3393_p6), %s3403_s1, 1408, %s3398_s5, %s3405_s4, %s4463_s27, %s4463_s27, %s4462_s10  }
 0x10f   : > { %s4482_s19 = sld [smem:[#allocation29_spill]] }
 0x115   : > { %p4483_p12 = scmp.ne.s32.totalorder %s4482_s19, 0 }
 0x116   : > { %s405_s21 = sand.u32 (!%p4483_p12), 1, %s2912_s7  }
 0x117   : > { %403 = sbr.rel (%p4483_p12) target bundleno = 1192 (0x4a8), region = 44  ;;  %s406_s22 = scalar_lea.sflag (!%p4483_p12), [#allocation3], %s405_s21 }
 0x118   : > { %s2267_s9 = smul.u32 (!%p4483_p12), 88, %s405_s21 }
 0x11a   : > { %s3439_s2 = scalar_lea.vmem (!%p4483_p12), [#allocation2], %s2267_s9 }
 0x11e   : > { %2847 = dma.done.wait (%p3242_p9), %s406_s22, 1408  }
 0x11f   : > { %2849 = vsyncadd (%p3242_p9), %s406_s22, 4294965888  ;;  %s4484_s15 = sld [smem:[#allocation24_spill]]  ;;  %s4485_s20 = sld [smem:[#allocation32_spill]] }
 0x120   : > { %s414_s30 = sand.u32 1, %s3079_s14  }
 0x121   : > { %s415_s27 = scalar_lea.sflag [#allocation6], %s414_s30 }
 0x125   : > { %s416_s4 = sand.u32 1, %s4484_s15   ;;  %p4486_p1 = scmp.ne.s32.totalorder %s4485_s20, 0 }
 0x126   : > { %s2268_s10 = smul.u32 88, %s416_s4 }
 0x128   : > { %s3447_s5 = scalar_lea.vmem [#allocation5], %s2268_s10 }
 0x129   : > { %2851 = dma.done.wait (%p4486_p1), %s415_s27, 1408  }
 0x12a   : > { %2853 = vsyncadd (%p4486_p1), %s415_s27, 4294965888  ;;  %s425_s1 = sand.u32 1, %s2888_s25   ;;  %p4487_p9 = scmp.ne.s32.totalorder %s4467_s23, 0 }
 0x12b   : > { %s2269_s6 = smul.u32 88, %s425_s1 }
 0x12d   : > { %s3454_s18 = scalar_lea.vmem [#allocation7], %s2269_s6 }
 0x12e   : > { %2855 = dma.done.wait (%p4487_p9), %s415_s27, 1408  }
 0x12f   : > { %2857 = vsyncadd (%p4487_p9), %s415_s27, 4294965888  ;;  %p4488_p4 = scmp.eq.s32.totalorder %s3079_s14, 0 }
 0x131   : > { %2859 = dma.done.wait (%p4488_p4), [#allocation9], 768   ;;  %p4489_p6 = pmov %p4488_p4 }
 0x132   : > { %s4490_s3 = sld [smem:[#allocation21_spill]]  ;;  %p4491_p10 = scmp.ne.s32.totalorder %s4476_s17, 0 }
 0x133   : > { %2861 = vsyncadd (%p4489_p6), [#allocation9], 4294966528 }
 0x138   : > { %s3465_s12 = sand.u32 1, %s4490_s3  }
 0x139   : > { %s2270_s19 = smul.u32 88, %s3465_s12  ;;  %s441_s21 = scalar_lea.sflag [#allocation12], %s3465_s12 }
 0x13b   : > { %s3469_s9 = scalar_lea.vmem [#allocation11], %s2270_s19 }
 0x13c   : > { %2863 = dma.done.wait (%p4491_p10), %s441_s21, 1408  }
 0x13d   : > { %2865 = vsyncadd (%p4491_p10), %s441_s21, 4294965888  ;;  %s4492_s23 = sld [smem:[#allocation26_spill]]  ;;  %s3481_s22 = scalar_lea.vmem [#allocation13], %s2270_s19 }
 0x143   : > { %p503_p5 = scmp.ge.s32.totalorder %s4492_s23, 1  ;;  %p504_p2 = scmp.lt.s32.totalorder %s4492_s23, 9 }
 0x145   : > { %p3477_p8 = pnand %p504_p2, %p503_p5 }
 0x146   : > { %v3486_v0 = vld [vmem:[%s3439_s2 + $0xc] ss:$44 sps:$4 sm:$0xff] (!%p3477_p8)   ;;  %v3489_v1 = vld [vmem:[%s3439_s2 + $0x4] ss:$44 sps:$4 sm:$0xff] (!%p3477_p8)   ;;  %s2950_s17 = smov (!%p3477_p8), 127   ;;  %s2951_s15 = smov (!%p3477_p8), 126  }
 0x147   : > { %508 = sbr.rel (%p3477_p8) target bundleno = 1157 (0x485), region = 72  ;;  %596 = vrot.lane.b32.xlu1 (!%p3477_p8), %v3486_v0, %s2950_s17  ;;  %v3494_v2 = vld [vmem:[%s3439_s2 + $0x10] ss:$44 sps:$4 sm:$0xff] (!%p3477_p8)   ;;  %1205 = vmatprep.subr.bf16.mxu1 (!%p3477_p8), %v3486_v0  ;;  %v3500_v3 = vld [vmem:[%s3439_s2 + $0x8] ss:$44 sps:$4 sm:$0xff] (!%p3477_p8)   ;;  %s2952_s20 = smov (!%p3477_p8), 1  }
 0x148   : > { %592 = vrot.lane.b32.xlu0 (!%p3477_p8), %v3489_v1, %s2950_s17  ;;  %v2526_v4 = vld [vmem:[%s3439_s2] ss:$44 sps:$4 sm:$0xff] (!%p3477_p8)   ;;  %1119 = vmatprep.subr.bf16.mxu0 (!%p3477_p8), %v3489_v1  ;;  %v3520_v6 = vld [vmem:[%s3447_s5 + $0xc] ss:$44 sps:$4 sm:$0xff] (!%p3477_p8)   ;;  %v3533_v8 = vld [vmem:[%s3447_s5 + $0x14] ss:$44 sps:$4 sm:$0xff] (!%p3477_p8)  }
 0x149   : > { %1206 = vmatpush1.bf16.msra.mxu1 (!%p3477_p8), %v3500_v3  ;;  %1120 = vmatpush1.bf16.msra.mxu0 (!%p3477_p8), %v2526_v4  ;;  %v3517_v5 = vld [vmem:[%s3447_s5 + $0x10] ss:$44 sps:$4 sm:$0xff] (!%p3477_p8)   ;;  %v3528_v7 = vld [vmem:[%s3447_s5 + $0x18] ss:$44 sps:$4 sm:$0xff] (!%p3477_p8)   ;;  %v3538_v9 = vld [vmem:[%s3447_s5 + $0x8] ss:$44 sps:$4 sm:$0xff] (!%p3477_p8)  }
 0x14a   : > { %v3543_v10 = vld [vmem:[%s3447_s5 + $0x1c] ss:$44 sps:$4 sm:$0xff] (!%p3477_p8)   ;;  %v2536_v11 = vld [vmem:[%s3454_s18 + $0x4] ss:$44 sps:$4 sm:$0xff] (!%p3477_p8)   ;;  %v2541_v14 = vld [vmem:[%s3454_s18 + $0x8] ss:$44 sps:$4 sm:$0xff] (!%p3477_p8)  }
 0x14b   : > { %598 = vrot.lane.b32.xlu1 (!%p3477_p8), %v3494_v2, %s2950_s17  ;;  %v2538_v12 = vld [vmem:[%s3454_s18] ss:$44 sps:$4 sm:$0xff] (!%p3477_p8)   ;;  %v2543_v16 = vld [vmem:[%s3454_s18 + $0x10] ss:$44 sps:$4 sm:$0xff] (!%p3477_p8)   ;;  %v3574_v18 = vld [vmem:[%s3439_s2 + $0x18] ss:$44 sps:$4 sm:$0xff] (!%p3477_p8)  }
 0x14c   : > { %594 = vrot.lane.b32.xlu0 (!%p3477_p8), %v3500_v3, %s2950_s17  ;;  %v2539_v13 = vld [vmem:[%s3454_s18 + $0xc] ss:$44 sps:$4 sm:$0xff] (!%p3477_p8)   ;;  %v3557_v15 = vld [vmem:[%s3439_s2 + $0x14] ss:$44 sps:$4 sm:$0xff] (!%p3477_p8)   ;;  %v3584_v20 = vld [vmem:[%s3447_s5] ss:$44 sps:$4 sm:$0xff] (!%p3477_p8)  }
 0x14d   : > { %v2545_v17 = vld [vmem:[%s3454_s18 + $0x14] ss:$44 sps:$4 sm:$0xff] (!%p3477_p8)   ;;  %v2548_v19 = vld [vmem:[%s3454_s18 + $0x18] ss:$44 sps:$4 sm:$0xff] (!%p3477_p8)   ;;  %v3601_v22 = vld [vmem:[%s3454_s18 + $0x1c] ss:$44 sps:$4 sm:$0xff] (!%p3477_p8)  }
 0x14e   : > { %v3588_v21 = vld [vmem:[%s3447_s5 + $0x4] ss:$44 sps:$4 sm:$0xff]   ;;  %vm608_vm0 = vcmask 1039360   ;;  %vm643_vm1 = vcmask 1031168   ;;  %vm868_vm2 = vcmask 7168   ;;  %vm1115_vm3 = vcmask 392192  }
 0x14f   : > { %627 = vrot.lane.b32.xlu1 %v3489_v1, %s2951_s15  ;;  %v3609_v23 = vld [vmem:[#allocation8 + $0x4] ss:$16 sps:$4 sm:$0xff]   ;;  %vm1760_vm4 = vcmask 11264   ;;  %vm1857_vm9 = vcmask 1043464   ;;  %vm1858_vm10 = vcmask 1047556   ;;  %vm1833_vm11 = vcmask 1043456  }
 0x150   : > { %590 = vrot.lane.b32.xlu0 %v2526_v4, %s2950_s17  ;;  %1237 = vmatprep.mubr.bf16.mxu1 %v3609_v23  ;;  %vm1859_vm12 = vmor %vm1858_vm10, %vm1857_vm9 }
 0x151   : > { %1151 = vmatprep.mubr.bf16.mxu0 %v3609_v23 }
 0x153   : > { %631 = vrot.lane.b32.xlu1 %v3486_v0, %s2951_s15 }
 0x154   : > { %629 = vrot.lane.b32.xlu0 %v3500_v3, %s2951_s15 }
 0x157   : > { %625 = vrot.lane.b32.xlu1 %v2526_v4, %s2951_s15 }
 0x158   : > { %633 = vrot.lane.b32.xlu0 %v3494_v2, %s2951_s15 }
 0x15b   : > { %739 = vrot.lane.b32.xlu1 %v3517_v5, %s2950_s17 }
 0x15c   : > { %737 = vrot.lane.b32.xlu0 %v3520_v6, %s2950_s17 }
 0x15f   : > { %743 = vrot.lane.b32.xlu1 %v3528_v7, %s2950_s17 }
 0x160   : > { %741 = vrot.lane.b32.xlu0 %v3533_v8, %s2950_s17 }
 0x163   : > { %735 = vrot.lane.b32.xlu1 %v3538_v9, %s2950_s17 }
 0x164   : > { %745 = vrot.lane.b32.xlu0 %v3543_v10, %s2950_s17 }
 0x167   : > { %854 = vrot.lane.b32.xlu1 %v2536_v11, %s2952_s20 }
 0x168   : > { %852 = vrot.lane.b32.xlu0 %v2538_v12, %s2952_s20 }
 0x16b   : > { %858 = vrot.lane.b32.xlu1 %v2539_v13, %s2952_s20 }
 0x16c   : > { %856 = vrot.lane.b32.xlu0 %v2541_v14, %s2952_s20 }
 0x16f   : > { %600 = vrot.lane.b32.xlu1 %v3557_v15, %s2950_s17 }
 0x170   : > { %860 = vrot.lane.b32.xlu0 %v2543_v16, %s2952_s20 }
 0x173   : > { %883 = vrot.lane.b32.xlu1 %v2536_v11, %s2950_s17 }
 0x174   : > { %635 = vrot.lane.b32.xlu0 %v3557_v15, %s2951_s15 }
 0x177   : > { %887 = vrot.lane.b32.xlu1 %v2539_v13, %s2950_s17 }
 0x178   : > { %885 = vrot.lane.b32.xlu0 %v2541_v14, %s2950_s17 }
 0x17b   : > { %891 = vrot.lane.b32.xlu1 %v2545_v17, %s2950_s17 }
 0x17c   : > { %889 = vrot.lane.b32.xlu0 %v2543_v16, %s2950_s17 }
 0x17f   : > { %862 = vrot.lane.b32.xlu1 %v2545_v17, %s2952_s20 }
 0x180   : > { %881 = vrot.lane.b32.xlu0 %v2538_v12, %s2950_s17 }
 0x183   : > { %637 = vrot.lane.b32.xlu1 %v3574_v18, %s2951_s15 }
 0x184   : > { %602 = vrot.lane.b32.xlu0 %v3574_v18, %s2950_s17 }
 0x187   : > { %864 = vrot.lane.b32.xlu1 %v2548_v19, %s2952_s20 }
 0x188   : > { %893 = vrot.lane.b32.xlu0 %v2548_v19, %s2950_s17 }
 0x18b   : > { %731 = vrot.lane.b32.xlu1 %v3584_v20, %s2950_s17 }
 0x18c   : > { %733 = vrot.lane.b32.xlu0 %v3588_v21, %s2950_s17 }
 0x18f   : > { %769 = vrot.lane.b32.xlu1 %v3538_v9, %s2951_s15 }
 0x190   : > { %767 = vrot.lane.b32.xlu0 %v3588_v21, %s2951_s15 }
 0x193   : > { %773 = vrot.lane.b32.xlu1 %v3517_v5, %s2951_s15 }
 0x194   : > { %771 = vrot.lane.b32.xlu0 %v3520_v6, %s2951_s15 }
 0x197   : > { %895 = vrot.lane.b32.xlu1 %v3601_v22, %s2950_s17 }
 0x198   : > { %765 = vrot.lane.b32.xlu0 %v3584_v20, %s2951_s15 }
 0x19c   : > { %775 = vrot.lane.b32.xlu0 %v3533_v8, %s2951_s15 }
 0x1b9   : > { %v597_v24 = vpop.permute.xlu1 %596 }
 0x1ba   : > { %v593_v25 = vpop.permute.xlu0 %592 }
 0x1bd   : > { %v3615_v26 = vpop.permute.xlu1 %598 }
 0x1be   : > { %v595_v27 = vpop.permute.xlu0 %594  ;;  %v3619_v28 = vsel %vm608_vm0, %v597_v24, %v3615_v26 }
 0x1bf   : > { %1207 = vmatprep.subr.bf16.mxu1 %v3619_v28  ;;  %v611_v29 = vsel %vm608_vm0, %v595_v27, %v597_v24  ;;  %v610_v30 = vsel %vm608_vm0, %v593_v25, %v595_v27 }
 0x1c0   : > { %1208 = vmatpush1.bf16.msra.mxu1 %v611_v29  ;;  %1121 = vmatprep.subr.bf16.mxu0 %v610_v30 }
 0x1c1   : > { %v628_v31 = vpop.permute.xlu1 %627 }
 0x1c2   : > { %v591_v32 = vpop.permute.xlu0 %590 }
 0x1c3   : > { %v609_v33 = vsel %vm608_vm0, %v591_v32, %v593_v25 }
 0x1c4   : > { %1122 = vmatpush1.bf16.msra.mxu0 %v609_v33 }
 0x1c5   : > { %v632_v34 = vpop.permute.xlu1 %631 }
 0x1c6   : > { %v630_v35 = vpop.permute.xlu0 %629 }
 0x1c7   : > { %v645_v36 = vsel %vm643_vm1, %v628_v31, %v630_v35  ;;  %v646_v41 = vsel %vm643_vm1, %v630_v35, %v632_v34 }
 0x1c8   : > { %1123 = vmatprep.subr.bf16.mxu0 %v645_v36 }
 0x1c9   : > { %v626_v37 = vpop.permute.xlu1 %625 }
 0x1ca   : > { %v634_v38 = vpop.permute.xlu0 %633  ;;  %v644_v39 = vsel %vm643_vm1, %v626_v37, %v628_v31 }
 0x1cb   : > { %1124 = vmatpush1.bf16.msra.mxu0 %v644_v39  ;;  %v647_v40 = vsel %vm643_vm1, %v632_v34, %v634_v38  ;;  %v3755_v39 = vld [vmem:[%s3439_s2 + $0x1c] ss:$44 sps:$4 sm:$0xff]  }
 0x1cc   : > { %1209 = vmatprep.subr.bf16.mxu1 %v647_v40  ;;  %1125 = vmatprep.subr.bf16.mxu0 %v3500_v3 }
 0x1cd   : > { %1210 = vmatpush1.bf16.msra.mxu1 %v646_v41  ;;  %v740_v42 = vpop.permute.xlu1 %739 }
 0x1ce   : > { %v738_v43 = vpop.permute.xlu0 %737  ;;  %1211 = vmatprep.subr.bf16.mxu1 %v3494_v2 }
 0x1cf   : > { %v3632_v44 = vsel %vm608_vm0, %v738_v43, %v740_v42  ;;  %1126 = vmatpush1.bf16.msra.mxu0 %v3489_v1 }
 0x1d0   : > { %929 = vrot.lane.b32.xlu1 %v3632_v44, %s2950_s17  ;;  %1127 = vmatprep.subr.bf16.mxu0 %v611_v29 }
 0x1d1   : > { %v744_v45 = vpop.permute.xlu1 %743  ;;  %1212 = vmatpush1.bf16.msra.mxu1 %v3486_v0 }
 0x1d2   : > { %v742_v46 = vpop.permute.xlu0 %741 }
 0x1d3   : > { %v3639_v47 = vsel %vm608_vm0, %v742_v46, %v744_v45  ;;  %1128 = vmatpush1.bf16.msra.mxu0 %v610_v30  ;;  %v3660_v55 = vsel %vm608_vm0, %v740_v42, %v742_v46 }
 0x1d4   : > { %933 = vrot.lane.b32.xlu1 %v3639_v47, %s2950_s17  ;;  %1129 = vmatprep.subr.bf16.mxu0 %v646_v41 }
 0x1d5   : > { %v3643_v48 = vpop.permute.xlu1 %735 }
 0x1d6   : > { %v3645_v49 = vpop.permute.xlu0 %745  ;;  %v3649_v50 = vsel %vm608_vm0, %v3643_v48, %v738_v43 }
 0x1d7   : > { %1130 = vmatpush1.bf16.msra.mxu0 %v645_v36  ;;  %v3669_v59 = vsel %vm608_vm0, %v744_v45, %v3645_v49 }
 0x1d8   : > { %927 = vrot.lane.b32.xlu1 %v3649_v50, %s2950_s17  ;;  %1131 = vmatprep.subr.bf16.mxu0 %v3486_v0 }
 0x1d9   : > { %v855_v51 = vpop.permute.xlu1 %854 }
 0x1da   : > { %v853_v52 = vpop.permute.xlu0 %852 }
 0x1db   : > { %945 = vrot.lane.b32.xlu0 %v853_v52, %s2950_s17  ;;  %1132 = vmatpush1.bf16.msra.mxu0 %v3500_v3  ;;  %v869_v0 = vsel %vm868_vm2, %v853_v52, %v855_v51 }
 0x1dc   : > { %1133 = vmatprep.subr.bf16.mxu0 %v3619_v28 }
 0x1dd   : > { %v859_v53 = vpop.permute.xlu1 %858 }
 0x1de   : > { %v3657_v54 = vpop.permute.xlu0 %856 }
 0x1df   : > { %931 = vrot.lane.b32.xlu0 %v3660_v55, %s2950_s17  ;;  %v870_v56 = vsel %vm868_vm2, %v855_v51, %v3657_v54  ;;  %1134 = vmatpush1.bf16.msra.mxu0 %v611_v29  ;;  %v871_v11 = vsel %vm868_vm2, %v3657_v54, %v859_v53 }
 0x1e0   : > { %949 = vrot.lane.b32.xlu1 %v870_v56, %s2950_s17  ;;  %1135 = vmatprep.subr.bf16.mxu0 %v647_v40 }
 0x1e1   : > { %v601_v57 = vpop.permute.xlu1 %600 }
 0x1e2   : > { %v861_v58 = vpop.permute.xlu0 %860  ;;  %v3673_v60 = vsel %vm608_vm0, %v3615_v26, %v601_v57 }
 0x1e3   : > { %935 = vrot.lane.b32.xlu0 %v3669_v59, %s2950_s17  ;;  %1213 = vmatprep.subr.bf16.mxu1 %v3673_v60  ;;  %v872_v61 = vsel %vm868_vm2, %v859_v53, %v861_v58 }
 0x1e4   : > { %953 = vrot.lane.b32.xlu1 %v872_v61, %s2950_s17  ;;  %1136 = vmatpush1.bf16.msra.mxu0 %v646_v41 }
 0x1e5   : > { %1214 = vmatpush1.bf16.msra.mxu1 %v3619_v28  ;;  %v884_v62 = vpop.permute.xlu1 %883  ;;  %1137 = vmatprep.subr.bf16.mxu0 %v3588_v21 }
 0x1e6   : > { %v636_v63 = vpop.permute.xlu0 %635 }
 0x1e7   : > { %947 = vrot.lane.b32.xlu0 %v869_v0, %s2950_s17  ;;  %v3685_v1 = vsel %vm643_vm1, %v634_v38, %v636_v63  ;;  %v3808_v0 = vld [vmem:[%s3447_s5 + $0x24] ss:$44 sps:$4 sm:$0xff]  }
 0x1e8   : > { %1215 = vmatprep.subr.bf16.mxu1 %v3685_v1  ;;  %1138 = vmatpush1.bf16.msra.mxu0 %v3584_v20 }
 0x1e9   : > { %1216 = vmatpush1.bf16.msra.mxu1 %v647_v40  ;;  %v888_v3 = vpop.permute.xlu1 %887 }
 0x1ea   : > { %v886_v4 = vpop.permute.xlu0 %885  ;;  %1217 = vmatprep.subr.bf16.mxu1 %v3557_v15 }
 0x1eb   : > { %951 = vrot.lane.b32.xlu0 %v871_v11, %s2950_s17  ;;  %v3694_v12 = vsel %vm608_vm0, %v884_v62, %v886_v4  ;;  %v3700_v14 = vsel %vm608_vm0, %v886_v4, %v888_v3  ;;  %v3820_v4 = vld [vmem:[#allocation8] ss:$16 sps:$4 sm:$0xff]   ;;  %v3823_v11 = vld [vmem:[#allocation8 + $0xc] ss:$16 sps:$4 sm:$0xff]  }
 0x1ec   : > { %965 = vrot.lane.b32.xlu1 %v3694_v12, %s2950_s17 }
 0x1ed   : > { %v892_v13 = vpop.permute.xlu1 %891  ;;  %1218 = vmatpush1.bf16.msra.mxu1 %v3494_v2 }
 0x1ee   : > { %v890_v16 = vpop.permute.xlu0 %889 }
 0x1ef   : > { %v3703_v17 = vsel %vm608_vm0, %v888_v3, %v890_v16  ;;  %967 = vrot.lane.b32.xlu0 %v3700_v14, %s2950_s17  ;;  %v3710_v20 = vsel %vm608_vm0, %v890_v16, %v892_v13  ;;  %v2566_v3 = vld [vmem:[%s3439_s2 + $0x28] ss:$44 sps:$4 sm:$0xff]  }
 0x1f0   : > { %969 = vrot.lane.b32.xlu1 %v3703_v17, %s2950_s17 }
 0x1f1   : > { %v863_v19 = vpop.permute.xlu1 %862 }
 0x1f2   : > { %v882_v24 = vpop.permute.xlu0 %881  ;;  %v873_v28 = vsel %vm868_vm2, %v861_v58, %v863_v19  ;;  %v2559_v58 = vld [vmem:[%s3447_s5 + $0x28] ss:$44 sps:$4 sm:$0xff]  }
 0x1f3   : > { %971 = vrot.lane.b32.xlu0 %v3710_v20, %s2950_s17  ;;  %v3715_v25 = vsel %vm608_vm0, %v882_v24, %v884_v62  ;;  %v3796_v62 = vld [vmem:[%s3439_s2 + $0x24] ss:$44 sps:$4 sm:$0xff]  }
 0x1f4   : > { %963 = vrot.lane.b32.xlu1 %v3715_v25, %s2950_s17 }
 0x1f5   : > { %v3719_v26 = vpop.permute.xlu1 %637 }
 0x1f6   : > { %v3721_v27 = vpop.permute.xlu0 %602  ;;  %v3736_v31 = vsel %vm643_vm1, %v636_v63, %v3719_v26 }
 0x1f7   : > { %955 = vrot.lane.b32.xlu0 %v873_v28, %s2950_s17  ;;  %v3727_v29 = vsel %vm608_vm0, %v601_v57, %v3721_v27  ;;  %v3781_v57 = vld [vmem:[%s3439_s2 + $0x20] ss:$44 sps:$4 sm:$0xff]  }
 0x1f8   : > { %981 = vrot.lane.b32.xlu1 %v855_v51, %s2950_s17  ;;  %1219 = vmatprep.subr.bf16.mxu1 %v3727_v29  ;;  %v3768_v51 = vld [vmem:[%s3447_s5 + $0x20] ss:$44 sps:$4 sm:$0xff]  }
 0x1f9   : > { %1220 = vmatpush1.bf16.msra.mxu1 %v3673_v60  ;;  %v3732_v30 = vpop.permute.xlu1 %864 }
 0x1fa   : > { %1221 = vmatprep.subr.bf16.mxu1 %v3736_v31  ;;  %v894_v32 = vpop.permute.xlu0 %893  ;;  %v874_v33 = vsel %vm868_vm2, %v863_v19, %v3732_v30 }
 0x1fb   : > { %v3742_v34 = vsel %vm608_vm0, %v892_v13, %v894_v32  ;;  %v2568_v13 = vld [vmem:[%s3454_s18 + $0x24] ss:$44 sps:$4 sm:$0xff]  }
 0x1fc   : > { %957 = vrot.lane.b32.xlu1 %v874_v33, %s2950_s17  ;;  %973 = vrot.lane.b32.xlu0 %v3742_v34, %s2950_s17 }
 0x1fd   : > { %1222 = vmatpush1.bf16.msra.mxu1 %v3685_v1  ;;  %v732_v35 = vpop.permute.xlu1 %731 }
 0x1fe   : > { %v734_v36 = vpop.permute.xlu0 %733  ;;  %1223 = vmatprep.subr.bf16.mxu1 %v3520_v6 }
 0x1ff   : > { %v750_v37 = vsel %vm608_vm0, %v734_v36, %v3643_v48  ;;  %v749_v38 = vsel %vm608_vm0, %v732_v35, %v734_v36 }
 0x200   : > { %991 = vrot.lane.b32.xlu0 %v3657_v54, %s2950_s17  ;;  %1139 = vmatprep.subr.bf16.mxu0 %v750_v37 }
 0x201   : > { %1140 = vmatpush1.bf16.msra.mxu0 %v749_v38  ;;  %1224 = vmatpush1.bf16.msra.mxu1 %v3538_v9  ;;  %v770_v40 = vpop.permute.xlu1 %769 }
 0x202   : > { %1225 = vmatprep.subr.bf16.mxu1 %v3632_v44  ;;  %v768_v41 = vpop.permute.xlu0 %767 }
 0x203   : > { %v784_v42 = vsel %vm643_vm1, %v768_v41, %v770_v40 }
 0x204   : > { %604 = vrot.lane.b32.xlu0 %v3755_v39, %s2950_s17  ;;  %1141 = vmatprep.subr.bf16.mxu0 %v784_v42 }
 0x205   : > { %1226 = vmatpush1.bf16.msra.mxu1 %v3649_v50  ;;  %v774_v43 = vpop.permute.xlu1 %773 }
 0x206   : > { %v772_v45 = vpop.permute.xlu0 %771 }
 0x207   : > { %v786_v46 = vsel %vm643_vm1, %v772_v45, %v774_v43  ;;  %v785_v48 = vsel %vm643_vm1, %v770_v40, %v772_v45 }
 0x208   : > { %639 = vrot.lane.b32.xlu0 %v3755_v39, %s2951_s15  ;;  %1227 = vmatprep.subr.bf16.mxu1 %v786_v46 }
 0x209   : > { %1228 = vmatpush1.bf16.msra.mxu1 %v785_v48  ;;  %v3770_v52 = vpop.permute.xlu1 %895 }
 0x20a   : > { %v3774_v53 = vsel %vm608_vm0, %v894_v32, %v3770_v52  ;;  %v766_v54 = vpop.permute.xlu0 %765  ;;  %1229 = vmatprep.subr.bf16.mxu1 %v3517_v5 }
 0x20b   : > { %975 = vrot.lane.b32.xlu1 %v3774_v53, %s2950_s17  ;;  %v783_v56 = vsel %vm643_vm1, %v766_v54, %v768_v41 }
 0x20c   : > { %747 = vrot.lane.b32.xlu0 %v3768_v51, %s2950_s17  ;;  %1142 = vmatpush1.bf16.msra.mxu0 %v783_v56 }
 0x20d   : > { %1230 = vmatpush1.bf16.msra.mxu1 %v3520_v6  ;;  %1143 = vmatprep.subr.bf16.mxu0 %v3538_v9 }
 0x20e   : > { %1231 = vmatprep.subr.bf16.mxu1 %v3660_v55  ;;  %v3789_v61 = vpop.permute.xlu0 %775 }
 0x20f   : > { %606 = vrot.lane.b32.xlu1 %v3781_v57, %s2950_s17  ;;  %v3802_v63 = vsel %vm643_vm1, %v774_v43, %v3789_v61 }
 0x210   : > { %817 = vrot.lane.b32.xlu0 %v2559_v58, %s2950_s17  ;;  %1144 = vmatpush1.bf16.msra.mxu0 %v3588_v21  ;;  %v2562_v21 = vld [vmem:[%s3454_s18 + $0x20] ss:$44 sps:$4 sm:$0xff]  }
 0x211   : > { %1145 = vmatprep.subr.bf16.mxu0 %v3649_v50  ;;  %1232 = vmatpush1.bf16.msra.mxu1 %v3632_v44 }
 0x212   : > { %1233 = vmatprep.subr.bf16.mxu1 %v3802_v63 }
 0x213   : > { %641 = vrot.lane.b32.xlu1 %v3781_v57, %s2951_s15 }
 0x214   : > { %664 = vrot.lane.b32.xlu0 %v3796_v62, %s2950_s17  ;;  %1146 = vmatpush1.bf16.msra.mxu0 %v750_v37 }
 0x215   : > { %1147 = vmatprep.subr.bf16.mxu0 %v785_v48  ;;  %1234 = vmatpush1.bf16.msra.mxu1 %v786_v46 }
 0x216   : > { %1235 = vmatprep.subr.bf16.mxu1 %v3533_v8 }
 0x217   : > { %803 = vrot.lane.b32.xlu1 %v3808_v0, %s2950_s17 }
 0x218   : > { %897 = vrot.lane.b32.xlu0 %v2562_v21, %s2950_s17  ;;  %1148 = vmatpush1.bf16.msra.mxu0 %v784_v42 }
 0x219   : > { %1236 = vmatpush1.bf16.msra.mxu1 %v3517_v5  ;;  %1149 = vmatprep.subr.bf16.mxu0 %v3520_v6  ;;  %v2569_v6 = vld [vmem:[%s3454_s18 + $0x28] ss:$44 sps:$4 sm:$0xff]  }
 0x21a   : > { %1248 = vmatprep.subr.bf16.mxu1 %v3639_v47 }
 0x21b   : > { %866 = vrot.lane.b32.xlu1 %v3601_v22, %s2952_s20  ;;  %v2953_v22 = vmov 0  }
 0x21c   : > { %678 = vrot.lane.b32.xlu0 %v2566_v3, %s2950_s17  ;;  %1150 = vmatpush1.bf16.msra.mxu0 %v3538_v9  ;;  %1761 = vst.msk [vmem:[%s3481_s22 + $0x28] sm:$0xf] %vm1760_vm4, %v2953_v22  ;;  %1767 = vst.msk [vmem:[%s3481_s22 + $0x54] sm:$0xf] %vm1760_vm4, %v2953_v22 }
 0x21d   : > { %1162 = vmatprep.subr.bf16.mxu0 %v3632_v44  ;;  %1238 = vmatmul.mubr.bf16.vlgmr.msra.gmra.mrb[0].mxu1 %v3820_v4  ;;  %1755 = vst [vmem:[%s3481_s22] sm:$0xff] %v2953_v22  ;;  %1756 = vst [vmem:[%s3481_s22 + $0x8] sm:$0xff] %v2953_v22 }
 0x21e   : > { %1249 = vmatpush1.bf16.msra.mxu1 %v3660_v55  ;;  %2183 = vmatprep.mubr.msk.bf16.mxu1 %vm1115_vm3, %v3823_v11  ;;  %1757 = vst [vmem:[%s3481_s22 + $0x10] sm:$0xff] %v2953_v22  ;;  %1758 = vst [vmem:[%s3481_s22 + $0x18] sm:$0xff] %v2953_v22 }
 0x21f   : > { %668 = vrot.lane.b32.xlu1 %v3796_v62, %s2951_s15  ;;  %1152 = vmatmul.mubr.bf16.vlgmr.msra.gmra.mrb[0].mxu0 %v3820_v4  ;;  %1759 = vst [vmem:[%s3481_s22 + $0x20] sm:$0xff] %v2953_v22  ;;  %1762 = vst [vmem:[%s3481_s22 + $0x2c] sm:$0xff] %v2953_v22 }
 0x220   : > { %913 = vrot.lane.b32.xlu0 %v2568_v13, %s2950_s17  ;;  %1163 = vmatpush1.bf16.msra.mxu0 %v3649_v50  ;;  %1763 = vst [vmem:[%s3481_s22 + $0x34] sm:$0xff] %v2953_v22  ;;  %1764 = vst [vmem:[%s3481_s22 + $0x3c] sm:$0xff] %v2953_v22 }
 0x221   : > { %2182 = vmatprep.mubr.msk.bf16.mxu0 %vm1115_vm3, %v3823_v11  ;;  %2472 = vset.pattern.permute.xlu1 %v2953_v22  ;;  %1765 = vst [vmem:[%s3481_s22 + $0x44] sm:$0xff] %v2953_v22  ;;  %1766 = vst [vmem:[%s3481_s22 + $0x4c] sm:$0xff] %v2953_v22 }
 0x222   : > { %2473 = vset.pattern.permute.xlu0 %v2953_v22 }
 0x223   : > { %907 = vrot.lane.b32.xlu1 %v2562_v21, %s2952_s20 }
 0x224   : > { %777 = vrot.lane.b32.xlu0 %v3528_v7, %s2951_s15 }
 0x227   : > { %682 = vrot.lane.b32.xlu1 %v2566_v3, %s2951_s15 }
 0x228   : > { %781 = vrot.lane.b32.xlu0 %v3768_v51, %s2951_s15 }
 0x22b   : > { %916 = vrot.lane.b32.xlu1 %v2568_v13, %s2952_s20 }
 0x22c   : > { %807 = vrot.lane.b32.xlu0 %v3808_v0, %s2951_s15 }
 0x22f   : > { %779 = vrot.lane.b32.xlu1 %v3543_v10, %s2951_s15 }
 0x233   : > { %924 = vrot.lane.b32.xlu1 %v2569_v6, %s2950_s17 }
 0x242   : > { %v930_v9 = vpop.permute.xlu1 %929 }
 0x246   : > { %v934_v44 = vpop.permute.xlu1 %933 }
 0x24a   : > { %v928_v16 = vpop.permute.xlu1 %927 }
 0x24b   : > { %v1001_v28 = vsel %vm608_vm0, %v928_v16, %v930_v9 }
 0x24d   : > { %v946_v50 = vpop.permute.xlu0 %945 }
 0x251   : > { %v932_v19 = vpop.permute.xlu0 %931 }
 0x252   : > { %v1002_v24 = vsel %vm608_vm0, %v930_v9, %v932_v19  ;;  %v950_v32 = vpop.permute.xlu1 %949  ;;  %v1003_v36 = vsel %vm608_vm0, %v932_v19, %v934_v44 }
 0x253   : > { %1164 = vmatprep.subr.bf16.mxu0 %v1002_v24 }
 0x254   : > { %1165 = vmatpush1.bf16.msra.mxu0 %v1001_v28 }
 0x255   : > { %v3869_v33 = vpop.permute.xlu0 %935 }
 0x256   : > { %v1004_v35 = vsel %vm608_vm0, %v934_v44, %v3869_v33  ;;  %v954_v38 = vpop.permute.xlu1 %953 }
 0x257   : > { %1250 = vmatprep.subr.bf16.mxu1 %v1004_v35 }
 0x258   : > { %1251 = vmatpush1.bf16.msra.mxu1 %v1003_v36 }
 0x259   : > { %v948_v37 = vpop.permute.xlu0 %947 }
 0x25a   : > { %v1009_v40 = vsel %vm608_vm0, %v946_v50, %v948_v37  ;;  %v1010_v41 = vsel %vm608_vm0, %v948_v37, %v950_v32 }
 0x25b   : > { %1166 = vmatprep.subr.bf16.mxu0 %v1010_v41 }
 0x25c   : > { %1167 = vmatpush1.bf16.msra.mxu0 %v1009_v40 }
 0x25d   : > { %v952_v42 = vpop.permute.xlu0 %951  ;;  %1168 = vmatprep.subr.bf16.mxu0 %v3694_v12 }
 0x25e   : > { %v966_v43 = vpop.permute.xlu1 %965  ;;  %v1012_v45 = vsel %vm608_vm0, %v952_v42, %v954_v38  ;;  %v1011_v46 = vsel %vm608_vm0, %v950_v32, %v952_v42 }
 0x25f   : > { %1252 = vmatprep.subr.bf16.mxu1 %v1012_v45 }
 0x260   : > { %1169 = vmatpush1.bf16.msra.mxu0 %v3715_v25  ;;  %1253 = vmatpush1.bf16.msra.mxu1 %v1011_v46 }
 0x261   : > { %1254 = vmatprep.subr.bf16.mxu1 %v3703_v17  ;;  %v968_v48 = vpop.permute.xlu0 %967 }
 0x262   : > { %v970_v54 = vpop.permute.xlu1 %969  ;;  %v1018_v56 = vsel %vm608_vm0, %v966_v43, %v968_v48 }
 0x263   : > { %1170 = vmatprep.subr.bf16.mxu0 %v1018_v56  ;;  %v1019_v13 = vsel %vm608_vm0, %v968_v48, %v970_v54 }
 0x264   : > { %1255 = vmatpush1.bf16.msra.mxu1 %v3700_v14 }
 0x265   : > { %v972_v58 = vpop.permute.xlu0 %971 }
 0x266   : > { %v964_v21 = vpop.permute.xlu1 %963  ;;  %v1020_v3 = vsel %vm608_vm0, %v970_v54, %v972_v58 }
 0x267   : > { %v1017_v6 = vsel %vm608_vm0, %v964_v21, %v966_v43  ;;  %1256 = vmatprep.subr.bf16.mxu1 %v1020_v3 }
 0x268   : > { %1171 = vmatpush1.bf16.msra.mxu0 %v1017_v6  ;;  %1257 = vmatpush1.bf16.msra.mxu1 %v1019_v13 }
 0x269   : > { %v956_v25 = vpop.permute.xlu0 %955  ;;  %1172 = vmatprep.subr.bf16.mxu0 %v1011_v46 }
 0x26a   : > { %v982_v9 = vpop.permute.xlu1 %981  ;;  %v3887_v22 = vsel %vm608_vm0, %v954_v38, %v956_v25 }
 0x26b   : > { %v1025_v44 = vsel %vm608_vm0, %v982_v9, %v950_v32  ;;  %1258 = vmatprep.subr.bf16.mxu1 %v3887_v22  ;;  %v1465_v9 = vld [vmem:[%s3469_s9 + $0x14] sm:$0xff] }
 0x26c   : > { %1173 = vmatpush1.bf16.msra.mxu0 %v1025_v44  ;;  %1259 = vmatpush1.bf16.msra.mxu1 %v1012_v45 }
 0x26d   : > { %1174 = vmatprep.subr.bf16.mxu0 %v3700_v14  ;;  %1260 = vmatprep.subr.bf16.mxu1 %v3710_v20 }
 0x26e   : > { %v974_v50 = vpop.permute.xlu0 %973  ;;  %v3898_v19 = vpop.permute.xlu1 %957 }
 0x26f   : > { %v3894_v16 = vsel %vm608_vm0, %v972_v58, %v974_v50  ;;  %v3903_v28 = vsel %vm608_vm0, %v956_v25, %v3898_v19 }
 0x270   : > { %1175 = vmatpush1.bf16.msra.mxu0 %v3694_v12  ;;  %1261 = vmatpush1.bf16.msra.mxu1 %v3703_v17 }
 0x271   : > { %1176 = vmatprep.subr.bf16.mxu0 %v1019_v13  ;;  %1262 = vmatprep.subr.bf16.mxu1 %v3894_v16 }
 0x272   : > { %v992_v24 = vpop.permute.xlu0 %991 }
 0x273   : > { %v1030_v12 = vsel %vm608_vm0, %v992_v24, %v952_v42 }
 0x274   : > { %1177 = vmatpush1.bf16.msra.mxu0 %v1018_v56  ;;  %1263 = vmatpush1.bf16.msra.mxu1 %v1020_v3 }
 0x275   : > { %1178 = vmatprep.subr.bf16.mxu0 %v1012_v45  ;;  %1264 = vmatprep.subr.bf16.mxu1 %v3903_v28 }
 0x276   : > { %v605_v32 = vpop.permute.xlu0 %604 }
 0x277   : > { %v615_v45 = vsel %vm608_vm0, %v3721_v27, %v605_v32 }
 0x278   : > { %1179 = vmatpush1.bf16.msra.mxu0 %v1030_v12  ;;  %1265 = vmatpush1.bf16.msra.mxu1 %v3887_v22  ;;  %v1084_v12 = vld [vmem:[#allocation10] sm:$0xff] }
 0x279   : > { %1180 = vmatprep.subr.bf16.mxu0 %v3703_v17  ;;  %1266 = vmatprep.subr.bf16.mxu1 %v3742_v34  ;;  %v3923_v17 = vld [vmem:[#allocation8 + $0x8] ss:$16 sps:$4 sm:$0xff]  }
 0x27a   : > { %v640_v35 = vpop.permute.xlu0 %639 }
 0x27c   : > { %1181 = vmatpush1.bf16.msra.mxu0 %v3700_v14  ;;  %1267 = vmatpush1.bf16.msra.mxu1 %v3710_v20 }
 0x27d   : > { %1182 = vmatprep.subr.bf16.mxu0 %v1020_v3  ;;  %v3912_v36 = vpop.permute.xlu1 %975 }
 0x27e   : > { %v748_v37 = vpop.permute.xlu0 %747  ;;  %v3916_v38 = vsel %vm608_vm0, %v974_v50, %v3912_v36 }
 0x27f   : > { %v3920_v40 = vsel %vm608_vm0, %v3645_v49, %v748_v37  ;;  %1268 = vmatprep.subr.bf16.mxu1 %v3916_v38 }
 0x280   : > { %937 = vrot.lane.b32.xlu1 %v3920_v40, %s2950_s17  ;;  %1183 = vmatpush1.bf16.msra.mxu0 %v1019_v13 }
 0x281   : > { %1269 = vmatpush1.bf16.msra.mxu1 %v3894_v16  ;;  %v607_v14 = vpop.permute.xlu1 %606  ;;  %1291 = vmatprep.subr.bf16.mxu0 %v3557_v15 }
 0x282   : > { %v818_v41 = vpop.permute.xlu0 %817  ;;  %1377 = vmatprep.subr.bf16.mxu1 %v3755_v39  ;;  %v616_v42 = vsel %vm608_vm0, %v605_v32, %v607_v14 }
 0x283   : > { %1195 = vmatmul.mubr.bf16.vlgmr.msra.gmra.mrb[0].mxu0 %v3923_v17 }
 0x284   : > { %1292 = vmatpush1.bf16.msra.mxu0 %v3494_v2  ;;  %1281 = vmatmul.mubr.bf16.vlgmr.msra.gmra.mrb[0].mxu1 %v3923_v17 }
 0x285   : > { %1293 = vmatprep.subr.bf16.mxu0 %v3727_v29  ;;  %1378 = vmatpush1.bf16.msra.mxu1 %v3574_v18  ;;  %v642_v49 = vpop.permute.xlu1 %641 }
 0x286   : > { %1379 = vmatprep.subr.bf16.mxu1 %v616_v42  ;;  %v665_v43 = vpop.permute.xlu0 %664  ;;  %1323 = vmatprep.mubr.bf16.mxu0 %v3609_v23  ;;  %v651_v46 = vsel %vm643_vm1, %v640_v35, %v642_v49 }
 0x287   : > { %1409 = vmatprep.mubr.bf16.mxu1 %v3609_v23  ;;  %v650_v23 = vsel %vm643_vm1, %v3719_v26, %v640_v35  ;;  %v666_v26 = vsel %vm608_vm0, %v607_v14, %v665_v43  ;;  %v1464_v35 = vld [vmem:[%s3469_s9 + $0xc] sm:$0xff]  ;;  %v1478_v14 = vunpack.c.h.bf16 %v1465_v9 }
 0x288   : > { %1294 = vmatpush1.bf16.msra.mxu0 %v3673_v60 }
 0x289   : > { %1295 = vmatprep.subr.bf16.mxu0 %v3736_v31  ;;  %1380 = vmatpush1.bf16.msra.mxu1 %v615_v45  ;;  %v804_v2 = vpop.permute.xlu1 %803 }
 0x28a   : > { %1381 = vmatprep.subr.bf16.mxu1 %v651_v46  ;;  %v3944_v48 = vsel %vm608_vm0, %v748_v37, %v804_v2  ;;  %v3947_v54 = vsel %vm608_vm0, %v804_v2, %v818_v41  ;;  %v898_v56 = vpop.permute.xlu0 %897  ;;  %v1477_v37 = vunpack.c.l.bf16 %v1465_v9  ;;  %v1475_v2 = vunpack.c.l.bf16 %v1464_v35 }
 0x28b   : > { %939 = vrot.lane.b32.xlu0 %v3944_v48, %s2950_s17  ;;  %941 = vrot.lane.b32.xlu1 %v3947_v54, %s2950_s17  ;;  %v3967_v21 = vsel %vm608_vm0, %v3770_v52, %v898_v56 }
 0x28c   : > { %1296 = vmatpush1.bf16.msra.mxu0 %v3685_v1 }
 0x28d   : > { %1382 = vmatpush1.bf16.msra.mxu1 %v650_v23  ;;  %v867_v60 = vpop.permute.xlu1 %866  ;;  %1297 = vmatprep.subr.bf16.mxu0 %v3574_v18 }
 0x28e   : > { %1383 = vmatprep.subr.bf16.mxu1 %v3781_v57  ;;  %v875_v27 = vsel %vm868_vm2, %v3732_v30, %v867_v60  ;;  %v679_v58 = vpop.permute.xlu0 %678 }
 0x28f   : > { %959 = vrot.lane.b32.xlu1 %v875_v27, %s2950_s17  ;;  %943 = vrot.lane.b32.xlu0 %v818_v41, %s2950_s17  ;;  %v680_v6 = vsel %vm608_vm0, %v665_v43, %v679_v58  ;;  %v1468_v43 = vld [vmem:[%s3469_s9 + $0x30] sm:$0xff] }
 0x290   : > { %1298 = vmatpush1.bf16.msra.mxu0 %v3557_v15  ;;  %v1482_v27 = vunpack.c.l.bf16 %v1468_v43 }
 0x291   : > { %1299 = vmatprep.subr.bf16.mxu0 %v615_v45  ;;  %1384 = vmatpush1.bf16.msra.mxu1 %v3755_v39  ;;  %v669_v1 = vpop.permute.xlu1 %668 }
 0x292   : > { %1385 = vmatprep.subr.bf16.mxu1 %v666_v26  ;;  %v670_v30 = vsel %vm643_vm1, %v642_v49, %v669_v1  ;;  %v914_v13 = vpop.permute.xlu0 %913  ;;  %v1085_v49 = vld [vmem:[#allocation10 + $0x8] sm:$0xff] }
 0x293   : > { %961 = vrot.lane.b32.xlu0 %v867_v60, %s2950_s17  ;;  %977 = vrot.lane.b32.xlu1 %v3967_v21, %s2950_s17  ;;  %v3979_v52 = vsel %vm608_vm0, %v898_v56, %v914_v13 }
 0x294   : > { %1300 = vmatpush1.bf16.msra.mxu0 %v3727_v29 }
 0x295   : > { %1301 = vmatprep.subr.bf16.mxu0 %v650_v23  ;;  %1386 = vmatpush1.bf16.msra.mxu1 %v616_v42  ;;  %v908_v15 = vpop.permute.xlu1 %907 }
 0x296   : > { %1387 = vmatprep.subr.bf16.mxu1 %v670_v30  ;;  %v909_v3 = vsel %vm868_vm2, %v867_v60, %v908_v15  ;;  %v778_v25 = vpop.permute.xlu0 %777 }
 0x297   : > { %983 = vrot.lane.b32.xlu1 %v909_v3, %s2950_s17  ;;  %979 = vrot.lane.b32.xlu0 %v898_v56, %s2950_s17  ;;  %v788_v58 = vsel %vm643_vm1, %v3789_v61, %v778_v25 }
 0x298   : > { %1302 = vmatpush1.bf16.msra.mxu0 %v3736_v31 }
 0x299   : > { %1388 = vmatpush1.bf16.msra.mxu1 %v651_v46  ;;  %v683_v29 = vpop.permute.xlu1 %682  ;;  %1303 = vmatprep.subr.bf16.mxu0 %v3755_v39 }
 0x29a   : > { %1389 = vmatprep.subr.bf16.mxu1 %v3796_v62  ;;  %v782_v41 = vpop.permute.xlu0 %781 }
 0x29b   : > { %985 = vrot.lane.b32.xlu0 %v908_v15, %s2950_s17  ;;  %987 = vrot.lane.b32.xlu1 %v3979_v52, %s2950_s17 }
 0x29c   : > { %1304 = vmatpush1.bf16.msra.mxu0 %v3574_v18  ;;  %v684_v18 = vsel %vm643_vm1, %v669_v1, %v683_v29  ;;  %v1469_v1 = vld [vmem:[%s3469_s9 + $0x38] sm:$0xff] }
 0x29d   : > { %1305 = vmatprep.subr.bf16.mxu0 %v616_v42  ;;  %1390 = vmatpush1.bf16.msra.mxu1 %v3781_v57  ;;  %v917_v31 = vpop.permute.xlu1 %916  ;;  %v1463_v57 = vld [vmem:[%s3469_s9 + $0x4] sm:$0xff] }
 0x29e   : > { %1391 = vmatprep.subr.bf16.mxu1 %v680_v6  ;;  %v918_v39 = vsel %vm868_vm2, %v908_v15, %v917_v31  ;;  %v1473_v24 = vunpack.c.l.bf16 %v1463_v57  ;;  %v1474_v32 = vunpack.c.h.bf16 %v1463_v57  ;;  %v4007_v42 = vld [vmem:[%s3469_s9 + $0x24] ss:$44 sps:$4 sm:$0xff]   ;;  %v1483_v6 = vunpack.c.h.bf16 %v1468_v43 }
 0x29f   : > { %993 = vrot.lane.b32.xlu1 %v918_v39, %s2950_s17  ;;  %989 = vrot.lane.b32.xlu0 %v914_v13, %s2950_s17  ;;  %v1481_v60 = vunpack.c.l.bf16 %v4007_v42  ;;  %v1484_v39 = vunpack.c.l.bf16 %v1469_v1 }
 0x2a0   : > { %1306 = vmatpush1.bf16.msra.mxu0 %v615_v45  ;;  %v2474_v45 = vpack.i.bf16 %v1474_v32, %v1473_v24 }
 0x2a1   : > { %1307 = vmatprep.subr.bf16.mxu0 %v651_v46  ;;  %1392 = vmatpush1.bf16.msra.mxu1 %v666_v26  ;;  %v780_v62 = vpop.permute.xlu1 %779  ;;  %v1476_v46 = vunpack.c.h.bf16 %v1464_v35  ;;  %v1470_v26 = vld [vmem:[%s3469_s9 + $0x40] sm:$0xff]  ;;  %v2494_v29 = vpack.i.bf16 %v1482_v27, %v1481_v60 }
 0x2a2   : > { %1393 = vmatprep.subr.bf16.mxu1 %v684_v18  ;;  %v790_v56 = vsel %vm643_vm1, %v780_v62, %v782_v41  ;;  %v789_v15 = vsel %vm643_vm1, %v778_v25, %v780_v62  ;;  %v808_v18 = vpop.permute.xlu0 %807 }
 0x2a3   : > { %995 = vrot.lane.b32.xlu0 %v917_v31, %s2950_s17  ;;  %v1486_v31 = vunpack.c.l.bf16 %v1470_v26 }
 0x2a4   : > { %1308 = vmatpush1.bf16.msra.mxu0 %v650_v23  ;;  %v1466_v23 = vld [vmem:[%s3469_s9 + $0x1c] sm:$0xff] }
 0x2a5   : > { %1394 = vmatpush1.bf16.msra.mxu1 %v670_v30  ;;  %v925_v44 = vpop.permute.xlu1 %924  ;;  %1309 = vmatprep.subr.bf16.mxu0 %v3533_v8  ;;  %v1479_v30 = vunpack.c.l.bf16 %v1466_v23  ;;  %v1480_v3 = vunpack.c.h.bf16 %v1466_v23 }
 0x2a6   : > { %v3998_v50 = vsel %vm608_vm0, %v914_v13, %v925_v44  ;;  %1395 = vmatprep.subr.bf16.mxu1 %v3543_v10  ;;  %v2479_v13 = vpack.i.bf16 %v1476_v46, %v1475_v2 }
 0x2a7   : > { %997 = vrot.lane.b32.xlu1 %v3998_v50, %s2950_s17  ;;  %999 = vrot.lane.b32.xlu0 %v925_v44, %s2950_s17  ;;  %v2489_v61 = vpack.i.bf16 %v1480_v3, %v1479_v30 }
 0x2a8   : > { %1310 = vmatpush1.bf16.msra.mxu0 %v3517_v5  ;;  %v2484_v5 = vpack.i.bf16 %v1478_v14, %v1477_v37 }
 0x2a9   : > { %1311 = vmatprep.subr.bf16.mxu0 %v3639_v47  ;;  %1396 = vmatpush1.bf16.msra.mxu1 %v3528_v7 }
 0x2aa   : > { %1397 = vmatprep.subr.bf16.mxu1 %v3920_v40 }
 0x2ab   : > { %1088 = vperm.xlu1 %2472, %v1084_v12   ;;  %1093 = vperm.xlu0 %2473, %v1085_v49  }
 0x2ac   : > { %1312 = vmatpush1.bf16.msra.mxu0 %v3660_v55  ;;  %v1485_v55 = vunpack.c.h.bf16 %v1469_v1 }
 0x2ad   : > { %1313 = vmatprep.subr.bf16.mxu0 %v788_v58  ;;  %1398 = vmatpush1.bf16.msra.mxu1 %v3669_v59 }
 0x2ae   : > { %1399 = vmatprep.subr.bf16.mxu1 %v790_v56  ;;  %v2504_v62 = vpack.i.bf16 %v1486_v31, %v1485_v55 }
 0x2af   : > { %2475 = vrot.lane.b32.xlu1 %v2474_v45, %s2950_s17  ;;  %2485 = vrot.lane.b32.xlu0 %v2484_v5, %s2950_s17 }
 0x2b0   : > { %1314 = vmatpush1.bf16.msra.mxu0 %v3802_v63  ;;  %v2499_v63 = vpack.i.bf16 %v1484_v39, %v1483_v6 }
 0x2b1   : > { %1400 = vmatpush1.bf16.msra.mxu1 %v789_v15  ;;  %1315 = vmatprep.subr.bf16.mxu0 %v3528_v7  ;;  %v809_v7 = vsel %vm643_vm1, %v782_v41, %v808_v18 }
 0x2b2   : > { %1401 = vmatprep.subr.bf16.mxu1 %v3768_v51 }
 0x2b3   : > { %2480 = vrot.lane.b32.xlu1 %v2479_v13, %s2950_s17  ;;  %2495 = vrot.lane.b32.xlu0 %v2494_v29, %s2950_s17 }
 0x2b4   : > { %1316 = vmatpush1.bf16.msra.mxu0 %v3533_v8  ;;  %v2573_v8 = vld [vmem:[%s3447_s5 + $0x18] ss:$44 sps:$4 sm:$0xff]  }
 0x2b5   : > { %1317 = vmatprep.subr.bf16.mxu0 %v3669_v59  ;;  %1402 = vmatpush1.bf16.msra.mxu1 %v3543_v10 }
 0x2b6   : > { %1403 = vmatprep.subr.bf16.mxu1 %v3944_v48 }
 0x2b7   : > { %2490 = vrot.lane.b32.xlu1 %v2489_v61, %s2950_s17  ;;  %2505 = vrot.lane.b32.xlu0 %v2504_v62, %s2950_s17 }
 0x2b8   : > { %1318 = vmatpush1.bf16.msra.mxu0 %v3639_v47  ;;  %v1487_v47 = vunpack.c.h.bf16 %v1470_v26 }
 0x2b9   : > { %1319 = vmatprep.subr.bf16.mxu0 %v789_v15  ;;  %1404 = vmatpush1.bf16.msra.mxu1 %v3920_v40 }
 0x2ba   : > { %1405 = vmatprep.subr.bf16.mxu1 %v809_v7 }
 0x2bb   : > { %2500 = vrot.lane.b32.xlu1 %v2499_v63, %s2950_s17 }
 0x2bc   : > { %1320 = vmatpush1.bf16.msra.mxu0 %v788_v58  ;;  %v1610_v58 = vlaneseq }
 0x2bd   : > { %1406 = vmatpush1.bf16.msra.mxu1 %v790_v56  ;;  %1321 = vmatprep.subr.bf16.mxu0 %v3543_v10  ;;  %v1471_v10 = vld [vmem:[%s3469_s9 + $0x48] sm:$0xff] }
 0x2be   : > { %1407 = vmatprep.subr.bf16.mxu1 %v3808_v0  ;;  %v1488_v0 = vunpack.c.l.bf16 %v1471_v10 }
 0x2c0   : > { %1322 = vmatpush1.bf16.msra.mxu0 %v2573_v8 }
 0x2c1   : > { %1334 = vmatprep.subr.bf16.mxu0 %v3920_v40  ;;  %1408 = vmatpush1.bf16.msra.mxu1 %v3768_v51  ;;  %v1489_v51 = vunpack.c.h.bf16 %v1471_v10  ;;  %v1490_v40 = vunpack.c.h.bf16 %v4007_v42 }
 0x2c2   : > { %1420 = vmatprep.subr.bf16.mxu1 %v3947_v54  ;;  %v2509_v54 = vpack.i.bf16 %v1488_v0, %v1487_v47 }
 0x2c3   : > { %1324 = vmatmul.mubr.bf16.vlgmr.msra.gmra.mrb[4].mxu0 %v3820_v4  ;;  %v2514_v57 = vpack.i.bf16 %v1490_v40, %v1489_v51 }
 0x2c4   : > { %1335 = vmatpush1.bf16.msra.mxu0 %v3669_v59  ;;  %1410 = vmatmul.mubr.bf16.vlgmr.msra.gmra.mrb[4].mxu1 %v3820_v4 }
 0x2c5   : > { %1421 = vmatpush1.bf16.msra.mxu1 %v3944_v48  ;;  %2184 = vmatprep.mubr.msk.bf16.mxu0 %vm1115_vm3, %v3823_v11 }
 0x2c6   : > { %2185 = vmatprep.mubr.msk.bf16.mxu1 %vm1115_vm3, %v3823_v11  ;;  %2510 = vrot.lane.b32.xlu1 %v2509_v54, %s2950_s17 }
 0x2c7   : > { %2515 = vrot.lane.b32.xlu0 %v2514_v57, %s2950_s17 }
 0x2f2   : > { %v938_v59 = vpop.permute.xlu1 %937 }
 0x2f3   : > { %v1005_v11 = vsel %vm608_vm0, %v3869_v33, %v938_v59 }
 0x2fd   : > { %v942_v4 = vpop.permute.xlu1 %941  ;;  %v940_v48 = vpop.permute.xlu0 %939 }
 0x2fe   : > { %v1006_v25 = vsel %vm608_vm0, %v938_v59, %v940_v48  ;;  %v1007_v24 = vsel %vm608_vm0, %v940_v48, %v942_v4 }
 0x2ff   : > { %1336 = vmatprep.subr.bf16.mxu0 %v1006_v25 }
 0x300   : > { %1337 = vmatpush1.bf16.msra.mxu0 %v1005_v11 }
 0x301   : > { %v944_v9 = vpop.permute.xlu0 %943  ;;  %1338 = vmatprep.subr.bf16.mxu0 %v3903_v28  ;;  %v960_v32 = vpop.permute.xlu1 %959 }
 0x302   : > { %v1008_v44 = vsel %vm608_vm0, %v942_v4, %v944_v9  ;;  %v1015_v33 = vsel %vm608_vm0, %v3898_v19, %v960_v32 }
 0x303   : > { %1422 = vmatprep.subr.bf16.mxu1 %v1008_v44 }
 0x304   : > { %1339 = vmatpush1.bf16.msra.mxu0 %v3887_v22  ;;  %1423 = vmatpush1.bf16.msra.mxu1 %v1007_v24 }
 0x305   : > { %v962_v12 = vpop.permute.xlu0 %961  ;;  %1340 = vmatprep.subr.bf16.mxu0 %v3742_v34  ;;  %v978_v37 = vpop.permute.xlu1 %977 }
 0x306   : > { %v1016_v35 = vsel %vm608_vm0, %v960_v32, %v962_v12 }
 0x307   : > { %1424 = vmatprep.subr.bf16.mxu1 %v1016_v35 }
 0x308   : > { %1341 = vmatpush1.bf16.msra.mxu0 %v3710_v20  ;;  %1425 = vmatpush1.bf16.msra.mxu1 %v1015_v33  ;;  %v1023_v20 = vsel %vm608_vm0, %v3912_v36, %v978_v37 }
 0x309   : > { %1426 = vmatprep.subr.bf16.mxu1 %v3967_v21  ;;  %v980_v14 = vpop.permute.xlu0 %979  ;;  %1342 = vmatprep.subr.bf16.mxu0 %v3916_v38  ;;  %v984_v49 = vpop.permute.xlu1 %983 }
 0x30a   : > { %v1024_v22 = vsel %vm608_vm0, %v978_v37, %v980_v14  ;;  %v1026_v42 = vsel %vm608_vm0, %v960_v32, %v984_v49 }
 0x30c   : > { %1343 = vmatpush1.bf16.msra.mxu0 %v3894_v16  ;;  %1427 = vmatpush1.bf16.msra.mxu1 %v3774_v53 }
 0x30d   : > { %1428 = vmatprep.subr.bf16.mxu1 %v1024_v22  ;;  %v986_v41 = vpop.permute.xlu0 %985  ;;  %1344 = vmatprep.subr.bf16.mxu0 %v1015_v33  ;;  %v988_v43 = vpop.permute.xlu1 %987 }
 0x30e   : > { %v1027_v19 = vsel %vm608_vm0, %v984_v49, %v986_v41  ;;  %v1028_v2 = vsel %vm608_vm0, %v978_v37, %v988_v43 }
 0x310   : > { %1345 = vmatpush1.bf16.msra.mxu0 %v3903_v28  ;;  %1429 = vmatpush1.bf16.msra.mxu1 %v1023_v20 }
 0x311   : > { %1430 = vmatprep.subr.bf16.mxu1 %v1027_v19  ;;  %1346 = vmatprep.subr.bf16.mxu0 %v3774_v53  ;;  %v990_v16 = vpop.permute.xlu0 %989  ;;  %v994_v45 = vpop.permute.xlu1 %993 }
 0x312   : > { %v1029_v28 = vsel %vm608_vm0, %v988_v43, %v990_v16  ;;  %v1031_v46 = vsel %vm608_vm0, %v984_v49, %v994_v45 }
 0x314   : > { %1347 = vmatpush1.bf16.msra.mxu0 %v3742_v34  ;;  %1431 = vmatpush1.bf16.msra.mxu1 %v1026_v42 }
 0x315   : > { %1432 = vmatprep.subr.bf16.mxu1 %v3979_v52  ;;  %1348 = vmatprep.subr.bf16.mxu0 %v1023_v20  ;;  %v996_v36 = vpop.permute.xlu0 %995 }
 0x316   : > { %v1032_v34 = vsel %vm608_vm0, %v994_v45, %v996_v36 }
 0x318   : > { %1349 = vmatpush1.bf16.msra.mxu0 %v3916_v38  ;;  %1433 = vmatpush1.bf16.msra.mxu1 %v3967_v21 }
 0x319   : > { %1434 = vmatprep.subr.bf16.mxu1 %v1029_v28  ;;  %1350 = vmatprep.subr.bf16.mxu0 %v1026_v42  ;;  %v998_v38 = vpop.permute.xlu1 %997  ;;  %v1000_v56 = vpop.permute.xlu0 %999 }
 0x31a   : > { %v1034_v5 = vsel %vm608_vm0, %v998_v38, %v1000_v56  ;;  %v1033_v23 = vsel %vm608_vm0, %v988_v43, %v998_v38 }
 0x31c   : > { %1351 = vmatpush1.bf16.msra.mxu0 %v1015_v33  ;;  %1435 = vmatpush1.bf16.msra.mxu1 %v1028_v2 }
 0x31d   : > { %1352 = vmatprep.subr.bf16.mxu0 %v3967_v21  ;;  %1436 = vmatprep.subr.bf16.mxu1 %v1032_v34 }
 0x320   : > { %1353 = vmatpush1.bf16.msra.mxu0 %v3774_v53  ;;  %1437 = vmatpush1.bf16.msra.mxu1 %v1031_v46 }
 0x321   : > { %1354 = vmatprep.subr.bf16.mxu0 %v1028_v2  ;;  %1438 = vmatprep.subr.bf16.mxu1 %v3998_v50 }
 0x324   : > { %1355 = vmatpush1.bf16.msra.mxu0 %v1023_v20  ;;  %1439 = vmatpush1.bf16.msra.mxu1 %v3979_v52  ;;  %v4103_v52 = vand.u32 127, %v1610_v58 }
 0x325   : > { %1440 = vmatprep.subr.bf16.mxu1 %v1034_v5 }
 0x326   : > { %v1613_v15 = vadd.s32 256, %v4103_v52  ;;  %v1612_v30 = vadd.s32 128, %v4103_v52  ;;  %vm1715_vm6 = vcmp.lt.s32.totalorder %v4103_v52, 8 }
 0x327   : > { %1367 = vmatmul.mubr.bf16.vlgmr.msra.gmra.mrb[4].mxu0 %v3923_v17 }
 0x328   : > { %1441 = vmatpush1.bf16.msra.mxu1 %v1033_v23  ;;  %v1637_v13 = vand.u32 127, %v1613_v15  ;;  %v1630_v29 = vand.u32 127, %v1612_v30 }
 0x32a   : > { %v4097_v53 = vpop.permute.xlu1 %1088  ;;  %v4099_v21 = vpop.permute.xlu0 %1093  ;;  %vm4118_vm5 = vcmp.lt.s32.totalorder %v1637_v13, 8  ;;  %vm4125_vm7 = vcmp.lt.s32.totalorder %v1630_v29, 8 }
 0x32b   : > { %1453 = vmatmul.mubr.bf16.vlgmr.msra.gmra.mrb[4].mxu1 %v3923_v17  ;;  %v1614_v17 = vadd.s32 384, %v4103_v52 }
 0x32d   : > { %v1644_v55 = vand.u32 127, %v1614_v17 }
 0x32e   : > { %v2476_v60 = vpop.permute.xlu1 %2475  ;;  %v4101_v27 = vpop.permute.xlu0 %2485 }
 0x32f   : > { %v2478_v61 = vunpack.i.h.bf16 %v2476_v60  ;;  %v2477_v6 = vunpack.i.l.bf16 %v2476_v60  ;;  %v2487_v18 = vunpack.i.l.bf16 %v4101_v27  ;;  %vm4129_vm8 = vcmp.lt.s32.totalorder %v1644_v55, 8 }
 0x331   : > { %v1546_v54 = vsel %vm608_vm0, %v2477_v6, %v2478_v61 }
 0x332   : > { %v2481_v50 = vpop.permute.xlu1 %2480  ;;  %v4105_v1 = vpop.permute.xlu0 %2495 }
 0x333   : > { %v2483_v39 = vunpack.i.h.bf16 %v2481_v50  ;;  %v2482_v62 = vunpack.i.l.bf16 %v2481_v50  ;;  %v2498_v8 = vunpack.i.h.bf16 %v4105_v1 }
 0x335   : > { %v1548_v51 = vsel %vm608_vm0, %v2482_v62, %v2483_v39  ;;  %v1547_v11 = vsel %vm608_vm0, %v2478_v61, %v2482_v62  ;;  %v1549_v9 = vsel %vm608_vm0, %v2483_v39, %v2487_v18 }
 0x336   : > { %v4107_v26 = vpop.permute.xlu1 %2490  ;;  %v4112_v3 = vpop.permute.xlu0 %2505 }
 0x337   : > { %v2508_v7 = vunpack.i.h.bf16 %v4112_v3  ;;  %v2507_v63 = vunpack.i.l.bf16 %v4112_v3  ;;  %v2493_v0 = vunpack.i.h.bf16 %v4107_v26 }
 0x339   : > { %v1557_v44 = vsel %vm608_vm0, %v2507_v63, %v2508_v7 }
 0x33a   : > { %v2501_v31 = vpop.permute.xlu1 %2500 }
 0x33b   : > { %v2503_v10 = vunpack.i.h.bf16 %v2501_v31  ;;  %v2502_v47 = vunpack.i.l.bf16 %v2501_v31 }
 0x33d   : > { %v1556_v35 = vsel %vm608_vm0, %v2503_v10, %v2507_v63  ;;  %v1554_v37 = vsel %vm608_vm0, %v2498_v8, %v2502_v47  ;;  %v1555_v19 = vsel %vm608_vm0, %v2502_v47, %v2503_v10 }
 0x356   : > { %v1196_v40 = vpop.f32.mrb[0].mxu0 }
 0x357   : > { %v1282_v4 = vpop.f32.mrb[0].mxu1  ;;  %v2223_v48 = vadd.f32 %v1196_v40, %v4097_v53  ;;  %v1198_v25 = vpop.f32.mrb[1].mxu0  ;;  %v2492_v40 = vunpack.i.l.bf16 %v4107_v26 }
 0x358   : > { %v2227_v24 = vadd.f32 %v1282_v4, %v4097_v53  ;;  %v2224_v32 = vadd.f32 %v1198_v25, %v4097_v53  ;;  %v1284_v12 = vpop.f32.mrb[1].mxu1  ;;  %v1200_v33 = vpop.f32.mrb[2].mxu0 }
 0x359   : > { %v1578_v14 = vadd.f32 %v2223_v48, %v1546_v54  ;;  %v2228_v22 = vadd.f32 %v1284_v12, %v4097_v53  ;;  %v1286_v41 = vpop.f32.mrb[2].mxu1  ;;  %v2225_v49 = vadd.f32 %v1200_v33, %v4099_v21  ;;  %v1202_v20 = vpop.f32.mrb[3].mxu0  ;;  %v2497_v54 = vunpack.i.l.bf16 %v4105_v1 }
 0x35a   : > { %v1580_v16 = vadd.f32 %v2227_v24, %v1548_v51  ;;  %v1579_v42 = vadd.f32 %v2224_v32, %v1547_v11  ;;  %v2229_v43 = vadd.f32 %v1286_v41, %v4099_v21  ;;  %v2226_v28 = vadd.f32 %v1202_v20, %v4099_v21  ;;  %v1288_v36 = vpop.f32.mrb[3].mxu1  ;;  %v2511_v4 = vpop.permute.xlu1 %2510 }
 0x35b   : > { %v1594_v45 = vmax.f32 %v1578_v14, 0.0  ;;  %v1581_v2 = vadd.f32 %v2228_v22, %v1549_v9  ;;  %v1586_v34 = vadd.f32 %v2225_v49, %v1554_v37  ;;  %v2230_v46 = vadd.f32 %v1288_v36, %v4099_v21  ;;  %v2516_v48 = vpop.permute.xlu0 %2515 }
 0x35c   : > { %v1596_v38 = vmax.f32 %v1580_v16, 0.0  ;;  %v1595_v56 = vmax.f32 %v1579_v42, 0.0  ;;  %v1588_v5 = vadd.f32 %v2229_v43, %v1556_v35  ;;  %v1587_v23 = vadd.f32 %v2226_v28, %v1555_v19 }
 0x35d   : > { %v1739_v60 = vsel %vm1715_vm6, %v1594_v45, 0.0  ;;  %v1597_v50 = vmax.f32 %v1581_v2, 0.0  ;;  %v1602_v58 = vmax.f32 %v1586_v34, 0.0  ;;  %v1589_v15 = vadd.f32 %v2230_v46, %v1557_v44 }
 0x35e   : > { %v1741_v30 = vsel %vm4118_vm5, %v1596_v38, 0.0  ;;  %v1740_v17 = vsel %vm4125_vm7, %v1595_v56, 0.0  ;;  %v1604_v13 = vmax.f32 %v1588_v5, 0.0  ;;  %v1603_v29 = vmax.f32 %v1587_v23, 0.0 }
 0x35f   : > { %v2215_v55 = vpack.c.bf16 %v1740_v17, %v1739_v60  ;;  %v1742_v31 = vsel %vm4129_vm8, %v1597_v50, 0.0  ;;  %v1747_v61 = vsel %vm1715_vm6, %v1602_v58, 0.0  ;;  %v1605_v6 = vmax.f32 %v1589_v15, 0.0 }
 0x360   : > { %v2216_v39 = vpack.c.bf16 %v1742_v31, %v1741_v30  ;;  %v1748_v62 = vsel %vm4125_vm7, %v1603_v29, 0.0  ;;  %v1749_v63 = vsel %vm4118_vm5, %v1604_v13, 0.0  ;;  %v2488_v51 = vunpack.i.h.bf16 %v4101_v27 }
 0x361   : > { %v2219_v8 = vpack.c.bf16 %v1748_v62, %v1747_v61  ;;  %v1750_v10 = vsel %vm4129_vm8, %v1605_v6, 0.0  ;;  %1808 = vrot.lane.b32.xlu1 %v2215_v55, %s2952_s20  ;;  %v4177_v59 = vsel %vm608_vm0, %v2493_v0, %v2497_v54  ;;  %v1615_v41 = vadd.s32 512, %v4103_v52 }
 0x362   : > { %v2220_v47 = vpack.c.bf16 %v1750_v10, %v1749_v63  ;;  %1810 = vrot.lane.b32.xlu0 %v2216_v39, %s2952_s20  ;;  %v1551_v57 = vsel %vm608_vm0, %v2488_v51, %v2492_v40  ;;  %v1616_v49 = vadd.s32 640, %v4103_v52  ;;  %v1617_v20 = vadd.s32 768, %v4103_v52 }
 0x363   : > { %v2513_v19 = vunpack.i.h.bf16 %v2511_v4  ;;  %v2512_v16 = vunpack.i.l.bf16 %v2511_v4  ;;  %v1618_v42 = vadd.s32 896, %v4103_v52  ;;  %v1651_v43 = vand.u32 127, %v1615_v41 }
 0x364   : > { %v1658_v28 = vand.u32 127, %v1616_v49  ;;  %v2518_v36 = vunpack.i.h.bf16 %v2516_v48  ;;  %v2517_v45 = vunpack.i.l.bf16 %v2516_v48  ;;  %v1550_v46 = vsel %vm608_vm0, %v2487_v18, %v2488_v51 }
 0x365   : > { %1816 = vrot.lane.b32.xlu1 %v2219_v8, %s2952_s20  ;;  %v1552_v56 = vsel %vm608_vm0, %v2492_v40, %v2493_v0  ;;  %v1665_v5 = vand.u32 127, %v1617_v20  ;;  %v1558_v52 = vsel %vm608_vm0, %v2508_v7, %v2512_v16  ;;  %v1559_v50 = vsel %vm608_vm0, %v2512_v16, %v2513_v19 }
 0x366   : > { %1818 = vrot.lane.b32.xlu0 %v2220_v47, %s2952_s20  ;;  %v1672_v58 = vand.u32 127, %v1618_v42  ;;  %vm4215_vm13 = vcmp.lt.s32.totalorder %v1651_v43, 8  ;;  %vm4219_vm14 = vcmp.lt.s32.totalorder %v1658_v28, 8  ;;  %v1560_v7 = vsel %vm608_vm0, %v2513_v19, %v2517_v45 }
 0x367   : > { %v1561_v55 = vsel %vm608_vm0, %v2517_v45, %v2518_v36  ;;  %vm4228_vm15 = vcmp.lt.s32.totalorder %v1665_v5, 8  ;;  %vm1864_vm0 = vcmask 3072  }
 0x368   : > { %vm4233_vm1 = vcmp.lt.s32.totalorder %v1672_v58, 8 }
 0x3d3   : > { %v1809_v25 = vpop.permute.xlu1 %1808 }
 0x3d4   : > { %v4179_v11 = vpop.permute.xlu0 %1810  ;;  %v1824_v26 = vrot.slane %v1809_v25, 4 }
 0x3d5   : > { %v1825_v1 = vrot.slane %v4179_v11, 4 }
 0x3d6   : > { %v1832_v9 = vsel %vm868_vm2, %v1824_v26, %v1809_v25 }
 0x3d7   : > { %v1834_v44 = vsel %vm1833_vm11, %v1824_v26, %v1825_v1  ;;  %1860 = vst.msk [vmem:[%s3481_s22 + $0x4] sm:$0xff] %vm1859_vm12, %v1832_v9  ;;  %v1817_v24 = vpop.permute.xlu1 %1816 }
 0x3d8   : > { %v1835_v32 = vsel %vm868_vm2, %v1834_v44, %v4179_v11  ;;  %v4189_v12 = vpop.permute.xlu0 %1818  ;;  %v1828_v35 = vrot.slane %v1817_v24, 4 }
 0x3d9   : > { %1861 = vst [vmem:[%s3481_s22 + $0xc] sm:$0xff] %v1835_v32  ;;  %v1829_v33 = vrot.slane %v4189_v12, 4 }
 0x3da   : > { %v1840_v37 = vsel %vm868_vm2, %v1828_v35, %v1817_v24 }
 0x3db   : > { %v1841_v14 = vsel %vm1833_vm11, %v1828_v35, %v1829_v33  ;;  %1866 = vst.msk [vmem:[%s3481_s22 + $0x30] sm:$0xff] %vm1859_vm12, %v1840_v37 }
 0x3dc   : > { %v1842_v22 = vsel %vm868_vm2, %v1841_v14, %v4189_v12 }
 0x3dd   : > { %1867 = vst [vmem:[%s3481_s22 + $0x38] sm:$0xff] %v1842_v22 }
 0x3fa   : > { %v1368_v2 = vpop.f32.mrb[4].mxu0 }
 0x3fb   : > { %v2231_v34 = vadd.f32 %v1368_v2, %v4097_v53  ;;  %v1370_v38 = vpop.f32.mrb[5].mxu0 }
 0x3fc   : > { %v2232_v23 = vadd.f32 %v1370_v38, %v4097_v53  ;;  %v1372_v60 = vpop.f32.mrb[6].mxu0 }
 0x3fd   : > { %v1582_v15 = vadd.f32 %v2231_v34, %v1550_v46  ;;  %v2233_v18 = vadd.f32 %v1372_v60, %v4099_v21  ;;  %v1374_v17 = vpop.f32.mrb[7].mxu0 }
 0x3fe   : > { %v1583_v13 = vadd.f32 %v2232_v23, %v1551_v57  ;;  %v2234_v3 = vadd.f32 %v1374_v17, %v4099_v21  ;;  %v1454_v29 = vpop.f32.mrb[4].mxu1 }
 0x3ff   : > { %v1598_v31 = vmax.f32 %v1582_v15, 0.0  ;;  %v1590_v61 = vadd.f32 %v2233_v18, %v1558_v52  ;;  %v2235_v6 = vadd.f32 %v1454_v29, %v4097_v53  ;;  %v1456_v62 = vpop.f32.mrb[5].mxu1 }
 0x400   : > { %v1599_v63 = vmax.f32 %v1583_v13, 0.0  ;;  %v1591_v8 = vadd.f32 %v2234_v3, %v1559_v50  ;;  %v2236_v10 = vadd.f32 %v1456_v62, %v4097_v53  ;;  %v1458_v51 = vpop.f32.mrb[6].mxu1 }
 0x401   : > { %v1743_v40 = vsel %vm4215_vm13, %v1598_v31, 0.0  ;;  %v1606_v0 = vmax.f32 %v1590_v61, 0.0  ;;  %v1584_v54 = vadd.f32 %v2235_v6, %v1552_v56  ;;  %v2237_v57 = vadd.f32 %v1458_v51, %v4099_v21  ;;  %v1460_v4 = vpop.f32.mrb[7].mxu1 }
 0x402   : > { %v1744_v48 = vsel %vm4219_vm14, %v1599_v63, 0.0  ;;  %v1607_v25 = vmax.f32 %v1591_v8, 0.0  ;;  %v1585_v26 = vadd.f32 %v2236_v10, %v4177_v59  ;;  %v2238_v53 = vadd.f32 %v1460_v4, %v4099_v21 }
 0x403   : > { %v2217_v9 = vpack.c.bf16 %v1744_v48, %v1743_v40  ;;  %v1751_v44 = vsel %vm4215_vm13, %v1606_v0, 0.0  ;;  %v1600_v24 = vmax.f32 %v1584_v54, 0.0  ;;  %v1592_v32 = vadd.f32 %v2237_v57, %v1560_v7 }
 0x404   : > { %v1752_v35 = vsel %vm4219_vm14, %v1607_v25, 0.0  ;;  %v1601_v37 = vmax.f32 %v1585_v26, 0.0  ;;  %v1593_v14 = vadd.f32 %v2238_v53, %v1561_v55 }
 0x405   : > { %v2221_v22 = vpack.c.bf16 %v1752_v35, %v1751_v44  ;;  %v1745_v41 = vsel %vm4228_vm15, %v1600_v24, 0.0  ;;  %v1608_v49 = vmax.f32 %v1592_v32, 0.0  ;;  %1812 = vrot.lane.b32.xlu1 %v2217_v9, %s2952_s20 }
 0x406   : > { %v1746_v21 = vsel %vm4233_vm1, %v1601_v37, 0.0  ;;  %v1609_v59 = vmax.f32 %v1593_v14, 0.0 }
 0x407   : > { %v2218_v20 = vpack.c.bf16 %v1746_v21, %v1745_v41  ;;  %v1753_v19 = vsel %vm4228_vm15, %v1608_v49, 0.0 }
 0x408   : > { %v1754_v16 = vsel %vm4233_vm1, %v1609_v59, 0.0 }
 0x409   : > { %v2222_v42 = vpack.c.bf16 %v1754_v16, %v1753_v19  ;;  %1814 = vrot.lane.b32.xlu0 %v2218_v20, %s2952_s20  ;;  %1820 = vrot.lane.b32.xlu1 %v2221_v22, %s2952_s20 }
 0x40d   : > { %1822 = vrot.lane.b32.xlu0 %v2222_v42, %s2952_s20 }
 0x477   : > { %v1813_v43 = vpop.permute.xlu1 %1812 }
 0x478   : > { %v1826_v28 = vrot.slane %v1813_v43, 4 }
 0x47a   : > { %v1836_v36 = vsel %vm1833_vm11, %v1825_v1, %v1826_v28 }
 0x47b   : > { %v1837_v45 = vsel %vm868_vm2, %v1836_v36, %v1813_v43  ;;  %v1815_v2 = vpop.permute.xlu0 %1814  ;;  %v1821_v34 = vpop.permute.xlu1 %1820 }
 0x47c   : > { %1862 = vst [vmem:[%s3481_s22 + $0x14] sm:$0xff] %v1837_v45  ;;  %v1827_v46 = vrot.slane %v1815_v2, 4  ;;  %v1830_v38 = vrot.slane %v1821_v34, 4 }
 0x47e   : > { %v1838_v56 = vsel %vm1833_vm11, %v1826_v28, %v1827_v46  ;;  %1865 = vst.msk [vmem:[%s3481_s22 + $0x24] sm:$0xf] %vm1864_vm0, %v1827_v46  ;;  %v1843_v11 = vsel %vm1833_vm11, %v1829_v33, %v1830_v38 }
 0x47f   : > { %v1839_v1 = vsel %vm868_vm2, %v1838_v56, %v1815_v2  ;;  %v1844_v5 = vsel %vm868_vm2, %v1843_v11, %v1821_v34  ;;  %v1823_v23 = vpop.permute.xlu0 %1822 }
 0x480   : > { %1863 = vst [vmem:[%s3481_s22 + $0x1c] sm:$0xff] %v1839_v1  ;;  %1868 = vst [vmem:[%s3481_s22 + $0x40] sm:$0xff] %v1844_v5  ;;  %v1831_v60 = vrot.slane %v1823_v23, 4 }
 0x482   : > { %v1845_v52 = vsel %vm1833_vm11, %v1830_v38, %v1831_v60  ;;  %1870 = vst.msk [vmem:[%s3481_s22 + $0x50] sm:$0xf] %vm1864_vm0, %v1831_v60 }
 0x483   : > { %v1846_v50 = vsel %vm868_vm2, %v1845_v52, %v1823_v23 }
 0x484   : > { %1869 = vst [vmem:[%s3481_s22 + $0x48] sm:$0xff] %v1846_v50 }
 0x485 PF: > { %1873 = sbr.rel (!%p3477_p8) target bundleno = 1164 (0x48c), region = 76  ;;  %vm1879_vm3 = vcmask (%p3477_p8), 11264   ;;  %v2954_v12 = vmov (%p3477_p8), 0  }
 0x486   : > { %1874 = vst [vmem:[%s3481_s22] sm:$0xff] (%p3477_p8), %v2954_v12  ;;  %1875 = vst [vmem:[%s3481_s22 + $0x8] sm:$0xff] (%p3477_p8), %v2954_v12 }
 0x487   : > { %1876 = vst [vmem:[%s3481_s22 + $0x10] sm:$0xff] (%p3477_p8), %v2954_v12  ;;  %1877 = vst [vmem:[%s3481_s22 + $0x18] sm:$0xff] (%p3477_p8), %v2954_v12 }
 0x488   : > { %1878 = vst [vmem:[%s3481_s22 + $0x20] sm:$0xff] (%p3477_p8), %v2954_v12  ;;  %1881 = vst [vmem:[%s3481_s22 + $0x2c] sm:$0xff] (%p3477_p8), %v2954_v12 }
 0x489   : > { %1882 = vst [vmem:[%s3481_s22 + $0x34] sm:$0xff] (%p3477_p8), %v2954_v12  ;;  %1883 = vst [vmem:[%s3481_s22 + $0x3c] sm:$0xff] (%p3477_p8), %v2954_v12 }
 0x48a   : > { %1884 = vst [vmem:[%s3481_s22 + $0x44] sm:$0xff] (%p3477_p8), %v2954_v12  ;;  %1885 = vst [vmem:[%s3481_s22 + $0x4c] sm:$0xff] (%p3477_p8), %v2954_v12 }
 0x48b   : > { %1880 = vst.msk [vmem:[%s3481_s22 + $0x28] sm:$0xf] (%p3477_p8), %vm1879_vm3, %v2954_v12  ;;  %1886 = vst.msk [vmem:[%s3481_s22 + $0x54] sm:$0xf] (%p3477_p8), %vm1879_vm3, %v2954_v12 }
 0x48c PF: > { %s4508_s2 = sld [smem:[#allocation26_spill]]  ;;  %s4509_s30 = sld [smem:[#allocation27_spill]] }
 0x48d   : > { %s1903_s27 = sshll.u32 %s3481_s22, 4  ;;  %s4510_s3 = sld [smem:[#allocation41_spill]]  ;;  %s4297_s27 = int_to_ptr.vmem [resolvable:$true] %s1903_s27 }
 0x48e   : > { %s1888_s21 = scalar_lea.sflag [#allocation4], %s3465_s12  ;;  %s2750_s9 = scalar_lea.vmem %s4297_s27, 1408 }
 0x48f   : > { %p2751_p0 = scmp.ne.s32.totalorder %s4297_s27, %s2750_s9  ;;  %p4511_p7 = scmp.ne.s32.totalorder %s4477_s29, 0 }
 0x490   : > { %s2955_s23 = smov [#allocation13]  }
 0x491   : > { %p2752_p11 = pnand %p2751_p0, %p4511_p7  ;;  %s2754_s14 = sshll.u32 %s2955_s23, 4  ;;  %s2755_s14 = int_to_ptr.vmem [resolvable:$false] %s2754_s14 }
 0x492   : > { %s2271_s4 = smul.u32 22, %s4508_s2  ;;  %s2756_s22 = scalar_lea.vmem %s2755_s14, 2816 }
 0x493   : > { %s2272_s10 = smul.u32 220, %s4509_s30  ;;  %p2753_p13 = pneg %p2752_p11 }
 0x494   : > { %p2757_p3 = scmp.lt.s32.totalorder %s4297_s27, %s2755_s14  ;;  %p2758_p12 = scmp.lt.s32.totalorder %s2756_s22, %s2750_s9 }
 0x495   : > { %s1900_s5 = sadd.s32 %s2272_s10, %s2271_s4 }
 0x496   : > { %s2194_s1 = sshll.u32 %s1900_s5, 6  ;;  %p2759_p1 = por %p2758_p12, %p2757_p3 }
 0x497   : > { %s4302_s19 = scalar_lea.hbm %s4510_s3, %s2194_s1 }
 0x498   : > { %p2760_p9 = pnand %p2759_p1, %p2753_p13 }
 0x49a   : > { %2763 = shalt.err (!%p2760_p9)
}
 0x49b   : > { %s2764_s17 = scalar_lea.hbm %s4302_s19, 1408  ;;  %s2768_s2 = scalar_lea.hbm %s4510_s3, 28160 }
 0x49c   : > { %p2765_p4 = scmp.ne.s32.totalorder %s4302_s19, %s2764_s17  ;;  %p2769_p5 = scmp.lt.u32.totalorder %s4302_s19, %s4510_s3 }
 0x49d   : > { %p2770_p2 = scmp.lt.u32.totalorder %s2768_s2, %s2764_s17  ;;  %p2772_p0 = scmp.lt.u32.totalorder %s2764_s17, %s4302_s19 }
 0x49e   : > { %p2766_p6 = pnand %p2765_p4, %p4511_p7 }
 0x49f   : > { %p2771_p8 = por %p2770_p2, %p2769_p5 }
 0x4a0   : > { %p2767_p10 = pneg %p2766_p6 }
 0x4a1   : > { %p2773_p11 = por %p2772_p0, %p2771_p8 }
 0x4a3   : > { %p2774_p13 = pnand %p2773_p11, %p2767_p10 }
 0x4a5   : > { %2777 = shalt.err (!%p2774_p13)
}
 0x4a6   : > { %s2956_s10 = smov 704   ;;  %s2957_s5 = smov 44  }
 0x4a7   : > { %2289 = dma.vmem_to_hbm [thread:$0]  (%p4511_p7), %s4297_s27, 1408, %s4302_s19, %s1888_s21, %s2956_s10, %s2956_s10, %s2957_s5  }
 0x4a8 PF: > { %s4512_s1 = sld [smem:[#allocation20_spill]]  ;;  %p2320_p3 = scmp.ge.s32.totalorder %s2936_s13, 2 }
 0x4a9   : > { %p4513_p12 = scmp.ne.s32.totalorder %s4478_s28, 0 }
 0x4ab   : > { %p2312_p1 = pnand %p2320_p3, %p4513_p12 }
 0x4ae   : > { %s1918_s6 = sand.u32 1, %s4512_s1  }
 0x4af   : > { %s1919_s18 = scalar_lea.sflag [#allocation4], %s1918_s6 }
 0x4b0   : > { %2867 = dma.done.wait (!%p2312_p1), %s1919_s18, 1408  }
 0x4b1   : > { %2869 = vsyncadd (!%p2312_p1), %s1919_s18, 4294965888  ;;  %s29_s13 = sadd.s32 1, %s2936_s13   ;;  %s4515_s21 = sld [smem:[#allocation21_spill]] }
 0x4b2   : > { %p4333_p9 = scmp.ge.s32.totalorder %s29_s13, 22   ;;  %s4516_s22 = sld [smem:[#allocation22_spill]] }
 0x4b3   : > { %s4517_s29 = smov %s3321_s24  ;;  %s4518_s27 = sld [smem:[#allocation24_spill]] }
 0x4b4   : > { %s4519_s28 = sld [smem:[#allocation25_spill]]  ;;  %s4520_s12 = sld [smem:[#allocation33_spill]] }
 0x4b5   : > { %s4521_s19 = sld [smem:[#allocation34_spill]]  ;;  %s4522_s10 = sld [smem:[#allocation28_spill]] }
 0x4b6   : > { %s4523_s14 = sld [smem:[#allocation30_spill]]  ;;  %s4524_s17 = sld [smem:[#allocation31_spill]] }
 0x4b7   : > { %s4526_s23 = smov %s3373_s16  ;;  %s4527_s24 = smov %s2888_s25 }
 0x4b8   : > { %s4528_s25 = smov %s2892_s26  ;;  %s4529_s26 = smov %s4517_s29 }
 0x4b9   : > { %s4531_s30 = smov %s2912_s7  ;;  %s4532_s7 = smov %s2916_s8 }
 0x4ba   : > { %s4530_s29 = smov %s4520_s12  ;;  %s4534_s9 = smov %s2928_s11 }
 0x4bb   : > { %s4533_s8 = smov %s4521_s19  ;;  %28 = sbr.rel (!%p4333_p9) target bundleno = 25 (0x19), region = 142 }
 0x4bc   : > { %s4535_s11 = smov %s4523_s14  ;;  %s4536_s12 = smov %s4524_s17 }
 0x4c2   :  { %1924 = vsyncpa [#allocation3], 1 }
 0x4c3   :  { %1926 = vsyncpa [#allocation3 + $0x1], 1 }
 0x4c4   :  { %1927 = vsyncpa [#allocation6], 1 }
 0x4c5   :  { %1929 = vsyncpa [#allocation6 + $0x1], 1 }
 0x4c6   :  { %1930 = vsyncpa [#allocation9], 1 }
 0x4c7   :  { %1931 = vsyncpa [#allocation12], 1 }
 0x4c8   :  { %1933 = vsyncpa [#allocation12 + $0x1], 1 }
 0x4c9   :  { %1934 = vsyncpa [#allocation4], 1 }
 0x4ca   :  { %1936 = vsyncpa [#allocation4 + $0x1], 1 }

</bundles_post_ra>
